<compile_context>
chip_gen: v6e
topology: v6e:2x2x1
jax: 0.10.0
libtpu: 0.0.40
codegen_flags: <defaults>
</compile_context>

<pallas_src>
import functools

import jax
import jax.numpy as jnp
from jax import lax
from jax.experimental import pallas as pl
from jax.experimental.pallas import tpu as pltpu

LN_EPS = 1e-5


def _layer_norm(y, gamma, beta):
    mean = jnp.mean(y, axis=-1, keepdims=True)
    var = jnp.mean((y - mean) ** 2, axis=-1, keepdims=True)  # biased, like PyTorch
    return (y - mean) * lax.rsqrt(var + LN_EPS) * gamma + beta


def _model_kernel(
    x_ref, pos_ref, mask_ref,
    wqkv_ref, bqkv_ref, wo_ref, bo_ref,
    w1_ref, b1_ref, w2_ref, b2_ref,
    g1_ref, be1_ref, g2_ref, be2_ref,
    wf_ref, bf_ref,
    out_ref,
    *, num_heads: int, num_layers: int, sub_rows: int,
):
    M, D = x_ref.shape                      # (block_tokens * seq_len, d_model)
    Dh = D // num_heads
    n_sub = M // sub_rows                   # 14-token sub-blocks inside the block

    def process_sub_block(sb, carry):
        off = pl.multiple_of(sb * sub_rows, sub_rows)   # 112-row aligned offset
        rows = pl.ds(off, sub_rows)

        # positional-encoding add (pos pre-expanded to the blocked row layout)
        z = x_ref[rows, :] + pos_ref[rows, :]

        for l in range(num_layers):
            # ---- fused QKV projection (Q side pre-scaled by 1/sqrt(Dh)) ----
            qkv = jnp.dot(z, wqkv_ref[l],
                          preferred_element_type=jnp.float32) + bqkv_ref[l]
            q = qkv[:, 0 * D:1 * D]
            k = qkv[:, 1 * D:2 * D]
            v = qkv[:, 2 * D:3 * D]

            # ---- multi-head attention with per-head out-proj accumulation --
            wo_l = wo_ref[l]                # (D, D) value, 1 vreg
            a = bo_ref[l]                   # (1, D); broadcasts on first add
            for h in range(num_heads):
                sl = slice(h * Dh, (h + 1) * Dh)
                s = lax.dot_general(q[:, sl], k[:, sl],
                                    (((1,), (1,)), ((), ())),
                                    preferred_element_type=jnp.float32)
                # additive block-diagonal "same token" bias (0 / -1e30)
                s = s + mask_ref[...]
                s = s - jnp.max(s, axis=-1, keepdims=True)
                p = jnp.exp(s)
                p = p * pl.reciprocal(jnp.sum(p, axis=-1, keepdims=True),
                                      approx=True)
                ctx = jnp.dot(p, v[:, sl], preferred_element_type=jnp.float32)
                a = a + jnp.dot(ctx, wo_l[sl, :],
                                preferred_element_type=jnp.float32)

            # dropout1: identity (eval mode)
            # TODO(synk): training-mode dropout (pltpu.prng_*) not implemented.
            z = _layer_norm(z + a, g1_ref[l], be1_ref[l])

            # ---- feed-forward ----------------------------------------------
            ff = jnp.dot(z, w1_ref[l],
                         preferred_element_type=jnp.float32) + b1_ref[l]
            ff = jnp.maximum(ff, 0.0)
            ff = jnp.dot(ff, w2_ref[l],
                         preferred_element_type=jnp.float32) + b2_ref[l]

            # dropout2: identity (eval mode)
            z = _layer_norm(z + ff, g2_ref[l], be2_ref[l])

        # ---- final Linear + Sigmoid ----------------------------------------
        logits = jnp.dot(z, wf_ref[...],
                         preferred_element_type=jnp.float32) + bf_ref[...]
        out_ref[rows, :] = 1.0 / (1.0 + jnp.exp(-logits))
        return carry

    lax.fori_loop(0, n_sub, process_sub_block, 0)


def transformer_model_forward(x, params, *, num_heads,
                              block_tokens=98, sub_tokens=14):
    """x: (B, N, D); B = attention sequence dim (PyTorch batch_first=False).

    Returns sigmoid(fc(transformer_layers(x + pos))) of shape (B, N, out_dim).
    """
    B, N, D = x.shape
    layers = params["layers"]
    L = len(layers)
    F = layers[0]["w1"].shape[1]
    O = params["wf"].shape[1]
    Dh = D // num_heads
    q_scale = 1.0 / (Dh ** 0.5)

    NB = block_tokens
    assert N % NB == 0, "token count must be divisible by the token block size"
    assert NB % sub_tokens == 0, "block size must be a multiple of the sub-block"
    G = N // NB                   # grid steps (2 by default: even -> v7x megacore)
    M = NB * B                    # rows per grid step (token-major, seq-minor)
    SUBR = sub_tokens * B         # rows per in-kernel attention sub-block

    # ---- one-time wrapper-side layout (tiny tensors) -------------------------
    xb = x.astype(jnp.float32).transpose(1, 0, 2).reshape(G, M, D)
    pos = params["pos"].astype(jnp.float32).reshape(N, D)
    posb = jnp.broadcast_to(pos.reshape(G, NB, 1, D), (G, NB, B, D)).reshape(G, M, D)

    # additive "same token" mask bias for one 112-row sub-block
    tok = jnp.arange(SUBR) // B
    mask_add = jnp.where(tok[:, None] == tok[None, :], 0.0, -1e30).astype(jnp.float32)

    # ---- fuse + stack weights (QKV fusion, Q pre-scaled by 1/sqrt(Dh)) -------
    stack = lambda f: jnp.stack([f(lyr) for lyr in layers])
    wqkv = stack(lambda l: jnp.concatenate([l["wq"] * q_scale, l["wk"], l["wv"]], axis=1))
    bqkv = stack(lambda l: jnp.concatenate([l["bq"] * q_scale, l["bk"], l["bv"]], axis=1))
    wo, bo = stack(lambda l: l["wo"]), stack(lambda l: l["bo"])
    w1, b1 = stack(lambda l: l["w1"]), stack(lambda l: l["b1"])
    w2, b2 = stack(lambda l: l["w2"]), stack(lambda l: l["b2"])
    g1, be1 = stack(lambda l: l["g1"]), stack(lambda l: l["be1"])
    g2, be2 = stack(lambda l: l["g2"]), stack(lambda l: l["be2"])
    wf, bf = params["wf"], params["bf"]

    full = lambda shape: pl.BlockSpec(shape, lambda g: (0,) * len(shape))
    blk = lambda rows, cols: pl.BlockSpec((None, rows, cols), lambda g: (g, 0, 0))

    out_b = pl.pallas_call(
        functools.partial(_model_kernel, num_heads=num_heads, num_layers=L,
                          sub_rows=SUBR),
        out_shape=jax.ShapeDtypeStruct((G, M, O), jnp.float32),
        grid=(G,),
        in_specs=[
            blk(M, D),                                  # x block
            blk(M, D),                                  # positional encoding block
            full((SUBR, SUBR)),                         # additive attention mask
            full((L, D, 3 * D)), full((L, 1, 3 * D)),   # fused QKV weight / bias
            full((L, D, D)), full((L, 1, D)),           # attn output projection
            full((L, D, F)), full((L, 1, F)),           # FFN linear 1
            full((L, F, D)), full((L, 1, D)),           # FFN linear 2
            full((L, 1, D)), full((L, 1, D)),           # norm1 gamma / beta
            full((L, 1, D)), full((L, 1, D)),           # norm2 gamma / beta
            full((D, O)), full((1, O)),                 # final fc
        ],
        out_specs=blk(M, O),
        compiler_params=pltpu.CompilerParams(dimension_semantics=("parallel",)),
    )(xb, posb, mask_add, wqkv, bqkv, wo, bo, w1, b1, w2, b2,
      g1, be1, g2, be2, wf, bf)

    return (out_b.reshape(G, NB, B, O)
                 .transpose(2, 0, 1, 3)
                 .reshape(B, N, O))


def init_params(key, *, num_tokens, d_model, dim_ff, num_layers, out_dim):
    """Deterministic synthetic parameters.

    Linear weights are stored already transposed for `x @ W` (i.e. (in, out)).
    The positional encoding is randomly initialized (PyTorch inits it to zeros,
    which would make the pos-add path untestable)."""
    keys = iter(jax.random.split(key, 10 * num_layers + 3))
    nrm = lambda k, shape, s=0.1: s * jax.random.normal(k, shape, jnp.float32)
    layers = []
    for _ in range(num_layers):
        layers.append(dict(
            wq=nrm(next(keys), (d_model, d_model)), bq=nrm(next(keys), (1, d_model)),
            wk=nrm(next(keys), (d_model, d_model)), bk=nrm(next(keys), (1, d_model)),
            wv=nrm(next(keys), (d_model, d_model)), bv=nrm(next(keys), (1, d_model)),
            wo=nrm(next(keys), (d_model, d_model)), bo=nrm(next(keys), (1, d_model)),
            w1=nrm(next(keys), (d_model, dim_ff)), b1=jnp.zeros((1, dim_ff), jnp.float32),
            w2=nrm(next(keys), (dim_ff, d_model)), b2=jnp.zeros((1, d_model), jnp.float32),
            g1=jnp.ones((1, d_model), jnp.float32), be1=jnp.zeros((1, d_model), jnp.float32),
            g2=jnp.ones((1, d_model), jnp.float32), be2=jnp.zeros((1, d_model), jnp.float32),
        ))
    return dict(
        pos=nrm(next(keys), (1, num_tokens, d_model), 0.02),
        layers=layers,
        wf=nrm(next(keys), (d_model, out_dim)),
        bf=nrm(next(keys), (1, out_dim)),
    )


def _ln_ref(y, g, b):
    m = jnp.mean(y, axis=-1, keepdims=True)
    v = jnp.mean((y - m) ** 2, axis=-1, keepdims=True)
    return (y - m) / jnp.sqrt(v + LN_EPS) * g + b


def reference_forward(x, params, *, num_heads):
    """Pure-JAX reference mirroring the PyTorch module (eval mode)."""
    x = x.astype(jnp.float32)
    S, N, D = x.shape                  # S = attention seq (dim 0, batch_first=False)
    H, Dh = num_heads, D // num_heads
    z = x + params["pos"]
    for lyr in params["layers"]:
        q = jnp.einsum("snd,de->sne", z, lyr["wq"]) + lyr["bq"]
        k = jnp.einsum("snd,de->sne", z, lyr["wk"]) + lyr["bk"]
        v = jnp.einsum("snd,de->sne", z, lyr["wv"]) + lyr["bv"]
        qh = q.reshape(S, N, H, Dh)
        kh = k.reshape(S, N, H, Dh)
        vh = v.reshape(S, N, H, Dh)
        s = jnp.einsum("qnhd,knhd->nhqk", qh, kh) / (Dh ** 0.5)
        p = jax.nn.softmax(s, axis=-1)
        a = jnp.einsum("nhqk,knhd->qnhd", p, vh).reshape(S, N, D)
        a = jnp.einsum("snd,de->sne", a, lyr["wo"]) + lyr["bo"]
        z = _ln_ref(z + a, lyr["g1"], lyr["be1"])
        ff = jax.nn.relu(jnp.einsum("snd,df->snf", z, lyr["w1"]) + lyr["b1"])
        ff = jnp.einsum("snf,fd->snd", ff, lyr["w2"]) + lyr["b2"]
        z = _ln_ref(z + ff, lyr["g2"], lyr["be2"])
    logits = jnp.einsum("snd,do->sno", z, params["wf"]) + params["bf"]
    return jax.nn.sigmoid(logits)


if __name__ == "__main__":
    # Small-but-faithful shapes: the module hard-codes 196 tokens via its
    # positional-encoding parameter; the rest (batch/seq=8, d_model=32,
    # heads=4, ffn=64, layers=2, out_dim=8) is kept small.
    B, N_TOKENS, D_MODEL, HEADS, D_FF, N_LAYERS, OUT_DIM = 8, 196, 32, 4, 64, 2, 8

    key = jax.random.PRNGKey(0)
    kx, kp = jax.random.split(key)
    x = jax.random.normal(kx, (B, N_TOKENS, D_MODEL), jnp.float32)
    params = init_params(kp, num_tokens=N_TOKENS, d_model=D_MODEL, dim_ff=D_FF,
                         num_layers=N_LAYERS, out_dim=OUT_DIM)

    out = transformer_model_forward(x, params, num_heads=HEADS,
                                    block_tokens=98, sub_tokens=14)
    out = jax.block_until_ready(out)

    ref = reference_forward(x, params, num_heads=HEADS)
    assert out.shape == (B, N_TOKENS, OUT_DIM)
    max_err = float(jnp.max(jnp.abs(out - ref)))
    # tolerance loosened slightly for pl.reciprocal(approx=True) in the softmax
    assert jnp.allclose(out, ref, atol=2e-3, rtol=2e-3), f"mismatch vs reference: {max_err}"
    print("KERNEL_OK")
</pallas_src>

<mosaic_0001>
module attributes {stable_mosaic.version = 11 : i64} {
  func.func @_model_kernel(%arg0: i32, %arg1: memref<1x784x32xf32, #tpu.memory_space<vmem>>, %arg2: memref<1x784x32xf32, #tpu.memory_space<vmem>>, %arg3: memref<112x112xf32, #tpu.memory_space<vmem>>, %arg4: memref<2x32x96xf32, #tpu.memory_space<vmem>>, %arg5: memref<2x1x96xf32, #tpu.memory_space<vmem>>, %arg6: memref<2x32x32xf32, #tpu.memory_space<vmem>>, %arg7: memref<2x1x32xf32, #tpu.memory_space<vmem>>, %arg8: memref<2x32x64xf32, #tpu.memory_space<vmem>>, %arg9: memref<2x1x64xf32, #tpu.memory_space<vmem>>, %arg10: memref<2x64x32xf32, #tpu.memory_space<vmem>>, %arg11: memref<2x1x32xf32, #tpu.memory_space<vmem>>, %arg12: memref<2x1x32xf32, #tpu.memory_space<vmem>>, %arg13: memref<2x1x32xf32, #tpu.memory_space<vmem>>, %arg14: memref<2x1x32xf32, #tpu.memory_space<vmem>>, %arg15: memref<2x1x32xf32, #tpu.memory_space<vmem>>, %arg16: memref<32x8xf32, #tpu.memory_space<vmem>>, %arg17: memref<1x8xf32, #tpu.memory_space<vmem>>, %arg18: memref<1x784x8xf32, #tpu.memory_space<vmem>>) attributes {dimension_semantics = [#tpu.dimension_semantics<parallel>], iteration_bounds = array<i64: 2>, scalar_prefetch = 0 : i64, scratch_operands = 0 : i64, tpu.core_type = #tpu.core_type<tc>, window_params = [{transform_indices = @transform_0, window_bounds = array<i64: 1, 784, 32>}, {transform_indices = @transform_1, window_bounds = array<i64: 1, 784, 32>}, {pipeline_mode = #tpu.pipeline_mode<synchronous>, transform_indices = @transform_2, window_bounds = array<i64: 112, 112>}, {pipeline_mode = #tpu.pipeline_mode<synchronous>, transform_indices = @transform_3, window_bounds = array<i64: 2, 32, 96>}, {pipeline_mode = #tpu.pipeline_mode<synchronous>, transform_indices = @transform_4, window_bounds = array<i64: 2, 1, 96>}, {pipeline_mode = #tpu.pipeline_mode<synchronous>, transform_indices = @transform_5, window_bounds = array<i64: 2, 32, 32>}, {pipeline_mode = #tpu.pipeline_mode<synchronous>, transform_indices = @transform_6, window_bounds = array<i64: 2, 1, 32>}, {pipeline_mode = #tpu.pipeline_mode<synchronous>, transform_indices = @transform_7, window_bounds = array<i64: 2, 32, 64>}, {pipeline_mode = #tpu.pipeline_mode<synchronous>, transform_indices = @transform_8, window_bounds = array<i64: 2, 1, 64>}, {pipeline_mode = #tpu.pipeline_mode<synchronous>, transform_indices = @transform_9, window_bounds = array<i64: 2, 64, 32>}, {pipeline_mode = #tpu.pipeline_mode<synchronous>, transform_indices = @transform_10, window_bounds = array<i64: 2, 1, 32>}, {pipeline_mode = #tpu.pipeline_mode<synchronous>, transform_indices = @transform_11, window_bounds = array<i64: 2, 1, 32>}, {pipeline_mode = #tpu.pipeline_mode<synchronous>, transform_indices = @transform_12, window_bounds = array<i64: 2, 1, 32>}, {pipeline_mode = #tpu.pipeline_mode<synchronous>, transform_indices = @transform_13, window_bounds = array<i64: 2, 1, 32>}, {pipeline_mode = #tpu.pipeline_mode<synchronous>, transform_indices = @transform_14, window_bounds = array<i64: 2, 1, 32>}, {pipeline_mode = #tpu.pipeline_mode<synchronous>, transform_indices = @transform_15, window_bounds = array<i64: 32, 8>}, {pipeline_mode = #tpu.pipeline_mode<synchronous>, transform_indices = @transform_16, window_bounds = array<i64: 1, 8>}, {transform_indices = @transform_17, window_bounds = array<i64: 1, 784, 8>}]} {
    %c0_i32 = arith.constant 0 : i32
    %c7_i32 = arith.constant 7 : i32
    %0 = arith.addi %c0_i32, %c7_i32 : i32
    %c1_i32 = arith.constant 1 : i32
    scf.for %arg19 = %c0_i32 to %0 step %c1_i32  : i32 {
      %c112_i32 = arith.constant 112 : i32
      %1 = arith.muli %arg19, %c112_i32 : i32
      %2 = tpu.assume_multiple %1, 112 : i32
      %c0 = arith.constant 0 : index
      %3 = arith.index_cast %2 : i32 to index
      %c0_1 = arith.constant 0 : index
      %4 = vector.load %arg1[%c0, %3, %c0_1] : memref<1x784x32xf32, #tpu.memory_space<vmem>>, vector<1x112x32xf32>
      %5 = vector.shape_cast %4 : vector<1x112x32xf32> to vector<112x32xf32>
      %c0_2 = arith.constant 0 : index
      %6 = arith.index_cast %2 : i32 to index
      %c0_3 = arith.constant 0 : index
      %7 = vector.load %arg2[%c0_2, %6, %c0_3] : memref<1x784x32xf32, #tpu.memory_space<vmem>>, vector<1x112x32xf32>
      %8 = vector.shape_cast %7 : vector<1x112x32xf32> to vector<112x32xf32>
      %9 = arith.addf %5, %8 : vector<112x32xf32>
      %c0_4 = arith.constant 0 : index
      %c0_5 = arith.constant 0 : index
      %c0_6 = arith.constant 0 : index
      %10 = vector.load %arg4[%c0_4, %c0_5, %c0_6] : memref<2x32x96xf32, #tpu.memory_space<vmem>>, vector<1x32x96xf32>
      %11 = vector.shape_cast %10 : vector<1x32x96xf32> to vector<32x96xf32>
      %cst = arith.constant dense<0.000000e+00> : vector<112x96xf32>
      %12 = tpu.matmul %9, %11, %cst {dimension_numbers = #tpu.dot_dimension_numbers<[1], [0], [0], [1], [0, 0, 1, 1], [], []>} : vector<112x32xf32>, vector<32x96xf32>, vector<112x96xf32> -> vector<112x96xf32>
      %c0_7 = arith.constant 0 : index
      %c0_8 = arith.constant 0 : index
      %c0_9 = arith.constant 0 : index
      %13 = vector.load %arg5[%c0_7, %c0_8, %c0_9] : memref<2x1x96xf32, #tpu.memory_space<vmem>>, vector<1x1x96xf32>
      %14 = vector.shape_cast %13 : vector<1x1x96xf32> to vector<1x96xf32>
      %15 = vector.broadcast %14 : vector<1x96xf32> to vector<112x96xf32>
      %16 = arith.addf %12, %15 : vector<112x96xf32>
      %17 = vector.extract_strided_slice %16 {offsets = [0, 0], sizes = [112, 32], strides = [1, 1]} : vector<112x96xf32> to vector<112x32xf32>
      %18 = vector.extract_strided_slice %16 {offsets = [0, 32], sizes = [112, 32], strides = [1, 1]} : vector<112x96xf32> to vector<112x32xf32>
      %19 = vector.extract_strided_slice %16 {offsets = [0, 64], sizes = [112, 32], strides = [1, 1]} : vector<112x96xf32> to vector<112x32xf32>
      %c0_10 = arith.constant 0 : index
      %c0_11 = arith.constant 0 : index
      %c0_12 = arith.constant 0 : index
      %20 = vector.load %arg6[%c0_10, %c0_11, %c0_12] : memref<2x32x32xf32, #tpu.memory_space<vmem>>, vector<1x32x32xf32>
      %21 = vector.shape_cast %20 : vector<1x32x32xf32> to vector<32x32xf32>
      %c0_13 = arith.constant 0 : index
      %c0_14 = arith.constant 0 : index
      %c0_15 = arith.constant 0 : index
      %22 = vector.load %arg7[%c0_13, %c0_14, %c0_15] : memref<2x1x32xf32, #tpu.memory_space<vmem>>, vector<1x1x32xf32>
      %23 = vector.shape_cast %22 : vector<1x1x32xf32> to vector<1x32xf32>
      %24 = vector.extract_strided_slice %17 {offsets = [0, 0], sizes = [112, 8], strides = [1, 1]} : vector<112x32xf32> to vector<112x8xf32>
      %25 = vector.extract_strided_slice %18 {offsets = [0, 0], sizes = [112, 8], strides = [1, 1]} : vector<112x32xf32> to vector<112x8xf32>
      %cst_16 = arith.constant dense<0.000000e+00> : vector<112x112xf32>
      %26 = tpu.matmul %24, %25, %cst_16 {dimension_numbers = #tpu.dot_dimension_numbers<[1], [1], [0], [0], [0, 0, 1, 0], [], []>} : vector<112x8xf32>, vector<112x8xf32>, vector<112x112xf32> -> vector<112x112xf32>
      %c0_17 = arith.constant 0 : index
      %c0_18 = arith.constant 0 : index
      %27 = vector.load %arg3[%c0_17, %c0_18] : memref<112x112xf32, #tpu.memory_space<vmem>>, vector<112x112xf32>
      %28 = arith.addf %26, %27 : vector<112x112xf32>
      %cst_19 = arith.constant dense<0xFF800000> : vector<112xf32>
      %29 = vector.multi_reduction <maximumf>, %28, %cst_19 [1] : vector<112x112xf32> to vector<112xf32>
      %30 = vector.shape_cast %29 : vector<112xf32> to vector<112x1xf32>
      %31 = vector.broadcast %30 : vector<112x1xf32> to vector<112x112xf32>
      %32 = arith.subf %28, %31 : vector<112x112xf32>
      %33 = math.exp %32 : vector<112x112xf32>
      %cst_20 = arith.constant dense<0.000000e+00> : vector<112xf32>
      %34 = vector.multi_reduction <add>, %33, %cst_20 [1] : vector<112x112xf32> to vector<112xf32>
      %35 = vector.shape_cast %34 : vector<112xf32> to vector<112x1xf32>
      %36 = tpu.reciprocal %35 {approx = true} : vector<112x1xf32> -> vector<112x1xf32>
      %37 = vector.broadcast %36 : vector<112x1xf32> to vector<112x112xf32>
      %38 = arith.mulf %33, %37 : vector<112x112xf32>
      %39 = vector.extract_strided_slice %19 {offsets = [0, 0], sizes = [112, 8], strides = [1, 1]} : vector<112x32xf32> to vector<112x8xf32>
      %cst_21 = arith.constant dense<0.000000e+00> : vector<112x8xf32>
      %40 = tpu.matmul %38, %39, %cst_21 {dimension_numbers = #tpu.dot_dimension_numbers<[1], [0], [0], [1], [0, 0, 1, 1], [], []>} : vector<112x112xf32>, vector<112x8xf32>, vector<112x8xf32> -> vector<112x8xf32>
      %41 = vector.extract_strided_slice %21 {offsets = [0, 0], sizes = [8, 32], strides = [1, 1]} : vector<32x32xf32> to vector<8x32xf32>
      %cst_22 = arith.constant dense<0.000000e+00> : vector<112x32xf32>
      %42 = tpu.matmul %40, %41, %cst_22 {dimension_numbers = #tpu.dot_dimension_numbers<[1], [0], [0], [1], [0, 0, 1, 1], [], []>} : vector<112x8xf32>, vector<8x32xf32>, vector<112x32xf32> -> vector<112x32xf32>
      %43 = vector.broadcast %23 : vector<1x32xf32> to vector<112x32xf32>
      %44 = arith.addf %43, %42 : vector<112x32xf32>
      %45 = vector.extract_strided_slice %17 {offsets = [0, 8], sizes = [112, 8], strides = [1, 1]} : vector<112x32xf32> to vector<112x8xf32>
      %46 = vector.extract_strided_slice %18 {offsets = [0, 8], sizes = [112, 8], strides = [1, 1]} : vector<112x32xf32> to vector<112x8xf32>
      %cst_23 = arith.constant dense<0.000000e+00> : vector<112x112xf32>
      %47 = tpu.matmul %45, %46, %cst_23 {dimension_numbers = #tpu.dot_dimension_numbers<[1], [1], [0], [0], [0, 0, 1, 0], [], []>} : vector<112x8xf32>, vector<112x8xf32>, vector<112x112xf32> -> vector<112x112xf32>
      %c0_24 = arith.constant 0 : index
      %c0_25 = arith.constant 0 : index
      %48 = vector.load %arg3[%c0_24, %c0_25] : memref<112x112xf32, #tpu.memory_space<vmem>>, vector<112x112xf32>
      %49 = arith.addf %47, %48 : vector<112x112xf32>
      %cst_26 = arith.constant dense<0xFF800000> : vector<112xf32>
      %50 = vector.multi_reduction <maximumf>, %49, %cst_26 [1] : vector<112x112xf32> to vector<112xf32>
      %51 = vector.shape_cast %50 : vector<112xf32> to vector<112x1xf32>
      %52 = vector.broadcast %51 : vector<112x1xf32> to vector<112x112xf32>
      %53 = arith.subf %49, %52 : vector<112x112xf32>
      %54 = math.exp %53 : vector<112x112xf32>
      %cst_27 = arith.constant dense<0.000000e+00> : vector<112xf32>
      %55 = vector.multi_reduction <add>, %54, %cst_27 [1] : vector<112x112xf32> to vector<112xf32>
      %56 = vector.shape_cast %55 : vector<112xf32> to vector<112x1xf32>
      %57 = tpu.reciprocal %56 {approx = true} : vector<112x1xf32> -> vector<112x1xf32>
      %58 = vector.broadcast %57 : vector<112x1xf32> to vector<112x112xf32>
      %59 = arith.mulf %54, %58 : vector<112x112xf32>
      %60 = vector.extract_strided_slice %19 {offsets = [0, 8], sizes = [112, 8], strides = [1, 1]} : vector<112x32xf32> to vector<112x8xf32>
      %cst_28 = arith.constant dense<0.000000e+00> : vector<112x8xf32>
      %61 = tpu.matmul %59, %60, %cst_28 {dimension_numbers = #tpu.dot_dimension_numbers<[1], [0], [0], [1], [0, 0, 1, 1], [], []>} : vector<112x112xf32>, vector<112x8xf32>, vector<112x8xf32> -> vector<112x8xf32>
      %62 = vector.extract_strided_slice %21 {offsets = [8, 0], sizes = [8, 32], strides = [1, 1]} : vector<32x32xf32> to vector<8x32xf32>
      %cst_29 = arith.constant dense<0.000000e+00> : vector<112x32xf32>
      %63 = tpu.matmul %61, %62, %cst_29 {dimension_numbers = #tpu.dot_dimension_numbers<[1], [0], [0], [1], [0, 0, 1, 1], [], []>} : vector<112x8xf32>, vector<8x32xf32>, vector<112x32xf32> -> vector<112x32xf32>
      %64 = arith.addf %44, %63 : vector<112x32xf32>
      %65 = vector.extract_strided_slice %17 {offsets = [0, 16], sizes = [112, 8], strides = [1, 1]} : vector<112x32xf32> to vector<112x8xf32>
      %66 = vector.extract_strided_slice %18 {offsets = [0, 16], sizes = [112, 8], strides = [1, 1]} : vector<112x32xf32> to vector<112x8xf32>
      %cst_30 = arith.constant dense<0.000000e+00> : vector<112x112xf32>
      %67 = tpu.matmul %65, %66, %cst_30 {dimension_numbers = #tpu.dot_dimension_numbers<[1], [1], [0], [0], [0, 0, 1, 0], [], []>} : vector<112x8xf32>, vector<112x8xf32>, vector<112x112xf32> -> vector<112x112xf32>
      %c0_31 = arith.constant 0 : index
      %c0_32 = arith.constant 0 : index
      %68 = vector.load %arg3[%c0_31, %c0_32] : memref<112x112xf32, #tpu.memory_space<vmem>>, vector<112x112xf32>
      %69 = arith.addf %67, %68 : vector<112x112xf32>
      %cst_33 = arith.constant dense<0xFF800000> : vector<112xf32>
      %70 = vector.multi_reduction <maximumf>, %69, %cst_33 [1] : vector<112x112xf32> to vector<112xf32>
      %71 = vector.shape_cast %70 : vector<112xf32> to vector<112x1xf32>
      %72 = vector.broadcast %71 : vector<112x1xf32> to vector<112x112xf32>
      %73 = arith.subf %69, %72 : vector<112x112xf32>
      %74 = math.exp %73 : vector<112x112xf32>
      %cst_34 = arith.constant dense<0.000000e+00> : vector<112xf32>
      %75 = vector.multi_reduction <add>, %74, %cst_34 [1] : vector<112x112xf32> to vector<112xf32>
      %76 = vector.shape_cast %75 : vector<112xf32> to vector<112x1xf32>
      %77 = tpu.reciprocal %76 {approx = true} : vector<112x1xf32> -> vector<112x1xf32>
      %78 = vector.broadcast %77 : vector<112x1xf32> to vector<112x112xf32>
      %79 = arith.mulf %74, %78 : vector<112x112xf32>
      %80 = vector.extract_strided_slice %19 {offsets = [0, 16], sizes = [112, 8], strides = [1, 1]} : vector<112x32xf32> to vector<112x8xf32>
      %cst_35 = arith.constant dense<0.000000e+00> : vector<112x8xf32>
      %81 = tpu.matmul %79, %80, %cst_35 {dimension_numbers = #tpu.dot_dimension_numbers<[1], [0], [0], [1], [0, 0, 1, 1], [], []>} : vector<112x112xf32>, vector<112x8xf32>, vector<112x8xf32> -> vector<112x8xf32>
      %82 = vector.extract_strided_slice %21 {offsets = [16, 0], sizes = [8, 32], strides = [1, 1]} : vector<32x32xf32> to vector<8x32xf32>
      %cst_36 = arith.constant dense<0.000000e+00> : vector<112x32xf32>
      %83 = tpu.matmul %81, %82, %cst_36 {dimension_numbers = #tpu.dot_dimension_numbers<[1], [0], [0], [1], [0, 0, 1, 1], [], []>} : vector<112x8xf32>, vector<8x32xf32>, vector<112x32xf32> -> vector<112x32xf32>
      %84 = arith.addf %64, %83 : vector<112x32xf32>
      %85 = vector.extract_strided_slice %17 {offsets = [0, 24], sizes = [112, 8], strides = [1, 1]} : vector<112x32xf32> to vector<112x8xf32>
      %86 = vector.extract_strided_slice %18 {offsets = [0, 24], sizes = [112, 8], strides = [1, 1]} : vector<112x32xf32> to vector<112x8xf32>
      %cst_37 = arith.constant dense<0.000000e+00> : vector<112x112xf32>
      %87 = tpu.matmul %85, %86, %cst_37 {dimension_numbers = #tpu.dot_dimension_numbers<[1], [1], [0], [0], [0, 0, 1, 0], [], []>} : vector<112x8xf32>, vector<112x8xf32>, vector<112x112xf32> -> vector<112x112xf32>
      %c0_38 = arith.constant 0 : index
      %c0_39 = arith.constant 0 : index
      %88 = vector.load %arg3[%c0_38, %c0_39] : memref<112x112xf32, #tpu.memory_space<vmem>>, vector<112x112xf32>
      %89 = arith.addf %87, %88 : vector<112x112xf32>
      %cst_40 = arith.constant dense<0xFF800000> : vector<112xf32>
      %90 = vector.multi_reduction <maximumf>, %89, %cst_40 [1] : vector<112x112xf32> to vector<112xf32>
      %91 = vector.shape_cast %90 : vector<112xf32> to vector<112x1xf32>
      %92 = vector.broadcast %91 : vector<112x1xf32> to vector<112x112xf32>
      %93 = arith.subf %89, %92 : vector<112x112xf32>
      %94 = math.exp %93 : vector<112x112xf32>
      %cst_41 = arith.constant dense<0.000000e+00> : vector<112xf32>
      %95 = vector.multi_reduction <add>, %94, %cst_41 [1] : vector<112x112xf32> to vector<112xf32>
      %96 = vector.shape_cast %95 : vector<112xf32> to vector<112x1xf32>
      %97 = tpu.reciprocal %96 {approx = true} : vector<112x1xf32> -> vector<112x1xf32>
      %98 = vector.broadcast %97 : vector<112x1xf32> to vector<112x112xf32>
      %99 = arith.mulf %94, %98 : vector<112x112xf32>
      %100 = vector.extract_strided_slice %19 {offsets = [0, 24], sizes = [112, 8], strides = [1, 1]} : vector<112x32xf32> to vector<112x8xf32>
      %cst_42 = arith.constant dense<0.000000e+00> : vector<112x8xf32>
      %101 = tpu.matmul %99, %100, %cst_42 {dimension_numbers = #tpu.dot_dimension_numbers<[1], [0], [0], [1], [0, 0, 1, 1], [], []>} : vector<112x112xf32>, vector<112x8xf32>, vector<112x8xf32> -> vector<112x8xf32>
      %102 = vector.extract_strided_slice %21 {offsets = [24, 0], sizes = [8, 32], strides = [1, 1]} : vector<32x32xf32> to vector<8x32xf32>
      %cst_43 = arith.constant dense<0.000000e+00> : vector<112x32xf32>
      %103 = tpu.matmul %101, %102, %cst_43 {dimension_numbers = #tpu.dot_dimension_numbers<[1], [0], [0], [1], [0, 0, 1, 1], [], []>} : vector<112x8xf32>, vector<8x32xf32>, vector<112x32xf32> -> vector<112x32xf32>
      %104 = arith.addf %84, %103 : vector<112x32xf32>
      %105 = arith.addf %9, %104 : vector<112x32xf32>
      %c0_44 = arith.constant 0 : index
      %c0_45 = arith.constant 0 : index
      %c0_46 = arith.constant 0 : index
      %106 = vector.load %arg12[%c0_44, %c0_45, %c0_46] : memref<2x1x32xf32, #tpu.memory_space<vmem>>, vector<1x1x32xf32>
      %107 = vector.shape_cast %106 : vector<1x1x32xf32> to vector<1x32xf32>
      %c0_47 = arith.constant 0 : index
      %c0_48 = arith.constant 0 : index
      %c0_49 = arith.constant 0 : index
      %108 = vector.load %arg13[%c0_47, %c0_48, %c0_49] : memref<2x1x32xf32, #tpu.memory_space<vmem>>, vector<1x1x32xf32>
      %109 = vector.shape_cast %108 : vector<1x1x32xf32> to vector<1x32xf32>
      %cst_50 = arith.constant dense<0.000000e+00> : vector<112xf32>
      %110 = vector.multi_reduction <add>, %105, %cst_50 [1] : vector<112x32xf32> to vector<112xf32>
      %111 = vector.shape_cast %110 : vector<112xf32> to vector<112x1xf32>
      %cst_51 = arith.constant 3.200000e+01 : f32
      %112 = vector.broadcast %cst_51 : f32 to vector<112x1xf32>
      %113 = arith.divf %111, %112 : vector<112x1xf32>
      %114 = vector.broadcast %113 : vector<112x1xf32> to vector<112x32xf32>
      %115 = arith.subf %105, %114 : vector<112x32xf32>
      %116 = arith.mulf %115, %115 : vector<112x32xf32>
      %cst_52 = arith.constant dense<0.000000e+00> : vector<112xf32>
      %117 = vector.multi_reduction <add>, %116, %cst_52 [1] : vector<112x32xf32> to vector<112xf32>
      %118 = vector.shape_cast %117 : vector<112xf32> to vector<112x1xf32>
      %cst_53 = arith.constant 3.200000e+01 : f32
      %119 = vector.broadcast %cst_53 : f32 to vector<112x1xf32>
      %120 = arith.divf %118, %119 : vector<112x1xf32>
      %121 = vector.broadcast %113 : vector<112x1xf32> to vector<112x32xf32>
      %122 = arith.subf %105, %121 : vector<112x32xf32>
      %cst_54 = arith.constant 9.99999974E-6 : f32
      %123 = vector.broadcast %cst_54 : f32 to vector<112x1xf32>
      %124 = arith.addf %120, %123 : vector<112x1xf32>
      %125 = math.rsqrt %124 : vector<112x1xf32>
      %126 = vector.broadcast %125 : vector<112x1xf32> to vector<112x32xf32>
      %127 = arith.mulf %122, %126 : vector<112x32xf32>
      %128 = vector.broadcast %107 : vector<1x32xf32> to vector<112x32xf32>
      %129 = arith.mulf %127, %128 : vector<112x32xf32>
      %130 = vector.broadcast %109 : vector<1x32xf32> to vector<112x32xf32>
      %131 = arith.addf %129, %130 : vector<112x32xf32>
      %c0_55 = arith.constant 0 : index
      %c0_56 = arith.constant 0 : index
      %c0_57 = arith.constant 0 : index
      %132 = vector.load %arg8[%c0_55, %c0_56, %c0_57] : memref<2x32x64xf32, #tpu.memory_space<vmem>>, vector<1x32x64xf32>
      %133 = vector.shape_cast %132 : vector<1x32x64xf32> to vector<32x64xf32>
      %cst_58 = arith.constant dense<0.000000e+00> : vector<112x64xf32>
      %134 = tpu.matmul %131, %133, %cst_58 {dimension_numbers = #tpu.dot_dimension_numbers<[1], [0], [0], [1], [0, 0, 1, 1], [], []>} : vector<112x32xf32>, vector<32x64xf32>, vector<112x64xf32> -> vector<112x64xf32>
      %c0_59 = arith.constant 0 : index
      %c0_60 = arith.constant 0 : index
      %c0_61 = arith.constant 0 : index
      %135 = vector.load %arg9[%c0_59, %c0_60, %c0_61] : memref<2x1x64xf32, #tpu.memory_space<vmem>>, vector<1x1x64xf32>
      %136 = vector.shape_cast %135 : vector<1x1x64xf32> to vector<1x64xf32>
      %137 = vector.broadcast %136 : vector<1x64xf32> to vector<112x64xf32>
      %138 = arith.addf %134, %137 : vector<112x64xf32>
      %cst_62 = arith.constant 0.000000e+00 : f32
      %139 = vector.broadcast %cst_62 : f32 to vector<112x64xf32>
      %140 = arith.maximumf %138, %139 : vector<112x64xf32>
      %c0_63 = arith.constant 0 : index
      %c0_64 = arith.constant 0 : index
      %c0_65 = arith.constant 0 : index
      %141 = vector.load %arg10[%c0_63, %c0_64, %c0_65] : memref<2x64x32xf32, #tpu.memory_space<vmem>>, vector<1x64x32xf32>
      %142 = vector.shape_cast %141 : vector<1x64x32xf32> to vector<64x32xf32>
      %cst_66 = arith.constant dense<0.000000e+00> : vector<112x32xf32>
      %143 = tpu.matmul %140, %142, %cst_66 {dimension_numbers = #tpu.dot_dimension_numbers<[1], [0], [0], [1], [0, 0, 1, 1], [], []>} : vector<112x64xf32>, vector<64x32xf32>, vector<112x32xf32> -> vector<112x32xf32>
      %c0_67 = arith.constant 0 : index
      %c0_68 = arith.constant 0 : index
      %c0_69 = arith.constant 0 : index
      %144 = vector.load %arg11[%c0_67, %c0_68, %c0_69] : memref<2x1x32xf32, #tpu.memory_space<vmem>>, vector<1x1x32xf32>
      %145 = vector.shape_cast %144 : vector<1x1x32xf32> to vector<1x32xf32>
      %146 = vector.broadcast %145 : vector<1x32xf32> to vector<112x32xf32>
      %147 = arith.addf %143, %146 : vector<112x32xf32>
      %148 = arith.addf %131, %147 : vector<112x32xf32>
      %c0_70 = arith.constant 0 : index
      %c0_71 = arith.constant 0 : index
      %c0_72 = arith.constant 0 : index
      %149 = vector.load %arg14[%c0_70, %c0_71, %c0_72] : memref<2x1x32xf32, #tpu.memory_space<vmem>>, vector<1x1x32xf32>
      %150 = vector.shape_cast %149 : vector<1x1x32xf32> to vector<1x32xf32>
      %c0_73 = arith.constant 0 : index
      %c0_74 = arith.constant 0 : index
      %c0_75 = arith.constant 0 : index
      %151 = vector.load %arg15[%c0_73, %c0_74, %c0_75] : memref<2x1x32xf32, #tpu.memory_space<vmem>>, vector<1x1x32xf32>
      %152 = vector.shape_cast %151 : vector<1x1x32xf32> to vector<1x32xf32>
      %cst_76 = arith.constant dense<0.000000e+00> : vector<112xf32>
      %153 = vector.multi_reduction <add>, %148, %cst_76 [1] : vector<112x32xf32> to vector<112xf32>
      %154 = vector.shape_cast %153 : vector<112xf32> to vector<112x1xf32>
      %cst_77 = arith.constant 3.200000e+01 : f32
      %155 = vector.broadcast %cst_77 : f32 to vector<112x1xf32>
      %156 = arith.divf %154, %155 : vector<112x1xf32>
      %157 = vector.broadcast %156 : vector<112x1xf32> to vector<112x32xf32>
      %158 = arith.subf %148, %157 : vector<112x32xf32>
      %159 = arith.mulf %158, %158 : vector<112x32xf32>
      %cst_78 = arith.constant dense<0.000000e+00> : vector<112xf32>
      %160 = vector.multi_reduction <add>, %159, %cst_78 [1] : vector<112x32xf32> to vector<112xf32>
      %161 = vector.shape_cast %160 : vector<112xf32> to vector<112x1xf32>
      %cst_79 = arith.constant 3.200000e+01 : f32
      %162 = vector.broadcast %cst_79 : f32 to vector<112x1xf32>
      %163 = arith.divf %161, %162 : vector<112x1xf32>
      %164 = vector.broadcast %156 : vector<112x1xf32> to vector<112x32xf32>
      %165 = arith.subf %148, %164 : vector<112x32xf32>
      %cst_80 = arith.constant 9.99999974E-6 : f32
      %166 = vector.broadcast %cst_80 : f32 to vector<112x1xf32>
      %167 = arith.addf %163, %166 : vector<112x1xf32>
      %168 = math.rsqrt %167 : vector<112x1xf32>
      %169 = vector.broadcast %168 : vector<112x1xf32> to vector<112x32xf32>
      %170 = arith.mulf %165, %169 : vector<112x32xf32>
      %171 = vector.broadcast %150 : vector<1x32xf32> to vector<112x32xf32>
      %172 = arith.mulf %170, %171 : vector<112x32xf32>
      %173 = vector.broadcast %152 : vector<1x32xf32> to vector<112x32xf32>
      %174 = arith.addf %172, %173 : vector<112x32xf32>
      %c1 = arith.constant 1 : index
      %c0_81 = arith.constant 0 : index
      %c0_82 = arith.constant 0 : index
      %175 = vector.load %arg4[%c1, %c0_81, %c0_82] : memref<2x32x96xf32, #tpu.memory_space<vmem>>, vector<1x32x96xf32>
      %176 = vector.shape_cast %175 : vector<1x32x96xf32> to vector<32x96xf32>
      %cst_83 = arith.constant dense<0.000000e+00> : vector<112x96xf32>
      %177 = tpu.matmul %174, %176, %cst_83 {dimension_numbers = #tpu.dot_dimension_numbers<[1], [0], [0], [1], [0, 0, 1, 1], [], []>} : vector<112x32xf32>, vector<32x96xf32>, vector<112x96xf32> -> vector<112x96xf32>
      %c1_84 = arith.constant 1 : index
      %c0_85 = arith.constant 0 : index
      %c0_86 = arith.constant 0 : index
      %178 = vector.load %arg5[%c1_84, %c0_85, %c0_86] : memref<2x1x96xf32, #tpu.memory_space<vmem>>, vector<1x1x96xf32>
      %179 = vector.shape_cast %178 : vector<1x1x96xf32> to vector<1x96xf32>
      %180 = vector.broadcast %179 : vector<1x96xf32> to vector<112x96xf32>
      %181 = arith.addf %177, %180 : vector<112x96xf32>
      %182 = vector.extract_strided_slice %181 {offsets = [0, 0], sizes = [112, 32], strides = [1, 1]} : vector<112x96xf32> to vector<112x32xf32>
      %183 = vector.extract_strided_slice %181 {offsets = [0, 32], sizes = [112, 32], strides = [1, 1]} : vector<112x96xf32> to vector<112x32xf32>
      %184 = vector.extract_strided_slice %181 {offsets = [0, 64], sizes = [112, 32], strides = [1, 1]} : vector<112x96xf32> to vector<112x32xf32>
      %c1_87 = arith.constant 1 : index
      %c0_88 = arith.constant 0 : index
      %c0_89 = arith.constant 0 : index
      %185 = vector.load %arg6[%c1_87, %c0_88, %c0_89] : memref<2x32x32xf32, #tpu.memory_space<vmem>>, vector<1x32x32xf32>
      %186 = vector.shape_cast %185 : vector<1x32x32xf32> to vector<32x32xf32>
      %c1_90 = arith.constant 1 : index
      %c0_91 = arith.constant 0 : index
      %c0_92 = arith.constant 0 : index
      %187 = vector.load %arg7[%c1_90, %c0_91, %c0_92] : memref<2x1x32xf32, #tpu.memory_space<vmem>>, vector<1x1x32xf32>
      %188 = vector.shape_cast %187 : vector<1x1x32xf32> to vector<1x32xf32>
      %189 = vector.extract_strided_slice %182 {offsets = [0, 0], sizes = [112, 8], strides = [1, 1]} : vector<112x32xf32> to vector<112x8xf32>
      %190 = vector.extract_strided_slice %183 {offsets = [0, 0], sizes = [112, 8], strides = [1, 1]} : vector<112x32xf32> to vector<112x8xf32>
      %cst_93 = arith.constant dense<0.000000e+00> : vector<112x112xf32>
      %191 = tpu.matmul %189, %190, %cst_93 {dimension_numbers = #tpu.dot_dimension_numbers<[1], [1], [0], [0], [0, 0, 1, 0], [], []>} : vector<112x8xf32>, vector<112x8xf32>, vector<112x112xf32> -> vector<112x112xf32>
      %c0_94 = arith.constant 0 : index
      %c0_95 = arith.constant 0 : index
      %192 = vector.load %arg3[%c0_94, %c0_95] : memref<112x112xf32, #tpu.memory_space<vmem>>, vector<112x112xf32>
      %193 = arith.addf %191, %192 : vector<112x112xf32>
      %cst_96 = arith.constant dense<0xFF800000> : vector<112xf32>
      %194 = vector.multi_reduction <maximumf>, %193, %cst_96 [1] : vector<112x112xf32> to vector<112xf32>
      %195 = vector.shape_cast %194 : vector<112xf32> to vector<112x1xf32>
      %196 = vector.broadcast %195 : vector<112x1xf32> to vector<112x112xf32>
      %197 = arith.subf %193, %196 : vector<112x112xf32>
      %198 = math.exp %197 : vector<112x112xf32>
      %cst_97 = arith.constant dense<0.000000e+00> : vector<112xf32>
      %199 = vector.multi_reduction <add>, %198, %cst_97 [1] : vector<112x112xf32> to vector<112xf32>
      %200 = vector.shape_cast %199 : vector<112xf32> to vector<112x1xf32>
      %201 = tpu.reciprocal %200 {approx = true} : vector<112x1xf32> -> vector<112x1xf32>
      %202 = vector.broadcast %201 : vector<112x1xf32> to vector<112x112xf32>
      %203 = arith.mulf %198, %202 : vector<112x112xf32>
      %204 = vector.extract_strided_slice %184 {offsets = [0, 0], sizes = [112, 8], strides = [1, 1]} : vector<112x32xf32> to vector<112x8xf32>
      %cst_98 = arith.constant dense<0.000000e+00> : vector<112x8xf32>
      %205 = tpu.matmul %203, %204, %cst_98 {dimension_numbers = #tpu.dot_dimension_numbers<[1], [0], [0], [1], [0, 0, 1, 1], [], []>} : vector<112x112xf32>, vector<112x8xf32>, vector<112x8xf32> -> vector<112x8xf32>
      %206 = vector.extract_strided_slice %186 {offsets = [0, 0], sizes = [8, 32], strides = [1, 1]} : vector<32x32xf32> to vector<8x32xf32>
      %cst_99 = arith.constant dense<0.000000e+00> : vector<112x32xf32>
      %207 = tpu.matmul %205, %206, %cst_99 {dimension_numbers = #tpu.dot_dimension_numbers<[1], [0], [0], [1], [0, 0, 1, 1], [], []>} : vector<112x8xf32>, vector<8x32xf32>, vector<112x32xf32> -> vector<112x32xf32>
      %208 = vector.broadcast %188 : vector<1x32xf32> to vector<112x32xf32>
      %209 = arith.addf %208, %207 : vector<112x32xf32>
      %210 = vector.extract_strided_slice %182 {offsets = [0, 8], sizes = [112, 8], strides = [1, 1]} : vector<112x32xf32> to vector<112x8xf32>
      %211 = vector.extract_strided_slice %183 {offsets = [0, 8], sizes = [112, 8], strides = [1, 1]} : vector<112x32xf32> to vector<112x8xf32>
      %cst_100 = arith.constant dense<0.000000e+00> : vector<112x112xf32>
      %212 = tpu.matmul %210, %211, %cst_100 {dimension_numbers = #tpu.dot_dimension_numbers<[1], [1], [0], [0], [0, 0, 1, 0], [], []>} : vector<112x8xf32>, vector<112x8xf32>, vector<112x112xf32> -> vector<112x112xf32>
      %c0_101 = arith.constant 0 : index
      %c0_102 = arith.constant 0 : index
      %213 = vector.load %arg3[%c0_101, %c0_102] : memref<112x112xf32, #tpu.memory_space<vmem>>, vector<112x112xf32>
      %214 = arith.addf %212, %213 : vector<112x112xf32>
      %cst_103 = arith.constant dense<0xFF800000> : vector<112xf32>
      %215 = vector.multi_reduction <maximumf>, %214, %cst_103 [1] : vector<112x112xf32> to vector<112xf32>
      %216 = vector.shape_cast %215 : vector<112xf32> to vector<112x1xf32>
      %217 = vector.broadcast %216 : vector<112x1xf32> to vector<112x112xf32>
      %218 = arith.subf %214, %217 : vector<112x112xf32>
      %219 = math.exp %218 : vector<112x112xf32>
      %cst_104 = arith.constant dense<0.000000e+00> : vector<112xf32>
      %220 = vector.multi_reduction <add>, %219, %cst_104 [1] : vector<112x112xf32> to vector<112xf32>
      %221 = vector.shape_cast %220 : vector<112xf32> to vector<112x1xf32>
      %222 = tpu.reciprocal %221 {approx = true} : vector<112x1xf32> -> vector<112x1xf32>
      %223 = vector.broadcast %222 : vector<112x1xf32> to vector<112x112xf32>
      %224 = arith.mulf %219, %223 : vector<112x112xf32>
      %225 = vector.extract_strided_slice %184 {offsets = [0, 8], sizes = [112, 8], strides = [1, 1]} : vector<112x32xf32> to vector<112x8xf32>
      %cst_105 = arith.constant dense<0.000000e+00> : vector<112x8xf32>
      %226 = tpu.matmul %224, %225, %cst_105 {dimension_numbers = #tpu.dot_dimension_numbers<[1], [0], [0], [1], [0, 0, 1, 1], [], []>} : vector<112x112xf32>, vector<112x8xf32>, vector<112x8xf32> -> vector<112x8xf32>
      %227 = vector.extract_strided_slice %186 {offsets = [8, 0], sizes = [8, 32], strides = [1, 1]} : vector<32x32xf32> to vector<8x32xf32>
      %cst_106 = arith.constant dense<0.000000e+00> : vector<112x32xf32>
      %228 = tpu.matmul %226, %227, %cst_106 {dimension_numbers = #tpu.dot_dimension_numbers<[1], [0], [0], [1], [0, 0, 1, 1], [], []>} : vector<112x8xf32>, vector<8x32xf32>, vector<112x32xf32> -> vector<112x32xf32>
      %229 = arith.addf %209, %228 : vector<112x32xf32>
      %230 = vector.extract_strided_slice %182 {offsets = [0, 16], sizes = [112, 8], strides = [1, 1]} : vector<112x32xf32> to vector<112x8xf32>
      %231 = vector.extract_strided_slice %183 {offsets = [0, 16], sizes = [112, 8], strides = [1, 1]} : vector<112x32xf32> to vector<112x8xf32>
      %cst_107 = arith.constant dense<0.000000e+00> : vector<112x112xf32>
      %232 = tpu.matmul %230, %231, %cst_107 {dimension_numbers = #tpu.dot_dimension_numbers<[1], [1], [0], [0], [0, 0, 1, 0], [], []>} : vector<112x8xf32>, vector<112x8xf32>, vector<112x112xf32> -> vector<112x112xf32>
      %c0_108 = arith.constant 0 : index
      %c0_109 = arith.constant 0 : index
      %233 = vector.load %arg3[%c0_108, %c0_109] : memref<112x112xf32, #tpu.memory_space<vmem>>, vector<112x112xf32>
      %234 = arith.addf %232, %233 : vector<112x112xf32>
      %cst_110 = arith.constant dense<0xFF800000> : vector<112xf32>
      %235 = vector.multi_reduction <maximumf>, %234, %cst_110 [1] : vector<112x112xf32> to vector<112xf32>
      %236 = vector.shape_cast %235 : vector<112xf32> to vector<112x1xf32>
      %237 = vector.broadcast %236 : vector<112x1xf32> to vector<112x112xf32>
      %238 = arith.subf %234, %237 : vector<112x112xf32>
      %239 = math.exp %238 : vector<112x112xf32>
      %cst_111 = arith.constant dense<0.000000e+00> : vector<112xf32>
      %240 = vector.multi_reduction <add>, %239, %cst_111 [1] : vector<112x112xf32> to vector<112xf32>
      %241 = vector.shape_cast %240 : vector<112xf32> to vector<112x1xf32>
      %242 = tpu.reciprocal %241 {approx = true} : vector<112x1xf32> -> vector<112x1xf32>
      %243 = vector.broadcast %242 : vector<112x1xf32> to vector<112x112xf32>
      %244 = arith.mulf %239, %243 : vector<112x112xf32>
      %245 = vector.extract_strided_slice %184 {offsets = [0, 16], sizes = [112, 8], strides = [1, 1]} : vector<112x32xf32> to vector<112x8xf32>
      %cst_112 = arith.constant dense<0.000000e+00> : vector<112x8xf32>
      %246 = tpu.matmul %244, %245, %cst_112 {dimension_numbers = #tpu.dot_dimension_numbers<[1], [0], [0], [1], [0, 0, 1, 1], [], []>} : vector<112x112xf32>, vector<112x8xf32>, vector<112x8xf32> -> vector<112x8xf32>
      %247 = vector.extract_strided_slice %186 {offsets = [16, 0], sizes = [8, 32], strides = [1, 1]} : vector<32x32xf32> to vector<8x32xf32>
      %cst_113 = arith.constant dense<0.000000e+00> : vector<112x32xf32>
      %248 = tpu.matmul %246, %247, %cst_113 {dimension_numbers = #tpu.dot_dimension_numbers<[1], [0], [0], [1], [0, 0, 1, 1], [], []>} : vector<112x8xf32>, vector<8x32xf32>, vector<112x32xf32> -> vector<112x32xf32>
      %249 = arith.addf %229, %248 : vector<112x32xf32>
      %250 = vector.extract_strided_slice %182 {offsets = [0, 24], sizes = [112, 8], strides = [1, 1]} : vector<112x32xf32> to vector<112x8xf32>
      %251 = vector.extract_strided_slice %183 {offsets = [0, 24], sizes = [112, 8], strides = [1, 1]} : vector<112x32xf32> to vector<112x8xf32>
      %cst_114 = arith.constant dense<0.000000e+00> : vector<112x112xf32>
      %252 = tpu.matmul %250, %251, %cst_114 {dimension_numbers = #tpu.dot_dimension_numbers<[1], [1], [0], [0], [0, 0, 1, 0], [], []>} : vector<112x8xf32>, vector<112x8xf32>, vector<112x112xf32> -> vector<112x112xf32>
      %c0_115 = arith.constant 0 : index
      %c0_116 = arith.constant 0 : index
      %253 = vector.load %arg3[%c0_115, %c0_116] : memref<112x112xf32, #tpu.memory_space<vmem>>, vector<112x112xf32>
      %254 = arith.addf %252, %253 : vector<112x112xf32>
      %cst_117 = arith.constant dense<0xFF800000> : vector<112xf32>
      %255 = vector.multi_reduction <maximumf>, %254, %cst_117 [1] : vector<112x112xf32> to vector<112xf32>
      %256 = vector.shape_cast %255 : vector<112xf32> to vector<112x1xf32>
      %257 = vector.broadcast %256 : vector<112x1xf32> to vector<112x112xf32>
      %258 = arith.subf %254, %257 : vector<112x112xf32>
      %259 = math.exp %258 : vector<112x112xf32>
      %cst_118 = arith.constant dense<0.000000e+00> : vector<112xf32>
      %260 = vector.multi_reduction <add>, %259, %cst_118 [1] : vector<112x112xf32> to vector<112xf32>
      %261 = vector.shape_cast %260 : vector<112xf32> to vector<112x1xf32>
      %262 = tpu.reciprocal %261 {approx = true} : vector<112x1xf32> -> vector<112x1xf32>
      %263 = vector.broadcast %262 : vector<112x1xf32> to vector<112x112xf32>
      %264 = arith.mulf %259, %263 : vector<112x112xf32>
      %265 = vector.extract_strided_slice %184 {offsets = [0, 24], sizes = [112, 8], strides = [1, 1]} : vector<112x32xf32> to vector<112x8xf32>
      %cst_119 = arith.constant dense<0.000000e+00> : vector<112x8xf32>
      %266 = tpu.matmul %264, %265, %cst_119 {dimension_numbers = #tpu.dot_dimension_numbers<[1], [0], [0], [1], [0, 0, 1, 1], [], []>} : vector<112x112xf32>, vector<112x8xf32>, vector<112x8xf32> -> vector<112x8xf32>
      %267 = vector.extract_strided_slice %186 {offsets = [24, 0], sizes = [8, 32], strides = [1, 1]} : vector<32x32xf32> to vector<8x32xf32>
      %cst_120 = arith.constant dense<0.000000e+00> : vector<112x32xf32>
      %268 = tpu.matmul %266, %267, %cst_120 {dimension_numbers = #tpu.dot_dimension_numbers<[1], [0], [0], [1], [0, 0, 1, 1], [], []>} : vector<112x8xf32>, vector<8x32xf32>, vector<112x32xf32> -> vector<112x32xf32>
      %269 = arith.addf %249, %268 : vector<112x32xf32>
      %270 = arith.addf %174, %269 : vector<112x32xf32>
      %c1_121 = arith.constant 1 : index
      %c0_122 = arith.constant 0 : index
      %c0_123 = arith.constant 0 : index
      %271 = vector.load %arg12[%c1_121, %c0_122, %c0_123] : memref<2x1x32xf32, #tpu.memory_space<vmem>>, vector<1x1x32xf32>
      %272 = vector.shape_cast %271 : vector<1x1x32xf32> to vector<1x32xf32>
      %c1_124 = arith.constant 1 : index
      %c0_125 = arith.constant 0 : index
      %c0_126 = arith.constant 0 : index
      %273 = vector.load %arg13[%c1_124, %c0_125, %c0_126] : memref<2x1x32xf32, #tpu.memory_space<vmem>>, vector<1x1x32xf32>
      %274 = vector.shape_cast %273 : vector<1x1x32xf32> to vector<1x32xf32>
      %cst_127 = arith.constant dense<0.000000e+00> : vector<112xf32>
      %275 = vector.multi_reduction <add>, %270, %cst_127 [1] : vector<112x32xf32> to vector<112xf32>
      %276 = vector.shape_cast %275 : vector<112xf32> to vector<112x1xf32>
      %cst_128 = arith.constant 3.200000e+01 : f32
      %277 = vector.broadcast %cst_128 : f32 to vector<112x1xf32>
      %278 = arith.divf %276, %277 : vector<112x1xf32>
      %279 = vector.broadcast %278 : vector<112x1xf32> to vector<112x32xf32>
      %280 = arith.subf %270, %279 : vector<112x32xf32>
      %281 = arith.mulf %280, %280 : vector<112x32xf32>
      %cst_129 = arith.constant dense<0.000000e+00> : vector<112xf32>
      %282 = vector.multi_reduction <add>, %281, %cst_129 [1] : vector<112x32xf32> to vector<112xf32>
      %283 = vector.shape_cast %282 : vector<112xf32> to vector<112x1xf32>
      %cst_130 = arith.constant 3.200000e+01 : f32
      %284 = vector.broadcast %cst_130 : f32 to vector<112x1xf32>
      %285 = arith.divf %283, %284 : vector<112x1xf32>
      %286 = vector.broadcast %278 : vector<112x1xf32> to vector<112x32xf32>
      %287 = arith.subf %270, %286 : vector<112x32xf32>
      %cst_131 = arith.constant 9.99999974E-6 : f32
      %288 = vector.broadcast %cst_131 : f32 to vector<112x1xf32>
      %289 = arith.addf %285, %288 : vector<112x1xf32>
      %290 = math.rsqrt %289 : vector<112x1xf32>
      %291 = vector.broadcast %290 : vector<112x1xf32> to vector<112x32xf32>
      %292 = arith.mulf %287, %291 : vector<112x32xf32>
      %293 = vector.broadcast %272 : vector<1x32xf32> to vector<112x32xf32>
      %294 = arith.mulf %292, %293 : vector<112x32xf32>
      %295 = vector.broadcast %274 : vector<1x32xf32> to vector<112x32xf32>
      %296 = arith.addf %294, %295 : vector<112x32xf32>
      %c1_132 = arith.constant 1 : index
      %c0_133 = arith.constant 0 : index
      %c0_134 = arith.constant 0 : index
      %297 = vector.load %arg8[%c1_132, %c0_133, %c0_134] : memref<2x32x64xf32, #tpu.memory_space<vmem>>, vector<1x32x64xf32>
      %298 = vector.shape_cast %297 : vector<1x32x64xf32> to vector<32x64xf32>
      %cst_135 = arith.constant dense<0.000000e+00> : vector<112x64xf32>
      %299 = tpu.matmul %296, %298, %cst_135 {dimension_numbers = #tpu.dot_dimension_numbers<[1], [0], [0], [1], [0, 0, 1, 1], [], []>} : vector<112x32xf32>, vector<32x64xf32>, vector<112x64xf32> -> vector<112x64xf32>
      %c1_136 = arith.constant 1 : index
      %c0_137 = arith.constant 0 : index
      %c0_138 = arith.constant 0 : index
      %300 = vector.load %arg9[%c1_136, %c0_137, %c0_138] : memref<2x1x64xf32, #tpu.memory_space<vmem>>, vector<1x1x64xf32>
      %301 = vector.shape_cast %300 : vector<1x1x64xf32> to vector<1x64xf32>
      %302 = vector.broadcast %301 : vector<1x64xf32> to vector<112x64xf32>
      %303 = arith.addf %299, %302 : vector<112x64xf32>
      %cst_139 = arith.constant 0.000000e+00 : f32
      %304 = vector.broadcast %cst_139 : f32 to vector<112x64xf32>
      %305 = arith.maximumf %303, %304 : vector<112x64xf32>
      %c1_140 = arith.constant 1 : index
      %c0_141 = arith.constant 0 : index
      %c0_142 = arith.constant 0 : index
      %306 = vector.load %arg10[%c1_140, %c0_141, %c0_142] : memref<2x64x32xf32, #tpu.memory_space<vmem>>, vector<1x64x32xf32>
      %307 = vector.shape_cast %306 : vector<1x64x32xf32> to vector<64x32xf32>
      %cst_143 = arith.constant dense<0.000000e+00> : vector<112x32xf32>
      %308 = tpu.matmul %305, %307, %cst_143 {dimension_numbers = #tpu.dot_dimension_numbers<[1], [0], [0], [1], [0, 0, 1, 1], [], []>} : vector<112x64xf32>, vector<64x32xf32>, vector<112x32xf32> -> vector<112x32xf32>
      %c1_144 = arith.constant 1 : index
      %c0_145 = arith.constant 0 : index
      %c0_146 = arith.constant 0 : index
      %309 = vector.load %arg11[%c1_144, %c0_145, %c0_146] : memref<2x1x32xf32, #tpu.memory_space<vmem>>, vector<1x1x32xf32>
      %310 = vector.shape_cast %309 : vector<1x1x32xf32> to vector<1x32xf32>
      %311 = vector.broadcast %310 : vector<1x32xf32> to vector<112x32xf32>
      %312 = arith.addf %308, %311 : vector<112x32xf32>
      %313 = arith.addf %296, %312 : vector<112x32xf32>
      %c1_147 = arith.constant 1 : index
      %c0_148 = arith.constant 0 : index
      %c0_149 = arith.constant 0 : index
      %314 = vector.load %arg14[%c1_147, %c0_148, %c0_149] : memref<2x1x32xf32, #tpu.memory_space<vmem>>, vector<1x1x32xf32>
      %315 = vector.shape_cast %314 : vector<1x1x32xf32> to vector<1x32xf32>
      %c1_150 = arith.constant 1 : index
      %c0_151 = arith.constant 0 : index
      %c0_152 = arith.constant 0 : index
      %316 = vector.load %arg15[%c1_150, %c0_151, %c0_152] : memref<2x1x32xf32, #tpu.memory_space<vmem>>, vector<1x1x32xf32>
      %317 = vector.shape_cast %316 : vector<1x1x32xf32> to vector<1x32xf32>
      %cst_153 = arith.constant dense<0.000000e+00> : vector<112xf32>
      %318 = vector.multi_reduction <add>, %313, %cst_153 [1] : vector<112x32xf32> to vector<112xf32>
      %319 = vector.shape_cast %318 : vector<112xf32> to vector<112x1xf32>
      %cst_154 = arith.constant 3.200000e+01 : f32
      %320 = vector.broadcast %cst_154 : f32 to vector<112x1xf32>
      %321 = arith.divf %319, %320 : vector<112x1xf32>
      %322 = vector.broadcast %321 : vector<112x1xf32> to vector<112x32xf32>
      %323 = arith.subf %313, %322 : vector<112x32xf32>
      %324 = arith.mulf %323, %323 : vector<112x32xf32>
      %cst_155 = arith.constant dense<0.000000e+00> : vector<112xf32>
      %325 = vector.multi_reduction <add>, %324, %cst_155 [1] : vector<112x32xf32> to vector<112xf32>
      %326 = vector.shape_cast %325 : vector<112xf32> to vector<112x1xf32>
      %cst_156 = arith.constant 3.200000e+01 : f32
      %327 = vector.broadcast %cst_156 : f32 to vector<112x1xf32>
      %328 = arith.divf %326, %327 : vector<112x1xf32>
      %329 = vector.broadcast %321 : vector<112x1xf32> to vector<112x32xf32>
      %330 = arith.subf %313, %329 : vector<112x32xf32>
      %cst_157 = arith.constant 9.99999974E-6 : f32
      %331 = vector.broadcast %cst_157 : f32 to vector<112x1xf32>
      %332 = arith.addf %328, %331 : vector<112x1xf32>
      %333 = math.rsqrt %332 : vector<112x1xf32>
      %334 = vector.broadcast %333 : vector<112x1xf32> to vector<112x32xf32>
      %335 = arith.mulf %330, %334 : vector<112x32xf32>
      %336 = vector.broadcast %315 : vector<1x32xf32> to vector<112x32xf32>
      %337 = arith.mulf %335, %336 : vector<112x32xf32>
      %338 = vector.broadcast %317 : vector<1x32xf32> to vector<112x32xf32>
      %339 = arith.addf %337, %338 : vector<112x32xf32>
      %c0_158 = arith.constant 0 : index
      %c0_159 = arith.constant 0 : index
      %340 = vector.load %arg16[%c0_158, %c0_159] : memref<32x8xf32, #tpu.memory_space<vmem>>, vector<32x8xf32>
      %cst_160 = arith.constant dense<0.000000e+00> : vector<112x8xf32>
      %341 = tpu.matmul %339, %340, %cst_160 {dimension_numbers = #tpu.dot_dimension_numbers<[1], [0], [0], [1], [0, 0, 1, 1], [], []>} : vector<112x32xf32>, vector<32x8xf32>, vector<112x8xf32> -> vector<112x8xf32>
      %c0_161 = arith.constant 0 : index
      %c0_162 = arith.constant 0 : index
      %342 = vector.load %arg17[%c0_161, %c0_162] : memref<1x8xf32, #tpu.memory_space<vmem>>, vector<1x8xf32>
      %343 = vector.broadcast %342 : vector<1x8xf32> to vector<112x8xf32>
      %344 = arith.addf %341, %343 : vector<112x8xf32>
      %cst_163 = arith.constant 0.000000e+00 : f32
      %345 = vector.broadcast %cst_163 : f32 to vector<112x8xf32>
      %346 = arith.subf %345, %344 : vector<112x8xf32>
      %347 = math.exp %346 : vector<112x8xf32>
      %cst_164 = arith.constant 1.000000e+00 : f32
      %348 = vector.broadcast %cst_164 : f32 to vector<112x8xf32>
      %349 = arith.addf %348, %347 : vector<112x8xf32>
      %cst_165 = arith.constant 1.000000e+00 : f32
      %350 = vector.broadcast %cst_165 : f32 to vector<112x8xf32>
      %351 = arith.divf %350, %349 : vector<112x8xf32>
      %c0_166 = arith.constant 0 : index
      %352 = arith.index_cast %2 : i32 to index
      %c0_167 = arith.constant 0 : index
      %353 = vector.load %arg18[%c0_166, %352, %c0_167] : memref<1x784x8xf32, #tpu.memory_space<vmem>>, vector<1x112x8xf32>
      %354 = vector.shape_cast %353 : vector<1x112x8xf32> to vector<112x8xf32>
      %355 = vector.shape_cast %351 : vector<112x8xf32> to vector<1x112x8xf32>
      tpu.vector_store %arg18[%c0_166, %352, %c0_167], %355 {strides = array<i32>} : memref<1x784x8xf32, #tpu.memory_space<vmem>>, vector<1x112x8xf32>,
    }
    %c7_i32_0 = arith.constant 7 : i32
    return
  }
  func.func @transform_0(%arg0: i32) -> (i32, i32, i32) {
    %c0_i32 = arith.constant 0 : i32
    %c0_i32_0 = arith.constant 0 : i32
    %c0_i32_1 = arith.constant 0 : i32
    return %arg0, %c0_i32, %c0_i32_0 : i32, i32, i32
  }
  func.func @transform_1(%arg0: i32) -> (i32, i32, i32) {
    %c0_i32 = arith.constant 0 : i32
    %c0_i32_0 = arith.constant 0 : i32
    %c0_i32_1 = arith.constant 0 : i32
    return %arg0, %c0_i32, %c0_i32_0 : i32, i32, i32
  }
  func.func @transform_2(%arg0: i32) -> (i32, i32) {
    %c0_i32 = arith.constant 0 : i32
    %c0_i32_0 = arith.constant 0 : i32
    %c0_i32_1 = arith.constant 0 : i32
    return %c0_i32, %c0_i32_0 : i32, i32
  }
  func.func @transform_3(%arg0: i32) -> (i32, i32, i32) {
    %c0_i32 = arith.constant 0 : i32
    %c0_i32_0 = arith.constant 0 : i32
    %c0_i32_1 = arith.constant 0 : i32
    %c0_i32_2 = arith.constant 0 : i32
    return %c0_i32, %c0_i32_0, %c0_i32_1 : i32, i32, i32
  }
  func.func @transform_4(%arg0: i32) -> (i32, i32, i32) {
    %c0_i32 = arith.constant 0 : i32
    %c0_i32_0 = arith.constant 0 : i32
    %c0_i32_1 = arith.constant 0 : i32
    %c0_i32_2 = arith.constant 0 : i32
    return %c0_i32, %c0_i32_0, %c0_i32_1 : i32, i32, i32
  }
  func.func @transform_5(%arg0: i32) -> (i32, i32, i32) {
    %c0_i32 = arith.constant 0 : i32
    %c0_i32_0 = arith.constant 0 : i32
    %c0_i32_1 = arith.constant 0 : i32
    %c0_i32_2 = arith.constant 0 : i32
    return %c0_i32, %c0_i32_0, %c0_i32_1 : i32, i32, i32
  }
  func.func @transform_6(%arg0: i32) -> (i32, i32, i32) {
    %c0_i32 = arith.constant 0 : i32
    %c0_i32_0 = arith.constant 0 : i32
    %c0_i32_1 = arith.constant 0 : i32
    %c0_i32_2 = arith.constant 0 : i32
    return %c0_i32, %c0_i32_0, %c0_i32_1 : i32, i32, i32
  }
  func.func @transform_7(%arg0: i32) -> (i32, i32, i32) {
    %c0_i32 = arith.constant 0 : i32
    %c0_i32_0 = arith.constant 0 : i32
    %c0_i32_1 = arith.constant 0 : i32
    %c0_i32_2 = arith.constant 0 : i32
    return %c0_i32, %c0_i32_0, %c0_i32_1 : i32, i32, i32
  }
  func.func @transform_8(%arg0: i32) -> (i32, i32, i32) {
    %c0_i32 = arith.constant 0 : i32
    %c0_i32_0 = arith.constant 0 : i32
    %c0_i32_1 = arith.constant 0 : i32
    %c0_i32_2 = arith.constant 0 : i32
    return %c0_i32, %c0_i32_0, %c0_i32_1 : i32, i32, i32
  }
  func.func @transform_9(%arg0: i32) -> (i32, i32, i32) {
    %c0_i32 = arith.constant 0 : i32
    %c0_i32_0 = arith.constant 0 : i32
    %c0_i32_1 = arith.constant 0 : i32
    %c0_i32_2 = arith.constant 0 : i32
    return %c0_i32, %c0_i32_0, %c0_i32_1 : i32, i32, i32
  }
  func.func @transform_10(%arg0: i32) -> (i32, i32, i32) {
    %c0_i32 = arith.constant 0 : i32
    %c0_i32_0 = arith.constant 0 : i32
    %c0_i32_1 = arith.constant 0 : i32
    %c0_i32_2 = arith.constant 0 : i32
    return %c0_i32, %c0_i32_0, %c0_i32_1 : i32, i32, i32
  }
  func.func @transform_11(%arg0: i32) -> (i32, i32, i32) {
    %c0_i32 = arith.constant 0 : i32
    %c0_i32_0 = arith.constant 0 : i32
    %c0_i32_1 = arith.constant 0 : i32
    %c0_i32_2 = arith.constant 0 : i32
    return %c0_i32, %c0_i32_0, %c0_i32_1 : i32, i32, i32
  }
  func.func @transform_12(%arg0: i32) -> (i32, i32, i32) {
    %c0_i32 = arith.constant 0 : i32
    %c0_i32_0 = arith.constant 0 : i32
    %c0_i32_1 = arith.constant 0 : i32
    %c0_i32_2 = arith.constant 0 : i32
    return %c0_i32, %c0_i32_0, %c0_i32_1 : i32, i32, i32
  }
  func.func @transform_13(%arg0: i32) -> (i32, i32, i32) {
    %c0_i32 = arith.constant 0 : i32
    %c0_i32_0 = arith.constant 0 : i32
    %c0_i32_1 = arith.constant 0 : i32
    %c0_i32_2 = arith.constant 0 : i32
    return %c0_i32, %c0_i32_0, %c0_i32_1 : i32, i32, i32
  }
  func.func @transform_14(%arg0: i32) -> (i32, i32, i32) {
    %c0_i32 = arith.constant 0 : i32
    %c0_i32_0 = arith.constant 0 : i32
    %c0_i32_1 = arith.constant 0 : i32
    %c0_i32_2 = arith.constant 0 : i32
    return %c0_i32, %c0_i32_0, %c0_i32_1 : i32, i32, i32
  }
  func.func @transform_15(%arg0: i32) -> (i32, i32) {
    %c0_i32 = arith.constant 0 : i32
    %c0_i32_0 = arith.constant 0 : i32
    %c0_i32_1 = arith.constant 0 : i32
    return %c0_i32, %c0_i32_0 : i32, i32
  }
  func.func @transform_16(%arg0: i32) -> (i32, i32) {
    %c0_i32 = arith.constant 0 : i32
    %c0_i32_0 = arith.constant 0 : i32
    %c0_i32_1 = arith.constant 0 : i32
    return %c0_i32, %c0_i32_0 : i32, i32
  }
  func.func @transform_17(%arg0: i32) -> (i32, i32, i32) {
    %c0_i32 = arith.constant 0 : i32
    %c0_i32_0 = arith.constant 0 : i32
    %c0_i32_1 = arith.constant 0 : i32
    return %arg0, %c0_i32, %c0_i32_0 : i32, i32, i32
  }
}

</mosaic_0001>

<bundles_post_ra>
// kernel: tpu_custom_call.1
= control target key start
LH: loop header
LB: loop body
LE: loop exit
PB: predicated region body
PF: predicated region fallthrough
CT: control target
= control target key end

     0   :  { %s12916_s24 = smov 0   ;;  %s17865_s0 = inlined_call_operand.vmem [shape: f32[2,784,32], index: 0, kind: input, shape index: {}]   ;;  %s17866_s1 = inlined_call_operand.vmem [shape: f32[2,784,32], index: 1, kind: input, shape index: {}]   ;;  %s17867_s2 = inlined_call_operand.vmem [shape: f32[112,112], index: 2, kind: input, shape index: {}]   ;;  %s17868_s3 = inlined_call_operand.vmem [shape: f32[2,32,96], index: 3, kind: input, shape index: {}]   ;;  %s17869_s4 = inlined_call_operand.vmem [shape: f32[2,1,96], index: 4, kind: input, shape index: {}]   ;;  %s17870_s5 = inlined_call_operand.vmem [shape: f32[2,32,32], index: 5, kind: input, shape index: {}]   ;;  %s17871_s6 = inlined_call_operand.vmem [shape: f32[2,1,32], index: 6, kind: input, shape index: {}]   ;;  %s17872_s7 = inlined_call_operand.vmem [shape: f32[2,32,64], index: 7, kind: input, shape index: {}]   ;;  %s17873_s8 = inlined_call_operand.vmem [shape: f32[2,1,64], index: 8, kind: input, shape index: {}]   ;;  %s17874_s9 = inlined_call_operand.vmem [shape: f32[2,64,32], index: 9, kind: input, shape index: {}]   ;;  %s17875_s10 = inlined_call_operand.vmem [shape: f32[2,1,32], index: 10, kind: input, shape index: {}]   ;;  %s17876_s11 = inlined_call_operand.vmem [shape: f32[2,1,32], index: 11, kind: input, shape index: {}]   ;;  %s17877_s12 = inlined_call_operand.vmem [shape: f32[2,1,32], index: 12, kind: input, shape index: {}]   ;;  %s17878_s13 = inlined_call_operand.vmem [shape: f32[2,1,32], index: 13, kind: input, shape index: {}]   ;;  %s17879_s14 = inlined_call_operand.vmem [shape: f32[2,1,32], index: 14, kind: input, shape index: {}]   ;;  %s17880_s15 = inlined_call_operand.vmem [shape: f32[32,8], index: 15, kind: input, shape index: {}]   ;;  %s17881_s16 = inlined_call_operand.vmem [shape: f32[1,8], index: 16, kind: input, shape index: {}]   ;;  %s17882_s17 = inlined_call_operand.vmem [shape: f32[2,784,8], index: 17, kind: output, shape index: {}]  }
   0x1   :  { %17964 = sst [smem:[#allocation42_spill]] %s17865_s0 }
   0x2   :  { %17965 = sst [smem:[#allocation43_spill]] %s17866_s1 }
   0x3 LB: > { %17966 = sst [smem:[#allocation2_spill]] %s12809_s24  ;;  %s9614_s25 = sadd.s32 4294967295, %s12809_s24   ;;  %s12809_s24 = sphi %s12916_s24, %s27_s24  }
   0x4   : > { %p9618_p0 = scmp.ge.s32.totalorder %s12809_s24, 1  ;;  %p497_p1 = scmp.lt.s32.totalorder %s12809_s24, 3 }
   0x6   : > { %p498_p2 = pnand %p9618_p0, %p497_p1 }
   0x7   : > { %p554_p3 = scmp.lt.s32.totalorder (!%p498_p2), %s9614_s25, 1  ;;  %s12938_s23 = smov (!%p498_p2), 0  }
   0x8   : > { %501 = sbr.rel (%p498_p2) target bundleno = 7055 (0x1b8f), region = 88 }
   0xd   : > { %s18141_s25 = smov (!%p554_p3, %s9614_s25), 1 }
   0xe   : > { %s12924_s26 = smul.u32 784, %s18141_s25 }
   0xf LB: >> { %v623_v0 = vld [vmem:[%s17868_s3 + $0x18] sm:$0xff]  ;;  %v622_v1 = vld [vmem:[%s17868_s3 + $0x10] sm:$0xff]  ;;  %v621_v2 = vld [vmem:[%s17868_s3 + $0x8] sm:$0xff]  ;;  %s12953_s19 = smul.u32 112, %s12813_s23  ;;  %s17969_s28 = sld [smem:[#allocation42_spill]]  ;;  %vm631_vm0 = vcmask 261120   ;;  %s12813_s23 = sphi %s12938_s23, %s574_s23  }
  0x10   : >> { %10917 = vmatprep.subr.mxu0 %v623_v0  ;;  %v620_v3 = vld [vmem:[%s17868_s3] sm:$0xff]  ;;  %s17971_s30 = sld [smem:[#allocation43_spill]]  ;;  %vm870_vm1 = vcmask 64512   ;;  %s12816_s20 = smov 96   ;;  %vm1062_vm2 = vcmask 916480   ;;  %vm4522_vm3 = vcmask 523264  }
  0x11   : >> { %10918 = vmatpush3.msra.mxu0 %v623_v0  ;;  %v13061_v46 = vld [vmem:[%s17869_s4] ss:$0 sm:$0xff]  ;;  %s12817_s21 = smov 64   ;;  %s12818_s25 = smov 88  }
  0x12   : >> { %10919 = vmatprep.subr.mxu0 %v622_v1  ;;  %s17946_s27 = smov 80   ;;  %s18109_s1 = smov 56  }
  0x13   : >> { %10920 = vmatpush3.msra.mxu0 %v622_v1  ;;  %s18110_s22 = smov 72   ;;  %s574_s23 = sadd.s32 1, %s12813_s23  }
  0x14   : >> { %10921 = vmatprep.subr.mxu0 %v621_v2  ;;  %p571_p4 = scmp.ge.s32.totalorder %s574_s23, 7  }
  0x15   : >> { %s17970_s0 = scalar_lea.vmem %s17969_s28, %s12924_s26  ;;  %10922 = vmatpush3.msra.mxu0 %v621_v2  ;;  %s17900_s28 = smov 112  }
  0x16   : >> { %s12964_s29 = scalar_lea.vmem %s17970_s0, %s12953_s19  ;;  %s17972_s18 = scalar_lea.vmem %s17971_s30, %s12924_s26  ;;  %10923 = vmatprep.subr.mxu0 %v620_v3 }
  0x17   : >> { %s12972_s24 = scalar_lea.vmem %s17972_s18, %s12953_s19  ;;  %v577_v4 = vld [vmem:[%s12964_s29] sm:$0xff]  ;;  %v578_v6 = vld [vmem:[%s12964_s29 + $0x8] sm:$0xff]  ;;  %v579_v9 = vld [vmem:[%s12964_s29 + $0x10] sm:$0xff]  ;;  %10924 = vmatpush3.msra.mxu0 %v620_v3  ;;  %s17938_s30 = smov 72  }
  0x18   : >> { %v592_v5 = vld [vmem:[%s12972_s24] sm:$0xff]  ;;  %v593_v8 = vld [vmem:[%s12972_s24 + $0x8] sm:$0xff]  ;;  %v594_v10 = vld [vmem:[%s12972_s24 + $0x10] sm:$0xff]  ;;  %s17936_s18 = smov 104   ;;  %s17944_s0 = smov 48  }
  0x19   : >> { %v12977_v7 = vadd.f32 %v592_v5, %v577_v4  ;;  %v12982_v11 = vadd.f32 %v593_v8, %v578_v6  ;;  %v12984_v12 = vadd.f32 %v594_v10, %v579_v9  ;;  %v580_v13 = vld [vmem:[%s12964_s29 + $0x18] sm:$0xff]  ;;  %v581_v15 = vld [vmem:[%s12964_s29 + $0x20] sm:$0xff]  ;;  %v582_v19 = vld [vmem:[%s12964_s29 + $0x28] sm:$0xff] }
  0x1a   : >> { %v595_v14 = vld [vmem:[%s12972_s24 + $0x18] sm:$0xff]  ;;  %v596_v16 = vld [vmem:[%s12972_s24 + $0x20] sm:$0xff]  ;;  %v597_v20 = vld [vmem:[%s12972_s24 + $0x28] sm:$0xff] }
  0x1b   : >> { %17973 = vst [vmem:[#allocation3_spill] sm:$0xff] %v12977_v7  ;;  %17974 = vst [vmem:[#allocation4_spill] sm:$0xff] %v12982_v11  ;;  %10925 = vmatprep.mubr.msk.f32.mxu0 %vm631_vm0, %v12977_v7  ;;  %v12994_v17 = vadd.f32 %v595_v14, %v580_v13  ;;  %v12998_v18 = vadd.f32 %v596_v16, %v581_v15  ;;  %v583_v21 = vld [vmem:[%s12964_s29 + $0x30] sm:$0xff]  ;;  %v13006_v23 = vadd.f32 %v597_v20, %v582_v19  ;;  %v584_v25 = vld [vmem:[%s12964_s29 + $0x38] sm:$0xff] }
  0x1c   : >> { %17975 = vst [vmem:[#allocation5_spill] sm:$0xff] %v12984_v12  ;;  %10926 = vmatmul.mubr.msk.f32.vlgmr.msra.gmra.mxu0 %vm631_vm0, %v12982_v11  ;;  %v598_v22 = vld [vmem:[%s12972_s24 + $0x30] sm:$0xff]  ;;  %v599_v26 = vld [vmem:[%s12972_s24 + $0x38] sm:$0xff]  ;;  %v585_v27 = vld [vmem:[%s12964_s29 + $0x40] sm:$0xff] }
  0x1d   : >> { %17976 = vst [vmem:[#allocation6_spill] sm:$0xff] %v12994_v17  ;;  %10928 = vmatprep.mubr.msk.f32.mxu0 %vm631_vm0, %v12984_v12  ;;  %17977 = vst [vmem:[#allocation7_spill] sm:$0xff] %v12998_v18  ;;  %v13010_v24 = vadd.f32 %v598_v22, %v583_v21  ;;  %v600_v28 = vld [vmem:[%s12972_s24 + $0x40] sm:$0xff]  ;;  %v13018_v29 = vadd.f32 %v599_v26, %v584_v25  ;;  %v586_v31 = vld [vmem:[%s12964_s29 + $0x48] sm:$0xff] }
  0x1e   : >> { %17978 = vst [vmem:[#allocation8_spill] sm:$0xff] %v13006_v23  ;;  %v13022_v30 = vadd.f32 %v600_v28, %v585_v27  ;;  %v601_v32 = vld [vmem:[%s12972_s24 + $0x48] sm:$0xff]  ;;  %v587_v33 = vld [vmem:[%s12964_s29 + $0x50] sm:$0xff]  ;;  %v588_v37 = vld [vmem:[%s12964_s29 + $0x58] sm:$0xff] }
  0x1f   : >> { %17979 = vst [vmem:[#allocation9_spill] sm:$0xff] %v13010_v24  ;;  %17980 = vst [vmem:[#allocation10_spill] sm:$0xff] %v13018_v29  ;;  %v602_v34 = vld [vmem:[%s12972_s24 + $0x50] sm:$0xff]  ;;  %v13030_v35 = vadd.f32 %v601_v32, %v586_v31  ;;  %v603_v38 = vld [vmem:[%s12972_s24 + $0x58] sm:$0xff] }
  0x20   : >> { %10929 = vmatmul.mubr.msk.f32.gmra.mxu0 %vm631_vm0, %v12994_v17  ;;  %17981 = vst [vmem:[#allocation11_spill] sm:$0xff] %v13022_v30  ;;  %v13034_v36 = vadd.f32 %v602_v34, %v587_v33  ;;  %v589_v39 = vld [vmem:[%s12964_s29 + $0x60] sm:$0xff]  ;;  %v13042_v41 = vadd.f32 %v603_v38, %v588_v37  ;;  %v590_v43 = vld [vmem:[%s12964_s29 + $0x68] sm:$0xff]  ;;  %s17940_s29 = smov 56  }
  0x21   : >> { %10931 = vmatprep.mubr.msk.f32.mxu0 %vm631_vm0, %v12998_v18  ;;  %17982 = vst [vmem:[#allocation12_spill] sm:$0xff] %v13030_v35  ;;  %v604_v40 = vld [vmem:[%s12972_s24 + $0x60] sm:$0xff]  ;;  %v605_v44 = vld [vmem:[%s12972_s24 + $0x68] sm:$0xff]  ;;  %s12815_s24 = smov 120  }
  0x22   : >> { %17983 = vst [vmem:[#allocation13_spill] sm:$0xff] %v13034_v36  ;;  %17984 = vst [vmem:[#allocation14_spill] sm:$0xff] %v13042_v41  ;;  %v13046_v42 = vadd.f32 %v604_v40, %v589_v39  ;;  %v13052_v45 = vadd.f32 %v605_v44, %v590_v43 }
  0x24   : >> { %10932 = vmatmul.mubr.msk.f32.gmra.mxu0 %vm631_vm0, %v13006_v23  ;;  %17985 = vst [vmem:[#allocation15_spill] sm:$0xff] %v13046_v42  ;;  %17986 = vst [vmem:[#allocation16_spill] sm:$0xff] %v13052_v45 }
  0x25   : >> { %10934 = vmatprep.mubr.msk.f32.mxu0 %vm631_vm0, %v13010_v24 }
  0x28   : >> { %10935 = vmatmul.mubr.msk.f32.gmra.mxu0 %vm631_vm0, %v13018_v29 }
  0x29   : >> { %10937 = vmatprep.mubr.msk.f32.mxu0 %vm631_vm0, %v13022_v30 }
  0x2c   : >> { %10938 = vmatmul.mubr.msk.f32.gmra.mxu0 %vm631_vm0, %v13030_v35 }
  0x2d   : >> { %10940 = vmatprep.mubr.msk.f32.mxu0 %vm631_vm0, %v13034_v36 }
  0x30   : >> { %10941 = vmatmul.mubr.msk.f32.gmra.mxu0 %vm631_vm0, %v13042_v41 }
  0x31   : >> { %10943 = vmatprep.mubr.msk.f32.mxu0 %vm631_vm0, %v13046_v42 }
  0x34   : >> { %10944 = vmatmul.mubr.msk.f32.gmra.mxu0 %vm631_vm0, %v13052_v45 }
  0xdc   : >> { %v10927_v47 = vpop.f32.mrf.mxu0 }
  0xdd   : >> { %v13064_v48 = vadd.f32 %v10927_v47, %v13061_v46 }
  0xde   : >> { %v740_v49 = vpop.f32.mrf.mxu0 }
  0xdf   : >> { %17987 = vst [vmem:[#allocation17_spill] sm:$0xff] %v13064_v48  ;;  %v13067_v50 = vadd.f32 %v13061_v46, %v740_v49  ;;  %1635 = vrot.lane.b32.xlu1 %v13064_v48, %s12815_s24  ;;  %844 = vrot.lane.b32.xlu0 %v13064_v48, %s12816_s20 }
  0xe0   : >> { %v10930_v51 = vpop.f32.mrf.mxu0 }
  0xe1   : >> { %17988 = vst [vmem:[#allocation18_spill] sm:$0xff] %v13067_v50  ;;  %10974 = vmatprep.mubr.msk.f32.mxu1 %vm870_vm1, %v13067_v50  ;;  %v13080_v52 = vadd.f32 %v10930_v51, %v13061_v46 }
  0xe2   : >> { %v750_v53 = vpop.f32.mrf.mxu0 }
  0xe3   : >> { %1219 = vrot.lane.b32.xlu1 %v13064_v48, %s12817_s21  ;;  %1663 = vrot.lane.b32.xlu0 %v13064_v48, %s12818_s25  ;;  %17989 = vst [vmem:[#allocation19_spill] sm:$0xff] %v13080_v52  ;;  %v13095_v54 = vadd.f32 %v13061_v46, %v750_v53 }
  0xe4   : >> { %v10933_v55 = vpop.f32.mrf.mxu0 }
  0xe5   : >> { %17990 = vst [vmem:[#allocation20_spill] sm:$0xff] %v13095_v54  ;;  %v13102_v56 = vadd.f32 %v10933_v55, %v13061_v46 }
  0xe6   : >> { %v760_v57 = vpop.f32.mrf.mxu0 }
  0xe7   : >> { %1633 = vrot.lane.b32.xlu0 %v13067_v50, %s12815_s24  ;;  %842 = vrot.lane.b32.xlu1 %v13067_v50, %s12816_s20  ;;  %17991 = vst [vmem:[#allocation21_spill] sm:$0xff] %v13102_v56  ;;  %v13117_v58 = vadd.f32 %v13061_v46, %v760_v57 }
  0xe8   : >> { %v10936_v59 = vpop.f32.mrf.mxu0 }
  0xe9   : >> { %17992 = vst [vmem:[#allocation22_spill] sm:$0xff] %v13117_v58  ;;  %v13124_v60 = vadd.f32 %v10936_v59, %v13061_v46 }
  0xea   : >> { %v770_v61 = vpop.f32.mrf.mxu0 }
  0xeb   : >> { %848 = vrot.lane.b32.xlu0 %v13080_v52, %s12816_s20  ;;  %1661 = vrot.lane.b32.xlu1 %v13067_v50, %s12818_s25  ;;  %17993 = vst [vmem:[#allocation23_spill] sm:$0xff] %v13124_v60  ;;  %v13139_v62 = vadd.f32 %v13061_v46, %v770_v61 }
  0xec   : >> { %v10939_v63 = vpop.f32.mrf.mxu0 }
  0xed   : >> { %v13146_v0 = vadd.f32 %v10939_v63, %v13061_v46 }
  0xee   : >> { %v780_v1 = vpop.f32.mrf.mxu0 }
  0xef   : >> { %1667 = vrot.lane.b32.xlu0 %v13080_v52, %s12818_s25  ;;  %1639 = vrot.lane.b32.xlu1 %v13080_v52, %s12815_s24  ;;  %v13161_v2 = vadd.f32 %v13061_v46, %v780_v1 }
  0xf0   : >> { %v10942_v3 = vpop.f32.mrf.mxu0 }
  0xf1   : >> { %v13168_v4 = vadd.f32 %v10942_v3, %v13061_v46 }
  0xf2   : >> { %v790_v5 = vpop.f32.mrf.mxu0 }
  0xf3   : >> { %1637 = vrot.lane.b32.xlu0 %v13095_v54, %s12815_s24  ;;  %1223 = vrot.lane.b32.xlu1 %v13080_v52, %s12817_s21  ;;  %v13179_v6 = vadd.f32 %v13061_v46, %v790_v5 }
  0xf4   : >> { %v10945_v8 = vpop.f32.mrf.mxu0 }
  0xf5   : >> { %v13186_v9 = vadd.f32 %v10945_v8, %v13061_v46 }
  0xf6   : >> { %v800_v10 = vpop.f32.mrf.mxu0 }
  0xf7   : >> { %1221 = vrot.lane.b32.xlu0 %v13095_v54, %s12817_s21  ;;  %846 = vrot.lane.b32.xlu1 %v13095_v54, %s12816_s20  ;;  %v13201_v13 = vadd.f32 %v13061_v46, %v800_v10 }
  0xfb   : >> { %852 = vrot.lane.b32.xlu0 %v13102_v56, %s12816_s20  ;;  %1665 = vrot.lane.b32.xlu1 %v13095_v54, %s12818_s25 }
  0xff   : >> { %1671 = vrot.lane.b32.xlu0 %v13102_v56, %s12818_s25  ;;  %1643 = vrot.lane.b32.xlu1 %v13102_v56, %s12815_s24 }
 0x103   : >> { %1641 = vrot.lane.b32.xlu0 %v13117_v58, %s12815_s24  ;;  %1227 = vrot.lane.b32.xlu1 %v13102_v56, %s12817_s21 }
 0x107   : >> { %1225 = vrot.lane.b32.xlu0 %v13117_v58, %s12817_s21  ;;  %850 = vrot.lane.b32.xlu1 %v13117_v58, %s12816_s20 }
 0x10b   : >> { %856 = vrot.lane.b32.xlu0 %v13124_v60, %s12816_s20  ;;  %1669 = vrot.lane.b32.xlu1 %v13117_v58, %s12818_s25 }
 0x10f   : >> { %1675 = vrot.lane.b32.xlu0 %v13124_v60, %s12818_s25  ;;  %1647 = vrot.lane.b32.xlu1 %v13124_v60, %s12815_s24 }
 0x113   : >> { %1645 = vrot.lane.b32.xlu0 %v13139_v62, %s12815_s24  ;;  %1231 = vrot.lane.b32.xlu1 %v13124_v60, %s12817_s21 }
 0x117   : >> { %1229 = vrot.lane.b32.xlu0 %v13139_v62, %s12817_s21  ;;  %854 = vrot.lane.b32.xlu1 %v13139_v62, %s12816_s20 }
 0x11b   : >> { %860 = vrot.lane.b32.xlu0 %v13146_v0, %s12816_s20  ;;  %1673 = vrot.lane.b32.xlu1 %v13139_v62, %s12818_s25 }
 0x11f   : >> { %1679 = vrot.lane.b32.xlu0 %v13146_v0, %s12818_s25  ;;  %1651 = vrot.lane.b32.xlu1 %v13146_v0, %s12815_s24 }
 0x123   : >> { %1649 = vrot.lane.b32.xlu0 %v13161_v2, %s12815_s24  ;;  %1235 = vrot.lane.b32.xlu1 %v13146_v0, %s12817_s21 }
 0x127   : >> { %1233 = vrot.lane.b32.xlu0 %v13161_v2, %s12817_s21  ;;  %858 = vrot.lane.b32.xlu1 %v13161_v2, %s12816_s20 }
 0x12b   : >> { %1683 = vrot.lane.b32.xlu0 %v13168_v4, %s12818_s25  ;;  %1677 = vrot.lane.b32.xlu1 %v13161_v2, %s12818_s25 }
 0x12f   : >> { %1653 = vrot.lane.b32.xlu0 %v13179_v6, %s12815_s24  ;;  %864 = vrot.lane.b32.xlu1 %v13168_v4, %s12816_s20 }
 0x133   : >> { %1237 = vrot.lane.b32.xlu0 %v13179_v6, %s12817_s21  ;;  %1655 = vrot.lane.b32.xlu1 %v13168_v4, %s12815_s24 }
 0x137   : >> { %868 = vrot.lane.b32.xlu0 %v13186_v9, %s12816_s20  ;;  %1239 = vrot.lane.b32.xlu1 %v13168_v4, %s12817_s21 }
 0x13b   : >> { %1687 = vrot.lane.b32.xlu0 %v13186_v9, %s12818_s25  ;;  %862 = vrot.lane.b32.xlu1 %v13179_v6, %s12816_s20 }
 0x13f   : >> { %866 = vrot.lane.b32.xlu0 %v13201_v13, %s12816_s20  ;;  %1681 = vrot.lane.b32.xlu1 %v13179_v6, %s12818_s25 }
 0x143   : >> { %1657 = vrot.lane.b32.xlu0 %v13201_v13, %s12815_s24  ;;  %1659 = vrot.lane.b32.xlu1 %v13186_v9, %s12815_s24 }
 0x147   : >> { %1241 = vrot.lane.b32.xlu0 %v13201_v13, %s12817_s21  ;;  %1243 = vrot.lane.b32.xlu1 %v13186_v9, %s12817_s21 }
 0x14b   : >> { %1217 = vrot.lane.b32.xlu0 %v13067_v50, %s12817_s21  ;;  %1685 = vrot.lane.b32.xlu1 %v13201_v13, %s12818_s25 }
 0x14f   : >> { %2494 = vrot.lane.b32.xlu0 %v13168_v4, %s17946_s27  ;;  %2498 = vrot.lane.b32.xlu1 %v13186_v9, %s17946_s27 }
 0x151   : >> { %v13223_v14 = vpop.permute.xlu1 %1635  ;;  %v13225_v15 = vpop.permute.xlu0 %844 }
 0x153   : >> { %2490 = vrot.lane.b32.xlu0 %v13146_v0, %s17946_s27  ;;  %2492 = vrot.lane.b32.xlu1 %v13179_v6, %s17946_s27 }
 0x155   : >> { %v13231_v16 = vpop.permute.xlu1 %1219  ;;  %v13233_v19 = vpop.permute.xlu0 %1663 }
 0x157   : >> { %2486 = vrot.lane.b32.xlu0 %v13124_v60, %s17946_s27  ;;  %2488 = vrot.lane.b32.xlu1 %v13161_v2, %s17946_s27 }
 0x159   : >> { %v13239_v20 = vpop.permute.xlu0 %1633  ;;  %v13241_v21 = vpop.permute.xlu1 %842 }
 0x15b   : >> { %2482 = vrot.lane.b32.xlu0 %v13102_v56, %s17946_s27  ;;  %2484 = vrot.lane.b32.xlu1 %v13139_v62, %s17946_s27 }
 0x15d   : >> { %v13247_v22 = vpop.permute.xlu0 %848  ;;  %v13249_v25 = vpop.permute.xlu1 %1661 }
 0x15f   : >> { %2478 = vrot.lane.b32.xlu0 %v13080_v52, %s17946_s27  ;;  %2480 = vrot.lane.b32.xlu1 %v13117_v58, %s17946_s27 }
 0x161   : >> { %v13255_v26 = vpop.permute.xlu0 %1667  ;;  %v13257_v27 = vpop.permute.xlu1 %1639 }
 0x163   : >> { %2474 = vrot.lane.b32.xlu0 %v13064_v48, %s17946_s27  ;;  %2476 = vrot.lane.b32.xlu1 %v13095_v54, %s17946_s27 }
 0x165   : >> { %v13263_v28 = vpop.permute.xlu0 %1637  ;;  %v13265_v31 = vpop.permute.xlu1 %1223 }
 0x167   : >> { %2444 = vrot.lane.b32.xlu0 %v13067_v50, %s17900_s28  ;;  %2496 = vrot.lane.b32.xlu1 %v13201_v13, %s17946_s27 }
 0x169   : >> { %v13271_v32 = vpop.permute.xlu0 %1221  ;;  %v13273_v33 = vpop.permute.xlu1 %846 }
 0x16b   : >> { %2448 = vrot.lane.b32.xlu0 %v13095_v54, %s17900_s28  ;;  %2472 = vrot.lane.b32.xlu1 %v13067_v50, %s17946_s27 }
 0x16d   : >> { %v13279_v34 = vpop.permute.xlu0 %852  ;;  %v13281_v37 = vpop.permute.xlu1 %1665 }
 0x16f   : >> { %2452 = vrot.lane.b32.xlu0 %v13117_v58, %s17900_s28  ;;  %2446 = vrot.lane.b32.xlu1 %v13064_v48, %s17900_s28 }
 0x171   : >> { %v13287_v38 = vpop.permute.xlu0 %1671  ;;  %v13289_v39 = vpop.permute.xlu1 %1643 }
 0x173   : >> { %2456 = vrot.lane.b32.xlu0 %v13139_v62, %s17900_s28  ;;  %2450 = vrot.lane.b32.xlu1 %v13080_v52, %s17900_s28 }
 0x175   : >> { %v13295_v40 = vpop.permute.xlu0 %1641  ;;  %v13297_v43 = vpop.permute.xlu1 %1227 }
 0x177   : >> { %2460 = vrot.lane.b32.xlu0 %v13161_v2, %s17900_s28  ;;  %2454 = vrot.lane.b32.xlu1 %v13102_v56, %s17900_s28 }
 0x179   : >> { %v13303_v44 = vpop.permute.xlu0 %1225  ;;  %v13305_v46 = vpop.permute.xlu1 %850 }
 0x17b   : >> { %2464 = vrot.lane.b32.xlu0 %v13179_v6, %s17900_s28  ;;  %2458 = vrot.lane.b32.xlu1 %v13124_v60, %s17900_s28 }
 0x17d   : >> { %v13311_v47 = vpop.permute.xlu0 %856  ;;  %v13313_v49 = vpop.permute.xlu1 %1669 }
 0x17f   : >> { %2468 = vrot.lane.b32.xlu0 %v13201_v13, %s17900_s28  ;;  %2462 = vrot.lane.b32.xlu1 %v13146_v0, %s17900_s28 }
 0x181   : >> { %v13319_v51 = vpop.permute.xlu0 %1675  ;;  %v13321_v53 = vpop.permute.xlu1 %1647 }
 0x183   : >> { %2058 = vrot.lane.b32.xlu0 %v13201_v13, %s17940_s29  ;;  %2466 = vrot.lane.b32.xlu1 %v13168_v4, %s17900_s28 }
 0x185   : >> { %v13327_v55 = vpop.permute.xlu0 %1645  ;;  %v13329_v57 = vpop.permute.xlu1 %1231 }
 0x187   : >> { %2054 = vrot.lane.b32.xlu0 %v13179_v6, %s17940_s29  ;;  %2470 = vrot.lane.b32.xlu1 %v13186_v9, %s17900_s28 }
 0x189   : >> { %v1230_v59 = vpop.permute.xlu0 %1229  ;;  %v13335_v61 = vpop.permute.xlu1 %854 }
 0x18b   : >> { %2050 = vrot.lane.b32.xlu0 %v13161_v2, %s17940_s29  ;;  %2060 = vrot.lane.b32.xlu1 %v13186_v9, %s17940_s29 }
 0x18d   : >> { %v861_v63 = vpop.permute.xlu0 %860  ;;  %v13341_v1 = vpop.permute.xlu1 %1673 }
 0x18f   : >> { %2046 = vrot.lane.b32.xlu0 %v13139_v62, %s17940_s29  ;;  %2056 = vrot.lane.b32.xlu1 %v13168_v4, %s17940_s29 }
 0x191   : >> { %v13347_v3 = vpop.permute.xlu0 %1679  ;;  %v13349_v5 = vpop.permute.xlu1 %1651 }
 0x193   : >> { %2052 = vrot.lane.b32.xlu1 %v13146_v0, %s17940_s29 }
 0x195   : >> { %v13353_v8 = vpop.permute.xlu0 %1649  ;;  %v1236_v10 = vpop.permute.xlu1 %1235 }
 0x197   : >> { %2048 = vrot.lane.b32.xlu1 %v13124_v60, %s17940_s29 }
 0x199   : >> { %v1234_v42 = vpop.permute.xlu0 %1233  ;;  %v859_v45 = vpop.permute.xlu1 %858 }
 0x19b   : >> { %2044 = vrot.lane.b32.xlu1 %v13102_v56, %s17940_s29 }
 0x19d   : >> { %v13359_v36 = vpop.permute.xlu0 %1683  ;;  %v13361_v41 = vpop.permute.xlu1 %1677 }
 0x1a1   : >> { %v13363_v30 = vpop.permute.xlu0 %1653  ;;  %v865_v35 = vpop.permute.xlu1 %864 }
 0x1a2   : >> { %17994 = vst [vmem:[#allocation24_spill] sm:$0xff] %v13363_v30 }
 0x1a5   : >> { %v1238_v24 = vpop.permute.xlu0 %1237  ;;  %v13365_v29 = vpop.permute.xlu1 %1655 }
 0x1a6   : >> { %17995 = vst [vmem:[#allocation25_spill] sm:$0xff] %v13365_v29 }
 0x1a9   : >> { %v869_v18 = vpop.permute.xlu0 %868  ;;  %v1240_v23 = vpop.permute.xlu1 %1239 }
 0x1aa   : >> { %10946 = vmatprep.subr.msk.mxu1 %vm870_vm1, %v869_v18 }
 0x1ab   : >> { %10947 = vmatpush3.xpose.msk.msra.mxu1 %vm870_vm1, %v869_v18 }
 0x1ad   : >> { %v13369_v12 = vpop.permute.xlu0 %1687  ;;  %v863_v17 = vpop.permute.xlu1 %862 }
 0x1b1   : >> { %v867_v7 = vpop.permute.xlu0 %866  ;;  %v13371_v11 = vpop.permute.xlu1 %1681 }
 0x1b2   : >> { %10948 = vmatprep.subr.msk.mxu1 %vm870_vm1, %v867_v7 }
 0x1b3   : >> { %10949 = vmatpush3.xpose.msk.msra.mxu1 %vm870_vm1, %v867_v7 }
 0x1b4   : >> { %10950 = vmatprep.subr.msk.mxu1 %vm870_vm1, %v865_v35 }
 0x1b5   : >> { %v13376_v50 = vpop.permute.xlu0 %1657  ;;  %v13378_v29 = vpop.permute.xlu1 %1659 }
 0x1b7   : >> { %10951 = vmatpush3.xpose.msk.msra.mxu1 %vm870_vm1, %v865_v35 }
 0x1b8   : >> { %10952 = vmatprep.subr.msk.mxu1 %vm870_vm1, %v863_v17 }
 0x1b9   : >> { %v1244_v18 = vpop.permute.xlu1 %1243  ;;  %v1242_v30 = vpop.permute.xlu0 %1241 }
 0x1ba   : >> { %10995 = vmatprep.subr.mxu0 %v1244_v18 }
 0x1bb   : >> { %10953 = vmatpush3.xpose.msk.msra.mxu1 %vm870_vm1, %v863_v17  ;;  %10996 = vmatpush3.msra.mxu0 %v1244_v18 }
 0x1bc   : >> { %10954 = vmatprep.subr.msk.mxu1 %vm870_vm1, %v861_v63  ;;  %10997 = vmatprep.subr.mxu0 %v1242_v30 }
 0x1bd   : >> { %10998 = vmatpush3.msra.mxu0 %v1242_v30  ;;  %v1218_v7 = vpop.permute.xlu0 %1217  ;;  %v1686_v17 = vpop.permute.xlu1 %1685 }
 0x1be   : >> { %10999 = vmatprep.subr.mxu0 %v1240_v23 }
 0x1bf   : >> { %10955 = vmatpush3.xpose.msk.msra.mxu1 %vm870_vm1, %v861_v63  ;;  %11000 = vmatpush3.msra.mxu0 %v1240_v23  ;;  %v13612_v63 = vld [vmem:[%s17867_s2 + $0x10] sm:$0xff] }
 0x1c0   : >> { %10956 = vmatprep.subr.msk.mxu1 %vm870_vm1, %v859_v45  ;;  %11001 = vmatprep.subr.mxu0 %v1238_v24 }
 0x1c1   : >> { %11002 = vmatpush3.msra.mxu0 %v1238_v24  ;;  %v2495_v30 = vpop.permute.xlu0 %2494 }
 0x1c2   : >> { %11003 = vmatprep.subr.mxu0 %v1236_v10 }
 0x1c3   : >> { %10957 = vmatpush3.xpose.msk.msra.mxu1 %vm870_vm1, %v859_v45  ;;  %11004 = vmatpush3.msra.mxu0 %v1236_v10  ;;  %v13627_v10 = vld [vmem:[%s17867_s2 + $0x28] sm:$0xff] }
 0x1c4   : >> { %10958 = vmatprep.subr.msk.mxu1 %vm870_vm1, %v13311_v47  ;;  %11005 = vmatprep.subr.mxu0 %v1234_v42  ;;  %18000 = vst [vmem:[#allocation26_spill] sm:$0xff] %v13627_v10 }
 0x1c5   : >> { %11006 = vmatpush3.msra.mxu0 %v1234_v42 }
 0x1c6   : >> { %11007 = vmatprep.subr.mxu0 %v13329_v57 }
 0x1c7   : >> { %10959 = vmatpush3.xpose.msk.msra.mxu1 %vm870_vm1, %v13311_v47  ;;  %11008 = vmatpush3.msra.mxu0 %v13329_v57 }
 0x1c8   : >> { %10960 = vmatprep.subr.msk.mxu1 %vm870_vm1, %v13335_v61  ;;  %11009 = vmatprep.subr.mxu0 %v1230_v59 }
 0x1c9   : >> { %11010 = vmatpush3.msra.mxu0 %v1230_v59 }
 0x1ca   : >> { %11011 = vmatprep.subr.mxu0 %v13297_v43 }
 0x1cb   : >> { %10961 = vmatpush3.xpose.msk.msra.mxu1 %vm870_vm1, %v13335_v61  ;;  %11012 = vmatpush3.msra.mxu0 %v13297_v43 }
 0x1cc   : >> { %10962 = vmatprep.subr.msk.mxu1 %vm870_vm1, %v13279_v34  ;;  %11013 = vmatprep.subr.mxu0 %v13303_v44 }
 0x1cd   : >> { %11014 = vmatpush3.msra.mxu0 %v13303_v44  ;;  %v13589_v44 = vld [vmem:[%s17867_s2] sm:$0xff] }
 0x1ce   : >> { %11015 = vmatprep.subr.mxu0 %v13265_v31 }
 0x1cf   : >> { %10963 = vmatpush3.xpose.msk.msra.mxu1 %vm870_vm1, %v13279_v34  ;;  %11016 = vmatpush3.msra.mxu0 %v13265_v31 }
 0x1d0   : >> { %10964 = vmatprep.subr.msk.mxu1 %vm870_vm1, %v13305_v46  ;;  %11017 = vmatprep.subr.mxu0 %v13271_v32 }
 0x1d1   : >> { %11018 = vmatpush3.msra.mxu0 %v13271_v32 }
 0x1d2   : >> { %11019 = vmatprep.subr.mxu0 %v13231_v16 }
 0x1d3   : >> { %10965 = vmatpush3.xpose.msk.msra.mxu1 %vm870_vm1, %v13305_v46  ;;  %11020 = vmatpush3.msra.mxu0 %v13231_v16  ;;  %v17996_v16 = vld [vmem:[#allocation24_spill] sm:$0xff] }
 0x1d4   : >> { %10966 = vmatprep.subr.msk.mxu1 %vm870_vm1, %v13247_v22  ;;  %11021 = vmatprep.subr.mxu0 %v1218_v7 }
 0x1d5   : >> { %11022 = vmatpush3.msra.mxu0 %v1218_v7 }
 0x1d7   : >> { %10967 = vmatpush3.xpose.msk.msra.mxu1 %vm870_vm1, %v13247_v22 }
 0x1d8   : >> { %10968 = vmatprep.subr.msk.mxu1 %vm870_vm1, %v13273_v33 }
 0x1db   : >> { %10969 = vmatpush3.xpose.msk.msra.mxu1 %vm870_vm1, %v13273_v33 }
 0x1dc   : >> { %10970 = vmatprep.subr.msk.mxu1 %vm870_vm1, %v13225_v15 }
 0x1df   : >> { %10971 = vmatpush3.xpose.msk.msra.mxu1 %vm870_vm1, %v13225_v15 }
 0x1e0   : >> { %10972 = vmatprep.subr.msk.mxu1 %vm870_vm1, %v13241_v21 }
 0x1e3   : >> { %10973 = vmatpush3.xpose.msk.msra.mxu1 %vm870_vm1, %v13241_v21 }
 0x1e4   : >> { %11067 = vmatprep.subr.msk.mxu1 %vm870_vm1, %v13369_v12 }
 0x1e6   : >> { %10975 = vmatmul.mubr.msk.f32.vlgmr.msra.gmra.mxu1 %vm870_vm1, %v13064_v48 }
 0x1e7   : >> { %10977 = vmatprep.mubr.msk.f32.mxu1 %vm870_vm1, %v13095_v54  ;;  %11068 = vmatpush3.xpose.msk.msra.mxu1 %vm870_vm1, %v13369_v12  ;;  %v2499_v12 = vpop.permute.xlu1 %2498 }
 0x1e8   : >> { %11069 = vmatprep.subr.msk.mxu1 %vm870_vm1, %v1686_v17 }
 0x1ea   : >> { %10978 = vmatmul.mubr.msk.f32.gmra.mxu1 %vm870_vm1, %v13080_v52 }
 0x1eb   : >> { %10980 = vmatprep.mubr.msk.f32.mxu1 %vm870_vm1, %v13117_v58  ;;  %11070 = vmatpush3.xpose.msk.msra.mxu1 %vm870_vm1, %v1686_v17 }
 0x1ec   : >> { %11071 = vmatprep.subr.msk.mxu1 %vm870_vm1, %v13359_v36 }
 0x1ee   : >> { %10981 = vmatmul.mubr.msk.f32.gmra.mxu1 %vm870_vm1, %v13102_v56 }
 0x1ef   : >> { %10983 = vmatprep.mubr.msk.f32.mxu1 %vm870_vm1, %v13139_v62  ;;  %11072 = vmatpush3.xpose.msk.msra.mxu1 %vm870_vm1, %v13359_v36  ;;  %v2491_v36 = vpop.permute.xlu0 %2490 }
 0x1f0   : >> { %11073 = vmatprep.subr.msk.mxu1 %vm870_vm1, %v13371_v11 }
 0x1f2   : >> { %10984 = vmatmul.mubr.msk.f32.gmra.mxu1 %vm870_vm1, %v13124_v60 }
 0x1f3   : >> { %10986 = vmatprep.mubr.msk.f32.mxu1 %vm870_vm1, %v13161_v2  ;;  %11074 = vmatpush3.xpose.msk.msra.mxu1 %vm870_vm1, %v13371_v11  ;;  %v2493_v11 = vpop.permute.xlu1 %2492  ;;  %v2487_v42 = vpop.permute.xlu0 %2486 }
 0x1f4   : >> { %11075 = vmatprep.subr.msk.mxu1 %vm870_vm1, %v13347_v3 }
 0x1f6   : >> { %10987 = vmatmul.mubr.msk.f32.gmra.mxu1 %vm870_vm1, %v13146_v0 }
 0x1f7   : >> { %10989 = vmatprep.mubr.msk.f32.mxu1 %vm870_vm1, %v13179_v6  ;;  %11076 = vmatpush3.xpose.msk.msra.mxu1 %vm870_vm1, %v13347_v3  ;;  %v2489_v23 = vpop.permute.xlu1 %2488  ;;  %v2483_v15 = vpop.permute.xlu0 %2482  ;;  %v13617_v3 = vld [vmem:[%s17867_s2 + $0x20] sm:$0xff] }
 0x1f8   : >> { %11077 = vmatprep.subr.msk.mxu1 %vm870_vm1, %v13361_v41 }
 0x1fa   : >> { %10990 = vmatmul.mubr.msk.f32.gmra.mxu1 %vm870_vm1, %v13168_v4 }
 0x1fb   : >> { %10992 = vmatprep.mubr.msk.f32.mxu1 %vm870_vm1, %v13201_v13  ;;  %11078 = vmatpush3.xpose.msk.msra.mxu1 %vm870_vm1, %v13361_v41  ;;  %v2485_v24 = vpop.permute.xlu1 %2484 }
 0x1fc   : >> { %11079 = vmatprep.subr.msk.mxu1 %vm870_vm1, %v13319_v51 }
 0x1fe   : >> { %10993 = vmatmul.mubr.msk.f32.gmra.mxu1 %vm870_vm1, %v13186_v9 }
 0x1ff   : >> { %11080 = vmatpush3.xpose.msk.msra.mxu1 %vm870_vm1, %v13319_v51  ;;  %11095 = vmatprep.mubr.msk.f32.mxu1 %vm870_vm1, %v13239_v20  ;;  %v2481_v35 = vpop.permute.xlu1 %2480  ;;  %v17997_v20 = vld [vmem:[#allocation25_spill] sm:$0xff] }
 0x200   : >> { %11081 = vmatprep.subr.msk.mxu1 %vm870_vm1, %v13341_v1  ;;  %17999 = vst [vmem:[#allocation25_spill] sm:$0xff] %v13612_v63 }
 0x203   : >> { %11082 = vmatpush3.xpose.msk.msra.mxu1 %vm870_vm1, %v13341_v1  ;;  %v2477_v41 = vpop.permute.xlu1 %2476 }
 0x204   : >> { %11083 = vmatprep.subr.msk.mxu1 %vm870_vm1, %v13287_v38 }
 0x207   : >> { %11084 = vmatpush3.xpose.msk.msra.mxu1 %vm870_vm1, %v13287_v38  ;;  %v2497_v45 = vpop.permute.xlu1 %2496 }
 0x208   : >> { %11085 = vmatprep.subr.msk.mxu1 %vm870_vm1, %v13313_v49 }
 0x20b   : >> { %11086 = vmatpush3.xpose.msk.msra.mxu1 %vm870_vm1, %v13313_v49  ;;  %v13597_v49 = vld [vmem:[%s17867_s2 + $0x18] sm:$0xff] }
 0x20c   : >> { %11087 = vmatprep.subr.msk.mxu1 %vm870_vm1, %v13255_v26  ;;  %17998 = vst [vmem:[#allocation24_spill] sm:$0xff] %v13597_v49 }
 0x20f   : >> { %11088 = vmatpush3.xpose.msk.msra.mxu1 %vm870_vm1, %v13255_v26 }
 0x210   : >> { %11089 = vmatprep.subr.msk.mxu1 %vm870_vm1, %v13281_v37 }
 0x213   : >> { %11090 = vmatpush3.xpose.msk.msra.mxu1 %vm870_vm1, %v13281_v37 }
 0x214   : >> { %11091 = vmatprep.subr.msk.mxu1 %vm870_vm1, %v13233_v19 }
 0x217   : >> { %11092 = vmatpush3.xpose.msk.msra.mxu1 %vm870_vm1, %v13233_v19 }
 0x218   : >> { %11093 = vmatprep.subr.msk.mxu1 %vm870_vm1, %v13249_v25 }
 0x21b   : >> { %11094 = vmatpush3.xpose.msk.msra.mxu1 %vm870_vm1, %v13249_v25 }
 0x21c   : >> { %11188 = vmatprep.subr.msk.mxu1 %vm870_vm1, %v2499_v12 }
 0x21e   : >> { %11096 = vmatmul.mubr.msk.f32.vlgmr.msra.gmra.mxu1 %vm870_vm1, %v13223_v14  ;;  %v2479_v14 = vpop.permute.xlu0 %2478 }
 0x21f   : >> { %11098 = vmatprep.mubr.msk.f32.mxu1 %vm870_vm1, %v13263_v28  ;;  %11189 = vmatpush3.xpose.msk.msra.mxu1 %vm870_vm1, %v2499_v12  ;;  %v13635_v12 = vld [vmem:[%s17867_s2 + $0x30] sm:$0xff] }
 0x220   : >> { %11190 = vmatprep.subr.msk.mxu1 %vm870_vm1, %v2497_v45 }
 0x222   : >> { %11099 = vmatmul.mubr.msk.f32.gmra.mxu1 %vm870_vm1, %v13257_v27  ;;  %v2475_v19 = vpop.permute.xlu0 %2474 }
 0x223   : >> { %11101 = vmatprep.mubr.msk.f32.mxu1 %vm870_vm1, %v13295_v40  ;;  %11191 = vmatpush3.xpose.msk.msra.mxu1 %vm870_vm1, %v2497_v45  ;;  %v13584_v40 = vld [vmem:[%s17867_s2 + $0x8] sm:$0xff] }
 0x224   : >> { %11192 = vmatprep.subr.msk.mxu1 %vm870_vm1, %v2495_v30 }
 0x226   : >> { %11102 = vmatmul.mubr.msk.f32.gmra.mxu1 %vm870_vm1, %v13289_v39  ;;  %v2445_v21 = vpop.permute.xlu0 %2444 }
 0x227   : >> { %11104 = vmatprep.mubr.msk.f32.mxu1 %vm870_vm1, %v13327_v55  ;;  %11193 = vmatpush3.xpose.msk.msra.mxu1 %vm870_vm1, %v2495_v30  ;;  %v13647_v30 = vld [vmem:[%s17867_s2 + $0x38] sm:$0xff] }
 0x228   : >> { %11194 = vmatprep.subr.msk.mxu1 %vm870_vm1, %v2493_v11  ;;  %18001 = vst [vmem:[#allocation27_spill] sm:$0xff] %v13647_v30 }
 0x22a   : >> { %11105 = vmatmul.mubr.msk.f32.gmra.mxu1 %vm870_vm1, %v13321_v53  ;;  %v2449_v22 = vpop.permute.xlu0 %2448 }
 0x22b   : >> { %11107 = vmatprep.mubr.msk.f32.mxu1 %vm870_vm1, %v13353_v8  ;;  %11195 = vmatpush3.xpose.msk.msra.mxu1 %vm870_vm1, %v2493_v11 }
 0x22c   : >> { %11196 = vmatprep.subr.msk.mxu1 %vm870_vm1, %v2491_v36 }
 0x22e   : >> { %11108 = vmatmul.mubr.msk.f32.gmra.mxu1 %vm870_vm1, %v13349_v5  ;;  %v2453_v26 = vpop.permute.xlu0 %2452 }
 0x22f   : >> { %11110 = vmatprep.mubr.msk.f32.mxu1 %vm870_vm1, %v17996_v16  ;;  %11197 = vmatpush3.xpose.msk.msra.mxu1 %vm870_vm1, %v2491_v36  ;;  %v13667_v16 = vld [vmem:[%s17867_s2 + $0x48] sm:$0xff] }
 0x230   : >> { %11198 = vmatprep.subr.msk.mxu1 %vm870_vm1, %v2489_v23  ;;  %18002 = vst [vmem:[#allocation28_spill] sm:$0xff] %v13667_v16 }
 0x232   : >> { %11111 = vmatmul.mubr.msk.f32.gmra.mxu1 %vm870_vm1, %v17997_v20  ;;  %v2457_v28 = vpop.permute.xlu0 %2456 }
 0x233   : >> { %11113 = vmatprep.mubr.msk.f32.mxu1 %vm870_vm1, %v13376_v50  ;;  %11199 = vmatpush3.xpose.msk.msra.mxu1 %vm870_vm1, %v2489_v23  ;;  %v2473_v50 = vpop.permute.xlu1 %2472 }
 0x234   : >> { %11200 = vmatprep.subr.msk.mxu1 %vm870_vm1, %v2487_v42 }
 0x236   : >> { %11114 = vmatmul.mubr.msk.f32.gmra.mxu1 %vm870_vm1, %v13378_v29  ;;  %v2461_v32 = vpop.permute.xlu0 %2460 }
 0x237   : >> { %11201 = vmatpush3.xpose.msk.msra.mxu1 %vm870_vm1, %v2487_v42  ;;  %11216 = vmatprep.mubr.msk.f32.mxu1 %vm870_vm1, %v2445_v21  ;;  %v2447_v29 = vpop.permute.xlu1 %2446  ;;  %v13655_v42 = vld [vmem:[%s17867_s2 + $0x40] sm:$0xff] }
 0x238   : >> { %11202 = vmatprep.subr.msk.mxu1 %vm870_vm1, %v2485_v24 }
 0x23a   : >> { %v2465_v34 = vpop.permute.xlu0 %2464 }
 0x23b   : >> { %11203 = vmatpush3.xpose.msk.msra.mxu1 %vm870_vm1, %v2485_v24  ;;  %v2451_v25 = vpop.permute.xlu1 %2450 }
 0x23c   : >> { %11204 = vmatprep.subr.msk.mxu1 %vm870_vm1, %v2483_v15 }
 0x23e   : >> { %v2469_v38 = vpop.permute.xlu0 %2468 }
 0x23f   : >> { %11205 = vmatpush3.xpose.msk.msra.mxu1 %vm870_vm1, %v2483_v15  ;;  %v2455_v27 = vpop.permute.xlu1 %2454 }
 0x240   : >> { %11206 = vmatprep.subr.msk.mxu1 %vm870_vm1, %v2481_v35 }
 0x243   : >> { %11207 = vmatpush3.xpose.msk.msra.mxu1 %vm870_vm1, %v2481_v35  ;;  %v2459_v31 = vpop.permute.xlu1 %2458 }
 0x244   : >> { %11208 = vmatprep.subr.msk.mxu1 %vm870_vm1, %v2479_v14 }
 0x247   : >> { %11209 = vmatpush3.xpose.msk.msra.mxu1 %vm870_vm1, %v2479_v14  ;;  %v2463_v33 = vpop.permute.xlu1 %2462 }
 0x248   : >> { %11210 = vmatprep.subr.msk.mxu1 %vm870_vm1, %v2477_v41 }
 0x24b   : >> { %11211 = vmatpush3.xpose.msk.msra.mxu1 %vm870_vm1, %v2477_v41  ;;  %v2467_v37 = vpop.permute.xlu1 %2466 }
 0x24c   : >> { %11212 = vmatprep.subr.msk.mxu1 %vm870_vm1, %v2475_v19 }
 0x24f   : >> { %11213 = vmatpush3.xpose.msk.msra.mxu1 %vm870_vm1, %v2475_v19  ;;  %v2471_v39 = vpop.permute.xlu1 %2470 }
 0x250   : >> { %11214 = vmatprep.subr.msk.mxu1 %vm870_vm1, %v2473_v50 }
 0x253   : >> { %11215 = vmatpush3.xpose.msk.msra.mxu1 %vm870_vm1, %v2473_v50  ;;  %v13675_v50 = vld [vmem:[%s17867_s2 + $0x50] sm:$0xff] }
 0x256   : >> { %11217 = vmatmul.mubr.msk.f32.vlgmr.msra.gmra.mxu1 %vm870_vm1, %v2447_v29 }
 0x257   : >> { %11219 = vmatprep.mubr.msk.f32.mxu1 %vm870_vm1, %v2449_v22 }
 0x25a   : >> { %11220 = vmatmul.mubr.msk.f32.gmra.mxu1 %vm870_vm1, %v2451_v25 }
 0x25b   : >> { %11222 = vmatprep.mubr.msk.f32.mxu1 %vm870_vm1, %v2453_v26  ;;  %v13687_v26 = vld [vmem:[%s17867_s2 + $0x58] sm:$0xff] }
 0x25c   : >> { %18003 = vst [vmem:[#allocation29_spill] sm:$0xff] %v13687_v26 }
 0x25e   : >> { %11223 = vmatmul.mubr.msk.f32.gmra.mxu1 %vm870_vm1, %v2455_v27 }
 0x25f   : >> { %11225 = vmatprep.mubr.msk.f32.mxu1 %vm870_vm1, %v2457_v28 }
 0x262   : >> { %11226 = vmatmul.mubr.msk.f32.gmra.mxu1 %vm870_vm1, %v2459_v31 }
 0x263   : >> { %11228 = vmatprep.mubr.msk.f32.mxu1 %vm870_vm1, %v2461_v32  ;;  %v13695_v32 = vld [vmem:[%s17867_s2 + $0x60] sm:$0xff] }
 0x266   : >> { %11229 = vmatmul.mubr.msk.f32.gmra.mxu1 %vm870_vm1, %v2463_v33 }
 0x267   : >> { %11231 = vmatprep.mubr.msk.f32.mxu1 %vm870_vm1, %v2465_v34 }
 0x26a   : >> { %11232 = vmatmul.mubr.msk.f32.gmra.mxu1 %vm870_vm1, %v2467_v37 }
 0x26b   : >> { %11234 = vmatprep.mubr.msk.f32.mxu1 %vm870_vm1, %v2469_v38  ;;  %v13707_v38 = vld [vmem:[%s17867_s2 + $0x68] sm:$0xff] }
 0x26c   : >> { %18004 = vst [vmem:[#allocation30_spill] sm:$0xff] %v13707_v38 }
 0x26e   : >> { %11235 = vmatmul.mubr.msk.f32.gmra.mxu1 %vm870_vm1, %v2471_v39 }
 0x2a6   : >> { %v10976_v43 = vpop.f32.mrf.mxu1 }
 0x2a7   : >> { %v13592_v46 = vadd.f32 %v10976_v43, %v13584_v40 }
 0x2a8   : >> { %v993_v47 = vpop.f32.mrf.mxu1 }
 0x2a9   : >> { %v13600_v51 = vadd.f32 %v993_v47, %v13589_v44  ;;  %v1066_v53 = vsel %vm1062_vm2, %v13592_v46, -inf }
 0x2aa   : >> { %1067 = vmax.xlane.f32.xlu1 %v1066_v53  ;;  %v10979_v55 = vpop.f32.mrf.mxu1 }
 0x2ab   : >> { %v13605_v57 = vadd.f32 %v10979_v55, %v13597_v49  ;;  %v1063_v59 = vsel %vm1062_vm2, %v13600_v51, -inf }
 0x2ac   : >> { %v1003_v61 = vpop.f32.mrf.mxu1  ;;  %1064 = vmax.xlane.f32.xlu0 %v1063_v59 }
 0x2ad   : >> { %v13620_v5 = vadd.f32 %v1003_v61, %v13612_v63  ;;  %v1072_v8 = vsel %vm1062_vm2, %v13605_v57, -inf }
 0x2ae   : >> { %v10982_v1 = vpop.f32.mrf.mxu1 }
 0x2af   : >> { %v13638_v11 = vadd.f32 %v10982_v1, %v13627_v10  ;;  %v1069_v24 = vsel %vm1062_vm2, %v13620_v5, -inf }
 0x2b0   : >> { %v1013_v18 = vpop.f32.mrf.mxu1  ;;  %1073 = vmax.xlane.f32.xlu0 %v1072_v8 }
 0x2b1   : >> { %v13630_v7 = vadd.f32 %v1013_v18, %v13617_v3  ;;  %v1078_v14 = vsel %vm1062_vm2, %v13638_v11, -inf }
 0x2b2   : >> { %v10985_v17 = vpop.f32.mrf.mxu1 }
 0x2b3   : >> { %v1075_v23 = vsel %vm1062_vm2, %v13630_v7, -inf  ;;  %v13658_v45 = vadd.f32 %v10985_v17, %v13647_v30 }
 0x2b4   : >> { %v1023_v35 = vpop.f32.mrf.mxu1  ;;  %1076 = vmax.xlane.f32.xlu1 %v1075_v23  ;;  %1070 = vmax.xlane.f32.xlu0 %v1069_v24 }
 0x2b5   : >> { %v13650_v36 = vadd.f32 %v1023_v35, %v13635_v12  ;;  %v1084_v25 = vsel %vm1062_vm2, %v13658_v45, -inf }
 0x2b6   : >> { %v10988_v41 = vpop.f32.mrf.mxu1 }
 0x2b7   : >> { %v1081_v15 = vsel %vm1062_vm2, %v13650_v36, -inf  ;;  %v13678_v29 = vadd.f32 %v10988_v41, %v13667_v16 }
 0x2b8   : >> { %v1033_v19 = vpop.f32.mrf.mxu1  ;;  %1082 = vmax.xlane.f32.xlu1 %v1081_v15  ;;  %1079 = vmax.xlane.f32.xlu0 %v1078_v14 }
 0x2b9   : >> { %v13670_v20 = vadd.f32 %v1033_v19, %v13655_v42  ;;  %v1090_v37 = vsel %vm1062_vm2, %v13678_v29, -inf }
 0x2ba   : >> { %v10991_v21 = vpop.f32.mrf.mxu1 }
 0x2bb   : >> { %v1087_v22 = vsel %vm1062_vm2, %v13670_v20, -inf  ;;  %v13698_v33 = vadd.f32 %v10991_v21, %v13687_v26 }
 0x2bc   : >> { %v1043_v27 = vpop.f32.mrf.mxu1  ;;  %1088 = vmax.xlane.f32.xlu1 %v1087_v22  ;;  %1085 = vmax.xlane.f32.xlu0 %v1084_v25 }
 0x2bd   : >> { %v13690_v28 = vadd.f32 %v1043_v27, %v13675_v50  ;;  %v1096_v55 = vsel %vm1062_vm2, %v13698_v33, -inf }
 0x2be   : >> { %v10994_v31 = vpop.f32.mrf.mxu1 }
 0x2bf   : >> { %v1093_v34 = vsel %vm1062_vm2, %v13690_v28, -inf  ;;  %v13713_v47 = vadd.f32 %v10994_v31, %v13707_v38 }
 0x2c0   : >> { %v1053_v39 = vpop.f32.mrf.mxu1  ;;  %1094 = vmax.xlane.f32.xlu1 %v1093_v34  ;;  %1091 = vmax.xlane.f32.xlu0 %v1090_v37 }
 0x2c1   : >> { %v13710_v43 = vadd.f32 %v1053_v39, %v13695_v32  ;;  %v1102_v59 = vsel %vm1062_vm2, %v13713_v47, -inf }
 0x2c3   : >> { %v1099_v53 = vsel %vm1062_vm2, %v13710_v43, -inf }
 0x2c4   : >> { %1100 = vmax.xlane.f32.xlu1 %v1099_v53  ;;  %1097 = vmax.xlane.f32.xlu0 %v1096_v55 }
 0x2c8   : >> { %1103 = vmax.xlane.f32.xlu0 %v1102_v59 }
 0x2de   : >> { %v11097_v61 = vpop.f32.mrf.mxu1 }
 0x2df   : >> { %v13722_v1 = vadd.f32 %v11097_v61, %v13584_v40 }
 0x2e0   : >> { %v1811_v8 = vpop.f32.mrf.mxu1 }
 0x2e1   : >> { %v13725_v18 = vadd.f32 %v1811_v8, %v13589_v44  ;;  %v1883_v17 = vsel %vm1062_vm2, %v13722_v1, -inf }
 0x2e2   : >> { %v11100_v23 = vpop.f32.mrf.mxu1  ;;  %1884 = vmax.xlane.f32.xlu1 %v1883_v17 }
 0x2e3   : >> { %v13730_v24 = vadd.f32 %v11100_v23, %v13597_v49  ;;  %v1880_v35 = vsel %vm1062_vm2, %v13725_v18, -inf }
 0x2e4   : >> { %v1821_v41 = vpop.f32.mrf.mxu1  ;;  %1881 = vmax.xlane.f32.xlu0 %v1880_v35 }
 0x2e5   : >> { %v13735_v14 = vadd.f32 %v1821_v41, %v13612_v63  ;;  %v1889_v19 = vsel %vm1062_vm2, %v13730_v24, -inf }
 0x2e6   : >> { %v11103_v15 = vpop.f32.mrf.mxu1 }
 0x2e7   : >> { %v13743_v27 = vadd.f32 %v11103_v15, %v13627_v10  ;;  %v1886_v34 = vsel %vm1062_vm2, %v13735_v14, -inf }
 0x2e8   : >> { %v1831_v21 = vpop.f32.mrf.mxu1  ;;  %1890 = vmax.xlane.f32.xlu0 %v1889_v19 }
 0x2e9   : >> { %v13740_v22 = vadd.f32 %v1831_v21, %v13617_v3  ;;  %v1895_v61 = vsel %vm1062_vm2, %v13743_v27, -inf }
 0x2ea   : >> { %v11106_v25 = vpop.f32.mrf.mxu1 }
 0x2eb   : >> { %v1892_v31 = vsel %vm1062_vm2, %v13740_v22, -inf  ;;  %v13753_v55 = vadd.f32 %v11106_v25, %v13647_v30 }
 0x2ec   : >> { %v1841_v37 = vpop.f32.mrf.mxu1  ;;  %1893 = vmax.xlane.f32.xlu1 %v1892_v31  ;;  %1887 = vmax.xlane.f32.xlu0 %v1886_v34 }
 0x2ed   : >> { %v13750_v39 = vadd.f32 %v1841_v37, %v13635_v12  ;;  %v1901_v15 = vsel %vm1062_vm2, %v13753_v55, -inf }
 0x2ee   : >> { %v11109_v53 = vpop.f32.mrf.mxu1 }
 0x2ef   : >> { %v1898_v59 = vsel %vm1062_vm2, %v13750_v39, -inf  ;;  %v13763_v35 = vadd.f32 %v11109_v53, %v13667_v16 }
 0x2f0   : >> { %v1851_v8 = vpop.f32.mrf.mxu1  ;;  %1899 = vmax.xlane.f32.xlu1 %v1898_v59  ;;  %1896 = vmax.xlane.f32.xlu0 %v1895_v61 }
 0x2f1   : >> { %v13760_v17 = vadd.f32 %v1851_v8, %v13655_v42  ;;  %v1907_v37 = vsel %vm1062_vm2, %v13763_v35, -inf }
 0x2f2   : >> { %v11112_v23 = vpop.f32.mrf.mxu1 }
 0x2f3   : >> { %v1904_v41 = vsel %vm1062_vm2, %v13760_v17, -inf  ;;  %v13773_v31 = vadd.f32 %v11112_v23, %v13687_v26 }
 0x2f4   : >> { %v1861_v19 = vpop.f32.mrf.mxu1  ;;  %1905 = vmax.xlane.f32.xlu1 %v1904_v41  ;;  %1902 = vmax.xlane.f32.xlu0 %v1901_v15  ;;  %v13791_v15 = vpop.permute.xlu1 %2060 }
 0x2f5   : >> { %v13770_v21 = vadd.f32 %v1861_v19, %v13675_v50  ;;  %v1913_v23 = vsel %vm1062_vm2, %v13773_v31, -inf }
 0x2f6   : >> { %v11115_v25 = vpop.f32.mrf.mxu1 }
 0x2f7   : >> { %v1910_v34 = vsel %vm1062_vm2, %v13770_v21, -inf  ;;  %v13783_v61 = vadd.f32 %v11115_v25, %v13707_v38 }
 0x2f8   : >> { %v1871_v53 = vpop.f32.mrf.mxu1  ;;  %1911 = vmax.xlane.f32.xlu1 %v1910_v34  ;;  %1908 = vmax.xlane.f32.xlu0 %v1907_v37  ;;  %v13793_v19 = vpop.permute.xlu1 %2056 }
 0x2f9   : >> { %v13780_v59 = vadd.f32 %v1871_v53, %v13695_v32  ;;  %v1919_v41 = vsel %vm1062_vm2, %v13783_v61, -inf  ;;  %18005 = vst [vmem:[#allocation31_spill] sm:$0xff] %v13793_v19  ;;  %v13795_v34 = vpop.permute.xlu0 %2058 }
 0x2fa   : >> { %18006 = vst [vmem:[#allocation32_spill] sm:$0xff] %v13795_v34 }
 0x2fb   : >> { %v1916_v8 = vsel %vm1062_vm2, %v13780_v59, -inf }
 0x2fc   : >> { %1917 = vmax.xlane.f32.xlu1 %v1916_v8  ;;  %1914 = vmax.xlane.f32.xlu0 %v1913_v23  ;;  %v13797_v25 = vpop.permute.xlu1 %2052 }
 0x2fd   : >> { %18007 = vst [vmem:[#allocation33_spill] sm:$0xff] %v13797_v25  ;;  %v13799_v37 = vpop.permute.xlu0 %2054 }
 0x2fe   : >> { %18008 = vst [vmem:[#allocation34_spill] sm:$0xff] %v13799_v37 }
 0x300   : >> { %1920 = vmax.xlane.f32.xlu0 %v1919_v41  ;;  %v13801_v53 = vpop.permute.xlu1 %2048 }
 0x301   : >> { %18009 = vst [vmem:[#allocation35_spill] sm:$0xff] %v13801_v53  ;;  %v13803_v38 = vpop.permute.xlu0 %2050 }
 0x302   : >> { %18010 = vst [vmem:[#allocation36_spill] sm:$0xff] %v13803_v38 }
 0x304   : >> { %v13805_v8 = vpop.permute.xlu1 %2044 }
 0x305   : >> { %18011 = vst [vmem:[#allocation37_spill] sm:$0xff] %v13805_v8  ;;  %v13807_v23 = vpop.permute.xlu0 %2046 }
 0x306   : >> { %18012 = vst [vmem:[#allocation38_spill] sm:$0xff] %v13807_v23 }
 0x333   : >> { %v1068_v26 = vpop.xlane.xlu1 %1067 }
 0x334   : >> { %v1106_v41 = vsub.f32 %v13592_v46, %v1068_v26 }
 0x335   : >> { %v1065_v16 = vpop.xlane.xlu0 %1064 }
 0x336   : >> { %v1121_v30 = vmul.f32 1.442695, %v1106_v41  ;;  %v1105_v19 = vsub.f32 %v13600_v51, %v1065_v16 }
 0x338   : >> { %12140 = vpow2.f32 %v1121_v30  ;;  %v1119_v34 = vmul.f32 1.442695, %v1105_v19 }
 0x339   : >> { %v1074_v25 = vpop.xlane.xlu0 %1073 }
 0x33a   : >> { %12142 = vpow2.f32 %v1119_v34  ;;  %v1108_v37 = vsub.f32 %v13605_v57, %v1074_v25 }
 0x33c   : >> { %v1125_v53 = vmul.f32 1.442695, %v1108_v37 }
 0x33d   : >> { %v1077_v10 = vpop.xlane.xlu1 %1076  ;;  %v1071_v38 = vpop.xlane.xlu0 %1070 }
 0x33e   : >> { %12144 = vpow2.f32 %v1125_v53  ;;  %v1109_v8 = vsub.f32 %v13630_v7, %v1077_v10  ;;  %v1107_v23 = vsub.f32 %v13620_v5, %v1071_v38 }
 0x340   : >> { %v1123_v49 = vmul.f32 1.442695, %v1107_v23  ;;  %v1127_v46 = vmul.f32 1.442695, %v1109_v8 }
 0x341   : >> { %v1083_v26 = vpop.xlane.xlu1 %1082  ;;  %v1080_v41 = vpop.xlane.xlu0 %1079 }
 0x342   : >> { %v1111_v51 = vsub.f32 %v13650_v36, %v1083_v26  ;;  %v1110_v30 = vsub.f32 %v13638_v11, %v1080_v41  ;;  %12146 = vpow2.f32 %v1123_v49 }
 0x343   : >> { %12148 = vpow2.f32 %v1127_v46 }
 0x344   : >> { %v1129_v16 = vmul.f32 1.442695, %v1110_v30  ;;  %v1131_v57 = vmul.f32 1.442695, %v1111_v51 }
 0x345   : >> { %v13816_v19 = vpop.eup %12140  ;;  %v1089_v34 = vpop.xlane.xlu1 %1088 }
 0x346   : >> { %v1086_v25 = vpop.xlane.xlu0 %1085  ;;  %v1113_v10 = vsub.f32 %v13670_v20, %v1089_v34  ;;  %v1150_v7 = vsel %vm1062_vm2, %v13816_v19, 0.0  ;;  %12150 = vpow2.f32 %v1129_v16 }
 0x347   : >> { %v1112_v5 = vsub.f32 %v13658_v45, %v1086_v25  ;;  %v13822_v38 = vpop.eup %12142  ;;  %1151 = vadd.xlane.f32.xlu0 %v1150_v7  ;;  %12152 = vpow2.f32 %v1131_v57 }
 0x348   : >> { %v1147_v49 = vsel %vm1062_vm2, %v13822_v38, 0.0  ;;  %v1135_v36 = vmul.f32 1.442695, %v1113_v10 }
 0x349   : >> { %v1133_v11 = vmul.f32 1.442695, %v1112_v5  ;;  %v1095_v37 = vpop.xlane.xlu1 %1094  ;;  %1148 = vadd.xlane.f32.xlu1 %v1147_v49 }
 0x34a   : >> { %v1092_v53 = vpop.xlane.xlu0 %1091  ;;  %v1115_v20 = vsub.f32 %v13690_v28, %v1095_v37 }
 0x34b   : >> { %v1114_v45 = vsub.f32 %v13678_v29, %v1092_v53  ;;  %v13828_v8 = vpop.eup %12144  ;;  %12154 = vpow2.f32 %v1133_v11 }
 0x34c   : >> { %v1156_v46 = vsel %vm1062_vm2, %v13828_v8, 0.0  ;;  %12156 = vpow2.f32 %v1135_v36  ;;  %v1139_v26 = vmul.f32 1.442695, %v1115_v20 }
 0x34d   : >> { %v1137_v23 = vmul.f32 1.442695, %v1114_v45  ;;  %v1101_v41 = vpop.xlane.xlu1 %1100  ;;  %1157 = vadd.xlane.f32.xlu0 %v1156_v46 }
 0x34e   : >> { %v1098_v51 = vpop.xlane.xlu0 %1097  ;;  %v1117_v30 = vsub.f32 %v13710_v43, %v1101_v41 }
 0x34f   : >> { %v1116_v16 = vsub.f32 %v13698_v33, %v1098_v51  ;;  %12158 = vpow2.f32 %v1137_v23  ;;  %v13834_v28 = vpop.eup %12146 }
 0x350   : >> { %12160 = vpow2.f32 %v1139_v26  ;;  %v1143_v57 = vmul.f32 1.442695, %v1117_v30  ;;  %v1153_v34 = vsel %vm1062_vm2, %v13834_v28, 0.0  ;;  %v13838_v10 = vpop.eup %12148 }
 0x351   : >> { %v1141_v29 = vmul.f32 1.442695, %v1116_v16  ;;  %1154 = vadd.xlane.f32.xlu1 %v1153_v34  ;;  %v1159_v33 = vsel %vm1062_vm2, %v13838_v10, 0.0 }
 0x352   : >> { %v1104_v25 = vpop.xlane.xlu0 %1103 }
 0x353   : >> { %v1118_v5 = vsub.f32 %v13713_v47, %v1104_v25  ;;  %12162 = vpow2.f32 %v1141_v29  ;;  %v13841_v7 = vpop.eup %12150 }
 0x354   : >> { %12164 = vpow2.f32 %v1143_v57  ;;  %v1162_v11 = vsel %vm1062_vm2, %v13841_v7, 0.0  ;;  %v13847_v49 = vpop.eup %12152  ;;  %v13880_v57 = vld [vmem:[%s17870_s5] sm:$0xff] }
 0x355   : >> { %v1145_v43 = vmul.f32 1.442695, %v1118_v5  ;;  %1160 = vadd.xlane.f32.xlu1 %v1159_v33  ;;  %1163 = vadd.xlane.f32.xlu0 %v1162_v11  ;;  %v1165_v47 = vsel %vm1062_vm2, %v13847_v49, 0.0 }
 0x356   : >> { %11044 = vmatprep.subr.mxu0 %v13880_v57 }
 0x357   : >> { %12166 = vpow2.f32 %v1145_v43 }
 0x358   : >> { %v13849_v36 = vpop.eup %12154 }
 0x359   : >> { %v1168_v37 = vsel %vm1062_vm2, %v13849_v36, 0.0  ;;  %v13855_v53 = vpop.eup %12156  ;;  %1166 = vadd.xlane.f32.xlu1 %v1165_v47 }
 0x35a   : >> { %1169 = vadd.xlane.f32.xlu0 %v1168_v37  ;;  %v1171_v45 = vsel %vm1062_vm2, %v13855_v53, 0.0 }
 0x35c   : >> { %v13857_v20 = vpop.eup %12158 }
 0x35d   : >> { %v1174_v23 = vsel %vm1062_vm2, %v13857_v20, 0.0  ;;  %v13863_v46 = vpop.eup %12160  ;;  %1172 = vadd.xlane.f32.xlu1 %v1171_v45 }
 0x35e   : >> { %1175 = vadd.xlane.f32.xlu0 %v1174_v23  ;;  %v1177_v41 = vsel %vm1062_vm2, %v13863_v46, 0.0 }
 0x360   : >> { %v13865_v26 = vpop.eup %12162 }
 0x361   : >> { %v1180_v51 = vsel %vm1062_vm2, %v13865_v26, 0.0  ;;  %v13871_v30 = vpop.eup %12164  ;;  %1178 = vadd.xlane.f32.xlu1 %v1177_v41 }
 0x362   : >> { %1181 = vadd.xlane.f32.xlu0 %v1180_v51  ;;  %v1183_v34 = vsel %vm1062_vm2, %v13871_v30, 0.0 }
 0x364   : >> { %v13873_v16 = vpop.eup %12166 }
 0x365   : >> { %v1186_v29 = vsel %vm1062_vm2, %v13873_v16, 0.0  ;;  %1184 = vadd.xlane.f32.xlu1 %v1183_v34 }
 0x366   : >> { %1187 = vadd.xlane.f32.xlu0 %v1186_v29 }
 0x36b   : >> { %v1885_v25 = vpop.xlane.xlu1 %1884 }
 0x36c   : >> { %v1923_v5 = vsub.f32 %v13722_v1, %v1885_v25 }
 0x36d   : >> { %v1882_v43 = vpop.xlane.xlu0 %1881 }
 0x36e   : >> { %v1938_v33 = vmul.f32 1.442695, %v1923_v5  ;;  %v1922_v11 = vsub.f32 %v13725_v18, %v1882_v43 }
 0x370   : >> { %12168 = vpow2.f32 %v1938_v33  ;;  %v1936_v47 = vmul.f32 1.442695, %v1922_v11 }
 0x371   : >> { %v1891_v37 = vpop.xlane.xlu0 %1890 }
 0x372   : >> { %12170 = vpow2.f32 %v1936_v47  ;;  %v1925_v45 = vsub.f32 %v13730_v24, %v1891_v37 }
 0x374   : >> { %v1942_v23 = vmul.f32 1.442695, %v1925_v45 }
 0x375   : >> { %v1894_v41 = vpop.xlane.xlu1 %1893  ;;  %v1888_v51 = vpop.xlane.xlu0 %1887 }
 0x376   : >> { %12172 = vpow2.f32 %v1942_v23  ;;  %v1926_v34 = vsub.f32 %v13740_v22, %v1894_v41  ;;  %v1924_v29 = vsub.f32 %v13735_v14, %v1888_v51 }
 0x378   : >> { %v1940_v63 = vmul.f32 1.442695, %v1924_v29  ;;  %v1944_v1 = vmul.f32 1.442695, %v1926_v34 }
 0x379   : >> { %v1900_v25 = vpop.xlane.xlu1 %1899  ;;  %v1897_v5 = vpop.xlane.xlu0 %1896 }
 0x37a   : >> { %v1928_v18 = vsub.f32 %v13750_v39, %v1900_v25  ;;  %v1927_v43 = vsub.f32 %v13743_v27, %v1897_v5  ;;  %12174 = vpow2.f32 %v1940_v63 }
 0x37b   : >> { %12176 = vpow2.f32 %v1944_v1 }
 0x37c   : >> { %v1946_v33 = vmul.f32 1.442695, %v1927_v43  ;;  %v1948_v24 = vmul.f32 1.442695, %v1928_v18 }
 0x37d   : >> { %v13892_v11 = vpop.eup %12168  ;;  %v1906_v47 = vpop.xlane.xlu1 %1905 }
 0x37e   : >> { %v1903_v37 = vpop.xlane.xlu0 %1902  ;;  %v1930_v22 = vsub.f32 %v13760_v17, %v1906_v47  ;;  %v1967_v45 = vsel %vm1062_vm2, %v13892_v11, 0.0  ;;  %12178 = vpow2.f32 %v1946_v33 }
 0x37f   : >> { %v1929_v14 = vsub.f32 %v13753_v55, %v1903_v37  ;;  %v13898_v23 = vpop.eup %12170  ;;  %1968 = vadd.xlane.f32.xlu0 %v1967_v45  ;;  %12180 = vpow2.f32 %v1948_v24 }
 0x380   : >> { %v1964_v63 = vsel %vm1062_vm2, %v13898_v23, 0.0  ;;  %v1952_v39 = vmul.f32 1.442695, %v1930_v22 }
 0x381   : >> { %v1950_v27 = vmul.f32 1.442695, %v1929_v14  ;;  %v1912_v41 = vpop.xlane.xlu1 %1911  ;;  %1965 = vadd.xlane.f32.xlu1 %v1964_v63 }
 0x382   : >> { %v1909_v51 = vpop.xlane.xlu0 %1908  ;;  %v1932_v17 = vsub.f32 %v13770_v21, %v1912_v41 }
 0x383   : >> { %v1931_v55 = vsub.f32 %v13763_v35, %v1909_v51  ;;  %v13904_v34 = vpop.eup %12172  ;;  %12182 = vpow2.f32 %v1950_v27 }
 0x384   : >> { %v1973_v1 = vsel %vm1062_vm2, %v13904_v34, 0.0  ;;  %12184 = vpow2.f32 %v1952_v39  ;;  %v1956_v25 = vmul.f32 1.442695, %v1932_v17 }
 0x385   : >> { %v1954_v29 = vmul.f32 1.442695, %v1931_v55  ;;  %1974 = vadd.xlane.f32.xlu0 %v1973_v1  ;;  %v1918_v55 = vpop.xlane.xlu1 %1917 }
 0x386   : >> { %v1915_v51 = vpop.xlane.xlu0 %1914 }
 0x387   : >> { %12186 = vpow2.f32 %v1954_v29  ;;  %v13908_v5 = vpop.eup %12174  ;;  %v1933_v17 = vsub.f32 %v13773_v31, %v1915_v51  ;;  %v1934_v29 = vsub.f32 %v13780_v59, %v1918_v55 }
 0x388   : >> { %12188 = vpow2.f32 %v1956_v25  ;;  %v1970_v18 = vsel %vm1062_vm2, %v13908_v5, 0.0  ;;  %v13912_v21 = vpop.eup %12176 }
 0x389   : >> { %1971 = vadd.xlane.f32.xlu1 %v1970_v18  ;;  %v1976_v43 = vsel %vm1062_vm2, %v13912_v21, 0.0  ;;  %v1958_v1 = vmul.f32 1.442695, %v1933_v17  ;;  %v1960_v25 = vmul.f32 1.442695, %v1934_v29 }
 0x38b   : >> { %v13914_v35 = vpop.eup %12178  ;;  %12190 = vpow2.f32 %v1958_v1 }
 0x38c   : >> { %v1979_v33 = vsel %vm1062_vm2, %v13914_v35, 0.0  ;;  %v13920_v24 = vpop.eup %12180  ;;  %12192 = vpow2.f32 %v1960_v25 }
 0x38d   : >> { %1977 = vadd.xlane.f32.xlu1 %v1976_v43  ;;  %1980 = vadd.xlane.f32.xlu0 %v1979_v33  ;;  %v1982_v37 = vsel %vm1062_vm2, %v13920_v24, 0.0 }
 0x390   : >> { %v13922_v47 = vpop.eup %12182 }
 0x391   : >> { %v1985_v22 = vsel %vm1062_vm2, %v13922_v47, 0.0  ;;  %v13928_v14 = vpop.eup %12184  ;;  %1983 = vadd.xlane.f32.xlu1 %v1982_v37  ;;  %v1921_v37 = vpop.xlane.xlu0 %1920 }
 0x392   : >> { %1986 = vadd.xlane.f32.xlu0 %v1985_v22  ;;  %v1988_v27 = vsel %vm1062_vm2, %v13928_v14, 0.0 }
 0x394   : >> { %v13930_v45 = vpop.eup %12186 }
 0x395   : >> { %v1991_v63 = vsel %vm1062_vm2, %v13930_v45, 0.0  ;;  %v13936_v39 = vpop.eup %12188  ;;  %1989 = vadd.xlane.f32.xlu1 %v1988_v27 }
 0x396   : >> { %1992 = vadd.xlane.f32.xlu0 %v1991_v63  ;;  %v1994_v41 = vsel %vm1062_vm2, %v13936_v39, 0.0 }
 0x398   : >> { %v13946_v18 = vpop.eup %12190 }
 0x399   : >> { %1995 = vadd.xlane.f32.xlu1 %v1994_v41  ;;  %v1997_v43 = vsel %vm1062_vm2, %v13946_v18, 0.0  ;;  %v13950_v33 = vpop.eup %12192 }
 0x39a   : >> { %v2000_v22 = vsel %vm1062_vm2, %v13950_v33, 0.0 }
 0x3aa   : >> { %2040 = vrot.lane.b32.xlu1 %v13080_v52, %s17940_s29 }
 0x3ac   : >> { %2042 = vrot.lane.b32.xlu0 %v13117_v58, %s17940_s29 }
 0x3cb   : >> { %1998 = vadd.xlane.f32.xlu0 %v1997_v43 }
 0x3ce   : >> { %2001 = vadd.xlane.f32.xlu1 %v2000_v22 }
 0x3d0   : >> { %v1152_v31 = vpop.xlane.xlu0 %1151 }
 0x3d1   : >> { %12194 = vrcp.f32 %v1152_v31 }
 0x3d2   : >> { %v1149_v59 = vpop.xlane.xlu1 %1148 }
 0x3d3   : >> { %12196 = vrcp.f32 %v1149_v59 }
 0x3d6   : >> { %v1158_v27 = vpop.xlane.xlu0 %1157 }
 0x3d7   : >> { %12198 = vrcp.f32 %v1158_v27 }
 0x3da   : >> { %v1155_v63 = vpop.xlane.xlu1 %1154 }
 0x3db   : >> { %12200 = vrcp.f32 %v1155_v63 }
 0x3de   : >> { %v12195_v41 = vpop.eup %12194  ;;  %v1161_v51 = vpop.xlane.xlu1 %1160 }
 0x3df   : >> { %v1164_v17 = vpop.xlane.xlu0 %1163  ;;  %12202 = vrcp.f32 %v1161_v51  ;;  %2036 = vrot.lane.b32.xlu1 %v13064_v48, %s17940_s29  ;;  %v1204_v1 = vmul.f32 %v12195_v41, %v13816_v19 }
 0x3e0   : >> { %v12197_v55 = vpop.eup %12196  ;;  %12204 = vrcp.f32 %v1164_v17 }
 0x3e1   : >> { %2038 = vrot.lane.b32.xlu0 %v13095_v54, %s17940_s29  ;;  %v1203_v29 = vmul.f32 %v12197_v55, %v13822_v38  ;;  %v1935_v38 = vsub.f32 %v13783_v61, %v1921_v37 }
 0x3e2   : >> { %v1167_v25 = vpop.xlane.xlu1 %1166 }
 0x3e3   : >> { %v1170_v43 = vpop.xlane.xlu0 %1169  ;;  %11023 = vmatprep.mubr.msk.f32.mxu0 %vm1062_vm2, %v1203_v29  ;;  %12206 = vrcp.f32 %v1167_v25  ;;  %3309 = vrot.lane.b32.xlu1 %v13186_v9, %s17938_s30  ;;  %v1962_v63 = vmul.f32 1.442695, %v1935_v38 }
 0x3e4   : >> { %11024 = vmatmul.mubr.msk.f32.vlgmr.msra.gmra.mxu0 %vm1062_vm2, %v1204_v1  ;;  %12208 = vrcp.f32 %v1170_v43  ;;  %v12199_v31 = vpop.eup %12198 }
 0x3e5   : >> { %11045 = vmatpush3.msra.mxu0 %v13880_v57  ;;  %v1206_v57 = vmul.f32 %v12199_v31, %v13828_v8 }
 0x3e6   : >> { %11116 = vmatprep.subr.mxu0 %v13791_v15  ;;  %v1173_v22 = vpop.xlane.xlu1 %1172 }
 0x3e7   : >> { %v1176_v19 = vpop.xlane.xlu0 %1175  ;;  %12210 = vrcp.f32 %v1173_v22  ;;  %3307 = vrot.lane.b32.xlu1 %v13201_v13, %s17938_s30 }
 0x3e8   : >> { %v12201_v59 = vpop.eup %12200  ;;  %12212 = vrcp.f32 %v1176_v19 }
 0x3e9   : >> { %v1205_v27 = vmul.f32 %v12201_v59, %v13834_v28 }
 0x3ea   : >> { %v1179_v41 = vpop.xlane.xlu1 %1178 }
 0x3eb   : >> { %v1182_v51 = vpop.xlane.xlu0 %1181  ;;  %12214 = vrcp.f32 %v1179_v41  ;;  %3303 = vrot.lane.b32.xlu1 %v13179_v6, %s17938_s30  ;;  %11026 = vmatprep.mubr.msk.f32.mxu0 %vm1062_vm2, %v1205_v27 }
 0x3ec   : >> { %v12203_v61 = vpop.eup %12202  ;;  %12216 = vrcp.f32 %v1182_v51  ;;  %11027 = vmatmul.mubr.msk.f32.gmra.mxu0 %vm1062_vm2, %v1206_v57 }
 0x3ed   : >> { %v12205_v37 = vpop.eup %12204  ;;  %v1207_v17 = vmul.f32 %v12203_v61, %v13838_v10  ;;  %12218 = vpow2.f32 %v1962_v63 }
 0x3ee   : >> { %v1185_v28 = vpop.xlane.xlu1 %1184  ;;  %v1208_v29 = vmul.f32 %v12205_v37, %v13841_v7 }
 0x3ef   : >> { %v1188_v55 = vpop.xlane.xlu0 %1187  ;;  %12220 = vrcp.f32 %v1185_v28  ;;  %3299 = vrot.lane.b32.xlu1 %v13161_v2, %s17938_s30  ;;  %11029 = vmatprep.mubr.msk.f32.mxu0 %vm1062_vm2, %v1207_v17 }
 0x3f0   : >> { %v12207_v8 = vpop.eup %12206  ;;  %12222 = vrcp.f32 %v1188_v55  ;;  %11030 = vmatmul.mubr.msk.f32.gmra.mxu0 %vm1062_vm2, %v1208_v29 }
 0x3f1   : >> { %v12209_v1 = vpop.eup %12208  ;;  %v1209_v25 = vmul.f32 %v12207_v8, %v13847_v49 }
 0x3f2   : >> { %v1210_v10 = vmul.f32 %v12209_v1, %v13849_v36 }
 0x3f3   : >> { %3295 = vrot.lane.b32.xlu1 %v13139_v62, %s17938_s30  ;;  %11032 = vmatprep.mubr.msk.f32.mxu0 %vm1062_vm2, %v1209_v25 }
 0x3f4   : >> { %v12211_v7 = vpop.eup %12210  ;;  %11033 = vmatmul.mubr.msk.f32.gmra.mxu0 %vm1062_vm2, %v1210_v10 }
 0x3f5   : >> { %v12213_v43 = vpop.eup %12212  ;;  %v1211_v38 = vmul.f32 %v12211_v7, %v13855_v53 }
 0x3f6   : >> { %v1212_v22 = vmul.f32 %v12213_v43, %v13857_v20 }
 0x3f7   : >> { %3291 = vrot.lane.b32.xlu1 %v13117_v58, %s17938_s30  ;;  %11035 = vmatprep.mubr.msk.f32.mxu0 %vm1062_vm2, %v1211_v38 }
 0x3f8   : >> { %v12215_v49 = vpop.eup %12214  ;;  %11036 = vmatmul.mubr.msk.f32.gmra.mxu0 %vm1062_vm2, %v1212_v22 }
 0x3f9   : >> { %v12217_v36 = vpop.eup %12216  ;;  %v1213_v19 = vmul.f32 %v12215_v49, %v13863_v46 }
 0x3fa   : >> { %v1214_v31 = vmul.f32 %v12217_v36, %v13865_v26  ;;  %v13995_v59 = vpop.eup %12218  ;;  %v18013_v26 = vld [vmem:[#allocation18_spill] sm:$0xff] }
 0x3fb   : >> { %3287 = vrot.lane.b32.xlu1 %v13095_v54, %s17938_s30  ;;  %11038 = vmatprep.mubr.msk.f32.mxu0 %vm1062_vm2, %v1213_v19  ;;  %v2003_v63 = vsel %vm1062_vm2, %v13995_v59, 0.0 }
 0x3fc   : >> { %v12221_v53 = vpop.eup %12220  ;;  %11039 = vmatmul.mubr.msk.f32.gmra.mxu0 %vm1062_vm2, %v1214_v31 }
 0x3fd   : >> { %v12223_v20 = vpop.eup %12222  ;;  %v1215_v27 = vmul.f32 %v12221_v53, %v13871_v30  ;;  %v11218_v30 = vpop.f32.mrf.mxu1 }
 0x3fe   : >> { %v1216_v46 = vmul.f32 %v12223_v20, %v13873_v16  ;;  %v14052_v8 = vadd.f32 %v11218_v30, %v13584_v40 }
 0x3ff   : >> { %3283 = vrot.lane.b32.xlu1 %v18013_v26, %s17938_s30  ;;  %11041 = vmatprep.mubr.msk.f32.mxu0 %vm1062_vm2, %v1215_v27  ;;  %v2622_v16 = vpop.f32.mrf.mxu1 }
 0x400   : >> { %2004 = vadd.xlane.f32.xlu0 %v2003_v63  ;;  %11042 = vmatmul.mubr.msk.f32.gmra.mxu0 %vm1062_vm2, %v1216_v46  ;;  %v2694_v7 = vsel %vm1062_vm2, %v14052_v8, -inf }
 0x401   : >> { %v14029_v41 = vpop.f32.mrf.mxu1 }
 0x403   : >> { %3257 = vrot.lane.b32.xlu1 %v13064_v48, %s17936_s18  ;;  %v2632_v51 = vpop.f32.mrf.mxu1 }
 0x405   : >> { %v14035_v57 = vpop.f32.mrf.mxu1 }
 0x407   : >> { %3261 = vrot.lane.b32.xlu1 %v13080_v52, %s17936_s18  ;;  %v2642_v61 = vpop.f32.mrf.mxu1 }
 0x408   : >> { %v14059_v10 = vadd.f32 %v2642_v61, %v13617_v3 }
 0x409   : >> { %v11227_v37 = vpop.f32.mrf.mxu1 }
 0x40a   : >> { %v14041_v17 = vpop.xlane.xlu1 %1965  ;;  %v2703_v22 = vsel %vm1062_vm2, %v14059_v10, -inf }
 0x40b   : >> { %3265 = vrot.lane.b32.xlu1 %v13102_v56, %s17936_s18  ;;  %v2652_v28 = vpop.f32.mrf.mxu1  ;;  %12224 = vrcp.f32 %v14041_v17 }
 0x40c   : >> { %v14068_v40 = vadd.f32 %v2652_v28, %v13635_v12 }
 0x40d   : >> { %v11230_v29 = vpop.f32.mrf.mxu1 }
 0x40e   : >> { %v2709_v36 = vsel %vm1062_vm2, %v14068_v40, -inf }
 0x40f   : >> { %3269 = vrot.lane.b32.xlu1 %v13124_v60, %s17936_s18  ;;  %v2662_v1 = vpop.f32.mrf.mxu1 }
 0x410   : >> { %v14075_v3 = vadd.f32 %v2662_v1, %v13655_v42  ;;  %v14103_v1 = vpop.xlane.xlu0 %1968 }
 0x411   : >> { %v11233_v43 = vpop.f32.mrf.mxu1  ;;  %12226 = vrcp.f32 %v14103_v1 }
 0x412   : >> { %v14045_v55 = vpop.xlane.xlu1 %1971  ;;  %18014 = vst [vmem:[#allocation39_spill] sm:$0xff] %v14075_v3  ;;  %v2715_v53 = vsel %vm1062_vm2, %v14075_v3, -inf }
 0x413   : >> { %3273 = vrot.lane.b32.xlu1 %v13146_v0, %s17936_s18  ;;  %v2672_v49 = vpop.f32.mrf.mxu1  ;;  %12228 = vrcp.f32 %v14045_v55 }
 0x414   : >> { %v14084_v12 = vadd.f32 %v2672_v49, %v13675_v50  ;;  %v18017_v49 = vld [vmem:[#allocation25_spill] sm:$0xff] }
 0x415   : >> { %v11236_v19 = vpop.f32.mrf.mxu1 }
 0x416   : >> { %2034 = vrot.lane.b32.xlu0 %v18013_v26, %s17940_s29  ;;  %v14054_v25 = vpop.xlane.xlu1 %1977  ;;  %18015 = vst [vmem:[#allocation40_spill] sm:$0xff] %v14084_v12  ;;  %v2721_v63 = vsel %vm1062_vm2, %v14084_v12, -inf  ;;  %s18111_s29 = smov 104  }
 0x417   : >> { %3277 = vrot.lane.b32.xlu1 %v13168_v4, %s17936_s18  ;;  %v2682_v20 = vpop.f32.mrf.mxu1 }
 0x418   : >> { %v14091_v27 = vadd.f32 %v2682_v20, %v13695_v32  ;;  %v14108_v32 = vadd.f32 %v2622_v16, %v13589_v44 }
 0x41a   : >> { %3305 = vrot.lane.b32.xlu0 %v13168_v4, %s17938_s30  ;;  %v14063_v38 = vpop.xlane.xlu1 %1983  ;;  %18016 = vst [vmem:[#allocation41_spill] sm:$0xff] %v14091_v27  ;;  %v2727_v46 = vsel %vm1062_vm2, %v14091_v27, -inf }
 0x41b   : >> { %3281 = vrot.lane.b32.xlu1 %v13186_v9, %s17936_s18 }
 0x41e   : >> { %3301 = vrot.lane.b32.xlu0 %v13146_v0, %s17938_s30  ;;  %v14079_v31 = vpop.xlane.xlu1 %1989 }
 0x422   : >> { %3297 = vrot.lane.b32.xlu0 %v13124_v60, %s17938_s30  ;;  %v14088_v42 = vpop.xlane.xlu1 %1995 }
 0x426   : >> { %3293 = vrot.lane.b32.xlu0 %v13102_v56, %s17938_s30  ;;  %v14097_v30 = vpop.permute.xlu1 %2040 }
 0x42a   : >> { %3289 = vrot.lane.b32.xlu0 %v13080_v52, %s17938_s30 }
 0x42e   : >> { %3285 = vrot.lane.b32.xlu0 %v13064_v48, %s17938_s30 }
 0x432   : >> { %3255 = vrot.lane.b32.xlu0 %v18013_v26, %s17936_s18  ;;  %v18023_v26 = vld [vmem:[#allocation29_spill] sm:$0xff] }
 0x436   : >> { %3259 = vrot.lane.b32.xlu0 %v13095_v54, %s17936_s18 }
 0x43a   : >> { %3263 = vrot.lane.b32.xlu0 %v13117_v58, %s17936_s18 }
 0x43e   : >> { %3267 = vrot.lane.b32.xlu0 %v13139_v62, %s17936_s18 }
 0x43f   : >> { %2695 = vmax.xlane.f32.xlu1 %v2694_v7 }
 0x442   : >> { %3271 = vrot.lane.b32.xlu0 %v13161_v2, %s17936_s18 }
 0x443   : >> { %2704 = vmax.xlane.f32.xlu1 %v2703_v22  ;;  %v14110_v22 = vpop.xlane.xlu0 %1974 }
 0x444   : >> { %12230 = vrcp.f32 %v14110_v22 }
 0x445   : >> { %12232 = vrcp.f32 %v14054_v25  ;;  %v12225_v25 = vpop.eup %12224 }
 0x446   : >> { %3275 = vrot.lane.b32.xlu0 %v13179_v6, %s17936_s18 }
 0x447   : >> { %2710 = vmax.xlane.f32.xlu1 %v2709_v36  ;;  %v14115_v36 = vadd.f32 %v2632_v51, %v18017_v49  ;;  %v14119_v20 = vpop.xlane.xlu0 %1980  ;;  %v18020_v49 = vld [vmem:[#allocation27_spill] sm:$0xff] }
 0x448   : >> { %12234 = vrcp.f32 %v14119_v20 }
 0x449   : >> { %v2697_v16 = vsel %vm1062_vm2, %v14115_v36, -inf  ;;  %12236 = vrcp.f32 %v14063_v38  ;;  %v12227_v38 = vpop.eup %12226 }
 0x44a   : >> { %3279 = vrot.lane.b32.xlu0 %v13201_v13, %s17936_s18  ;;  %s17942_s18 = smov 40  }
 0x44b   : >> { %2716 = vmax.xlane.f32.xlu1 %v2715_v53  ;;  %v2691_v53 = vsel %vm1062_vm2, %v14108_v32, -inf }
 0x44f   : >> { %2722 = vmax.xlane.f32.xlu1 %v2721_v63  ;;  %v18018_v63 = vld [vmem:[#allocation24_spill] sm:$0xff] }
 0x450   : >> { %v14123_v44 = vadd.f32 %v14029_v41, %v18018_v63 }
 0x453   : >> { %2728 = vmax.xlane.f32.xlu1 %v2727_v46  ;;  %v14127_v46 = vpop.xlane.xlu0 %1986 }
 0x454   : >> { %12238 = vrcp.f32 %v14127_v46  ;;  %v2021_v46 = vmul.f32 %v12227_v38, %v13892_v11 }
 0x455   : >> { %12240 = vrcp.f32 %v14079_v31 }
 0x457   : >> { %v14099_v50 = vpop.xlane.xlu1 %2001  ;;  %v14140_v63 = vpop.xlane.xlu0 %1992 }
 0x458   : >> { %12242 = vrcp.f32 %v14140_v63 }
 0x459   : >> { %12244 = vrcp.f32 %v14088_v42 }
 0x45b   : >> { %v14101_v61 = vpop.permute.xlu1 %2036 }
 0x45f   : >> { %v3310_v28 = vpop.permute.xlu1 %3309 }
 0x460   : >> { %11309 = vmatprep.subr.msk.mxu1 %vm870_vm1, %v3310_v28 }
 0x461   : >> { %11310 = vmatpush3.xpose.msk.msra.mxu1 %vm870_vm1, %v3310_v28  ;;  %v18019_v28 = vld [vmem:[#allocation26_spill] sm:$0xff] }
 0x462   : >> { %v14131_v51 = vadd.f32 %v14035_v57, %v18019_v28  ;;  %v14147_v28 = vpop.permute.xlu0 %2042 }
 0x463   : >> { %v3308_v7 = vpop.permute.xlu1 %3307 }
 0x464   : >> { %11311 = vmatprep.subr.msk.mxu1 %vm870_vm1, %v3308_v7  ;;  %v2706_v41 = vsel %vm1062_vm2, %v14131_v51, -inf }
 0x465   : >> { %11312 = vmatpush3.xpose.msk.msra.mxu1 %vm870_vm1, %v3308_v7  ;;  %v2700_v7 = vsel %vm1062_vm2, %v14123_v44, -inf }
 0x466   : >> { %v14154_v27 = vpop.xlane.xlu0 %1998 }
 0x467   : >> { %12246 = vrcp.f32 %v14154_v27 }
 0x468   : >> { %12248 = vrcp.f32 %v14099_v50 }
 0x469   : >> { %2692 = vmax.xlane.f32.xlu0 %v2691_v53  ;;  %v14136_v53 = vadd.f32 %v11227_v37, %v18020_v49  ;;  %v3304_v37 = vpop.permute.xlu1 %3303 }
 0x46b   : >> { %v2712_v57 = vsel %vm1062_vm2, %v14136_v53, -inf }
 0x46d   : >> { %2698 = vmax.xlane.f32.xlu0 %v2697_v16  ;;  %v18021_v16 = vld [vmem:[#allocation28_spill] sm:$0xff] }
 0x46e   : >> { %v14143_v48 = vadd.f32 %v11230_v29, %v18021_v16  ;;  %v3300_v16 = vpop.permute.xlu1 %3299 }
 0x470   : >> { %18022 = vst [vmem:[#allocation25_spill] sm:$0xff] %v14143_v48  ;;  %v2718_v49 = vsel %vm1062_vm2, %v14143_v48, -inf }
 0x471   : >> { %2701 = vmax.xlane.f32.xlu0 %v2700_v7  ;;  %v14150_v7 = vadd.f32 %v11233_v43, %v18023_v26  ;;  %v14163_v26 = vpop.permute.xlu0 %2038 }
 0x472   : >> { %v3296_v43 = vpop.permute.xlu1 %3295 }
 0x473   : >> { %18024 = vst [vmem:[#allocation24_spill] sm:$0xff] %v14150_v7  ;;  %v2724_v29 = vsel %vm1062_vm2, %v14150_v7, -inf }
 0x475   : >> { %2707 = vmax.xlane.f32.xlu0 %v2706_v41  ;;  %v18025_v41 = vld [vmem:[#allocation30_spill] sm:$0xff] }
 0x476   : >> { %v14157_v52 = vadd.f32 %v11236_v19, %v18025_v41  ;;  %v3292_v12 = vpop.permute.xlu1 %3291 }
 0x478   : >> { %18026 = vst [vmem:[#allocation26_spill] sm:$0xff] %v14157_v52 }
 0x479   : >> { %2713 = vmax.xlane.f32.xlu0 %v2712_v57  ;;  %v2730_v57 = vsel %vm1062_vm2, %v14157_v52, -inf }
 0x47a   : >> { %v3288_v19 = vpop.permute.xlu1 %3287 }
 0x47d   : >> { %2719 = vmax.xlane.f32.xlu0 %v2718_v49 }
 0x481   : >> { %2725 = vmax.xlane.f32.xlu0 %v2724_v29 }
 0x485   : >> { %2731 = vmax.xlane.f32.xlu0 %v2730_v57  ;;  %v14174_v57 = vpop.permute.xlu1 %3283 }
 0x489   : >> { %v14165_v54 = vpop.xlane.xlu0 %2004  ;;  %v14179_v7 = vpop.permute.xlu1 %3257 }
 0x48d   : >> { %v14167_v49 = vpop.permute.xlu0 %2034  ;;  %v14184_v3 = vpop.permute.xlu1 %3261 }
 0x491   : >> { %v3306_v56 = vpop.permute.xlu0 %3305 }
 0x492   : >> { %11313 = vmatprep.subr.msk.mxu1 %vm870_vm1, %v3306_v56 }
 0x493   : >> { %11314 = vmatpush3.xpose.msk.msra.mxu1 %vm870_vm1, %v3306_v56 }
 0x494   : >> { %11315 = vmatprep.subr.msk.mxu1 %vm870_vm1, %v3304_v37 }
 0x495   : >> { %v3302_v41 = vpop.permute.xlu0 %3301 }
 0x497   : >> { %11316 = vmatpush3.xpose.msk.msra.mxu1 %vm870_vm1, %v3304_v37 }
 0x498   : >> { %11317 = vmatprep.subr.msk.mxu1 %vm870_vm1, %v3302_v41 }
 0x499   : >> { %v3298_v29 = vpop.permute.xlu0 %3297 }
 0x49b   : >> { %11318 = vmatpush3.xpose.msk.msra.mxu1 %vm870_vm1, %v3302_v41  ;;  %v18027_v41 = vld [vmem:[#allocation32_spill] sm:$0xff] }
 0x49c   : >> { %11319 = vmatprep.subr.msk.mxu1 %vm870_vm1, %v3300_v16 }
 0x49d   : >> { %v3294_v52 = vpop.permute.xlu0 %3293 }
 0x49f   : >> { %11320 = vmatpush3.xpose.msk.msra.mxu1 %vm870_vm1, %v3300_v16 }
 0x4a0   : >> { %11321 = vmatprep.subr.msk.mxu1 %vm870_vm1, %v3298_v29 }
 0x4a1   : >> { %v3290_v56 = vpop.permute.xlu0 %3289 }
 0x4a3   : >> { %11322 = vmatpush3.xpose.msk.msra.mxu1 %vm870_vm1, %v3298_v29  ;;  %v14195_v29 = vpop.permute.xlu1 %3265 }
 0x4a4   : >> { %11323 = vmatprep.subr.msk.mxu1 %vm870_vm1, %v3296_v43  ;;  %v11025_v37 = vpop.f32.mrf.mxu0 }
 0x4a5   : >> { %v3286_v58 = vpop.permute.xlu0 %3285 }
 0x4a6   : >> { %v1367_v60 = vpop.f32.mrf.mxu0 }
 0x4a7   : >> { %11324 = vmatpush3.xpose.msk.msra.mxu1 %vm870_vm1, %v3296_v43  ;;  %11046 = vmatprep.mubr.msk.f32.mxu0 %vm870_vm1, %v1367_v60  ;;  %v18028_v43 = vld [vmem:[#allocation31_spill] sm:$0xff] }
 0x4a8   : >> { %11325 = vmatprep.subr.msk.mxu1 %vm870_vm1, %v3294_v52  ;;  %11047 = vmatmul.mubr.msk.f32.vlgmr.msra.gmra.mxu0 %vm870_vm1, %v11025_v37  ;;  %v18029_v37 = vld [vmem:[#allocation34_spill] sm:$0xff] }
 0x4a9   : >> { %11117 = vmatpush3.msra.mxu0 %v13791_v15  ;;  %v3256_v16 = vpop.permute.xlu0 %3255 }
 0x4aa   : >> { %11118 = vmatprep.subr.mxu0 %v18027_v41  ;;  %11337 = vmatprep.mubr.msk.f32.mxu1 %vm870_vm1, %v3256_v16  ;;  %v18030_v16 = vld [vmem:[#allocation33_spill] sm:$0xff] }
 0x4ab   : >> { %11119 = vmatpush3.msra.mxu0 %v18027_v41  ;;  %11326 = vmatpush3.xpose.msk.msra.mxu1 %vm870_vm1, %v3294_v52  ;;  %v14207_v41 = vpop.permute.xlu1 %3269 }
 0x4ac   : >> { %11120 = vmatprep.subr.mxu0 %v18028_v43  ;;  %11327 = vmatprep.subr.msk.mxu1 %vm870_vm1, %v3292_v12  ;;  %v11028_v60 = vpop.f32.mrf.mxu0 }
 0x4ad   : >> { %11121 = vmatpush3.msra.mxu0 %v18028_v43  ;;  %v18031_v43 = vld [vmem:[#allocation36_spill] sm:$0xff] }
 0x4ae   : >> { %11122 = vmatprep.subr.mxu0 %v18029_v37  ;;  %v1377_v15 = vpop.f32.mrf.mxu0 }
 0x4af   : >> { %11123 = vmatpush3.msra.mxu0 %v18029_v37  ;;  %11328 = vmatpush3.xpose.msk.msra.mxu1 %vm870_vm1, %v3292_v12  ;;  %v18032_v12 = vld [vmem:[#allocation35_spill] sm:$0xff] }
 0x4b0   : >> { %11049 = vmatprep.mubr.msk.f32.mxu0 %vm870_vm1, %v1377_v15  ;;  %11124 = vmatprep.subr.mxu0 %v18030_v16  ;;  %v11031_v52 = vpop.f32.mrf.mxu0  ;;  %v18033_v15 = vld [vmem:[#allocation38_spill] sm:$0xff] }
 0x4b1   : >> { %11329 = vmatprep.subr.msk.mxu1 %vm870_vm1, %v3290_v56  ;;  %11050 = vmatmul.mubr.msk.f32.gmra.mxu0 %vm870_vm1, %v11028_v60 }
 0x4b2   : >> { %11125 = vmatpush3.msra.mxu0 %v18030_v16  ;;  %v1387_v48 = vpop.f32.mrf.mxu0  ;;  %v18034_v16 = vld [vmem:[#allocation37_spill] sm:$0xff] }
 0x4b3   : >> { %11126 = vmatprep.subr.mxu0 %v18031_v43  ;;  %11330 = vmatpush3.xpose.msk.msra.mxu1 %vm870_vm1, %v3290_v56  ;;  %v14221_v56 = vpop.permute.xlu1 %3273 }
 0x4b4   : >> { %11127 = vmatpush3.msra.mxu0 %v18031_v43  ;;  %11052 = vmatprep.mubr.msk.f32.mxu0 %vm870_vm1, %v1387_v48  ;;  %v11034_v60 = vpop.f32.mrf.mxu0  ;;  %v3260_v48 = vpop.permute.xlu0 %3259 }
 0x4b5   : >> { %11128 = vmatprep.subr.mxu0 %v18032_v12  ;;  %11331 = vmatprep.subr.msk.mxu1 %vm870_vm1, %v3288_v19 }
 0x4b6   : >> { %11053 = vmatmul.mubr.msk.f32.gmra.mxu0 %vm870_vm1, %v11031_v52  ;;  %v1397_v37 = vpop.f32.mrf.mxu0 }
 0x4b7   : >> { %11129 = vmatpush3.msra.mxu0 %v18032_v12  ;;  %11332 = vmatpush3.xpose.msk.msra.mxu1 %vm870_vm1, %v3288_v19  ;;  %v14239_v19 = vpop.permute.xlu1 %3277 }
 0x4b8   : >> { %11130 = vmatprep.subr.mxu0 %v18033_v15  ;;  %11055 = vmatprep.mubr.msk.f32.mxu0 %vm870_vm1, %v1397_v37  ;;  %v11037_v17 = vpop.f32.mrf.mxu0 }
 0x4b9   : >> { %11131 = vmatpush3.msra.mxu0 %v18033_v15  ;;  %11333 = vmatprep.subr.msk.mxu1 %vm870_vm1, %v3286_v58 }
 0x4ba   : >> { %11132 = vmatprep.subr.mxu0 %v18034_v16  ;;  %11056 = vmatmul.mubr.msk.f32.gmra.mxu0 %vm870_vm1, %v11034_v60  ;;  %v1407_v1 = vpop.f32.mrf.mxu0 }
 0x4bb   : >> { %11133 = vmatpush3.msra.mxu0 %v18034_v16  ;;  %11334 = vmatpush3.xpose.msk.msra.mxu1 %vm870_vm1, %v3286_v58  ;;  %v3264_v58 = vpop.permute.xlu0 %3263  ;;  %v3282_v20 = vpop.permute.xlu1 %3281 }
 0x4bc   : >> { %11134 = vmatprep.subr.mxu0 %v14147_v28  ;;  %11058 = vmatprep.mubr.msk.f32.mxu0 %vm870_vm1, %v1407_v1  ;;  %v11040_v55 = vpop.f32.mrf.mxu0 }
 0x4bd   : >> { %11135 = vmatpush3.msra.mxu0 %v14147_v28  ;;  %11335 = vmatprep.subr.msk.mxu1 %vm870_vm1, %v14174_v57 }
 0x4be   : >> { %11136 = vmatprep.subr.mxu0 %v14097_v30  ;;  %11059 = vmatmul.mubr.msk.f32.gmra.mxu0 %vm870_vm1, %v11037_v17  ;;  %v1417_v22 = vpop.f32.mrf.mxu0 }
 0x4bf   : >> { %11137 = vmatpush3.msra.mxu0 %v14097_v30  ;;  %11336 = vmatpush3.xpose.msk.msra.mxu1 %vm870_vm1, %v14174_v57  ;;  %v12229_v57 = vpop.eup %12228 }
 0x4c0   : >> { %11138 = vmatprep.subr.mxu0 %v14163_v26  ;;  %11061 = vmatprep.mubr.msk.f32.mxu0 %vm870_vm1, %v1417_v22  ;;  %v11043_v28 = vpop.f32.mrf.mxu0  ;;  %v12231_v31 = vpop.eup %12230 }
 0x4c1   : >> { %11139 = vmatpush3.msra.mxu0 %v14163_v26  ;;  %v3268_v26 = vpop.permute.xlu0 %3267 }
 0x4c2   : >> { %11140 = vmatprep.subr.mxu0 %v14101_v61  ;;  %11062 = vmatmul.mubr.msk.f32.gmra.mxu0 %vm870_vm1, %v11040_v55  ;;  %v1427_v30 = vpop.f32.mrf.mxu0 }
 0x4c3   : >> { %11141 = vmatpush3.msra.mxu0 %v14101_v61  ;;  %11338 = vmatmul.mubr.msk.f32.vlgmr.msra.gmra.mxu1 %vm870_vm1, %v14179_v7  ;;  %v2020_v61 = vmul.f32 %v12225_v25, %v13898_v23  ;;  %v2022_v23 = vmul.f32 %v12229_v57, %v13908_v5 }
 0x4c4   : >> { %11142 = vmatprep.subr.mxu0 %v14167_v49  ;;  %11340 = vmatprep.mubr.msk.f32.mxu1 %vm870_vm1, %v3260_v48 }
 0x4c5   : >> { %11143 = vmatpush3.msra.mxu0 %v14167_v49  ;;  %11064 = vmatprep.mubr.msk.f32.mxu0 %vm870_vm1, %v1427_v30  ;;  %v12233_v49 = vpop.eup %12232  ;;  %v3272_v43 = vpop.permute.xlu0 %3271 }
 0x4c6   : >> { %11065 = vmatmul.mubr.msk.f32.gmra.mxu0 %vm870_vm1, %v11043_v28  ;;  %v12235_v42 = vpop.eup %12234  ;;  %v2024_v5 = vmul.f32 %v12233_v49, %v13912_v21 }
 0x4c7   : >> { %11144 = vmatprep.mubr.msk.f32.mxu0 %vm1062_vm2, %v2020_v61  ;;  %11341 = vmatmul.mubr.msk.f32.gmra.mxu1 %vm870_vm1, %v14184_v3  ;;  %v2023_v3 = vmul.f32 %v12231_v31, %v13904_v34  ;;  %v2025_v34 = vmul.f32 %v12235_v42, %v13914_v35 }
 0x4c8   : >> { %11343 = vmatprep.mubr.msk.f32.mxu1 %vm870_vm1, %v3264_v58  ;;  %v2696_v7 = vpop.xlane.xlu1 %2695 }
 0x4c9   : >> { %v2734_v52 = vsub.f32 %v14052_v8, %v2696_v7  ;;  %v12237_v8 = vpop.eup %12236  ;;  %v3276_v63 = vpop.permute.xlu0 %3275 }
 0x4ca   : >> { %11145 = vmatmul.mubr.msk.f32.vlgmr.msra.gmra.mxu0 %vm1062_vm2, %v2021_v46  ;;  %v12239_v27 = vpop.eup %12238  ;;  %v2026_v50 = vmul.f32 %v12237_v8, %v13920_v24 }
 0x4cb   : >> { %11147 = vmatprep.mubr.msk.f32.mxu0 %vm1062_vm2, %v2022_v23  ;;  %11344 = vmatmul.mubr.msk.f32.gmra.mxu1 %vm870_vm1, %v14195_v29  ;;  %v2749_v11 = vmul.f32 1.442695, %v2734_v52  ;;  %v12241_v21 = vpop.eup %12240 }
 0x4cc   : >> { %11346 = vmatprep.mubr.msk.f32.mxu1 %vm870_vm1, %v3268_v26  ;;  %v12243_v29 = vpop.eup %12242  ;;  %v2705_v46 = vpop.xlane.xlu1 %2704 }
 0x4cd   : >> { %12250 = vpow2.f32 %v2749_v11  ;;  %v12245_v35 = vpop.eup %12244  ;;  %v3280_v12 = vpop.permute.xlu0 %3279  ;;  %v2029_v24 = vmul.f32 %v12243_v29, %v13930_v45 }
 0x4ce   : >> { %11148 = vmatmul.mubr.msk.f32.gmra.mxu0 %vm1062_vm2, %v2023_v3  ;;  %12252 = vrcp.f32 %v14165_v54  ;;  %v2027_v54 = vmul.f32 %v12239_v27, %v13922_v47  ;;  %v12247_v60 = vpop.eup %12246  ;;  %v2030_v37 = vmul.f32 %v12245_v35, %v13936_v39 }
 0x4cf   : >> { %11150 = vmatprep.mubr.msk.f32.mxu0 %vm1062_vm2, %v2024_v5  ;;  %11347 = vmatmul.mubr.msk.f32.gmra.mxu1 %vm870_vm1, %v14207_v41  ;;  %v2028_v41 = vmul.f32 %v12241_v21, %v13928_v14  ;;  %v12249_v47 = vpop.eup %12248  ;;  %v2031_v15 = vmul.f32 %v12247_v60, %v13946_v18 }
 0x4d0   : >> { %11349 = vmatprep.mubr.msk.f32.mxu1 %vm870_vm1, %v3272_v43  ;;  %v2032_v45 = vmul.f32 %v12249_v47, %v13950_v33 }
 0x4d2   : >> { %11151 = vmatmul.mubr.msk.f32.gmra.mxu0 %vm1062_vm2, %v2025_v34  ;;  %v2711_v34 = vpop.xlane.xlu1 %2710 }
 0x4d3   : >> { %11153 = vmatprep.mubr.msk.f32.mxu0 %vm1062_vm2, %v2026_v50  ;;  %11350 = vmatmul.mubr.msk.f32.gmra.mxu1 %vm870_vm1, %v14221_v56 }
 0x4d4   : >> { %11352 = vmatprep.mubr.msk.f32.mxu1 %vm870_vm1, %v3276_v63 }
 0x4d6   : >> { %11154 = vmatmul.mubr.msk.f32.gmra.mxu0 %vm1062_vm2, %v2027_v54  ;;  %v14378_v54 = vpop.xlane.xlu1 %2716 }
 0x4d7   : >> { %11156 = vmatprep.mubr.msk.f32.mxu0 %vm1062_vm2, %v2028_v41  ;;  %11353 = vmatmul.mubr.msk.f32.gmra.mxu1 %vm870_vm1, %v14239_v19 }
 0x4d8   : >> { %11355 = vmatprep.mubr.msk.f32.mxu1 %vm870_vm1, %v3280_v12 }
 0x4da   : >> { %11157 = vmatmul.mubr.msk.f32.gmra.mxu0 %vm1062_vm2, %v2029_v24  ;;  %v14305_v14 = vpop.eup %12250  ;;  %v14388_v24 = vpop.xlane.xlu1 %2722 }
 0x4db   : >> { %11159 = vmatprep.mubr.msk.f32.mxu0 %vm1062_vm2, %v2030_v37  ;;  %11356 = vmatmul.mubr.msk.f32.gmra.mxu1 %vm870_vm1, %v3282_v20  ;;  %v2778_v56 = vsel %vm1062_vm2, %v14305_v14, 0.0  ;;  %v12253_v48 = vpop.eup %12252 }
 0x4dc   : >> { %2779 = vadd.xlane.f32.xlu0 %v2778_v56  ;;  %v2033_v39 = vmul.f32 %v12253_v48, %v13995_v59 }
 0x4de   : >> { %11160 = vmatmul.mubr.msk.f32.gmra.mxu0 %vm1062_vm2, %v2031_v15  ;;  %v14396_v15 = vpop.xlane.xlu1 %2728 }
 0x4df   : >> { %11162 = vmatprep.mubr.msk.f32.mxu0 %vm1062_vm2, %v2032_v45  ;;  %v2739_v45 = vsub.f32 %v14068_v40, %v2711_v34 }
 0x4e2   : >> { %11163 = vmatmul.mubr.msk.f32.gmra.mxu0 %vm1062_vm2, %v2033_v39 }
 0x4f2   : >> { %v2693_v17 = vpop.xlane.xlu0 %2692  ;;  %2869 = vrot.lane.b32.xlu0 %v13201_v13, %s17944_s0 }
 0x4f3   : >> { %v2733_v16 = vsub.f32 %v14108_v32, %v2693_v17  ;;  %v810_v32 = vld [vmem:[%s17870_s5 + $0x8] sm:$0xff] }
 0x4f4   : >> { %11165 = vmatprep.subr.mxu0 %v810_v32 }
 0x4f5   : >> { %v2747_v18 = vmul.f32 1.442695, %v2733_v16  ;;  %11166 = vmatpush3.msra.mxu0 %v810_v32 }
 0x4f6   : >> { %v2699_v1 = vpop.xlane.xlu0 %2698 }
 0x4f7   : >> { %12254 = vpow2.f32 %v2747_v18 }
 0x4fa   : >> { %v2702_v55 = vpop.xlane.xlu0 %2701 }
 0x4fb   : >> { %v2736_v33 = vsub.f32 %v14123_v44, %v2702_v55  ;;  %v2735_v44 = vsub.f32 %v14115_v36, %v2699_v1  ;;  %v2759_v1 = vmul.f32 1.442695, %v2739_v45 }
 0x4fd   : >> { %v2753_v19 = vmul.f32 1.442695, %v2736_v33  ;;  %v2751_v28 = vmul.f32 1.442695, %v2735_v44 }
 0x4fe   : >> { %v2708_v30 = vpop.xlane.xlu0 %2707 }
 0x4ff   : >> { %12256 = vpow2.f32 %v2753_v19  ;;  %v2738_v38 = vsub.f32 %v14131_v51, %v2708_v30  ;;  %v2737_v51 = vsub.f32 %v14059_v10, %v2705_v46 }
 0x500   : >> { %12258 = vpow2.f32 %v2751_v28 }
 0x501   : >> { %v2757_v20 = vmul.f32 1.442695, %v2738_v38  ;;  %v2755_v31 = vmul.f32 1.442695, %v2737_v51 }
 0x502   : >> { %v2714_v7 = vpop.xlane.xlu0 %2713 }
 0x503   : >> { %12260 = vpow2.f32 %v2757_v20  ;;  %v2740_v23 = vsub.f32 %v14136_v53, %v2714_v7 }
 0x504   : >> { %v14321_v58 = vpop.eup %12254  ;;  %12262 = vpow2.f32 %v2755_v31 }
 0x505   : >> { %v2775_v59 = vsel %vm1062_vm2, %v14321_v58, 0.0  ;;  %v2761_v49 = vmul.f32 1.442695, %v2740_v23 }
 0x506   : >> { %2776 = vadd.xlane.f32.xlu1 %v2775_v59  ;;  %v2720_v29 = vpop.xlane.xlu0 %2719 }
 0x507   : >> { %12264 = vpow2.f32 %v2761_v49 }
 0x508   : >> { %12266 = vpow2.f32 %v2759_v1 }
 0x50a   : >> { %v14390_v60 = vpop.xlane.xlu0 %2725 }
 0x50c   : >> { %v14328_v22 = vpop.eup %12256 }
 0x50d   : >> { %v2784_v25 = vsel %vm1062_vm2, %v14328_v22, 0.0  ;;  %v14338_v26 = vpop.eup %12258 }
 0x50e   : >> { %v2781_v61 = vsel %vm1062_vm2, %v14338_v26, 0.0  ;;  %v14398_v48 = vpop.xlane.xlu0 %2731 }
 0x510   : >> { %v14342_v57 = vpop.eup %12260 }
 0x511   : >> { %2785 = vadd.xlane.f32.xlu0 %v2784_v25  ;;  %v2790_v36 = vsel %vm1062_vm2, %v14342_v57, 0.0  ;;  %v14354_v43 = vpop.eup %12262  ;;  %v18042_v25 = vld [vmem:[#allocation25_spill] sm:$0xff] }
 0x512   : >> { %v2787_v3 = vsel %vm1062_vm2, %v14354_v43, 0.0  ;;  %v2742_v44 = vsub.f32 %v18042_v25, %v2720_v29  ;;  %v18044_v29 = vld [vmem:[#allocation39_spill] sm:$0xff]  ;;  %v18047_v25 = vld [vmem:[#allocation21_spill] sm:$0xff] }
 0x514   : >> { %v14366_v8 = vpop.eup %12264  ;;  %v2765_v38 = vmul.f32 1.442695, %v2742_v44  ;;  %v18048_v44 = vld [vmem:[#allocation40_spill] sm:$0xff] }
 0x515   : >> { %v2796_v63 = vsel %vm1062_vm2, %v14366_v8, 0.0  ;;  %v14416_v46 = vpop.eup %12266 }
 0x516   : >> { %v2793_v23 = vsel %vm1062_vm2, %v14416_v46, 0.0 }
 0x517   : >> { %2871 = vrot.lane.b32.xlu1 %v13186_v9, %s17944_s0 }
 0x527   : >> { %2865 = vrot.lane.b32.xlu0 %v13179_v6, %s17944_s0 }
 0x53b   : >> { %2782 = vadd.xlane.f32.xlu1 %v2781_v61 }
 0x546   : >> { %2791 = vadd.xlane.f32.xlu0 %v2790_v36 }
 0x54c   : >> { %2867 = vrot.lane.b32.xlu1 %v13168_v4, %s17944_s0 }
 0x55c   : >> { %2861 = vrot.lane.b32.xlu0 %v13161_v2, %s17944_s0 }
 0x565   : >> { %v14403_v16 = vpop.xlane.xlu0 %2779 }
 0x568   : >> { %v14352_v52 = vpop.f32.mrf.mxu0 }
 0x569   : >> { %v2870_v59 = vpop.permute.xlu0 %2869 }
 0x56a   : >> { %v14356_v11 = vpop.f32.mrf.mxu0 }
 0x56b   : >> { %18035 = vst [vmem:[#allocation27_spill] sm:$0xff] %v14356_v11 }
 0x570   : >> { %2788 = vadd.xlane.f32.xlu1 %v2787_v3 }
 0x571   : >> { %v14360_v10 = vpop.f32.mrf.mxu0 }
 0x573   : >> { %v14362_v42 = vpop.f32.mrf.mxu0 }
 0x574   : >> { %18036 = vst [vmem:[#allocation28_spill] sm:$0xff] %v14362_v42  ;;  %v12760_v42 = vld [vmem:[%s17867_s2 + $0x48] sm:$0xff] }
 0x576   : >> { %v14364_v5 = vpop.f32.mrf.mxu0 }
 0x578   : >> { %v14368_v53 = vpop.f32.mrf.mxu0 }
 0x579   : >> { %18037 = vst [vmem:[#allocation29_spill] sm:$0xff] %v14368_v53 }
 0x57a   : >> { %v14370_v27 = vpop.f32.mrf.mxu0 }
 0x57b   : >> { %2797 = vadd.xlane.f32.xlu0 %v2796_v63  ;;  %v18043_v63 = vld [vmem:[#allocation23_spill] sm:$0xff] }
 0x57c   : >> { %v14374_v50 = vpop.f32.mrf.mxu0 }
 0x57d   : >> { %18038 = vst [vmem:[#allocation30_spill] sm:$0xff] %v14374_v50 }
 0x57e   : >> { %v14376_v21 = vpop.f32.mrf.mxu0 }
 0x580   : >> { %v14380_v41 = vpop.f32.mrf.mxu0 }
 0x581   : >> { %18039 = vst [vmem:[#allocation32_spill] sm:$0xff] %v14380_v41  ;;  %2863 = vrot.lane.b32.xlu1 %v13146_v0, %s17944_s0 }
 0x582   : >> { %v14384_v35 = vpop.f32.mrf.mxu0 }
 0x584   : >> { %v14386_v12 = vpop.f32.mrf.mxu0 }
 0x585   : >> { %18040 = vst [vmem:[#allocation31_spill] sm:$0xff] %v14386_v12  ;;  %v12758_v12 = vld [vmem:[%s17867_s2 + $0x28] sm:$0xff] }
 0x586   : >> { %v14392_v37 = vpop.f32.mrf.mxu0 }
 0x588   : >> { %v14394_v47 = vpop.f32.mrf.mxu0 }
 0x589   : >> { %18041 = vst [vmem:[#allocation34_spill] sm:$0xff] %v14394_v47 }
 0x58a   : >> { %v11146_v56 = vpop.f32.mrf.mxu0 }
 0x58c   : >> { %v2184_v39 = vpop.f32.mrf.mxu0 }
 0x58d   : >> { %11167 = vmatprep.mubr.msk.f32.mxu0 %vm870_vm1, %v2184_v39 }
 0x58e   : >> { %v11149_v17 = vpop.f32.mrf.mxu0  ;;  %11168 = vmatmul.mubr.msk.f32.vlgmr.msra.gmra.mxu0 %vm870_vm1, %v11146_v56  ;;  %v2741_v56 = vsub.f32 %v18044_v29, %v14378_v54  ;;  %v18051_v29 = vld [vmem:[#allocation19_spill] sm:$0xff] }
 0x58f   : >> { %v2777_v18 = vpop.xlane.xlu1 %2776 }
 0x590   : >> { %v2194_v55 = vpop.f32.mrf.mxu0  ;;  %12268 = vrcp.f32 %v2777_v18 }
 0x591   : >> { %11170 = vmatprep.mubr.msk.f32.mxu0 %vm870_vm1, %v2194_v55  ;;  %2857 = vrot.lane.b32.xlu0 %v13139_v62, %s17944_s0  ;;  %12270 = vpow2.f32 %v2765_v38  ;;  %v18046_v55 = vld [vmem:[#allocation24_spill] sm:$0xff] }
 0x592   : >> { %v11152_v33 = vpop.f32.mrf.mxu0  ;;  %11171 = vmatmul.mubr.msk.f32.gmra.mxu0 %vm870_vm1, %v11149_v17  ;;  %v18045_v17 = vld [vmem:[#allocation22_spill] sm:$0xff] }
 0x593   : >> { %v2872_v40 = vpop.permute.xlu1 %2871 }
 0x594   : >> { %v2204_v19 = vpop.f32.mrf.mxu0  ;;  %11237 = vmatprep.subr.mxu0 %v2872_v40 }
 0x595   : >> { %11173 = vmatprep.mubr.msk.f32.mxu0 %vm870_vm1, %v2204_v19  ;;  %11238 = vmatpush3.msra.mxu0 %v2872_v40 }
 0x596   : >> { %v11155_v32 = vpop.f32.mrf.mxu0  ;;  %11174 = vmatmul.mubr.msk.f32.gmra.mxu0 %vm870_vm1, %v11152_v33  ;;  %11239 = vmatprep.subr.mxu0 %v2870_v59  ;;  %v2744_v33 = vsub.f32 %v18046_v55, %v14390_v60  ;;  %v2743_v60 = vsub.f32 %v18048_v44, %v14388_v24  ;;  %v11339_v55 = vpop.f32.mrf.mxu1 }
 0x597   : >> { %11240 = vmatpush3.msra.mxu0 %v2870_v59 }
 0x598   : >> { %v2214_v28 = vpop.f32.mrf.mxu0  ;;  %v2769_v40 = vmul.f32 1.442695, %v2744_v33  ;;  %v2767_v38 = vmul.f32 1.442695, %v2743_v60  ;;  %v18053_v33 = vld [vmem:[#allocation18_spill] sm:$0xff] }
 0x599   : >> { %11176 = vmatprep.mubr.msk.f32.mxu0 %vm870_vm1, %v2214_v28 }
 0x59a   : >> { %v11158_v30 = vpop.f32.mrf.mxu0  ;;  %11177 = vmatmul.mubr.msk.f32.gmra.mxu0 %vm870_vm1, %v11155_v32  ;;  %v14434_v45 = vpop.xlane.xlu0 %2785 }
 0x59c   : >> { %v2224_v20 = vpop.f32.mrf.mxu0 }
 0x59d   : >> { %11179 = vmatprep.mubr.msk.f32.mxu0 %vm870_vm1, %v2224_v20  ;;  %v12269_v51 = vpop.eup %12268  ;;  %v18049_v20 = vld [vmem:[#allocation20_spill] sm:$0xff] }
 0x59e   : >> { %v11161_v61 = vpop.f32.mrf.mxu0  ;;  %11180 = vmatmul.mubr.msk.f32.gmra.mxu0 %vm870_vm1, %v11158_v30  ;;  %v2831_v49 = vmul.f32 %v12269_v51, %v14321_v58  ;;  %v14426_v3 = vpop.eup %12270  ;;  %v2763_v58 = vmul.f32 1.442695, %v2741_v56  ;;  %v18050_v51 = vld [vmem:[#allocation26_spill] sm:$0xff]  ;;  %v18052_v56 = vld [vmem:[#allocation41_spill] sm:$0xff] }
 0x59f   : >> { %v2802_v34 = vsel %vm1062_vm2, %v14426_v3, 0.0  ;;  %v2866_v1 = vpop.permute.xlu0 %2865 }
 0x5a0   : >> { %v2234_v36 = vpop.f32.mrf.mxu0  ;;  %12272 = vpow2.f32 %v2763_v58 }
 0x5a1   : >> { %11182 = vmatprep.mubr.msk.f32.mxu0 %vm870_vm1, %v2234_v36  ;;  %12274 = vpow2.f32 %v2769_v40 }
 0x5a2   : >> { %v11164_v31 = vpop.f32.mrf.mxu0  ;;  %11183 = vmatmul.mubr.msk.f32.gmra.mxu0 %vm870_vm1, %v11161_v61  ;;  %12276 = vpow2.f32 %v2767_v38 }
 0x5a4   : >> { %v2244_v7 = vpop.f32.mrf.mxu0 }
 0x5a5   : >> { %11185 = vmatprep.mubr.msk.f32.mxu0 %vm870_vm1, %v2244_v7  ;;  %2794 = vadd.xlane.f32.xlu1 %v2793_v23 }
 0x5a6   : >> { %11186 = vmatmul.mubr.msk.f32.gmra.mxu0 %vm870_vm1, %v11164_v31  ;;  %v2746_v31 = vsub.f32 %v18050_v51, %v14398_v48  ;;  %v2745_v48 = vsub.f32 %v18052_v56, %v14396_v15 }
 0x5a7   : >> { %11265 = vmatprep.mubr.msk.f32.mxu0 %vm1062_vm2, %v2831_v49 }
 0x5a8   : >> { %v2773_v7 = vmul.f32 1.442695, %v2746_v31  ;;  %v14493_v31 = vld [vmem:[%s17871_s6] ss:$0 sm:$0xff] }
 0x5a9   : >> { %v1620_v56 = vadd.f32 %v14352_v52, %v14493_v31 }
 0x5aa   : >> { %12278 = vpow2.f32 %v2773_v7  ;;  %v12756_v7 = vld [vmem:[%s17867_s2 + $0x8] sm:$0xff] }
 0x5ad   : >> { %v14442_v54 = vpop.eup %12272 }
 0x5ae   : >> { %v2799_v19 = vsel %vm1062_vm2, %v14442_v54, 0.0  ;;  %v14446_v59 = vpop.eup %12274 }
 0x5af   : >> { %v2808_v32 = vsel %vm1062_vm2, %v14446_v59, 0.0  ;;  %v14462_v24 = vpop.eup %12276 }
 0x5b0   : >> { %2803 = vadd.xlane.f32.xlu0 %v2802_v34  ;;  %v2805_v23 = vsel %vm1062_vm2, %v14462_v24, 0.0 }
 0x5b6   : >> { %2859 = vrot.lane.b32.xlu1 %v18043_v63, %s17944_s0 }
 0x5b7   : >> { %v14466_v49 = vpop.eup %12278 }
 0x5b8   : >> { %v2814_v34 = vsel %vm1062_vm2, %v14466_v49, 0.0 }
 0x5c4   : >> { %v14436_v39 = vpop.xlane.xlu1 %2782 }
 0x5c6   : >> { %2853 = vrot.lane.b32.xlu0 %v18045_v17, %s17944_s0 }
 0x5c8   : >> { %v2868_v18 = vpop.permute.xlu1 %2867 }
 0x5c9   : >> { %11241 = vmatprep.subr.mxu0 %v2868_v18 }
 0x5ca   : >> { %11242 = vmatpush3.msra.mxu0 %v2868_v18 }
 0x5cb   : >> { %11243 = vmatprep.subr.mxu0 %v2866_v1 }
 0x5cc   : >> { %11244 = vmatpush3.msra.mxu0 %v2866_v1  ;;  %v2771_v1 = vmul.f32 1.442695, %v2745_v48 }
 0x5ce   : >> { %12280 = vpow2.f32 %v2771_v1  ;;  %v12757_v1 = vld [vmem:[%s17867_s2 + $0x18] sm:$0xff] }
 0x5cf   : >> { %v14454_v28 = vpop.xlane.xlu0 %2791  ;;  %12282 = vrcp.f32 %v14403_v16 }
 0x5d0   : >> { %12284 = vrcp.f32 %v14436_v39 }
 0x5d1   : >> { %12286 = vrcp.f32 %v14434_v45 }
 0x5d3   : >> { %v2862_v36 = vpop.permute.xlu0 %2861 }
 0x5da   : >> { %2800 = vadd.xlane.f32.xlu1 %v2799_v19  ;;  %v14480_v19 = vpop.f32.mrf.mxu1 }
 0x5db   : >> { %v14484_v60 = vpop.eup %12280 }
 0x5dc   : >> { %v11342_v44 = vpop.f32.mrf.mxu1 }
 0x5de   : >> { %v14482_v15 = vpop.f32.mrf.mxu1 }
 0x5e0   : >> { %v11345_v38 = vpop.f32.mrf.mxu1 }
 0x5e1   : >> { %v14520_v41 = vadd.f32 %v12758_v12, %v11345_v38  ;;  %v12759_v12 = vld [vmem:[%s17867_s2 + $0x38] sm:$0xff] }
 0x5e5   : >> { %2809 = vadd.xlane.f32.xlu0 %v2808_v32 }
 0x5eb   : >> { %2855 = vrot.lane.b32.xlu1 %v18047_v25, %s17944_s0 }
 0x5f9   : >> { %v14456_v30 = vpop.xlane.xlu1 %2788 }
 0x5fa   : >> { %12288 = vrcp.f32 %v14456_v30 }
 0x5fb   : >> { %2849 = vrot.lane.b32.xlu0 %v18049_v20, %s17944_s0  ;;  %12290 = vrcp.f32 %v14454_v28 }
 0x5fd   : >> { %v2864_v61 = vpop.permute.xlu1 %2863 }
 0x5fe   : >> { %11245 = vmatprep.subr.mxu0 %v2864_v61 }
 0x5ff   : >> { %11246 = vmatpush3.msra.mxu0 %v2864_v61  ;;  %v2811_v61 = vsel %vm1062_vm2, %v14484_v60, 0.0 }
 0x600   : >> { %11247 = vmatprep.subr.mxu0 %v2862_v36 }
 0x601   : >> { %11248 = vmatpush3.msra.mxu0 %v2862_v36  ;;  %v14488_v36 = vpop.f32.mrf.mxu1 }
 0x603   : >> { %v11348_v51 = vpop.f32.mrf.mxu1 }
 0x604   : >> { %v14474_v58 = vpop.xlane.xlu0 %2797  ;;  %v14537_v38 = vadd.f32 %v12759_v12, %v11348_v51 }
 0x608   : >> { %v2858_v32 = vpop.permute.xlu0 %2857 }
 0x60f   : >> { %2806 = vadd.xlane.f32.xlu1 %v2805_v23  ;;  %v14498_v23 = vadd.f32 %v12756_v7, %v11339_v55  ;;  %v1622_v7 = vadd.f32 %v14360_v10, %v14493_v31  ;;  %v1624_v10 = vadd.f32 %v14364_v5, %v14493_v31  ;;  %v1626_v5 = vadd.f32 %v14370_v27, %v14493_v31 }
 0x61a   : >> { %2815 = vadd.xlane.f32.xlu0 %v2814_v34  ;;  %v14500_v34 = vpop.f32.mrf.mxu1 }
 0x61c   : >> { %v11351_v47 = vpop.f32.mrf.mxu1 }
 0x620   : >> { %2851 = vrot.lane.b32.xlu1 %v18051_v29, %s17944_s0 }
 0x62e   : >> { %v14476_v18 = vpop.xlane.xlu1 %2794 }
 0x62f   : >> { %12292 = vrcp.f32 %v14476_v18 }
 0x630   : >> { %2845 = vrot.lane.b32.xlu0 %v18053_v33, %s17944_s0  ;;  %12294 = vrcp.f32 %v14474_v58 }
 0x632   : >> { %v2860_v40 = vpop.permute.xlu1 %2859 }
 0x633   : >> { %11249 = vmatprep.subr.mxu0 %v2860_v40 }
 0x634   : >> { %11250 = vmatpush3.msra.mxu0 %v2860_v40  ;;  %v14507_v40 = vadd.f32 %v12757_v1, %v11342_v44 }
 0x635   : >> { %11251 = vmatprep.subr.mxu0 %v2858_v32 }
 0x636   : >> { %11252 = vmatpush3.msra.mxu0 %v2858_v32 }
 0x644   : >> { %2812 = vadd.xlane.f32.xlu1 %v2811_v61  ;;  %v3505_v61 = vsel %vm1062_vm2, %v14498_v23, -inf }
 0x64e   : >> { %v11169_v48 = vpop.f32.mrf.mxu0 }
 0x64f   : >> { %v14509_v32 = vadd.f32 %v11169_v48, %v1620_v56  ;;  %3506 = vmax.xlane.f32.xlu0 %v3505_v61  ;;  %v3511_v56 = vsel %vm1062_vm2, %v14507_v40, -inf  ;;  %v14526_v48 = vpop.f32.mrf.mxu1  ;;  %v18056_v61 = vld [vmem:[#allocation17_spill] sm:$0xff] }
 0x650   : >> { %v14513_v55 = vpop.f32.mrf.mxu0 }
 0x651   : >> { %18054 = vst [vmem:[#allocation33_spill] sm:$0xff] %v14513_v55  ;;  %v11354_v53 = vpop.f32.mrf.mxu1  ;;  %v14550_v55 = vadd.f32 %v12760_v42, %v11351_v47 }
 0x652   : >> { %v11172_v52 = vpop.f32.mrf.mxu0 }
 0x653   : >> { %v14522_v44 = vadd.f32 %v11172_v52, %v1622_v7  ;;  %3512 = vmax.xlane.f32.xlu0 %v3511_v56  ;;  %v3517_v52 = vsel %vm1062_vm2, %v14520_v41, -inf  ;;  %v3529_v47 = vsel %vm1062_vm2, %v14550_v55, -inf }
 0x654   : >> { %v14528_v1 = vpop.f32.mrf.mxu0 }
 0x655   : >> { %18055 = vst [vmem:[#allocation36_spill] sm:$0xff] %v14528_v1  ;;  %2847 = vrot.lane.b32.xlu1 %v18056_v61, %s17944_s0  ;;  %s18108_s0 = smov 112  }
 0x656   : >> { %v11175_v50 = vpop.f32.mrf.mxu0 }
 0x657   : >> { %v14539_v7 = vadd.f32 %v11175_v50, %v1624_v10  ;;  %3518 = vmax.xlane.f32.xlu0 %v3517_v52  ;;  %v3523_v50 = vsel %vm1062_vm2, %v14537_v38, -inf  ;;  %v3483_v10 = vpop.f32.mrf.mxu1  ;;  %v1628_v52 = vadd.f32 %v14376_v21, %v14493_v31 }
 0x658   : >> { %v14543_v56 = vpop.f32.mrf.mxu0 }
 0x659   : >> { %18057 = vst [vmem:[#allocation35_spill] sm:$0xff] %v14543_v56  ;;  %v12761_v56 = vld [vmem:[%s17867_s2 + $0x58] sm:$0xff] }
 0x65a   : >> { %v11178_v1 = vpop.f32.mrf.mxu0  ;;  %v14563_v11 = vadd.f32 %v12761_v56, %v11354_v53  ;;  %v14578_v53 = vpop.xlane.xlu0 %2803 }
 0x65b   : >> { %v14552_v51 = vadd.f32 %v11178_v1, %v1626_v5  ;;  %3524 = vmax.xlane.f32.xlu0 %v3523_v50  ;;  %v11357_v1 = vpop.f32.mrf.mxu1  ;;  %v1630_v50 = vadd.f32 %v14384_v35, %v14493_v31  ;;  %v1632_v35 = vadd.f32 %v14392_v37, %v14493_v31  ;;  %v12764_v37 = vld [vmem:[%s17867_s2 + $0x10] sm:$0xff] }
 0x65c   : >> { %v14556_v12 = vpop.f32.mrf.mxu0 }
 0x65d   : >> { %18058 = vst [vmem:[#allocation38_spill] sm:$0xff] %v14552_v51  ;;  %18059 = vst [vmem:[#allocation37_spill] sm:$0xff] %v14556_v12  ;;  %v12762_v12 = vld [vmem:[%s17867_s2 + $0x68] sm:$0xff] }
 0x65e   : >> { %v11181_v27 = vpop.f32.mrf.mxu0  ;;  %v14576_v51 = vadd.f32 %v12762_v12, %v11357_v1  ;;  %v2854_v1 = vpop.permute.xlu0 %2853 }
 0x65f   : >> { %v14565_v42 = vadd.f32 %v11181_v27, %v1628_v52  ;;  %3530 = vmax.xlane.f32.xlu0 %v3529_v47  ;;  %v3535_v27 = vsel %vm1062_vm2, %v14563_v11, -inf }
 0x660   : >> { %v14569_v5 = vpop.f32.mrf.mxu0  ;;  %v3541_v12 = vsel %vm1062_vm2, %v14576_v51, -inf }
 0x661   : >> { %18060 = vst [vmem:[#allocation25_spill] sm:$0xff] %v14565_v42  ;;  %18061 = vst [vmem:[#allocation23_spill] sm:$0xff] %v14569_v5 }
 0x662   : >> { %v11184_v21 = vpop.f32.mrf.mxu0 }
 0x663   : >> { %v14580_v56 = vadd.f32 %v11184_v21, %v1630_v50  ;;  %v2801_v52 = vpop.xlane.xlu1 %2800  ;;  %3536 = vmax.xlane.f32.xlu0 %v3535_v27  ;;  %v12763_v50 = vld [vmem:[%s17867_s2] sm:$0xff]  ;;  %v14602_v27 = vadd.f32 %v12764_v37, %v14482_v15  ;;  %v12766_v15 = vld [vmem:[%s17867_s2 + $0x30] sm:$0xff] }
 0x664   : >> { %v14584_v5 = vpop.f32.mrf.mxu0  ;;  %v14596_v21 = vadd.f32 %v12763_v50, %v14480_v19  ;;  %12296 = vrcp.f32 %v2801_v52 }
 0x665   : >> { %18062 = vst [vmem:[#allocation39_spill] sm:$0xff] %v14584_v5  ;;  %v3508_v19 = vsel %vm1062_vm2, %v14602_v27, -inf  ;;  %12298 = vrcp.f32 %v14578_v53 }
 0x666   : >> { %v11187_v47 = vpop.f32.mrf.mxu0 }
 0x667   : >> { %v14588_v42 = vadd.f32 %v11187_v47, %v1632_v35  ;;  %v2856_v61 = vpop.permute.xlu1 %2855  ;;  %3542 = vmax.xlane.f32.xlu0 %v3541_v12  ;;  %v3502_v35 = vsel %vm1062_vm2, %v14596_v21, -inf  ;;  %v14618_v12 = vadd.f32 %v12766_v15, %v14500_v34  ;;  %v12768_v34 = vld [vmem:[%s17867_s2 + $0x50] sm:$0xff] }
 0x668   : >> { %11253 = vmatprep.subr.mxu0 %v2856_v61 }
 0x669   : >> { %11254 = vmatpush3.msra.mxu0 %v2856_v61  ;;  %v12765_v61 = vld [vmem:[%s17867_s2 + $0x20] sm:$0xff]  ;;  %v3520_v37 = vsel %vm1062_vm2, %v14618_v12, -inf }
 0x66a   : >> { %11255 = vmatprep.subr.mxu0 %v2854_v1  ;;  %v14610_v47 = vadd.f32 %v12765_v61, %v14488_v36  ;;  %v12767_v36 = vld [vmem:[%s17867_s2 + $0x40] sm:$0xff] }
 0x66b   : >> { %11256 = vmatpush3.msra.mxu0 %v2854_v1  ;;  %v14626_v50 = vadd.f32 %v12767_v36, %v14526_v48  ;;  %v12769_v48 = vld [vmem:[%s17867_s2 + $0x60] sm:$0xff] }
 0x66c   : >> { %v3514_v1 = vsel %vm1062_vm2, %v14610_v47, -inf }
 0x66d   : >> { %v3526_v61 = vsel %vm1062_vm2, %v14626_v50, -inf }
 0x679   : >> { %3503 = vmax.xlane.f32.xlu1 %v3502_v35  ;;  %v14633_v35 = vadd.f32 %v12768_v34, %v3483_v10  ;;  %v2810_v10 = vpop.xlane.xlu0 %2809 }
 0x67d   : >> { %3509 = vmax.xlane.f32.xlu1 %v3508_v19  ;;  %v3493_v19 = vpop.f32.mrf.mxu1  ;;  %v2850_v5 = vpop.permute.xlu0 %2849 }
 0x67e   : >> { %v14640_v15 = vadd.f32 %v12769_v48, %v3493_v19  ;;  %v12283_v48 = vpop.eup %12282 }
 0x67f   : >> { %v2832_v39 = vmul.f32 %v12283_v48, %v14305_v14 }
 0x680   : >> { %v3538_v36 = vsel %vm1062_vm2, %v14640_v15, -inf }
 0x681   : >> { %3515 = vmax.xlane.f32.xlu1 %v3514_v1  ;;  %v3532_v1 = vsel %vm1062_vm2, %v14633_v35, -inf }
 0x685   : >> { %3521 = vmax.xlane.f32.xlu1 %v3520_v37 }
 0x689   : >> { %3527 = vmax.xlane.f32.xlu1 %v3526_v61 }
 0x68d   : >> { %3533 = vmax.xlane.f32.xlu1 %v3532_v1 }
 0x691   : >> { %3539 = vmax.xlane.f32.xlu1 %v3538_v36 }
 0x698   : >> { %v2807_v37 = vpop.xlane.xlu1 %2806 }
 0x699   : >> { %12300 = vrcp.f32 %v2807_v37 }
 0x69a   : >> { %12302 = vrcp.f32 %v2810_v10 }
 0x69c   : >> { %v2852_v34 = vpop.permute.xlu1 %2851 }
 0x69d   : >> { %11257 = vmatprep.subr.mxu0 %v2852_v34 }
 0x69e   : >> { %11258 = vmatpush3.msra.mxu0 %v2852_v34 }
 0x69f   : >> { %11259 = vmatprep.subr.mxu0 %v2850_v5 }
 0x6a0   : >> { %11260 = vmatpush3.msra.mxu0 %v2850_v5  ;;  %v12285_v5 = vpop.eup %12284 }
 0x6a1   : >> { %v12287_v45 = vpop.eup %12286  ;;  %v2833_v28 = vmul.f32 %v12285_v5, %v14338_v26 }
 0x6a2   : >> { %v12289_v30 = vpop.eup %12288  ;;  %v2834_v58 = vmul.f32 %v12287_v45, %v14328_v22 }
 0x6a3   : >> { %v2816_v61 = vpop.xlane.xlu0 %2815  ;;  %v12291_v18 = vpop.eup %12290  ;;  %v2835_v14 = vmul.f32 %v12289_v30, %v14354_v43 }
 0x6a4   : >> { %v12293_v53 = vpop.eup %12292  ;;  %v2836_v37 = vmul.f32 %v12291_v18, %v14342_v57 }
 0x6a5   : >> { %v12295_v34 = vpop.eup %12294  ;;  %v2837_v10 = vmul.f32 %v12293_v53, %v14416_v46 }
 0x6a6   : >> { %v12297_v22 = vpop.eup %12296  ;;  %v2838_v43 = vmul.f32 %v12295_v34, %v14366_v8 }
 0x6a7   : >> { %v2846_v16 = vpop.permute.xlu0 %2845 }
 0x6cd   : >> { %v2813_v19 = vpop.xlane.xlu1 %2812 }
 0x6ce   : >> { %12304 = vrcp.f32 %v2813_v19  ;;  %v2839_v19 = vmul.f32 %v12297_v22, %v14442_v54 }
 0x6cf   : >> { %12306 = vrcp.f32 %v2816_v61 }
 0x6d1   : >> { %v2848_v1 = vpop.permute.xlu1 %2847 }
 0x6d2   : >> { %11261 = vmatprep.subr.mxu0 %v2848_v1 }
 0x6d3   : >> { %11262 = vmatpush3.msra.mxu0 %v2848_v1 }
 0x6d4   : >> { %11263 = vmatprep.subr.mxu0 %v2846_v16 }
 0x6d5   : >> { %11264 = vmatpush3.msra.mxu0 %v2846_v16 }
 0x6d6   : >> { %11266 = vmatmul.mubr.msk.f32.vlgmr.msra.gmra.mxu0 %vm1062_vm2, %v2832_v39 }
 0x6d7   : >> { %11268 = vmatprep.mubr.msk.f32.mxu0 %vm1062_vm2, %v2833_v28 }
 0x6d8   : >> { %v3507_v52 = vpop.xlane.xlu0 %3506 }
 0x6d9   : >> { %v3545_v36 = vsub.f32 %v14498_v23, %v3507_v52  ;;  %v12299_v23 = vpop.eup %12298 }
 0x6da   : >> { %11269 = vmatmul.mubr.msk.f32.gmra.mxu0 %vm1062_vm2, %v2834_v58  ;;  %v12301_v48 = vpop.eup %12300  ;;  %v2840_v57 = vmul.f32 %v12299_v23, %v14426_v3 }
 0x6db   : >> { %11271 = vmatprep.mubr.msk.f32.mxu0 %vm1062_vm2, %v2835_v14  ;;  %v3560_v26 = vmul.f32 1.442695, %v3545_v36  ;;  %v12303_v61 = vpop.eup %12302  ;;  %v2841_v46 = vmul.f32 %v12301_v48, %v14462_v24 }
 0x6dc   : >> { %v12305_v1 = vpop.eup %12304  ;;  %v2842_v8 = vmul.f32 %v12303_v61, %v14446_v59  ;;  %v3513_v45 = vpop.xlane.xlu0 %3512 }
 0x6dd   : >> { %12308 = vpow2.f32 %v3560_v26  ;;  %v12307_v5 = vpop.eup %12306  ;;  %v2843_v54 = vmul.f32 %v12305_v1, %v14484_v60  ;;  %v3547_v28 = vsub.f32 %v14507_v40, %v3513_v45 }
 0x6de   : >> { %11272 = vmatmul.mubr.msk.f32.gmra.mxu0 %vm1062_vm2, %v2836_v37  ;;  %v2844_v24 = vmul.f32 %v12307_v5, %v14466_v49 }
 0x6df   : >> { %11274 = vmatprep.mubr.msk.f32.mxu0 %vm1062_vm2, %v2837_v10  ;;  %v3564_v30 = vmul.f32 1.442695, %v3547_v28 }
 0x6e0   : >> { %v3519_v53 = vpop.xlane.xlu0 %3518 }
 0x6e1   : >> { %v3549_v36 = vsub.f32 %v14520_v41, %v3519_v53 }
 0x6e2   : >> { %11275 = vmatmul.mubr.msk.f32.gmra.mxu0 %vm1062_vm2, %v2838_v43 }
 0x6e3   : >> { %11277 = vmatprep.mubr.msk.f32.mxu0 %vm1062_vm2, %v2839_v19  ;;  %v3568_v26 = vmul.f32 1.442695, %v3549_v36 }
 0x6e4   : >> { %v3525_v22 = vpop.xlane.xlu0 %3524 }
 0x6e5   : >> { %v3551_v43 = vsub.f32 %v14537_v38, %v3525_v22  ;;  %v14732_v38 = vpop.f32.mrf.mxu0 }
 0x6e6   : >> { %11278 = vmatmul.mubr.msk.f32.gmra.mxu0 %vm1062_vm2, %v2840_v57 }
 0x6e7   : >> { %11280 = vmatprep.mubr.msk.f32.mxu0 %vm1062_vm2, %v2841_v46  ;;  %v3572_v23 = vmul.f32 1.442695, %v3551_v43 }
 0x6ea   : >> { %11281 = vmatmul.mubr.msk.f32.gmra.mxu0 %vm1062_vm2, %v2842_v8  ;;  %v14678_v16 = vpop.eup %12308 }
 0x6eb   : >> { %11283 = vmatprep.mubr.msk.f32.mxu0 %vm1062_vm2, %v2843_v54  ;;  %v3589_v3 = vsel %vm1062_vm2, %v14678_v16, 0.0 }
 0x6ec   : >> { %3590 = vadd.xlane.f32.xlu0 %v3589_v3 }
 0x6ee   : >> { %11284 = vmatmul.mubr.msk.f32.gmra.mxu0 %vm1062_vm2, %v2844_v24 }
 0x702   : >> { %v3504_v39 = vpop.xlane.xlu1 %3503  ;;  %3680 = vrot.lane.b32.xlu0 %v13201_v13, %s17942_s18 }
 0x703   : >> { %v3544_v59 = vsub.f32 %v14596_v21, %v3504_v39  ;;  %v811_v21 = vld [vmem:[%s17870_s5 + $0x10] sm:$0xff] }
 0x704   : >> { %11286 = vmatprep.subr.mxu0 %v811_v21 }
 0x705   : >> { %v3558_v60 = vmul.f32 1.442695, %v3544_v59  ;;  %11287 = vmatpush3.msra.mxu0 %v811_v21 }
 0x706   : >> { %v3510_v40 = vpop.xlane.xlu1 %3509 }
 0x707   : >> { %12310 = vpow2.f32 %v3558_v60  ;;  %v3546_v52 = vsub.f32 %v14602_v27, %v3510_v40 }
 0x708   : >> { %12312 = vpow2.f32 %v3564_v30 }
 0x709   : >> { %v3562_v14 = vmul.f32 1.442695, %v3546_v52 }
 0x70b   : >> { %12314 = vpow2.f32 %v3562_v14 }
 0x70c   : >> { %12316 = vpow2.f32 %v3568_v26 }
 0x714   : >> { %v14689_v58 = vpop.eup %12310 }
 0x715   : >> { %v3586_v49 = vsel %vm1062_vm2, %v14689_v58, 0.0  ;;  %v14696_v13 = vpop.eup %12312 }
 0x716   : >> { %3587 = vadd.xlane.f32.xlu1 %v3586_v49  ;;  %v3595_v18 = vsel %vm1062_vm2, %v14696_v13, 0.0 }
 0x718   : >> { %v14706_v37 = vpop.eup %12314 }
 0x719   : >> { %v3592_v34 = vsel %vm1062_vm2, %v14706_v37, 0.0 }
 0x721   : >> { %3596 = vadd.xlane.f32.xlu0 %v3595_v18 }
 0x727   : >> { %3682 = vrot.lane.b32.xlu1 %v13186_v9, %s17942_s18  ;;  %v14710_v9 = vpop.eup %12316 }
 0x728   : >> { %v3601_v27 = vsel %vm1062_vm2, %v14710_v9, 0.0 }
 0x737   : >> { %3676 = vrot.lane.b32.xlu0 %v13179_v6, %s17942_s18  ;;  %v3516_v6 = vpop.xlane.xlu1 %3515 }
 0x738   : >> { %v3548_v41 = vsub.f32 %v14610_v47, %v3516_v6 }
 0x73a   : >> { %v3566_v10 = vmul.f32 1.442695, %v3548_v41 }
 0x73b   : >> { %v3522_v57 = vpop.xlane.xlu1 %3521 }
 0x73c   : >> { %12318 = vpow2.f32 %v3566_v10  ;;  %v3550_v39 = vsub.f32 %v14618_v12, %v3522_v57 }
 0x73d   : >> { %12320 = vpow2.f32 %v3572_v23 }
 0x73e   : >> { %v3570_v28 = vmul.f32 1.442695, %v3550_v39 }
 0x73f   : >> { %v14728_v61 = vpop.xlane.xlu1 %3527 }
 0x743   : >> { %v14736_v1 = vpop.xlane.xlu1 %3533 }
 0x747   : >> { %v14742_v24 = vpop.xlane.xlu1 %3539 }
 0x749   : >> { %v14720_v19 = vpop.eup %12318 }
 0x74a   : >> { %v3598_v48 = vsel %vm1062_vm2, %v14720_v19, 0.0 }
 0x74b   : >> { %3593 = vadd.xlane.f32.xlu1 %v3592_v34 }
 0x756   : >> { %3602 = vadd.xlane.f32.xlu0 %v3601_v27 }
 0x75c   : >> { %3678 = vrot.lane.b32.xlu1 %v13168_v4, %s17942_s18  ;;  %v14724_v4 = vpop.eup %12320 }
 0x75d   : >> { %v3607_v47 = vsel %vm1062_vm2, %v14724_v4, 0.0 }
 0x76c   : >> { %3672 = vrot.lane.b32.xlu0 %v13161_v2, %s17942_s18  ;;  %v3531_v2 = vpop.xlane.xlu0 %3530 }
 0x76d   : >> { %v3553_v52 = vsub.f32 %v14550_v55, %v3531_v2 }
 0x770   : >> { %v14734_v46 = vpop.xlane.xlu0 %3536 }
 0x774   : >> { %v14740_v3 = vpop.xlane.xlu0 %3542 }
 0x778   : >> { %v14747_v60 = vpop.xlane.xlu0 %3590 }
 0x77c   : >> { %v3681_v18 = vpop.permute.xlu0 %3680 }
 0x780   : >> { %3599 = vadd.xlane.f32.xlu1 %v3598_v48 }
 0x78b   : >> { %3608 = vadd.xlane.f32.xlu0 %v3607_v47 }
 0x791   : >> { %3674 = vrot.lane.b32.xlu1 %v13146_v0, %s17942_s18 }
 0x796   : >> { %v11267_v8 = vpop.f32.mrf.mxu0 }
 0x798   : >> { %v2995_v5 = vpop.f32.mrf.mxu0 }
 0x799   : >> { %11288 = vmatprep.mubr.msk.f32.mxu0 %vm870_vm1, %v2995_v5 }
 0x79a   : >> { %v11270_v54 = vpop.f32.mrf.mxu0  ;;  %11289 = vmatmul.mubr.msk.f32.vlgmr.msra.gmra.mxu0 %vm870_vm1, %v11267_v8 }
 0x79c   : >> { %v3005_v0 = vpop.f32.mrf.mxu0 }
 0x79d   : >> { %11291 = vmatprep.mubr.msk.f32.mxu0 %vm870_vm1, %v3005_v0 }
 0x79e   : >> { %v11273_v59 = vpop.f32.mrf.mxu0  ;;  %11292 = vmatmul.mubr.msk.f32.gmra.mxu0 %vm870_vm1, %v11270_v54 }
 0x79f   : >> { %v3588_v45 = vpop.xlane.xlu1 %3587 }
 0x7a0   : >> { %v3015_v30 = vpop.f32.mrf.mxu0  ;;  %12322 = vrcp.f32 %v3588_v45 }
 0x7a1   : >> { %11294 = vmatprep.mubr.msk.f32.mxu0 %vm870_vm1, %v3015_v30  ;;  %3668 = vrot.lane.b32.xlu0 %v13139_v62, %s17942_s18  ;;  %12324 = vpow2.f32 %v3570_v28  ;;  %v3576_v62 = vmul.f32 1.442695, %v3553_v52 }
 0x7a2   : >> { %v11276_v49 = vpop.f32.mrf.mxu0  ;;  %11295 = vmatmul.mubr.msk.f32.gmra.mxu0 %vm870_vm1, %v11273_v59 }
 0x7a3   : >> { %v3683_v12 = vpop.permute.xlu1 %3682  ;;  %12326 = vpow2.f32 %v3576_v62 }
 0x7a4   : >> { %v3025_v21 = vpop.f32.mrf.mxu0  ;;  %11358 = vmatprep.subr.mxu0 %v3683_v12 }
 0x7a5   : >> { %11297 = vmatprep.mubr.msk.f32.mxu0 %vm870_vm1, %v3025_v21  ;;  %11359 = vmatpush3.msra.mxu0 %v3683_v12 }
 0x7a6   : >> { %v11279_v40 = vpop.f32.mrf.mxu0  ;;  %11298 = vmatmul.mubr.msk.f32.gmra.mxu0 %vm870_vm1, %v11276_v49  ;;  %11360 = vmatprep.subr.mxu0 %v3681_v18 }
 0x7a7   : >> { %11361 = vmatpush3.msra.mxu0 %v3681_v18 }
 0x7a8   : >> { %v3035_v14 = vpop.f32.mrf.mxu0 }
 0x7a9   : >> { %11300 = vmatprep.mubr.msk.f32.mxu0 %vm870_vm1, %v3035_v14 }
 0x7aa   : >> { %v11282_v53 = vpop.f32.mrf.mxu0  ;;  %11301 = vmatmul.mubr.msk.f32.gmra.mxu0 %vm870_vm1, %v11279_v40  ;;  %v14776_v43 = vpop.xlane.xlu0 %3596 }
 0x7ac   : >> { %v3045_v36 = vpop.f32.mrf.mxu0 }
 0x7ad   : >> { %11303 = vmatprep.mubr.msk.f32.mxu0 %vm870_vm1, %v3045_v36  ;;  %v12323_v26 = vpop.eup %12322  ;;  %v18063_v36 = vld [vmem:[#allocation17_spill] sm:$0xff] }
 0x7ae   : >> { %v11285_v34 = vpop.f32.mrf.mxu0  ;;  %11304 = vmatmul.mubr.msk.f32.gmra.mxu0 %vm870_vm1, %v11282_v53  ;;  %v14760_v6 = vpop.eup %12324  ;;  %v3642_v55 = vmul.f32 %v12323_v26, %v14689_v58  ;;  %v3552_v58 = vsub.f32 %v14626_v50, %v14728_v61 }
 0x7af   : >> { %v3604_v41 = vsel %vm1062_vm2, %v14760_v6, 0.0  ;;  %v3677_v47 = vpop.permute.xlu0 %3676 }
 0x7b0   : >> { %v3055_v27 = vpop.f32.mrf.mxu0  ;;  %v14768_v10 = vpop.eup %12326  ;;  %v3574_v48 = vmul.f32 1.442695, %v3552_v58 }
 0x7b1   : >> { %11306 = vmatprep.mubr.msk.f32.mxu0 %vm870_vm1, %v3055_v27  ;;  %v3613_v22 = vsel %vm1062_vm2, %v14768_v10, 0.0 }
 0x7b2   : >> { %11307 = vmatmul.mubr.msk.f32.gmra.mxu0 %vm870_vm1, %v11285_v34  ;;  %12328 = vpow2.f32 %v3574_v48 }
 0x7b3   : >> { %11386 = vmatprep.mubr.msk.f32.mxu0 %vm1062_vm2, %v3642_v55 }
 0x7b5   : >> { %3605 = vadd.xlane.f32.xlu1 %v3604_v41 }
 0x7bf   : >> { %v14784_v50 = vpop.eup %12328 }
 0x7c0   : >> { %3614 = vadd.xlane.f32.xlu0 %v3613_v22  ;;  %v3610_v61 = vsel %vm1062_vm2, %v14784_v50, 0.0 }
 0x7c6   : >> { %3670 = vrot.lane.b32.xlu1 %v18043_v63, %s17942_s18  ;;  %v3555_v63 = vsub.f32 %v14563_v11, %v14734_v46  ;;  %v3554_v11 = vsub.f32 %v14633_v35, %v14736_v1 }
 0x7c8   : >> { %v3580_v2 = vmul.f32 1.442695, %v3555_v63  ;;  %v3578_v54 = vmul.f32 1.442695, %v3554_v11 }
 0x7ca   : >> { %12330 = vpow2.f32 %v3580_v2 }
 0x7cb   : >> { %12332 = vpow2.f32 %v3578_v54 }
 0x7d4   : >> { %v14778_v23 = vpop.xlane.xlu1 %3593 }
 0x7d6   : >> { %3664 = vrot.lane.b32.xlu0 %v18045_v17, %s17942_s18 }
 0x7d7   : >> { %v14788_v8 = vpop.eup %12330 }
 0x7d8   : >> { %v3679_v57 = vpop.permute.xlu1 %3678  ;;  %v3619_v17 = vsel %vm1062_vm2, %v14788_v8, 0.0  ;;  %v14804_v35 = vpop.eup %12332 }
 0x7d9   : >> { %11362 = vmatprep.subr.mxu0 %v3679_v57  ;;  %v3616_v1 = vsel %vm1062_vm2, %v14804_v35, 0.0 }
 0x7da   : >> { %11363 = vmatpush3.msra.mxu0 %v3679_v57 }
 0x7db   : >> { %11364 = vmatprep.subr.mxu0 %v3677_v47 }
 0x7dc   : >> { %11365 = vmatpush3.msra.mxu0 %v3677_v47 }
 0x7df   : >> { %v14796_v46 = vpop.xlane.xlu0 %3602 }
 0x7e3   : >> { %v3673_v0 = vpop.permute.xlu0 %3672 }
 0x7ea   : >> { %3611 = vadd.xlane.f32.xlu1 %v3610_v61 }
 0x7f5   : >> { %3620 = vadd.xlane.f32.xlu0 %v3619_v17 }
 0x7fb   : >> { %3666 = vrot.lane.b32.xlu1 %v18047_v25, %s17942_s18  ;;  %v3557_v25 = vsub.f32 %v14576_v51, %v14740_v3  ;;  %v3556_v51 = vsub.f32 %v14640_v15, %v14742_v24 }
 0x7fd   : >> { %v3584_v59 = vmul.f32 1.442695, %v3557_v25  ;;  %v3582_v30 = vmul.f32 1.442695, %v3556_v51 }
 0x7ff   : >> { %12334 = vpow2.f32 %v3584_v59 }
 0x800   : >> { %12336 = vpow2.f32 %v3582_v30 }
 0x801   : >> { %12338 = vrcp.f32 %v14747_v60  ;;  %v812_v60 = vld [vmem:[%s17870_s5 + $0x18] sm:$0xff] }
 0x802   : >> { %12340 = vrcp.f32 %v14778_v23 }
 0x803   : >> { %12342 = vrcp.f32 %v14776_v43 }
 0x809   : >> { %v14798_v5 = vpop.xlane.xlu1 %3599 }
 0x80a   : >> { %12344 = vrcp.f32 %v14798_v5 }
 0x80b   : >> { %3660 = vrot.lane.b32.xlu0 %v18049_v20, %s17942_s18  ;;  %12346 = vrcp.f32 %v14796_v46 }
 0x80c   : >> { %v14808_v45 = vpop.eup %12334 }
 0x80d   : >> { %v3675_v39 = vpop.permute.xlu1 %3674  ;;  %v3625_v20 = vsel %vm1062_vm2, %v14808_v45, 0.0  ;;  %v14818_v21 = vpop.eup %12336 }
 0x80e   : >> { %11366 = vmatprep.subr.mxu0 %v3675_v39  ;;  %v12339_v25 = vpop.eup %12338 }
 0x80f   : >> { %11367 = vmatpush3.msra.mxu0 %v3675_v39  ;;  %v3643_v43 = vmul.f32 %v12339_v25, %v14678_v16  ;;  %v18068_v25 = vld [vmem:[#allocation28_spill] sm:$0xff] }
 0x810   : >> { %11368 = vmatprep.subr.mxu0 %v3673_v0 }
 0x811   : >> { %11369 = vmatpush3.msra.mxu0 %v3673_v0 }
 0x814   : >> { %v3609_v3 = vpop.xlane.xlu0 %3608 }
 0x818   : >> { %v3669_v12 = vpop.permute.xlu0 %3668 }
 0x81f   : >> { %3617 = vadd.xlane.f32.xlu1 %v3616_v1  ;;  %v12341_v1 = vpop.eup %12340 }
 0x820   : >> { %v12343_v23 = vpop.eup %12342  ;;  %v3644_v46 = vmul.f32 %v12341_v1, %v14706_v37 }
 0x821   : >> { %v12345_v5 = vpop.eup %12344  ;;  %v3645_v51 = vmul.f32 %v12343_v23, %v14696_v13 }
 0x822   : >> { %v3646_v16 = vmul.f32 %v12345_v5, %v14720_v19 }
 0x82a   : >> { %3626 = vadd.xlane.f32.xlu0 %v3625_v20 }
 0x830   : >> { %3662 = vrot.lane.b32.xlu1 %v18051_v29, %s17942_s18  ;;  %v3622_v29 = vsel %vm1062_vm2, %v14818_v21, 0.0 }
 0x83e   : >> { %v3606_v28 = vpop.xlane.xlu1 %3605 }
 0x83f   : >> { %12348 = vrcp.f32 %v3606_v28 }
 0x840   : >> { %3656 = vrot.lane.b32.xlu0 %v18053_v33, %s17942_s18  ;;  %12350 = vrcp.f32 %v3609_v3  ;;  %v12347_v3 = vpop.eup %12346 }
 0x841   : >> { %v3647_v37 = vmul.f32 %v12347_v3, %v14710_v9  ;;  %v18071_v3 = vld [vmem:[#allocation29_spill] sm:$0xff] }
 0x842   : >> { %v3671_v49 = vpop.permute.xlu1 %3670 }
 0x843   : >> { %11370 = vmatprep.subr.mxu0 %v3671_v49 }
 0x844   : >> { %11371 = vmatpush3.msra.mxu0 %v3671_v49 }
 0x845   : >> { %11372 = vmatprep.subr.mxu0 %v3669_v12 }
 0x846   : >> { %11373 = vmatpush3.msra.mxu0 %v3669_v12 }
 0x849   : >> { %v3615_v47 = vpop.xlane.xlu0 %3614 }
 0x84c   : >> { %v12349_v28 = vpop.eup %12348 }
 0x84d   : >> { %v3665_v17 = vpop.permute.xlu0 %3664  ;;  %v12351_v30 = vpop.eup %12350  ;;  %v3648_v49 = vmul.f32 %v12349_v28, %v14760_v6 }
 0x84e   : >> { %v3649_v13 = vmul.f32 %v12351_v30, %v14724_v4  ;;  %v18072_v30 = vld [vmem:[#allocation3_spill] sm:$0xff] }
 0x854   : >> { %3623 = vadd.xlane.f32.xlu1 %v3622_v29 }
 0x85a   : >> { %v11290_v15 = vpop.f32.mrf.mxu0 }
 0x85b   : >> { %v14823_v24 = vadd.f32 %v11290_v15, %v14509_v32  ;;  %v18064_v32 = vld [vmem:[#allocation38_spill] sm:$0xff] }
 0x85c   : >> { %v14825_v18 = vpop.f32.mrf.mxu0 }
 0x85e   : >> { %v11293_v33 = vpop.f32.mrf.mxu0 }
 0x85f   : >> { %v14828_v40 = vadd.f32 %v11293_v33, %v14522_v44  ;;  %v18065_v44 = vld [vmem:[#allocation25_spill] sm:$0xff] }
 0x860   : >> { %v14830_v52 = vpop.f32.mrf.mxu0 }
 0x862   : >> { %v11296_v14 = vpop.f32.mrf.mxu0 }
 0x863   : >> { %v14833_v53 = vadd.f32 %v11296_v14, %v14539_v7 }
 0x864   : >> { %v14835_v62 = vpop.f32.mrf.mxu0 }
 0x865   : >> { %3658 = vrot.lane.b32.xlu1 %v18063_v36, %s17942_s18 }
 0x866   : >> { %v11299_v26 = vpop.f32.mrf.mxu0 }
 0x867   : >> { %v14840_v34 = vadd.f32 %v11299_v26, %v18064_v32 }
 0x868   : >> { %v14842_v27 = vpop.f32.mrf.mxu0 }
 0x86a   : >> { %v11302_v55 = vpop.f32.mrf.mxu0 }
 0x86b   : >> { %v14845_v41 = vadd.f32 %v11302_v55, %v18065_v44 }
 0x86c   : >> { %v14847_v22 = vpop.f32.mrf.mxu0 }
 0x86e   : >> { %v11305_v58 = vpop.f32.mrf.mxu0 }
 0x86f   : >> { %v14850_v7 = vadd.f32 %v11305_v58, %v14580_v56 }
 0x870   : >> { %v14852_v48 = vpop.f32.mrf.mxu0 }
 0x872   : >> { %v11308_v57 = vpop.f32.mrf.mxu0 }
 0x873   : >> { %v14855_v63 = vadd.f32 %v11308_v57, %v14588_v42  ;;  %v3612_v2 = vpop.xlane.xlu1 %3611 }
 0x874   : >> { %12352 = vrcp.f32 %v3612_v2 }
 0x875   : >> { %12354 = vrcp.f32 %v3615_v47 }
 0x877   : >> { %v3667_v61 = vpop.permute.xlu1 %3666 }
 0x878   : >> { %11374 = vmatprep.subr.mxu0 %v3667_v61 }
 0x879   : >> { %11375 = vmatpush3.msra.mxu0 %v3667_v61 }
 0x87a   : >> { %11376 = vmatprep.subr.mxu0 %v3665_v17 }
 0x87b   : >> { %11377 = vmatpush3.msra.mxu0 %v3665_v17 }
 0x87e   : >> { %v3621_v11 = vpop.xlane.xlu0 %3620 }
 0x881   : >> { %v12353_v12 = vpop.eup %12352 }
 0x882   : >> { %v3661_v56 = vpop.permute.xlu0 %3660  ;;  %v12355_v29 = vpop.eup %12354  ;;  %v3650_v19 = vmul.f32 %v12353_v12, %v14784_v50 }
 0x883   : >> { %v3651_v9 = vmul.f32 %v12355_v29, %v14768_v10  ;;  %v14891_v10 = vpop.f32.mrf.mxu0 }
 0x8a8   : >> { %v3618_v54 = vpop.xlane.xlu1 %3617 }
 0x8a9   : >> { %12356 = vrcp.f32 %v3618_v54  ;;  %v18066_v54 = vld [vmem:[#allocation27_spill] sm:$0xff] }
 0x8aa   : >> { %12358 = vrcp.f32 %v3621_v11 }
 0x8ac   : >> { %v3663_v39 = vpop.permute.xlu1 %3662 }
 0x8ad   : >> { %11378 = vmatprep.subr.mxu0 %v3663_v39 }
 0x8ae   : >> { %11379 = vmatpush3.msra.mxu0 %v3663_v39  ;;  %v1619_v39 = vadd.f32 %v14493_v31, %v18066_v54  ;;  %v18081_v54 = vld [vmem:[#allocation23_spill] sm:$0xff] }
 0x8af   : >> { %11380 = vmatprep.subr.mxu0 %v3661_v56 }
 0x8b0   : >> { %11381 = vmatpush3.msra.mxu0 %v3661_v56  ;;  %v18067_v56 = vld [vmem:[#allocation33_spill] sm:$0xff] }
 0x8b3   : >> { %v3627_v42 = vpop.xlane.xlu0 %3626 }
 0x8b6   : >> { %v12357_v15 = vpop.eup %12356 }
 0x8b7   : >> { %v3657_v20 = vpop.permute.xlu0 %3656  ;;  %v12359_v33 = vpop.eup %12358  ;;  %v3652_v6 = vmul.f32 %v12357_v15, %v14804_v35 }
 0x8b8   : >> { %v3653_v4 = vmul.f32 %v12359_v33, %v14788_v8 }
 0x8dd   : >> { %v3624_v0 = vpop.xlane.xlu1 %3623 }
 0x8de   : >> { %12360 = vrcp.f32 %v3624_v0 }
 0x8df   : >> { %12362 = vrcp.f32 %v3627_v42  ;;  %v2430_v42 = vadd.f32 %v18067_v56, %v1619_v39  ;;  %v18082_v56 = vld [vmem:[#allocation10_spill] sm:$0xff] }
 0x8e1   : >> { %v3659_v59 = vpop.permute.xlu1 %3658  ;;  %v3241_v1 = vadd.f32 %v14825_v18, %v2430_v42 }
 0x8e2   : >> { %11382 = vmatprep.subr.mxu0 %v3659_v59 }
 0x8e3   : >> { %11383 = vmatpush3.msra.mxu0 %v3659_v59  ;;  %v1621_v59 = vadd.f32 %v14493_v31, %v18068_v25 }
 0x8e4   : >> { %11384 = vmatprep.subr.mxu0 %v3657_v20 }
 0x8e5   : >> { %11385 = vmatpush3.msra.mxu0 %v3657_v20 }
 0x8e6   : >> { %11387 = vmatmul.mubr.msk.f32.vlgmr.msra.gmra.mxu0 %vm1062_vm2, %v3643_v43  ;;  %11407 = vmatprep.subr.mxu0 %v812_v60  ;;  %v18069_v43 = vld [vmem:[#allocation36_spill] sm:$0xff] }
 0x8e7   : >> { %11389 = vmatprep.mubr.msk.f32.mxu0 %vm1062_vm2, %v3644_v46  ;;  %11408 = vmatpush3.msra.mxu0 %v812_v60  ;;  %v2432_v23 = vadd.f32 %v18069_v43, %v1621_v59  ;;  %v18070_v46 = vld [vmem:[#allocation4_spill] sm:$0xff] }
 0x8ea   : >> { %11390 = vmatmul.mubr.msk.f32.gmra.mxu0 %vm1062_vm2, %v3645_v51 }
 0x8eb   : >> { %11392 = vmatprep.mubr.msk.f32.mxu0 %vm1062_vm2, %v3646_v16  ;;  %v12361_v14 = vpop.eup %12360  ;;  %v1623_v16 = vadd.f32 %v14493_v31, %v18071_v3 }
 0x8ec   : >> { %v12363_v36 = vpop.eup %12362  ;;  %v3654_v50 = vmul.f32 %v12361_v14, %v14818_v21 }
 0x8ed   : >> { %v3655_v26 = vmul.f32 %v12363_v36, %v14808_v45 }
 0x8ee   : >> { %11393 = vmatmul.mubr.msk.f32.gmra.mxu0 %vm1062_vm2, %v3647_v37  ;;  %v3243_v37 = vadd.f32 %v14830_v52, %v2432_v23  ;;  %v18075_v52 = vld [vmem:[#allocation30_spill] sm:$0xff] }
 0x8ef   : >> { %11395 = vmatprep.mubr.msk.f32.mxu0 %vm1062_vm2, %v3648_v49 }
 0x8f2   : >> { %11396 = vmatmul.mubr.msk.f32.gmra.mxu0 %vm1062_vm2, %v3649_v13  ;;  %v18073_v13 = vld [vmem:[#allocation35_spill] sm:$0xff] }
 0x8f3   : >> { %11398 = vmatprep.mubr.msk.f32.mxu0 %vm1062_vm2, %v3650_v19  ;;  %v2434_v29 = vadd.f32 %v18073_v13, %v1623_v16  ;;  %v18074_v19 = vld [vmem:[#allocation6_spill] sm:$0xff]  ;;  %v18086_v16 = vld [vmem:[#allocation12_spill] sm:$0xff] }
 0x8f6   : >> { %11399 = vmatmul.mubr.msk.f32.gmra.mxu0 %vm1062_vm2, %v3651_v9 }
 0x8f7   : >> { %11401 = vmatprep.mubr.msk.f32.mxu0 %vm1062_vm2, %v3652_v6  ;;  %v1625_v6 = vadd.f32 %v14493_v31, %v18075_v52  ;;  %v18089_v52 = vld [vmem:[#allocation14_spill] sm:$0xff] }
 0x8fa   : >> { %11402 = vmatmul.mubr.msk.f32.gmra.mxu0 %vm1062_vm2, %v3653_v4  ;;  %v18076_v4 = vld [vmem:[#allocation5_spill] sm:$0xff] }
 0x8fb   : >> { %11404 = vmatprep.mubr.msk.f32.mxu0 %vm1062_vm2, %v3654_v50 }
 0x8fe   : >> { %11405 = vmatmul.mubr.msk.f32.gmra.mxu0 %vm1062_vm2, %v3655_v26 }
 0x9a6   : >> { %v11388_v35 = vpop.f32.mrf.mxu0 }
 0x9a8   : >> { %v3806_v32 = vpop.f32.mrf.mxu0 }
 0x9a9   : >> { %11409 = vmatprep.mubr.msk.f32.mxu0 %vm870_vm1, %v3806_v32  ;;  %v18077_v32 = vld [vmem:[#allocation37_spill] sm:$0xff] }
 0x9aa   : >> { %v11391_v55 = vpop.f32.mrf.mxu0  ;;  %11410 = vmatmul.mubr.msk.f32.vlgmr.msra.gmra.mxu0 %vm870_vm1, %v11388_v35 }
 0x9ac   : >> { %v3816_v8 = vpop.f32.mrf.mxu0 }
 0x9ad   : >> { %11412 = vmatprep.mubr.msk.f32.mxu0 %vm870_vm1, %v3816_v8  ;;  %v18078_v8 = vld [vmem:[#allocation8_spill] sm:$0xff] }
 0x9ae   : >> { %v11394_v21 = vpop.f32.mrf.mxu0  ;;  %11413 = vmatmul.mubr.msk.f32.gmra.mxu0 %vm870_vm1, %v11391_v55  ;;  %v2436_v55 = vadd.f32 %v18077_v32, %v1625_v6  ;;  %v18091_v32 = vld [vmem:[#allocation16_spill] sm:$0xff] }
 0x9b0   : >> { %v3826_v44 = vpop.f32.mrf.mxu0 }
 0x9b1   : >> { %11415 = vmatprep.mubr.msk.f32.mxu0 %vm870_vm1, %v3826_v44 }
 0x9b2   : >> { %v11397_v45 = vpop.f32.mrf.mxu0  ;;  %11416 = vmatmul.mubr.msk.f32.gmra.mxu0 %vm870_vm1, %v11394_v21 }
 0x9b4   : >> { %v3836_v58 = vpop.f32.mrf.mxu0 }
 0x9b5   : >> { %11418 = vmatprep.mubr.msk.f32.mxu0 %vm870_vm1, %v3836_v58 }
 0x9b6   : >> { %v11400_v57 = vpop.f32.mrf.mxu0  ;;  %11419 = vmatmul.mubr.msk.f32.gmra.mxu0 %vm870_vm1, %v11397_v45 }
 0x9b8   : >> { %v3846_v47 = vpop.f32.mrf.mxu0 }
 0x9b9   : >> { %11421 = vmatprep.mubr.msk.f32.mxu0 %vm870_vm1, %v3846_v47  ;;  %v18080_v47 = vld [vmem:[#allocation7_spill] sm:$0xff] }
 0x9ba   : >> { %v11403_v2 = vpop.f32.mrf.mxu0  ;;  %11422 = vmatmul.mubr.msk.f32.gmra.mxu0 %vm870_vm1, %v11400_v57 }
 0x9bc   : >> { %v3856_v61 = vpop.f32.mrf.mxu0 }
 0x9bd   : >> { %11424 = vmatprep.mubr.msk.f32.mxu0 %vm870_vm1, %v3856_v61 }
 0x9be   : >> { %v11406_v17 = vpop.f32.mrf.mxu0  ;;  %11425 = vmatmul.mubr.msk.f32.gmra.mxu0 %vm870_vm1, %v11403_v2 }
 0x9c0   : >> { %v3866_v11 = vpop.f32.mrf.mxu0 }
 0x9c1   : >> { %11427 = vmatprep.mubr.msk.f32.mxu0 %vm870_vm1, %v3866_v11 }
 0x9c2   : >> { %11428 = vmatmul.mubr.msk.f32.gmra.mxu0 %vm870_vm1, %v11406_v17 }
 0xa6a   : >> { %v11411_v0 = vpop.f32.mrf.mxu0 }
 0xa6b   : >> { %v4053_v20 = vadd.f32 %v11411_v0, %v14823_v24 }
 0xa6c   : >> { %v3983_v60 = vpop.f32.mrf.mxu0 }
 0xa6d   : >> { %v14916_v5 = vadd.f32 %v4053_v20, %v18070_v46  ;;  %v4052_v51 = vadd.f32 %v3983_v60, %v3241_v1  ;;  %v18084_v20 = vld [vmem:[#allocation9_spill] sm:$0xff] }
 0xa6e   : >> { %v11414_v28 = vpop.f32.mrf.mxu0 }
 0xa6f   : >> { %v14922_v49 = vadd.f32 %v4052_v51, %v18072_v30  ;;  %v4055_v18 = vadd.f32 %v11414_v28, %v14828_v40  ;;  %v4085_v24 = vsel %vm631_vm0, %v14916_v5, 0.0  ;;  %v3245_v40 = vadd.f32 %v14835_v62, %v2434_v29  ;;  %v18079_v62 = vld [vmem:[#allocation32_spill] sm:$0xff]  ;;  %v18085_v51 = vld [vmem:[#allocation39_spill] sm:$0xff]  ;;  %v18087_v30 = vld [vmem:[#allocation34_spill] sm:$0xff] }
 0xa70   : >> { %4086 = vadd.xlane.f32.xlu0 %v4085_v24  ;;  %v3993_v12 = vpop.f32.mrf.mxu0  ;;  %v1627_v58 = vadd.f32 %v14493_v31, %v18079_v62 }
 0xa71   : >> { %v14929_v15 = vadd.f32 %v4055_v18, %v18074_v19  ;;  %v4054_v9 = vadd.f32 %v3993_v12, %v3243_v37  ;;  %v4082_v33 = vsel %vm631_vm0, %v14922_v49, 0.0  ;;  %v18088_v12 = vld [vmem:[#allocation11_spill] sm:$0xff] }
 0xa72   : >> { %4083 = vadd.xlane.f32.xlu1 %v4082_v33  ;;  %v11417_v14 = vpop.f32.mrf.mxu0  ;;  %v2438_v39 = vadd.f32 %v18081_v54, %v1627_v58  ;;  %v4308_v58 = vld [vmem:[%s17872_s7 + $0x18] sm:$0xff] }
 0xa73   : >> { %v14937_v36 = vadd.f32 %v4054_v9, %v18076_v4  ;;  %v4057_v50 = vadd.f32 %v11417_v14, %v14833_v53  ;;  %v4091_v26 = vsel %vm631_vm0, %v14929_v15, 0.0  ;;  %v3247_v53 = vadd.f32 %v14842_v27, %v2436_v55  ;;  %v18083_v27 = vld [vmem:[#allocation31_spill] sm:$0xff]  ;;  %11430 = vmatprep.subr.mxu1 %v4308_v58 }
 0xa74   : >> { %4092 = vadd.xlane.f32.xlu0 %v4091_v26  ;;  %v4003_v35 = vpop.f32.mrf.mxu0  ;;  %v1629_v59 = vadd.f32 %v14493_v31, %v18083_v27  ;;  %11431 = vmatpush3.msra.mxu1 %v4308_v58 }
 0xa75   : >> { %v14944_v21 = vadd.f32 %v4057_v50, %v18078_v8  ;;  %v4056_v44 = vadd.f32 %v4003_v35, %v3245_v40  ;;  %v4088_v45 = vsel %vm631_vm0, %v14937_v36, 0.0  ;;  %v18090_v50 = vld [vmem:[#allocation13_spill] sm:$0xff] }
 0xa76   : >> { %4089 = vadd.xlane.f32.xlu1 %v4088_v45  ;;  %v11420_v57 = vpop.f32.mrf.mxu0  ;;  %v2440_v3 = vadd.f32 %v18085_v51, %v1629_v59  ;;  %v18092_v45 = vld [vmem:[#allocation15_spill] sm:$0xff] }
 0xa77   : >> { %v14952_v2 = vadd.f32 %v4056_v44, %v18080_v47  ;;  %v4059_v61 = vadd.f32 %v11420_v57, %v14840_v34  ;;  %v4097_v17 = vsel %vm631_vm0, %v14944_v21, 0.0  ;;  %v3249_v34 = vadd.f32 %v14847_v22, %v2438_v39  ;;  %v12770_v22 = vld [vmem:[%s17871_s6] ss:$0 sm:$0xff] }
 0xa78   : >> { %4098 = vadd.xlane.f32.xlu0 %v4097_v17  ;;  %v4013_v11 = vpop.f32.mrf.mxu0  ;;  %v3251_v24 = vadd.f32 %v14852_v48, %v2440_v3 }
 0xa79   : >> { %v14959_v42 = vadd.f32 %v4059_v61, %v18082_v56  ;;  %v4058_v0 = vadd.f32 %v4013_v11, %v3247_v53  ;;  %v4094_v25 = vsel %vm631_vm0, %v14952_v2, 0.0 }
 0xa7a   : >> { %4095 = vadd.xlane.f32.xlu1 %v4094_v25  ;;  %v11423_v1 = vpop.f32.mrf.mxu0 }
 0xa7b   : >> { %v14967_v60 = vadd.f32 %v4058_v0, %v18084_v20  ;;  %v4061_v43 = vadd.f32 %v11423_v1, %v14845_v41  ;;  %v4103_v23 = vsel %vm631_vm0, %v14959_v42, 0.0  ;;  %v1631_v41 = vadd.f32 %v12770_v22, %v18087_v30 }
 0xa7c   : >> { %4104 = vadd.xlane.f32.xlu0 %v4103_v23  ;;  %v4023_v46 = vpop.f32.mrf.mxu0 }
 0xa7d   : >> { %v14974_v28 = vadd.f32 %v4061_v43, %v18086_v16  ;;  %v4060_v31 = vadd.f32 %v4023_v46, %v3249_v34  ;;  %v4100_v37 = vsel %vm631_vm0, %v14967_v60, 0.0  ;;  %v2442_v33 = vadd.f32 %v14732_v38, %v1631_v41 }
 0xa7e   : >> { %4101 = vadd.xlane.f32.xlu1 %v4100_v37  ;;  %v11426_v18 = vpop.f32.mrf.mxu0 }
 0xa7f   : >> { %v14984_v13 = vadd.f32 %v4060_v31, %v18088_v12  ;;  %v4063_v29 = vadd.f32 %v11426_v18, %v14850_v7  ;;  %v4109_v19 = vsel %vm631_vm0, %v14974_v28, 0.0  ;;  %v3253_v4 = vadd.f32 %v14891_v10, %v2442_v33 }
 0xa80   : >> { %4110 = vadd.xlane.f32.xlu0 %v4109_v19  ;;  %v4033_v9 = vpop.f32.mrf.mxu0 }
 0xa81   : >> { %v14991_v6 = vadd.f32 %v4063_v29, %v18089_v52  ;;  %v4062_v14 = vadd.f32 %v4033_v9, %v3251_v24  ;;  %v4106_v40 = vsel %vm631_vm0, %v14984_v13, 0.0 }
 0xa82   : >> { %4107 = vadd.xlane.f32.xlu1 %v4106_v40  ;;  %v11429_v48 = vpop.f32.mrf.mxu0 }
 0xa83   : >> { %v14997_v7 = vadd.f32 %v4062_v14, %v18090_v50  ;;  %v4065_v26 = vadd.f32 %v11429_v48, %v14855_v63  ;;  %v4115_v35 = vsel %vm631_vm0, %v14991_v6, 0.0 }
 0xa84   : >> { %4116 = vadd.xlane.f32.xlu0 %v4115_v35  ;;  %v4043_v38 = vpop.f32.mrf.mxu0 }
 0xa85   : >> { %v15003_v55 = vadd.f32 %v4065_v26, %v18091_v32  ;;  %v4064_v8 = vadd.f32 %v4043_v38, %v3253_v4  ;;  %v4112_v44 = vsel %vm631_vm0, %v14997_v7, 0.0 }
 0xa86   : >> { %4113 = vadd.xlane.f32.xlu1 %v4112_v44 }
 0xa87   : >> { %v15008_v10 = vadd.f32 %v4064_v8, %v18092_v45  ;;  %v4121_v62 = vsel %vm631_vm0, %v15003_v55, 0.0 }
 0xa88   : >> { %4122 = vadd.xlane.f32.xlu0 %v4121_v62 }
 0xa89   : >> { %v4118_v63 = vsel %vm631_vm0, %v15008_v10, 0.0 }
 0xa8a   : >> { %4119 = vadd.xlane.f32.xlu1 %v4118_v63 }
 0xaf9   : >> { %v4087_v57 = vpop.xlane.xlu0 %4086 }
 0xafa   : >> { %v4126_v53 = vmul.f32 0.03125, %v4087_v57 }
 0xafb   : >> { %v4084_v47 = vpop.xlane.xlu1 %4083 }
 0xafc   : >> { %v15018_v61 = vsub.f32 %v14916_v5, %v4126_v53  ;;  %v4125_v17 = vmul.f32 0.03125, %v4084_v47 }
 0xafd   : >> { %v4093_v11 = vpop.xlane.xlu0 %4092 }
 0xafe   : >> { %v15021_v54 = vsub.f32 %v14922_v49, %v4125_v17  ;;  %v4128_v39 = vmul.f32 0.03125, %v4093_v11  ;;  %v4154_v56 = vmul.f32 %v15018_v61, %v15018_v61 }
 0xaff   : >> { %v4090_v0 = vpop.xlane.xlu1 %4089 }
 0xb00   : >> { %v15026_v25 = vsub.f32 %v14929_v15, %v4128_v39  ;;  %v4127_v27 = vmul.f32 0.03125, %v4090_v0  ;;  %v4170_v59 = vsel %vm631_vm0, %v4154_v56, 0.0  ;;  %v4153_v5 = vmul.f32 %v15021_v54, %v15021_v54  ;;  %v4306_v0 = vld [vmem:[%s17872_s7 + $0x8] sm:$0xff] }
 0xb01   : >> { %v4099_v1 = vpop.xlane.xlu0 %4098  ;;  %4171 = vadd.xlane.f32.xlu0 %v4170_v59  ;;  %v4514_v59 = vld [vmem:[%s17874_s9 + $0x38] sm:$0xff] }
 0xb02   : >> { %v15032_v34 = vsub.f32 %v14937_v36, %v4127_v27  ;;  %v4130_v49 = vmul.f32 0.03125, %v4099_v1  ;;  %v4167_v20 = vsel %vm631_vm0, %v4153_v5, 0.0  ;;  %v4156_v43 = vmul.f32 %v15026_v25, %v15026_v25  ;;  %v4305_v27 = vld [vmem:[%s17872_s7] sm:$0xff]  ;;  %v4513_v5 = vld [vmem:[%s17874_s9 + $0x30] sm:$0xff]  ;;  %11459 = vmatprep.subr.mxu0 %v4514_v59  ;;  %v4512_v1 = vld [vmem:[%s17874_s9 + $0x28] sm:$0xff] }
 0xb03   : >> { %v4096_v23 = vpop.xlane.xlu1 %4095  ;;  %4168 = vadd.xlane.f32.xlu1 %v4167_v20  ;;  %11460 = vmatpush3.msra.mxu0 %v4514_v59  ;;  %v4510_v20 = vld [vmem:[%s17874_s9 + $0x18] sm:$0xff] }
 0xb04   : >> { %v15038_v15 = vsub.f32 %v14944_v21, %v4130_v49  ;;  %v4129_v46 = vmul.f32 0.03125, %v4096_v23  ;;  %v4176_v51 = vsel %vm631_vm0, %v4156_v43, 0.0  ;;  %v4155_v3 = vmul.f32 %v15032_v34, %v15032_v34  ;;  %11461 = vmatprep.subr.mxu0 %v4513_v5  ;;  %v4511_v49 = vld [vmem:[%s17874_s9 + $0x20] sm:$0xff]  ;;  %v4509_v43 = vld [vmem:[%s17874_s9 + $0x10] sm:$0xff] }
 0xb05   : >> { %v4105_v16 = vpop.xlane.xlu0 %4104  ;;  %4177 = vadd.xlane.f32.xlu0 %v4176_v51  ;;  %11462 = vmatpush3.msra.mxu0 %v4513_v5 }
 0xb06   : >> { %v15044_v36 = vsub.f32 %v14952_v2, %v4129_v46  ;;  %v4132_v31 = vmul.f32 0.03125, %v4105_v16  ;;  %v4173_v37 = vsel %vm631_vm0, %v4155_v3, 0.0  ;;  %v4158_v22 = vmul.f32 %v15038_v15, %v15038_v15  ;;  %11463 = vmatprep.subr.mxu0 %v4512_v1 }
 0xb07   : >> { %v4102_v30 = vpop.xlane.xlu1 %4101  ;;  %4174 = vadd.xlane.f32.xlu1 %v4173_v37  ;;  %11464 = vmatpush3.msra.mxu0 %v4512_v1 }
 0xb08   : >> { %v15050_v21 = vsub.f32 %v14959_v42, %v4132_v31  ;;  %v4131_v41 = vmul.f32 0.03125, %v4102_v30  ;;  %v4182_v18 = vsel %vm631_vm0, %v4158_v22, 0.0  ;;  %v4157_v24 = vmul.f32 %v15044_v36, %v15044_v36  ;;  %11465 = vmatprep.subr.mxu0 %v4511_v49 }
 0xb09   : >> { %v4111_v12 = vpop.xlane.xlu0 %4110  ;;  %4183 = vadd.xlane.f32.xlu0 %v4182_v18  ;;  %11466 = vmatpush3.msra.mxu0 %v4511_v49 }
 0xb0a   : >> { %v15056_v2 = vsub.f32 %v14967_v60, %v4131_v41  ;;  %v4134_v29 = vmul.f32 0.03125, %v4111_v12  ;;  %v4179_v19 = vsel %vm631_vm0, %v4157_v24, 0.0  ;;  %v4160_v9 = vmul.f32 %v15050_v21, %v15050_v21  ;;  %11467 = vmatprep.subr.mxu0 %v4510_v20 }
 0xb0b   : >> { %v4108_v33 = vpop.xlane.xlu1 %4107  ;;  %4180 = vadd.xlane.f32.xlu1 %v4179_v19  ;;  %11468 = vmatpush3.msra.mxu0 %v4510_v20 }
 0xb0c   : >> { %v15062_v42 = vsub.f32 %v14974_v28, %v4134_v29  ;;  %v4133_v52 = vmul.f32 0.03125, %v4108_v33  ;;  %v4188_v14 = vsel %vm631_vm0, %v4160_v9, 0.0  ;;  %v4159_v40 = vmul.f32 %v15056_v2, %v15056_v2  ;;  %11469 = vmatprep.subr.mxu0 %v4509_v43 }
 0xb0d   : >> { %v4117_v48 = vpop.xlane.xlu0 %4116  ;;  %4189 = vadd.xlane.f32.xlu0 %v4188_v14  ;;  %11470 = vmatpush3.msra.mxu0 %v4509_v43 }
 0xb0e   : >> { %v15068_v60 = vsub.f32 %v14984_v13, %v4133_v52  ;;  %v4136_v4 = vmul.f32 0.03125, %v4117_v48  ;;  %v4185_v50 = vsel %vm631_vm0, %v4159_v40, 0.0  ;;  %v4162_v26 = vmul.f32 %v15062_v42, %v15062_v42 }
 0xb0f   : >> { %v4114_v35 = vpop.xlane.xlu1 %4113  ;;  %4186 = vadd.xlane.f32.xlu1 %v4185_v50 }
 0xb10   : >> { %v15074_v28 = vsub.f32 %v14991_v6, %v4136_v4  ;;  %v4135_v38 = vmul.f32 0.03125, %v4114_v35  ;;  %v4194_v32 = vsel %vm631_vm0, %v4162_v26, 0.0  ;;  %v4161_v8 = vmul.f32 %v15068_v60, %v15068_v60 }
 0xb11   : >> { %4195 = vadd.xlane.f32.xlu0 %v4194_v32  ;;  %v4123_v13 = vpop.xlane.xlu0 %4122 }
 0xb12   : >> { %v15080_v44 = vsub.f32 %v14997_v7, %v4135_v38  ;;  %v4138_v45 = vmul.f32 0.03125, %v4123_v13  ;;  %v4191_v62 = vsel %vm631_vm0, %v4161_v8, 0.0  ;;  %v4164_v63 = vmul.f32 %v15074_v28, %v15074_v28  ;;  %v15131_v13 = vld [vmem:[%s17876_s11] ss:$0 sm:$0xff] }
 0xb13   : >> { %4192 = vadd.xlane.f32.xlu1 %v4191_v62  ;;  %v4120_v6 = vpop.xlane.xlu1 %4119 }
 0xb14   : >> { %v15086_v58 = vsub.f32 %v15003_v55, %v4138_v45  ;;  %v4137_v57 = vmul.f32 0.03125, %v4120_v6  ;;  %v4200_v53 = vsel %vm631_vm0, %v4164_v63, 0.0  ;;  %v4163_v47 = vmul.f32 %v15080_v44, %v15080_v44 }
 0xb15   : >> { %4201 = vadd.xlane.f32.xlu0 %v4200_v53 }
 0xb16   : >> { %v15092_v7 = vsub.f32 %v15008_v10, %v4137_v57  ;;  %v4197_v17 = vsel %vm631_vm0, %v4163_v47, 0.0  ;;  %v4166_v11 = vmul.f32 %v15086_v58, %v15086_v58  ;;  %v4307_v10 = vld [vmem:[%s17872_s7 + $0x10] sm:$0xff] }
 0xb17   : >> { %4198 = vadd.xlane.f32.xlu1 %v4197_v17  ;;  %11432 = vmatprep.subr.mxu1 %v4307_v10 }
 0xb18   : >> { %v4206_v39 = vsel %vm631_vm0, %v4166_v11, 0.0  ;;  %v4165_v55 = vmul.f32 %v15092_v7, %v15092_v7  ;;  %11433 = vmatpush3.msra.mxu1 %v4307_v10 }
 0xb19   : >> { %4207 = vadd.xlane.f32.xlu0 %v4206_v39  ;;  %11434 = vmatprep.subr.mxu1 %v4306_v0 }
 0xb1a   : >> { %v4203_v56 = vsel %vm631_vm0, %v4165_v55, 0.0  ;;  %11435 = vmatpush3.msra.mxu1 %v4306_v0 }
 0xb1b   : >> { %4204 = vadd.xlane.f32.xlu1 %v4203_v56  ;;  %11436 = vmatprep.subr.mxu1 %v4305_v27 }
 0xb1c   : >> { %11437 = vmatpush3.msra.mxu1 %v4305_v27 }
 0xb8a   : >> { %v4172_v23 = vpop.xlane.xlu0 %4171 }
 0xb8b   : >> { %v4210_v46 = vmul.f32 0.03125, %v4172_v23 }
 0xb8c   : >> { %v4169_v51 = vpop.xlane.xlu1 %4168 }
 0xb8d   : >> { %v4224_v3 = vadd.f32 1e-05, %v4210_v46  ;;  %v4209_v16 = vmul.f32 0.03125, %v4169_v51 }
 0xb8e   : >> { %v4178_v31 = vpop.xlane.xlu0 %4177 }
 0xb8f   : >> { %12364 = vrsqrt.f32 %v4224_v3  ;;  %v4223_v37 = vadd.f32 1e-05, %v4209_v16  ;;  %v4212_v22 = vmul.f32 0.03125, %v4178_v31 }
 0xb90   : >> { %v4175_v30 = vpop.xlane.xlu1 %4174 }
 0xb91   : >> { %12366 = vrsqrt.f32 %v4223_v37  ;;  %v4226_v41 = vadd.f32 1e-05, %v4212_v22  ;;  %v4211_v18 = vmul.f32 0.03125, %v4175_v30 }
 0xb92   : >> { %v4184_v24 = vpop.xlane.xlu0 %4183 }
 0xb93   : >> { %12368 = vrsqrt.f32 %v4226_v41  ;;  %v4225_v12 = vadd.f32 1e-05, %v4211_v18  ;;  %v4214_v29 = vmul.f32 0.03125, %v4184_v24 }
 0xb94   : >> { %v4181_v19 = vpop.xlane.xlu1 %4180 }
 0xb95   : >> { %12370 = vrsqrt.f32 %v4225_v12  ;;  %v4228_v9 = vadd.f32 1e-05, %v4214_v29  ;;  %v4213_v33 = vmul.f32 0.03125, %v4181_v19 }
 0xb96   : >> { %v4190_v52 = vpop.xlane.xlu0 %4189 }
 0xb97   : >> { %12372 = vrsqrt.f32 %v4228_v9  ;;  %v4227_v14 = vadd.f32 1e-05, %v4213_v33  ;;  %v4216_v40 = vmul.f32 0.03125, %v4190_v52 }
 0xb98   : >> { %v4187_v48 = vpop.xlane.xlu1 %4186 }
 0xb99   : >> { %12374 = vrsqrt.f32 %v4227_v14  ;;  %v4230_v4 = vadd.f32 1e-05, %v4216_v40  ;;  %v4215_v50 = vmul.f32 0.03125, %v4187_v48 }
 0xb9a   : >> { %v4196_v26 = vpop.xlane.xlu0 %4195 }
 0xb9b   : >> { %12376 = vrsqrt.f32 %v4230_v4  ;;  %v4229_v35 = vadd.f32 1e-05, %v4215_v50  ;;  %v4218_v38 = vmul.f32 0.03125, %v4196_v26 }
 0xb9c   : >> { %v12365_v32 = vpop.eup %12364  ;;  %v4193_v8 = vpop.xlane.xlu1 %4192 }
 0xb9d   : >> { %v4252_v45 = vmul.f32 %v12365_v32, %v15018_v61  ;;  %12378 = vrsqrt.f32 %v4229_v35  ;;  %v4232_v62 = vadd.f32 1e-05, %v4218_v38  ;;  %v4217_v63 = vmul.f32 0.03125, %v4193_v8  ;;  %v15139_v61 = vld [vmem:[%s17877_s12] ss:$0 sm:$0xff] }
 0xb9e   : >> { %v12367_v6 = vpop.eup %12366  ;;  %v4202_v57 = vpop.xlane.xlu0 %4201 }
 0xb9f   : >> { %12380 = vrsqrt.f32 %v4232_v62  ;;  %v4231_v53 = vadd.f32 1e-05, %v4217_v63  ;;  %v4220_v47 = vmul.f32 0.03125, %v4202_v57  ;;  %v4272_v11 = vmul.f32 %v15131_v13, %v4252_v45 }
 0xba0   : >> { %v12369_v17 = vpop.eup %12368  ;;  %v4199_v39 = vpop.xlane.xlu1 %4198  ;;  %v4251_v55 = vmul.f32 %v12367_v6, %v15021_v54 }
 0xba1   : >> { %12382 = vrsqrt.f32 %v4231_v53  ;;  %v4234_v56 = vadd.f32 1e-05, %v4220_v47  ;;  %v4219_v10 = vmul.f32 0.03125, %v4199_v39  ;;  %v4254_v5 = vmul.f32 %v12369_v17, %v15026_v25  ;;  %v9864_v39 = vld [vmem:[%s17873_s8] ss:$0 sm:$0xff] }
 0xba2   : >> { %v12371_v0 = vpop.eup %12370  ;;  %v4208_v27 = vpop.xlane.xlu0 %4207  ;;  %v4271_v59 = vmul.f32 %v15131_v13, %v4251_v55  ;;  %v15148_v46 = vadd.f32 %v15139_v61, %v4272_v11  ;;  %v4508_v11 = vld [vmem:[%s17874_s9 + $0x8] sm:$0xff] }
 0xba3   : >> { %12384 = vrsqrt.f32 %v4234_v56  ;;  %v4233_v1 = vadd.f32 1e-05, %v4219_v10  ;;  %v4222_v49 = vmul.f32 0.03125, %v4208_v27  ;;  %v4253_v20 = vmul.f32 %v12371_v0, %v15032_v34  ;;  %11471 = vmatprep.subr.mxu0 %v4508_v11 }
 0xba4   : >> { %v12373_v54 = vpop.eup %12372  ;;  %v4205_v43 = vpop.xlane.xlu1 %4204  ;;  %v15145_v23 = vadd.f32 %v15139_v61, %v4271_v59  ;;  %v4274_v51 = vmul.f32 %v15131_v13, %v4254_v5  ;;  %11472 = vmatpush3.msra.mxu0 %v4508_v11 }
 0xba5   : >> { %12386 = vrsqrt.f32 %v4233_v1  ;;  %v4236_v3 = vadd.f32 1e-05, %v4222_v49  ;;  %v4221_v16 = vmul.f32 0.03125, %v4205_v43  ;;  %v4273_v25 = vmul.f32 %v15131_v13, %v4253_v20 }
 0xba6   : >> { %v12375_v31 = vpop.eup %12374  ;;  %11438 = vmatprep.mubr.msk.f32.mxu1 %vm631_vm0, %v15145_v23  ;;  %v4256_v34 = vmul.f32 %v12373_v54, %v15038_v15  ;;  %v15162_v18 = vadd.f32 %v15139_v61, %v4274_v51 }
 0xba7   : >> { %12388 = vrsqrt.f32 %v4236_v3  ;;  %v4235_v37 = vadd.f32 1e-05, %v4221_v16  ;;  %11439 = vmatmul.mubr.msk.f32.vlgmr.msra.gmra.mxu1 %vm631_vm0, %v15148_v46  ;;  %v15158_v22 = vadd.f32 %v15139_v61, %v4273_v25  ;;  %v4255_v30 = vmul.f32 %v12375_v31, %v15044_v36 }
 0xba8   : >> { %v12377_v41 = vpop.eup %12376  ;;  %v4276_v24 = vmul.f32 %v15131_v13, %v4256_v34 }
 0xba9   : >> { %12390 = vrsqrt.f32 %v4235_v37  ;;  %11441 = vmatprep.mubr.msk.f32.mxu1 %vm631_vm0, %v15158_v22  ;;  %v4275_v15 = vmul.f32 %v15131_v13, %v4255_v30  ;;  %v4258_v12 = vmul.f32 %v12377_v41, %v15050_v21 }
 0xbaa   : >> { %v12379_v29 = vpop.eup %12378  ;;  %v15178_v33 = vadd.f32 %v15139_v61, %v4276_v24 }
 0xbab   : >> { %11442 = vmatmul.mubr.msk.f32.gmra.mxu1 %vm631_vm0, %v15162_v18  ;;  %v15172_v36 = vadd.f32 %v15139_v61, %v4275_v15  ;;  %v4257_v19 = vmul.f32 %v12379_v29, %v15056_v2  ;;  %v4278_v21 = vmul.f32 %v15131_v13, %v4258_v12 }
 0xbac   : >> { %v12381_v9 = vpop.eup %12380 }
 0xbad   : >> { %11444 = vmatprep.mubr.msk.f32.mxu1 %vm631_vm0, %v15172_v36  ;;  %v4277_v52 = vmul.f32 %v15131_v13, %v4257_v19  ;;  %v4260_v14 = vmul.f32 %v12381_v9, %v15062_v42  ;;  %v15192_v50 = vadd.f32 %v15139_v61, %v4278_v21 }
 0xbae   : >> { %v12383_v40 = vpop.eup %12382 }
 0xbaf   : >> { %11445 = vmatmul.mubr.msk.f32.gmra.mxu1 %vm631_vm0, %v15178_v33  ;;  %v15186_v48 = vadd.f32 %v15139_v61, %v4277_v52  ;;  %v4259_v2 = vmul.f32 %v12383_v40, %v15068_v60  ;;  %v4280_v42 = vmul.f32 %v15131_v13, %v4260_v14 }
 0xbb0   : >> { %v12385_v4 = vpop.eup %12384 }
 0xbb1   : >> { %11447 = vmatprep.mubr.msk.f32.mxu1 %vm631_vm0, %v15186_v48  ;;  %v4279_v26 = vmul.f32 %v15131_v13, %v4259_v2  ;;  %v4262_v35 = vmul.f32 %v12385_v4, %v15074_v28  ;;  %v15206_v45 = vadd.f32 %v15139_v61, %v4280_v42 }
 0xbb2   : >> { %v12387_v38 = vpop.eup %12386 }
 0xbb3   : >> { %11448 = vmatmul.mubr.msk.f32.gmra.mxu1 %vm631_vm0, %v15192_v50  ;;  %v15200_v32 = vadd.f32 %v15139_v61, %v4279_v26  ;;  %v4261_v60 = vmul.f32 %v12387_v38, %v15080_v44  ;;  %v4282_v28 = vmul.f32 %v15131_v13, %v4262_v35 }
 0xbb4   : >> { %v12389_v8 = vpop.eup %12388 }
 0xbb5   : >> { %11450 = vmatprep.mubr.msk.f32.mxu1 %vm631_vm0, %v15200_v32  ;;  %v4281_v62 = vmul.f32 %v15131_v13, %v4261_v60  ;;  %v4264_v63 = vmul.f32 %v12389_v8, %v15086_v58  ;;  %v15220_v53 = vadd.f32 %v15139_v61, %v4282_v28 }
 0xbb6   : >> { %v12391_v6 = vpop.eup %12390 }
 0xbb7   : >> { %11451 = vmatmul.mubr.msk.f32.gmra.mxu1 %vm631_vm0, %v15206_v45  ;;  %v15214_v57 = vadd.f32 %v15139_v61, %v4281_v62  ;;  %v4263_v44 = vmul.f32 %v12391_v6, %v15092_v7  ;;  %v4284_v17 = vmul.f32 %v15131_v13, %v4264_v63  ;;  %v15262_v63 = vld [vmem:[%s17875_s10] ss:$0 sm:$0xff] }
 0xbb9   : >> { %11453 = vmatprep.mubr.msk.f32.mxu1 %vm631_vm0, %v15214_v57  ;;  %v4283_v47 = vmul.f32 %v15131_v13, %v4263_v44  ;;  %v15232_v7 = vadd.f32 %v15139_v61, %v4284_v17  ;;  %v4507_v13 = vld [vmem:[%s17874_s9] sm:$0xff] }
 0xbba   : >> { %11473 = vmatprep.subr.mxu0 %v4507_v13 }
 0xbbb   : >> { %11454 = vmatmul.mubr.msk.f32.gmra.mxu1 %vm631_vm0, %v15220_v53  ;;  %v15227_v58 = vadd.f32 %v15139_v61, %v4283_v47  ;;  %11474 = vmatpush3.msra.mxu0 %v4507_v13 }
 0xbbd   : >> { %11456 = vmatprep.mubr.msk.f32.mxu1 %vm631_vm0, %v15227_v58 }
 0xbbf   : >> { %11457 = vmatmul.mubr.msk.f32.gmra.mxu1 %vm631_vm0, %v15232_v7 }
 0xc67   : >> { %v11440_v55 = vpop.f32.mrf.mxu1 }
 0xc68   : >> { %v4430_v56 = vadd.f32 %v11440_v55, %v9864_v39 }
 0xc69   : >> { %v4424_v10 = vpop.f32.mrf.mxu1 }
 0xc6a   : >> { %v4425_v61 = vadd.f32 %v9864_v39, %v4424_v10  ;;  %v4494_v59 = vmax.f32 %v4430_v56, 0.0 }
 0xc6b   : >> { %v11443_v0 = vpop.f32.mrf.mxu1 }
 0xc6c   : >> { %v4493_v27 = vmax.f32 %v4425_v61, 0.0  ;;  %v4440_v5 = vadd.f32 %v11443_v0, %v9864_v39 }
 0xc6d   : >> { %v4434_v1 = vpop.f32.mrf.mxu1 }
 0xc6e   : >> { %v4435_v49 = vadd.f32 %v9864_v39, %v4434_v1  ;;  %11475 = vmatprep.mubr.msk.f32.mxu0 %vm4522_vm3, %v4493_v27  ;;  %v4496_v43 = vmax.f32 %v4440_v5, 0.0 }
 0xc6f   : >> { %v11446_v20 = vpop.f32.mrf.mxu1  ;;  %11476 = vmatmul.mubr.msk.f32.vlgmr.msra.gmra.mxu0 %vm4522_vm3, %v4494_v59 }
 0xc70   : >> { %v4495_v54 = vmax.f32 %v4435_v49, 0.0  ;;  %v4450_v51 = vadd.f32 %v11446_v20, %v9864_v39 }
 0xc71   : >> { %v4444_v3 = vpop.f32.mrf.mxu1 }
 0xc72   : >> { %v4445_v16 = vadd.f32 %v9864_v39, %v4444_v3  ;;  %11478 = vmatprep.mubr.msk.f32.mxu0 %vm4522_vm3, %v4495_v54  ;;  %v4498_v34 = vmax.f32 %v4450_v51, 0.0 }
 0xc73   : >> { %v11449_v25 = vpop.f32.mrf.mxu1  ;;  %11479 = vmatmul.mubr.msk.f32.gmra.mxu0 %vm4522_vm3, %v4496_v43 }
 0xc74   : >> { %v4497_v31 = vmax.f32 %v4445_v16, 0.0  ;;  %v4460_v37 = vadd.f32 %v11449_v25, %v9864_v39 }
 0xc75   : >> { %v4454_v30 = vpop.f32.mrf.mxu1 }
 0xc76   : >> { %v4455_v41 = vadd.f32 %v9864_v39, %v4454_v30  ;;  %11481 = vmatprep.mubr.msk.f32.mxu0 %vm4522_vm3, %v4497_v31  ;;  %v4500_v12 = vmax.f32 %v4460_v37, 0.0 }
 0xc77   : >> { %v11452_v15 = vpop.f32.mrf.mxu1  ;;  %11482 = vmatmul.mubr.msk.f32.gmra.mxu0 %vm4522_vm3, %v4498_v34 }
 0xc78   : >> { %v4499_v24 = vmax.f32 %v4455_v41, 0.0  ;;  %v4470_v29 = vadd.f32 %v11452_v15, %v9864_v39 }
 0xc79   : >> { %v4464_v19 = vpop.f32.mrf.mxu1 }
 0xc7a   : >> { %v4465_v9 = vadd.f32 %v9864_v39, %v4464_v19  ;;  %11484 = vmatprep.mubr.msk.f32.mxu0 %vm4522_vm3, %v4499_v24  ;;  %v4502_v14 = vmax.f32 %v4470_v29, 0.0 }
 0xc7b   : >> { %v11455_v52 = vpop.f32.mrf.mxu1  ;;  %11485 = vmatmul.mubr.msk.f32.gmra.mxu0 %vm4522_vm3, %v4500_v12 }
 0xc7c   : >> { %v4501_v21 = vmax.f32 %v4465_v9, 0.0  ;;  %v4480_v40 = vadd.f32 %v11455_v52, %v9864_v39 }
 0xc7d   : >> { %v4474_v2 = vpop.f32.mrf.mxu1 }
 0xc7e   : >> { %v4475_v4 = vadd.f32 %v9864_v39, %v4474_v2  ;;  %11487 = vmatprep.mubr.msk.f32.mxu0 %vm4522_vm3, %v4501_v21  ;;  %v4504_v35 = vmax.f32 %v4480_v40, 0.0 }
 0xc7f   : >> { %v11458_v26 = vpop.f32.mrf.mxu1  ;;  %11488 = vmatmul.mubr.msk.f32.gmra.mxu0 %vm4522_vm3, %v4502_v14 }
 0xc80   : >> { %v4503_v42 = vmax.f32 %v4475_v4, 0.0  ;;  %v4490_v38 = vadd.f32 %v11458_v26, %v9864_v39 }
 0xc81   : >> { %v4484_v60 = vpop.f32.mrf.mxu1 }
 0xc82   : >> { %v4485_v8 = vadd.f32 %v9864_v39, %v4484_v60  ;;  %11490 = vmatprep.mubr.msk.f32.mxu0 %vm4522_vm3, %v4503_v42  ;;  %v4506_v28 = vmax.f32 %v4490_v38, 0.0 }
 0xc83   : >> { %11491 = vmatmul.mubr.msk.f32.gmra.mxu0 %vm4522_vm3, %v4504_v35 }
 0xc84   : >> { %v4505_v62 = vmax.f32 %v4485_v8, 0.0 }
 0xc86   : >> { %11493 = vmatprep.mubr.msk.f32.mxu0 %vm4522_vm3, %v4505_v62 }
 0xc87   : >> { %11494 = vmatmul.mubr.msk.f32.gmra.mxu0 %vm4522_vm3, %v4506_v28 }
 0xd2f   : >> { %v11477_v6 = vpop.f32.mrf.mxu0 }
 0xd30   : >> { %v4637_v44 = vadd.f32 %v11477_v6, %v15262_v63 }
 0xd31   : >> { %v4631_v47 = vpop.f32.mrf.mxu0 }
 0xd32   : >> { %v15266_v17 = vadd.f32 %v4637_v44, %v15148_v46  ;;  %v4632_v11 = vadd.f32 %v15262_v63, %v4631_v47 }
 0xd33   : >> { %v11480_v13 = vpop.f32.mrf.mxu0 }
 0xd34   : >> { %v15270_v39 = vadd.f32 %v4632_v11, %v15145_v23  ;;  %v4647_v55 = vadd.f32 %v11480_v13, %v15262_v63  ;;  %v4719_v56 = vsel %vm631_vm0, %v15266_v17, 0.0 }
 0xd35   : >> { %4720 = vadd.xlane.f32.xlu0 %v4719_v56  ;;  %v4641_v10 = vpop.f32.mrf.mxu0 }
 0xd36   : >> { %v15276_v61 = vadd.f32 %v4647_v55, %v15162_v18  ;;  %v4642_v0 = vadd.f32 %v15262_v63, %v4641_v10  ;;  %v4716_v46 = vsel %vm631_vm0, %v15270_v39, 0.0 }
 0xd37   : >> { %4717 = vadd.xlane.f32.xlu1 %v4716_v46  ;;  %v11483_v27 = vpop.f32.mrf.mxu0 }
 0xd38   : >> { %v15282_v23 = vadd.f32 %v4642_v0, %v15158_v22  ;;  %v4657_v59 = vadd.f32 %v11483_v27, %v15262_v63  ;;  %v4725_v5 = vsel %vm631_vm0, %v15276_v61, 0.0 }
 0xd39   : >> { %4726 = vadd.xlane.f32.xlu0 %v4725_v5  ;;  %v4651_v1 = vpop.f32.mrf.mxu0 }
 0xd3a   : >> { %v15288_v18 = vadd.f32 %v4657_v59, %v15178_v33  ;;  %v4652_v49 = vadd.f32 %v15262_v63, %v4651_v1  ;;  %v4722_v20 = vsel %vm631_vm0, %v15282_v23, 0.0 }
 0xd3b   : >> { %4723 = vadd.xlane.f32.xlu1 %v4722_v20  ;;  %v11486_v54 = vpop.f32.mrf.mxu0 }
 0xd3c   : >> { %v15294_v22 = vadd.f32 %v4652_v49, %v15172_v36  ;;  %v4667_v43 = vadd.f32 %v11486_v54, %v15262_v63  ;;  %v4731_v51 = vsel %vm631_vm0, %v15288_v18, 0.0 }
 0xd3d   : >> { %4732 = vadd.xlane.f32.xlu0 %v4731_v51  ;;  %v4661_v3 = vpop.f32.mrf.mxu0 }
 0xd3e   : >> { %v15300_v33 = vadd.f32 %v4667_v43, %v15192_v50  ;;  %v4662_v16 = vadd.f32 %v15262_v63, %v4661_v3  ;;  %v4728_v25 = vsel %vm631_vm0, %v15294_v22, 0.0 }
 0xd3f   : >> { %4729 = vadd.xlane.f32.xlu1 %v4728_v25  ;;  %v11489_v31 = vpop.f32.mrf.mxu0 }
 0xd40   : >> { %v15306_v36 = vadd.f32 %v4662_v16, %v15186_v48  ;;  %v4677_v34 = vadd.f32 %v11489_v31, %v15262_v63  ;;  %v4737_v37 = vsel %vm631_vm0, %v15300_v33, 0.0 }
 0xd41   : >> { %4738 = vadd.xlane.f32.xlu0 %v4737_v37  ;;  %v4671_v30 = vpop.f32.mrf.mxu0 }
 0xd42   : >> { %v15312_v50 = vadd.f32 %v4677_v34, %v15206_v45  ;;  %v4672_v41 = vadd.f32 %v15262_v63, %v4671_v30  ;;  %v4734_v15 = vsel %vm631_vm0, %v15306_v36, 0.0 }
 0xd43   : >> { %4735 = vadd.xlane.f32.xlu1 %v4734_v15  ;;  %v11492_v24 = vpop.f32.mrf.mxu0 }
 0xd44   : >> { %v15318_v48 = vadd.f32 %v4672_v41, %v15200_v32  ;;  %v4687_v12 = vadd.f32 %v11492_v24, %v15262_v63  ;;  %v4743_v29 = vsel %vm631_vm0, %v15312_v50, 0.0 }
 0xd45   : >> { %4744 = vadd.xlane.f32.xlu0 %v4743_v29  ;;  %v4681_v19 = vpop.f32.mrf.mxu0 }
 0xd46   : >> { %v15324_v45 = vadd.f32 %v4687_v12, %v15220_v53  ;;  %v4682_v9 = vadd.f32 %v15262_v63, %v4681_v19  ;;  %v4740_v52 = vsel %vm631_vm0, %v15318_v48, 0.0 }
 0xd47   : >> { %4741 = vadd.xlane.f32.xlu1 %v4740_v52  ;;  %v11495_v21 = vpop.f32.mrf.mxu0 }
 0xd48   : >> { %v15330_v32 = vadd.f32 %v4682_v9, %v15214_v57  ;;  %v4697_v14 = vadd.f32 %v11495_v21, %v15262_v63  ;;  %v4749_v40 = vsel %vm631_vm0, %v15324_v45, 0.0 }
 0xd49   : >> { %4750 = vadd.xlane.f32.xlu0 %v4749_v40  ;;  %v4691_v2 = vpop.f32.mrf.mxu0 }
 0xd4a   : >> { %v15336_v53 = vadd.f32 %v4697_v14, %v15232_v7  ;;  %v4692_v4 = vadd.f32 %v15262_v63, %v4691_v2  ;;  %v4746_v26 = vsel %vm631_vm0, %v15330_v32, 0.0  ;;  %v9899_v7 = vld [vmem:[%s17868_s3 + $0x38] sm:$0xff] }
 0xd4b   : >> { %4747 = vadd.xlane.f32.xlu1 %v4746_v26  ;;  %11496 = vmatprep.subr.mxu1 %v9899_v7 }
 0xd4c   : >> { %v15342_v42 = vadd.f32 %v4692_v4, %v15227_v58  ;;  %v4755_v57 = vsel %vm631_vm0, %v15336_v53, 0.0  ;;  %11497 = vmatpush3.msra.mxu1 %v9899_v7 }
 0xd4d   : >> { %4756 = vadd.xlane.f32.xlu0 %v4755_v57 }
 0xd4e   : >> { %v4752_v35 = vsel %vm631_vm0, %v15342_v42, 0.0 }
 0xd4f   : >> { %4753 = vadd.xlane.f32.xlu1 %v4752_v35 }
 0xdbe   : >> { %v4721_v38 = vpop.xlane.xlu0 %4720 }
 0xdbf   : >> { %v4759_v60 = vmul.f32 0.03125, %v4721_v38 }
 0xdc0   : >> { %v4718_v8 = vpop.xlane.xlu1 %4717 }
 0xdc1   : >> { %v15352_v58 = vsub.f32 %v15266_v17, %v4759_v60  ;;  %v4758_v62 = vmul.f32 0.03125, %v4718_v8 }
 0xdc2   : >> { %v4727_v28 = vpop.xlane.xlu0 %4726 }
 0xdc3   : >> { %v15355_v63 = vsub.f32 %v15270_v39, %v4758_v62  ;;  %v4761_v6 = vmul.f32 0.03125, %v4727_v28  ;;  %v4787_v44 = vmul.f32 %v15352_v58, %v15352_v58 }
 0xdc4   : >> { %v4724_v47 = vpop.xlane.xlu1 %4723 }
 0xdc5   : >> { %v15360_v11 = vsub.f32 %v15276_v61, %v4761_v6  ;;  %v4760_v13 = vmul.f32 0.03125, %v4724_v47  ;;  %v4803_v55 = vsel %vm631_vm0, %v4787_v44, 0.0  ;;  %v4786_v17 = vmul.f32 %v15355_v63, %v15355_v63  ;;  %v9897_v47 = vld [vmem:[%s17868_s3 + $0x28] sm:$0xff] }
 0xdc6   : >> { %v4733_v56 = vpop.xlane.xlu0 %4732  ;;  %4804 = vadd.xlane.f32.xlu0 %v4803_v55 }
 0xdc7   : >> { %v15366_v10 = vsub.f32 %v15282_v23, %v4760_v13  ;;  %v4763_v39 = vmul.f32 0.03125, %v4733_v56  ;;  %v4800_v0 = vsel %vm631_vm0, %v4786_v17, 0.0  ;;  %v4789_v46 = vmul.f32 %v15360_v11, %v15360_v11  ;;  %v9896_v13 = vld [vmem:[%s17868_s3 + $0x20] sm:$0xff] }
 0xdc8   : >> { %4801 = vadd.xlane.f32.xlu1 %v4800_v0  ;;  %v4730_v61 = vpop.xlane.xlu1 %4729 }
 0xdc9   : >> { %v15372_v27 = vsub.f32 %v15288_v18, %v4763_v39  ;;  %v4762_v59 = vmul.f32 0.03125, %v4730_v61  ;;  %v4809_v5 = vsel %vm631_vm0, %v4789_v46, 0.0  ;;  %v4788_v1 = vmul.f32 %v15366_v10, %v15366_v10 }
 0xdca   : >> { %v4739_v49 = vpop.xlane.xlu0 %4738  ;;  %4810 = vadd.xlane.f32.xlu0 %v4809_v5 }
 0xdcb   : >> { %v15378_v23 = vsub.f32 %v15294_v22, %v4762_v59  ;;  %v4765_v20 = vmul.f32 0.03125, %v4739_v49  ;;  %v4806_v54 = vsel %vm631_vm0, %v4788_v1, 0.0  ;;  %v4791_v43 = vmul.f32 %v15372_v27, %v15372_v27 }
 0xdcc   : >> { %4807 = vadd.xlane.f32.xlu1 %v4806_v54  ;;  %v4736_v18 = vpop.xlane.xlu1 %4735 }
 0xdcd   : >> { %v15384_v51 = vsub.f32 %v15300_v33, %v4765_v20  ;;  %v4764_v3 = vmul.f32 0.03125, %v4736_v18  ;;  %v4815_v16 = vsel %vm631_vm0, %v4791_v43, 0.0  ;;  %v4790_v25 = vmul.f32 %v15378_v23, %v15378_v23 }
 0xdce   : >> { %v4745_v31 = vpop.xlane.xlu0 %4744  ;;  %4816 = vadd.xlane.f32.xlu0 %v4815_v16 }
 0xdcf   : >> { %v15390_v22 = vsub.f32 %v15306_v36, %v4764_v3  ;;  %v4767_v34 = vmul.f32 0.03125, %v4745_v31  ;;  %v4812_v37 = vsel %vm631_vm0, %v4790_v25, 0.0  ;;  %v4793_v30 = vmul.f32 %v15384_v51, %v15384_v51 }
 0xdd0   : >> { %4813 = vadd.xlane.f32.xlu1 %v4812_v37  ;;  %v4742_v33 = vpop.xlane.xlu1 %4741 }
 0xdd1   : >> { %v15396_v41 = vsub.f32 %v15312_v50, %v4767_v34  ;;  %v4766_v15 = vmul.f32 0.03125, %v4742_v33  ;;  %v4821_v24 = vsel %vm631_vm0, %v4793_v30, 0.0  ;;  %v4792_v12 = vmul.f32 %v15390_v22, %v15390_v22 }
 0xdd2   : >> { %v4751_v29 = vpop.xlane.xlu0 %4750  ;;  %4822 = vadd.xlane.f32.xlu0 %v4821_v24 }
 0xdd3   : >> { %v15402_v36 = vsub.f32 %v15318_v48, %v4766_v15  ;;  %v4769_v19 = vmul.f32 0.03125, %v4751_v29  ;;  %v4818_v9 = vsel %vm631_vm0, %v4792_v12, 0.0  ;;  %v4795_v52 = vmul.f32 %v15396_v41, %v15396_v41 }
 0xdd4   : >> { %4819 = vadd.xlane.f32.xlu1 %v4818_v9  ;;  %v4748_v50 = vpop.xlane.xlu1 %4747  ;;  %v15447_v9 = vld [vmem:[%s17878_s13] ss:$0 sm:$0xff] }
 0xdd5   : >> { %v15408_v21 = vsub.f32 %v15324_v45, %v4769_v19  ;;  %v4768_v14 = vmul.f32 0.03125, %v4748_v50  ;;  %v4827_v40 = vsel %vm631_vm0, %v4795_v52, 0.0  ;;  %v4794_v2 = vmul.f32 %v15402_v36, %v15402_v36 }
 0xdd6   : >> { %4828 = vadd.xlane.f32.xlu0 %v4827_v40  ;;  %v4757_v48 = vpop.xlane.xlu0 %4756 }
 0xdd7   : >> { %v15414_v4 = vsub.f32 %v15330_v32, %v4768_v14  ;;  %v4771_v26 = vmul.f32 0.03125, %v4757_v48  ;;  %v4824_v57 = vsel %vm631_vm0, %v4794_v2, 0.0  ;;  %v4797_v35 = vmul.f32 %v15408_v21, %v15408_v21 }
 0xdd8   : >> { %4825 = vadd.xlane.f32.xlu1 %v4824_v57  ;;  %v4754_v45 = vpop.xlane.xlu1 %4753 }
 0xdd9   : >> { %v15420_v7 = vsub.f32 %v15336_v53, %v4771_v26  ;;  %v4770_v38 = vmul.f32 0.03125, %v4754_v45  ;;  %v4833_v60 = vsel %vm631_vm0, %v4797_v35, 0.0  ;;  %v4796_v8 = vmul.f32 %v15414_v4, %v15414_v4 }
 0xdda   : >> { %4834 = vadd.xlane.f32.xlu0 %v4833_v60 }
 0xddb   : >> { %v15426_v32 = vsub.f32 %v15342_v42, %v4770_v38  ;;  %v4830_v62 = vsel %vm631_vm0, %v4796_v8, 0.0  ;;  %v4799_v28 = vmul.f32 %v15420_v7, %v15420_v7  ;;  %v9898_v42 = vld [vmem:[%s17868_s3 + $0x30] sm:$0xff] }
 0xddc   : >> { %4831 = vadd.xlane.f32.xlu1 %v4830_v62  ;;  %11498 = vmatprep.subr.mxu1 %v9898_v42 }
 0xddd   : >> { %v4839_v6 = vsel %vm631_vm0, %v4799_v28, 0.0  ;;  %v4798_v53 = vmul.f32 %v15426_v32, %v15426_v32  ;;  %11499 = vmatpush3.msra.mxu1 %v9898_v42 }
 0xdde   : >> { %4840 = vadd.xlane.f32.xlu0 %v4839_v6  ;;  %11500 = vmatprep.subr.mxu1 %v9897_v47 }
 0xddf   : >> { %v4836_v44 = vsel %vm631_vm0, %v4798_v53, 0.0  ;;  %11501 = vmatpush3.msra.mxu1 %v9897_v47 }
 0xde0   : >> { %4837 = vadd.xlane.f32.xlu1 %v4836_v44  ;;  %11502 = vmatprep.subr.mxu1 %v9896_v13 }
 0xde1   : >> { %11503 = vmatpush3.msra.mxu1 %v9896_v13 }
 0xe4f   : >> { %v4805_v55 = vpop.xlane.xlu0 %4804 }
 0xe50   : >> { %v4843_v17 = vmul.f32 0.03125, %v4805_v55 }
 0xe51   : >> { %v4802_v56 = vpop.xlane.xlu1 %4801 }
 0xe52   : >> { %v4857_v39 = vadd.f32 1e-05, %v4843_v17  ;;  %v4842_v0 = vmul.f32 0.03125, %v4802_v56 }
 0xe53   : >> { %v4811_v46 = vpop.xlane.xlu0 %4810 }
 0xe54   : >> { %12392 = vrsqrt.f32 %v4857_v39  ;;  %v4856_v61 = vadd.f32 1e-05, %v4842_v0  ;;  %v4845_v59 = vmul.f32 0.03125, %v4811_v46 }
 0xe55   : >> { %v4808_v5 = vpop.xlane.xlu1 %4807 }
 0xe56   : >> { %12394 = vrsqrt.f32 %v4856_v61  ;;  %v4859_v1 = vadd.f32 1e-05, %v4845_v59  ;;  %v4844_v49 = vmul.f32 0.03125, %v4808_v5 }
 0xe57   : >> { %v4817_v20 = vpop.xlane.xlu0 %4816 }
 0xe58   : >> { %12396 = vrsqrt.f32 %v4859_v1  ;;  %v4858_v54 = vadd.f32 1e-05, %v4844_v49  ;;  %v4847_v43 = vmul.f32 0.03125, %v4817_v20 }
 0xe59   : >> { %v4814_v18 = vpop.xlane.xlu1 %4813 }
 0xe5a   : >> { %12398 = vrsqrt.f32 %v4858_v54  ;;  %v4861_v3 = vadd.f32 1e-05, %v4847_v43  ;;  %v4846_v16 = vmul.f32 0.03125, %v4814_v18 }
 0xe5b   : >> { %v4823_v25 = vpop.xlane.xlu0 %4822 }
 0xe5c   : >> { %12400 = vrsqrt.f32 %v4861_v3  ;;  %v4860_v31 = vadd.f32 1e-05, %v4846_v16  ;;  %v4849_v34 = vmul.f32 0.03125, %v4823_v25 }
 0xe5d   : >> { %v4820_v37 = vpop.xlane.xlu1 %4819 }
 0xe5e   : >> { %12402 = vrsqrt.f32 %v4860_v31  ;;  %v4863_v30 = vadd.f32 1e-05, %v4849_v34  ;;  %v4848_v33 = vmul.f32 0.03125, %v4820_v37 }
 0xe5f   : >> { %v4829_v15 = vpop.xlane.xlu0 %4828 }
 0xe60   : >> { %12404 = vrsqrt.f32 %v4863_v30  ;;  %v4862_v24 = vadd.f32 1e-05, %v4848_v33  ;;  %v4851_v12 = vmul.f32 0.03125, %v4829_v15 }
 0xe61   : >> { %v12393_v29 = vpop.eup %12392  ;;  %v4826_v19 = vpop.xlane.xlu1 %4825 }
 0xe62   : >> { %v4885_v52 = vmul.f32 %v12393_v29, %v15352_v58  ;;  %12406 = vrsqrt.f32 %v4862_v24  ;;  %v4865_v50 = vadd.f32 1e-05, %v4851_v12  ;;  %v4850_v14 = vmul.f32 0.03125, %v4826_v19  ;;  %v15455_v58 = vld [vmem:[%s17879_s14] ss:$0 sm:$0xff] }
 0xe63   : >> { %v12395_v40 = vpop.eup %12394  ;;  %v4835_v2 = vpop.xlane.xlu0 %4834 }
 0xe64   : >> { %12408 = vrsqrt.f32 %v4865_v50  ;;  %v4864_v48 = vadd.f32 1e-05, %v4850_v14  ;;  %v4853_v26 = vmul.f32 0.03125, %v4835_v2  ;;  %v4905_v35 = vmul.f32 %v15447_v9, %v4885_v52 }
 0xe65   : >> { %v12397_v57 = vpop.eup %12396  ;;  %v4832_v45 = vpop.xlane.xlu1 %4831  ;;  %v4884_v38 = vmul.f32 %v12395_v40, %v15355_v63 }
 0xe66   : >> { %12410 = vrsqrt.f32 %v4864_v48  ;;  %v4867_v60 = vadd.f32 1e-05, %v4853_v26  ;;  %v4852_v8 = vmul.f32 0.03125, %v4832_v45  ;;  %v4887_v53 = vmul.f32 %v12397_v57, %v15360_v11 }
 0xe67   : >> { %v12399_v62 = vpop.eup %12398  ;;  %v4841_v28 = vpop.xlane.xlu0 %4840  ;;  %v4904_v6 = vmul.f32 %v15447_v9, %v4884_v38  ;;  %v15464_v17 = vadd.f32 %v15455_v58, %v4905_v35 }
 0xe68   : >> { %12412 = vrsqrt.f32 %v4867_v60  ;;  %v4866_v44 = vadd.f32 1e-05, %v4852_v8  ;;  %v4855_v42 = vmul.f32 0.03125, %v4841_v28  ;;  %v4886_v47 = vmul.f32 %v12399_v62, %v15366_v10 }
 0xe69   : >> { %v12401_v63 = vpop.eup %12400  ;;  %v4838_v13 = vpop.xlane.xlu1 %4837  ;;  %v15461_v55 = vadd.f32 %v15455_v58, %v4904_v6  ;;  %18094 = vst [vmem:[#allocation24_spill] sm:$0xff] %v15464_v17  ;;  %v4907_v56 = vmul.f32 %v15447_v9, %v4887_v53 }
 0xe6a   : >> { %12414 = vrsqrt.f32 %v4866_v44  ;;  %v4869_v39 = vadd.f32 1e-05, %v4855_v42  ;;  %v4854_v0 = vmul.f32 0.03125, %v4838_v13  ;;  %v4906_v11 = vmul.f32 %v15447_v9, %v4886_v47 }
 0xe6b   : >> { %18093 = vst [vmem:[#allocation22_spill] sm:$0xff] %v15461_v55  ;;  %v12403_v46 = vpop.eup %12402  ;;  %11504 = vmatprep.mubr.msk.f32.mxu1 %vm631_vm0, %v15461_v55  ;;  %v4889_v10 = vmul.f32 %v12401_v63, %v15372_v27  ;;  %v15478_v49 = vadd.f32 %v15455_v58, %v4907_v56 }
 0xe6c   : >> { %12416 = vrsqrt.f32 %v4869_v39  ;;  %v4868_v61 = vadd.f32 1e-05, %v4854_v0  ;;  %11505 = vmatmul.mubr.msk.f32.vlgmr.msra.gmra.mxu1 %vm631_vm0, %v15464_v17  ;;  %v15474_v59 = vadd.f32 %v15455_v58, %v4906_v11  ;;  %v4888_v5 = vmul.f32 %v12403_v46, %v15378_v23 }
 0xe6d   : >> { %v12405_v1 = vpop.eup %12404  ;;  %18096 = vst [vmem:[#allocation40_spill] sm:$0xff] %v15478_v49  ;;  %v4909_v20 = vmul.f32 %v15447_v9, %v4889_v10 }
 0xe6e   : >> { %18095 = vst [vmem:[#allocation21_spill] sm:$0xff] %v15474_v59  ;;  %12418 = vrsqrt.f32 %v4868_v61  ;;  %11507 = vmatprep.mubr.msk.f32.mxu1 %vm631_vm0, %v15474_v59  ;;  %v4908_v27 = vmul.f32 %v15447_v9, %v4888_v5  ;;  %v4891_v54 = vmul.f32 %v12405_v1, %v15384_v51 }
 0xe6f   : >> { %v12407_v43 = vpop.eup %12406  ;;  %v15494_v16 = vadd.f32 %v15455_v58, %v4909_v20 }
 0xe70   : >> { %11508 = vmatmul.mubr.msk.f32.gmra.mxu1 %vm631_vm0, %v15478_v49  ;;  %v15488_v23 = vadd.f32 %v15455_v58, %v4908_v27  ;;  %v4890_v18 = vmul.f32 %v12407_v43, %v15390_v22  ;;  %v4911_v51 = vmul.f32 %v15447_v9, %v4891_v54 }
 0xe71   : >> { %v12409_v3 = vpop.eup %12408  ;;  %18098 = vst [vmem:[#allocation26_spill] sm:$0xff] %v15494_v16 }
 0xe72   : >> { %18097 = vst [vmem:[#allocation20_spill] sm:$0xff] %v15488_v23  ;;  %11510 = vmatprep.mubr.msk.f32.mxu1 %vm631_vm0, %v15488_v23  ;;  %v4910_v25 = vmul.f32 %v15447_v9, %v4890_v18  ;;  %v4893_v31 = vmul.f32 %v12409_v3, %v15396_v41  ;;  %v15508_v33 = vadd.f32 %v15455_v58, %v4911_v51 }
 0xe73   : >> { %v12411_v34 = vpop.eup %12410 }
 0xe74   : >> { %11511 = vmatmul.mubr.msk.f32.gmra.mxu1 %vm631_vm0, %v15494_v16  ;;  %v15502_v37 = vadd.f32 %v15455_v58, %v4910_v25  ;;  %v4892_v22 = vmul.f32 %v12411_v34, %v15402_v36  ;;  %18100 = vst [vmem:[#allocation41_spill] sm:$0xff] %v15508_v33  ;;  %v4913_v41 = vmul.f32 %v15447_v9, %v4893_v31 }
 0xe75   : >> { %v12413_v30 = vpop.eup %12412 }
 0xe76   : >> { %18099 = vst [vmem:[#allocation19_spill] sm:$0xff] %v15502_v37  ;;  %11513 = vmatprep.mubr.msk.f32.mxu1 %vm631_vm0, %v15502_v37  ;;  %v4912_v15 = vmul.f32 %v15447_v9, %v4892_v22  ;;  %v4895_v24 = vmul.f32 %v12413_v30, %v15408_v21  ;;  %v15522_v52 = vadd.f32 %v15455_v58, %v4913_v41 }
 0xe77   : >> { %v12415_v12 = vpop.eup %12414 }
 0xe78   : >> { %11514 = vmatmul.mubr.msk.f32.gmra.mxu1 %vm631_vm0, %v15508_v33  ;;  %v15516_v29 = vadd.f32 %v15455_v58, %v4912_v15  ;;  %v4894_v36 = vmul.f32 %v12415_v12, %v15414_v4  ;;  %18102 = vst [vmem:[#allocation17_spill] sm:$0xff] %v15522_v52  ;;  %v4915_v21 = vmul.f32 %v15447_v9, %v4895_v24 }
 0xe79   : >> { %v12417_v19 = vpop.eup %12416 }
 0xe7a   : >> { %18101 = vst [vmem:[#allocation18_spill] sm:$0xff] %v15516_v29  ;;  %11516 = vmatprep.mubr.msk.f32.mxu1 %vm631_vm0, %v15516_v29  ;;  %v4914_v50 = vmul.f32 %v15447_v9, %v4894_v36  ;;  %v4897_v14 = vmul.f32 %v12417_v19, %v15420_v7  ;;  %v15536_v48 = vadd.f32 %v15455_v58, %v4915_v21 }
 0xe7b   : >> { %v12419_v40 = vpop.eup %12418 }
 0xe7c   : >> { %11517 = vmatmul.mubr.msk.f32.gmra.mxu1 %vm631_vm0, %v15522_v52  ;;  %v15530_v2 = vadd.f32 %v15455_v58, %v4914_v50  ;;  %v4896_v4 = vmul.f32 %v12419_v40, %v15426_v32  ;;  %18104 = vst [vmem:[#allocation25_spill] sm:$0xff] %v15536_v48  ;;  %v4917_v57 = vmul.f32 %v15447_v9, %v4897_v14 }
 0xe7e   : >> { %18103 = vst [vmem:[#allocation38_spill] sm:$0xff] %v15530_v2  ;;  %11519 = vmatprep.mubr.msk.f32.mxu1 %vm631_vm0, %v15530_v2  ;;  %v4916_v26 = vmul.f32 %v15447_v9, %v4896_v4  ;;  %v15548_v32 = vadd.f32 %v15455_v58, %v4917_v57  ;;  %v9901_v9 = vld [vmem:[%s17869_s4 + $0x1] ss:$0 sm:$0xff] }
 0xe80   : >> { %11520 = vmatmul.mubr.msk.f32.gmra.mxu1 %vm631_vm0, %v15536_v48  ;;  %v15543_v7 = vadd.f32 %v15455_v58, %v4916_v26  ;;  %18106 = vst [vmem:[#allocation33_spill] sm:$0xff] %v15548_v32 }
 0xe82   : >> { %18105 = vst [vmem:[#allocation27_spill] sm:$0xff] %v15543_v7  ;;  %11522 = vmatprep.mubr.msk.f32.mxu1 %vm631_vm0, %v15543_v7 }
 0xe84   : >> { %11523 = vmatmul.mubr.msk.f32.gmra.mxu1 %vm631_vm0, %v15548_v32 }
 0xf2c   : >> { %v11506_v35 = vpop.f32.mrf.mxu1 }
 0xf2d   : >> { %v15601_v54 = vadd.f32 %v11506_v35, %v9901_v9 }
 0xf2e   : >> { %v5059_v45 = vpop.f32.mrf.mxu1 }
 0xf2f   : >> { %v15555_v38 = vadd.f32 %v9901_v9, %v5059_v45 }
 0xf30   : >> { %v11509_v60 = vpop.f32.mrf.mxu1 }
 0xf31   : >> { %11553 = vmatprep.mubr.msk.f32.mxu0 %vm870_vm1, %v15555_v38  ;;  %v15593_v27 = vadd.f32 %v11509_v60, %v9901_v9 }
 0xf32   : >> { %v5069_v8 = vpop.f32.mrf.mxu1 }
 0xf33   : >> { %v15605_v43 = vadd.f32 %v9901_v9, %v5069_v8 }
 0xf34   : >> { %v11512_v62 = vpop.f32.mrf.mxu1 }
 0xf35   : >> { %v15585_v5 = vadd.f32 %v11512_v62, %v9901_v9 }
 0xf36   : >> { %v5079_v28 = vpop.f32.mrf.mxu1 }
 0xf37   : >> { %v15597_v20 = vadd.f32 %v9901_v9, %v5079_v28 }
 0xf38   : >> { %v11515_v58 = vpop.f32.mrf.mxu1 }
 0xf39   : >> { %v15577_v10 = vadd.f32 %v11515_v58, %v9901_v9 }
 0xf3a   : >> { %v5089_v6 = vpop.f32.mrf.mxu1 }
 0xf3b   : >> { %v15589_v1 = vadd.f32 %v9901_v9, %v5089_v6 }
 0xf3c   : >> { %v11518_v53 = vpop.f32.mrf.mxu1 }
 0xf3d   : >> { %v15569_v11 = vadd.f32 %v11518_v53, %v9901_v9 }
 0xf3e   : >> { %v5099_v44 = vpop.f32.mrf.mxu1 }
 0xf3f   : >> { %v15581_v61 = vadd.f32 %v9901_v9, %v5099_v44 }
 0xf40   : >> { %v11521_v42 = vpop.f32.mrf.mxu1 }
 0xf41   : >> { %v15565_v0 = vadd.f32 %v11521_v42, %v9901_v9 }
 0xf42   : >> { %v5109_v47 = vpop.f32.mrf.mxu1 }
 0xf43   : >> { %v15573_v46 = vadd.f32 %v9901_v9, %v5109_v47 }
 0xf44   : >> { %v11524_v63 = vpop.f32.mrf.mxu1 }
 0xf45   : >> { %v15559_v13 = vadd.f32 %v11524_v63, %v9901_v9 }
 0xf46   : >> { %v5119_v56 = vpop.f32.mrf.mxu1 }
 0xf47   : >> { %v15561_v39 = vadd.f32 %v9901_v9, %v5119_v56  ;;  %5175 = vrot.lane.b32.xlu1 %v15559_v13, %s12816_s20 }
 0xf49   : >> { %5173 = vrot.lane.b32.xlu0 %v15561_v39, %s12816_s20 }
 0xf4b   : >> { %5171 = vrot.lane.b32.xlu1 %v15565_v0, %s12816_s20 }
 0xf4d   : >> { %5167 = vrot.lane.b32.xlu0 %v15569_v11, %s12816_s20 }
 0xf4f   : >> { %5169 = vrot.lane.b32.xlu1 %v15573_v46, %s12816_s20 }
 0xf51   : >> { %5163 = vrot.lane.b32.xlu0 %v15577_v10, %s12816_s20 }
 0xf53   : >> { %5165 = vrot.lane.b32.xlu1 %v15581_v61, %s12816_s20 }
 0xf55   : >> { %5159 = vrot.lane.b32.xlu0 %v15585_v5, %s12816_s20 }
 0xf57   : >> { %5161 = vrot.lane.b32.xlu1 %v15589_v1, %s12816_s20 }
 0xf59   : >> { %5155 = vrot.lane.b32.xlu0 %v15593_v27, %s12816_s20 }
 0xf5b   : >> { %5157 = vrot.lane.b32.xlu1 %v15597_v20, %s12816_s20 }
 0xf5d   : >> { %5151 = vrot.lane.b32.xlu0 %v15601_v54, %s12816_s20 }
 0xf5f   : >> { %5153 = vrot.lane.b32.xlu1 %v15605_v43, %s12816_s20 }
 0xf61   : >> { %5992 = vrot.lane.b32.xlu0 %v15559_v13, %s12818_s25 }
 0xf63   : >> { %5149 = vrot.lane.b32.xlu1 %v15555_v38, %s12816_s20  ;;  %s18107_s20 = smov 80  }
 0xf65   : >> { %5988 = vrot.lane.b32.xlu0 %v15565_v0, %s12818_s25 }
 0xf67   : >> { %5986 = vrot.lane.b32.xlu1 %v15573_v46, %s12818_s25 }
 0xf69   : >> { %5984 = vrot.lane.b32.xlu0 %v15569_v11, %s12818_s25 }
 0xf6b   : >> { %5982 = vrot.lane.b32.xlu1 %v15581_v61, %s12818_s25 }
 0xf6d   : >> { %5980 = vrot.lane.b32.xlu0 %v15577_v10, %s12818_s25 }
 0xf6f   : >> { %5978 = vrot.lane.b32.xlu1 %v15589_v1, %s12818_s25 }
 0xf71   : >> { %5976 = vrot.lane.b32.xlu0 %v15585_v5, %s12818_s25 }
 0xf73   : >> { %5974 = vrot.lane.b32.xlu1 %v15597_v20, %s12818_s25 }
 0xf75   : >> { %5972 = vrot.lane.b32.xlu0 %v15593_v27, %s12818_s25 }
 0xf77   : >> { %5970 = vrot.lane.b32.xlu1 %v15605_v43, %s12818_s25 }
 0xf79   : >> { %5968 = vrot.lane.b32.xlu0 %v15601_v54, %s12818_s25 }
 0xf7b   : >> { %5966 = vrot.lane.b32.xlu1 %v15555_v38, %s12818_s25 }
 0xf7d   : >> { %5938 = vrot.lane.b32.xlu0 %v15555_v38, %s12815_s24 }
 0xf7f   : >> { %5940 = vrot.lane.b32.xlu1 %v15601_v54, %s12815_s24 }
 0xf81   : >> { %5942 = vrot.lane.b32.xlu0 %v15605_v43, %s12815_s24 }
 0xf83   : >> { %5944 = vrot.lane.b32.xlu1 %v15593_v27, %s12815_s24 }
 0xf85   : >> { %5946 = vrot.lane.b32.xlu0 %v15597_v20, %s12815_s24 }
 0xf87   : >> { %5948 = vrot.lane.b32.xlu1 %v15585_v5, %s12815_s24 }
 0xf89   : >> { %5950 = vrot.lane.b32.xlu0 %v15589_v1, %s12815_s24 }
 0xf8b   : >> { %5990 = vrot.lane.b32.xlu1 %v15561_v39, %s12818_s25  ;;  %s18138_s25 = scalar_lea.vmem %s17882_s17, %s12924_s26 }
 0xf8c   : >> { %s17829_s18 = scalar_lea.vmem %s18138_s25, %s12953_s19 }
 0xf8d   : >> { %5954 = vrot.lane.b32.xlu0 %v15581_v61, %s12815_s24 }
 0xf8f   : >> { %5952 = vrot.lane.b32.xlu1 %v15577_v10, %s12815_s24 }
 0xf91   : >> { %5958 = vrot.lane.b32.xlu0 %v15573_v46, %s12815_s24 }
 0xf93   : >> { %5956 = vrot.lane.b32.xlu1 %v15569_v11, %s12815_s24 }
 0xf95   : >> { %5542 = vrot.lane.b32.xlu0 %v15573_v46, %s12817_s21 }
 0xf97   : >> { %5960 = vrot.lane.b32.xlu1 %v15565_v0, %s12815_s24 }
 0xf99   : >> { %5538 = vrot.lane.b32.xlu0 %v15581_v61, %s12817_s21 }
 0xf9b   : >> { %5964 = vrot.lane.b32.xlu1 %v15559_v13, %s12815_s24 }
 0xf9d   : >> { %5534 = vrot.lane.b32.xlu0 %v15589_v1, %s12817_s21 }
 0xf9f   : >> { %5548 = vrot.lane.b32.xlu1 %v15559_v13, %s12817_s21 }
 0xfa1   : >> { %5530 = vrot.lane.b32.xlu0 %v15597_v20, %s12817_s21 }
 0xfa3   : >> { %5544 = vrot.lane.b32.xlu1 %v15565_v0, %s12817_s21 }
 0xfa5   : >> { %5526 = vrot.lane.b32.xlu0 %v15605_v43, %s12817_s21 }
 0xfa7   : >> { %5540 = vrot.lane.b32.xlu1 %v15569_v11, %s12817_s21 }
 0xfa9   : >> { %5522 = vrot.lane.b32.xlu0 %v15555_v38, %s12817_s21 }
 0xfab   : >> { %5536 = vrot.lane.b32.xlu1 %v15577_v10, %s12817_s21 }
 0xfad   : >> { %6799 = vrot.lane.b32.xlu0 %v15565_v0, %s18107_s20 }
 0xfaf   : >> { %5532 = vrot.lane.b32.xlu1 %v15585_v5, %s12817_s21 }
 0xfb1   : >> { %6795 = vrot.lane.b32.xlu0 %v15569_v11, %s18107_s20 }
 0xfb3   : >> { %5528 = vrot.lane.b32.xlu1 %v15593_v27, %s12817_s21 }
 0xfb5   : >> { %6791 = vrot.lane.b32.xlu0 %v15577_v10, %s18107_s20 }
 0xfb7   : >> { %5524 = vrot.lane.b32.xlu1 %v15601_v54, %s12817_s21 }
 0xfb9   : >> { %v5176_v18 = vpop.permute.xlu1 %5175  ;;  %6787 = vrot.lane.b32.xlu0 %v15585_v5, %s18107_s20 }
 0xfba   : >> { %11525 = vmatprep.subr.msk.mxu0 %vm870_vm1, %v5176_v18 }
 0xfbb   : >> { %11526 = vmatpush3.xpose.msk.msra.mxu0 %vm870_vm1, %v5176_v18  ;;  %6803 = vrot.lane.b32.xlu1 %v15559_v13, %s18107_s20  ;;  %v5174_v3 = vpop.permute.xlu0 %5173 }
 0xfbc   : >> { %11527 = vmatprep.subr.msk.mxu0 %vm870_vm1, %v5174_v3 }
 0xfbd   : >> { %v5172_v25 = vpop.permute.xlu1 %5171  ;;  %6783 = vrot.lane.b32.xlu0 %v15593_v27, %s18107_s20 }
 0xfbf   : >> { %6797 = vrot.lane.b32.xlu1 %v15573_v46, %s18107_s20  ;;  %11528 = vmatpush3.xpose.msk.msra.mxu0 %vm870_vm1, %v5174_v3  ;;  %v5168_v51 = vpop.permute.xlu0 %5167 }
 0xfc0   : >> { %11529 = vmatprep.subr.msk.mxu0 %vm870_vm1, %v5172_v25 }
 0xfc1   : >> { %v5170_v31 = vpop.permute.xlu1 %5169  ;;  %5962 = vrot.lane.b32.xlu0 %v15561_v39, %s12815_s24 }
 0xfc3   : >> { %6793 = vrot.lane.b32.xlu1 %v15581_v61, %s18107_s20  ;;  %11530 = vmatpush3.xpose.msk.msra.mxu0 %vm870_vm1, %v5172_v25  ;;  %v5164_v34 = vpop.permute.xlu0 %5163 }
 0xfc4   : >> { %11531 = vmatprep.subr.msk.mxu0 %vm870_vm1, %v5170_v31 }
 0xfc5   : >> { %v5166_v22 = vpop.permute.xlu1 %5165  ;;  %5546 = vrot.lane.b32.xlu0 %v15561_v39, %s12817_s21 }
 0xfc7   : >> { %6789 = vrot.lane.b32.xlu1 %v15589_v1, %s18107_s20  ;;  %11532 = vmatpush3.xpose.msk.msra.mxu0 %vm870_vm1, %v5170_v31  ;;  %v5160_v30 = vpop.permute.xlu0 %5159 }
 0xfc8   : >> { %11533 = vmatprep.subr.msk.mxu0 %vm870_vm1, %v5168_v51 }
 0xfc9   : >> { %v5162_v15 = vpop.permute.xlu1 %5161 }
 0xfcb   : >> { %6785 = vrot.lane.b32.xlu1 %v15597_v20, %s18107_s20  ;;  %11534 = vmatpush3.xpose.msk.msra.mxu0 %vm870_vm1, %v5168_v51  ;;  %v5156_v41 = vpop.permute.xlu0 %5155 }
 0xfcc   : >> { %11535 = vmatprep.subr.msk.mxu0 %vm870_vm1, %v5166_v22 }
 0xfcd   : >> { %v5158_v24 = vpop.permute.xlu1 %5157 }
 0xfcf   : >> { %6801 = vrot.lane.b32.xlu1 %v15561_v39, %s18107_s20  ;;  %11536 = vmatpush3.xpose.msk.msra.mxu0 %vm870_vm1, %v5166_v22  ;;  %v5152_v12 = vpop.permute.xlu0 %5151 }
 0xfd0   : >> { %11537 = vmatprep.subr.msk.mxu0 %vm870_vm1, %v5164_v34 }
 0xfd1   : >> { %v5154_v36 = vpop.permute.xlu1 %5153 }
 0xfd3   : >> { %11538 = vmatpush3.xpose.msk.msra.mxu0 %vm870_vm1, %v5164_v34  ;;  %v5993_v19 = vpop.permute.xlu0 %5992 }
 0xfd4   : >> { %11539 = vmatprep.subr.msk.mxu0 %vm870_vm1, %v5162_v15 }
 0xfd5   : >> { %v5150_v50 = vpop.permute.xlu1 %5149 }
 0xfd7   : >> { %11540 = vmatpush3.xpose.msk.msra.mxu0 %vm870_vm1, %v5162_v15  ;;  %v5989_v21 = vpop.permute.xlu0 %5988 }
 0xfd8   : >> { %11541 = vmatprep.subr.msk.mxu0 %vm870_vm1, %v5160_v30 }
 0xfd9   : >> { %v5987_v14 = vpop.permute.xlu1 %5986 }
 0xfdb   : >> { %11542 = vmatpush3.xpose.msk.msra.mxu0 %vm870_vm1, %v5160_v30  ;;  %v5985_v40 = vpop.permute.xlu0 %5984 }
 0xfdc   : >> { %11543 = vmatprep.subr.msk.mxu0 %vm870_vm1, %v5158_v24 }
 0xfdd   : >> { %v5983_v4 = vpop.permute.xlu1 %5982 }
 0xfdf   : >> { %11544 = vmatpush3.xpose.msk.msra.mxu0 %vm870_vm1, %v5158_v24  ;;  %v15739_v26 = vpop.permute.xlu0 %5980 }
 0xfe0   : >> { %11545 = vmatprep.subr.msk.mxu0 %vm870_vm1, %v5156_v41 }
 0xfe1   : >> { %v15742_v57 = vpop.permute.xlu1 %5978 }
 0xfe3   : >> { %11546 = vmatpush3.xpose.msk.msra.mxu0 %vm870_vm1, %v5156_v41  ;;  %v15745_v35 = vpop.permute.xlu0 %5976 }
 0xfe4   : >> { %11547 = vmatprep.subr.msk.mxu0 %vm870_vm1, %v5154_v36 }
 0xfe5   : >> { %v15748_v9 = vpop.permute.xlu1 %5974 }
 0xfe7   : >> { %11548 = vmatpush3.xpose.msk.msra.mxu0 %vm870_vm1, %v5154_v36  ;;  %v15751_v45 = vpop.permute.xlu0 %5972 }
 0xfe8   : >> { %11549 = vmatprep.subr.msk.mxu0 %vm870_vm1, %v5152_v12 }
 0xfe9   : >> { %v15754_v60 = vpop.permute.xlu1 %5970 }
 0xfeb   : >> { %11550 = vmatpush3.xpose.msk.msra.mxu0 %vm870_vm1, %v5152_v12  ;;  %v15757_v8 = vpop.permute.xlu0 %5968 }
 0xfec   : >> { %11551 = vmatprep.subr.msk.mxu0 %vm870_vm1, %v5150_v50 }
 0xfed   : >> { %v15760_v62 = vpop.permute.xlu1 %5966 }
 0xfef   : >> { %11552 = vmatpush3.xpose.msk.msra.mxu0 %vm870_vm1, %v5150_v50  ;;  %v5939_v28 = vpop.permute.xlu0 %5938 }
 0xff0   : >> { %11646 = vmatprep.subr.msk.mxu0 %vm870_vm1, %v5993_v19 }
 0xff1   : >> { %v15764_v58 = vpop.permute.xlu1 %5940 }
 0xff2   : >> { %11554 = vmatmul.mubr.msk.f32.vlgmr.msra.gmra.mxu0 %vm870_vm1, %v15601_v54 }
 0xff3   : >> { %11556 = vmatprep.mubr.msk.f32.mxu0 %vm870_vm1, %v15605_v43  ;;  %11647 = vmatpush3.xpose.msk.msra.mxu0 %vm870_vm1, %v5993_v19  ;;  %v15771_v6 = vpop.permute.xlu0 %5942 }
 0xff5   : >> { %v15773_v53 = vpop.permute.xlu1 %5944 }
 0xff6   : >> { %11557 = vmatmul.mubr.msk.f32.gmra.mxu0 %vm870_vm1, %v15593_v27 }
 0xff7   : >> { %11559 = vmatprep.mubr.msk.f32.mxu0 %vm870_vm1, %v15597_v20  ;;  %v15779_v44 = vpop.permute.xlu0 %5946 }
 0xff9   : >> { %v15781_v42 = vpop.permute.xlu1 %5948 }
 0xffa   : >> { %11560 = vmatmul.mubr.msk.f32.gmra.mxu0 %vm870_vm1, %v15585_v5 }
 0xffb   : >> { %11562 = vmatprep.mubr.msk.f32.mxu0 %vm870_vm1, %v15589_v1  ;;  %v15787_v47 = vpop.permute.xlu0 %5950 }
 0xffd   : >> { %v5991_v63 = vpop.permute.xlu1 %5990 }
 0xffe   : >> { %11563 = vmatmul.mubr.msk.f32.gmra.mxu0 %vm870_vm1, %v15577_v10  ;;  %11648 = vmatprep.subr.msk.mxu0 %vm870_vm1, %v5991_v63 }
 0xfff   : >> { %11565 = vmatprep.mubr.msk.f32.mxu0 %vm870_vm1, %v15581_v61  ;;  %11649 = vmatpush3.xpose.msk.msra.mxu0 %vm870_vm1, %v5991_v63  ;;  %v15795_v56 = vpop.permute.xlu0 %5954 }
0x1000   : >> { %11650 = vmatprep.subr.msk.mxu0 %vm870_vm1, %v5989_v21 }
0x1001   : >> { %v15798_v18 = vpop.permute.xlu1 %5952 }
0x1002   : >> { %11566 = vmatmul.mubr.msk.f32.gmra.mxu0 %vm870_vm1, %v15569_v11 }
0x1003   : >> { %11568 = vmatprep.mubr.msk.f32.mxu0 %vm870_vm1, %v15573_v46  ;;  %11651 = vmatpush3.xpose.msk.msra.mxu0 %vm870_vm1, %v5989_v21  ;;  %v15805_v3 = vpop.permute.xlu0 %5958 }
0x1004   : >> { %11652 = vmatprep.subr.msk.mxu0 %vm870_vm1, %v5987_v14 }
0x1005   : >> { %v15808_v25 = vpop.permute.xlu1 %5956 }
0x1006   : >> { %11569 = vmatmul.mubr.msk.f32.gmra.mxu0 %vm870_vm1, %v15565_v0 }
0x1007   : >> { %11571 = vmatprep.mubr.msk.f32.mxu0 %vm870_vm1, %v15561_v39  ;;  %11653 = vmatpush3.xpose.msk.msra.mxu0 %vm870_vm1, %v5987_v14  ;;  %v15815_v51 = vpop.permute.xlu0 %5542 }
0x1008   : >> { %11654 = vmatprep.subr.msk.mxu0 %vm870_vm1, %v5985_v40 }
0x1009   : >> { %v15818_v31 = vpop.permute.xlu1 %5960 }
0x100a   : >> { %11572 = vmatmul.mubr.msk.f32.gmra.mxu0 %vm870_vm1, %v15559_v13 }
0x100b   : >> { %11655 = vmatpush3.xpose.msk.msra.mxu0 %vm870_vm1, %v5985_v40  ;;  %11674 = vmatprep.mubr.msk.f32.mxu0 %vm870_vm1, %v5939_v28  ;;  %v15824_v34 = vpop.permute.xlu0 %5538 }
0x100c   : >> { %11656 = vmatprep.subr.msk.mxu0 %vm870_vm1, %v5983_v4 }
0x100d   : >> { %v15827_v22 = vpop.permute.xlu1 %5964 }
0x100f   : >> { %11657 = vmatpush3.xpose.msk.msra.mxu0 %vm870_vm1, %v5983_v4  ;;  %v15830_v30 = vpop.permute.xlu0 %5534 }
0x1010   : >> { %11658 = vmatprep.subr.msk.mxu0 %vm870_vm1, %v15739_v26 }
0x1011   : >> { %v5549_v15 = vpop.permute.xlu1 %5548 }
0x1012   : >> { %11574 = vmatprep.subr.mxu1 %v5549_v15 }
0x1013   : >> { %11575 = vmatpush3.msra.mxu1 %v5549_v15  ;;  %11659 = vmatpush3.xpose.msk.msra.mxu0 %vm870_vm1, %v15739_v26  ;;  %v15836_v41 = vpop.permute.xlu0 %5530  ;;  %v15976_v15 = vld [vmem:[%s17867_s2 + $0x10] sm:$0xff] }
0x1014   : >> { %11660 = vmatprep.subr.msk.mxu0 %vm870_vm1, %v15742_v57 }
0x1015   : >> { %v5545_v24 = vpop.permute.xlu1 %5544 }
0x1017   : >> { %11661 = vmatpush3.xpose.msk.msra.mxu0 %vm870_vm1, %v15742_v57  ;;  %v15842_v12 = vpop.permute.xlu0 %5526 }
0x1018   : >> { %11662 = vmatprep.subr.msk.mxu0 %vm870_vm1, %v15745_v35 }
0x1019   : >> { %v5541_v36 = vpop.permute.xlu1 %5540 }
0x101b   : >> { %11663 = vmatpush3.xpose.msk.msra.mxu0 %vm870_vm1, %v15745_v35  ;;  %v15848_v19 = vpop.permute.xlu0 %5522 }
0x101c   : >> { %11664 = vmatprep.subr.msk.mxu0 %vm870_vm1, %v15748_v9 }
0x101d   : >> { %v5537_v50 = vpop.permute.xlu1 %5536 }
0x101f   : >> { %11665 = vmatpush3.xpose.msk.msra.mxu0 %vm870_vm1, %v15748_v9  ;;  %v6800_v21 = vpop.permute.xlu0 %6799 }
0x1020   : >> { %11666 = vmatprep.subr.msk.mxu0 %vm870_vm1, %v15751_v45 }
0x1021   : >> { %v5533_v14 = vpop.permute.xlu1 %5532 }
0x1023   : >> { %11667 = vmatpush3.xpose.msk.msra.mxu0 %vm870_vm1, %v15751_v45  ;;  %v15858_v40 = vpop.permute.xlu0 %6795 }
0x1024   : >> { %11668 = vmatprep.subr.msk.mxu0 %vm870_vm1, %v15754_v60 }
0x1025   : >> { %v5529_v4 = vpop.permute.xlu1 %5528 }
0x1027   : >> { %11669 = vmatpush3.xpose.msk.msra.mxu0 %vm870_vm1, %v15754_v60  ;;  %v15864_v26 = vpop.permute.xlu0 %6791 }
0x1028   : >> { %11670 = vmatprep.subr.msk.mxu0 %vm870_vm1, %v15757_v8 }
0x1029   : >> { %v5525_v57 = vpop.permute.xlu1 %5524 }
0x102b   : >> { %11671 = vmatpush3.xpose.msk.msra.mxu0 %vm870_vm1, %v15757_v8  ;;  %v15870_v35 = vpop.permute.xlu0 %6787 }
0x102c   : >> { %11672 = vmatprep.subr.msk.mxu0 %vm870_vm1, %v15760_v62 }
0x102d   : >> { %v6804_v9 = vpop.permute.xlu1 %6803 }
0x102f   : >> { %11673 = vmatpush3.xpose.msk.msra.mxu0 %vm870_vm1, %v15760_v62  ;;  %v15876_v45 = vpop.permute.xlu0 %6783 }
0x1030   : >> { %11767 = vmatprep.subr.msk.mxu0 %vm870_vm1, %v6804_v9 }
0x1031   : >> { %v6798_v60 = vpop.permute.xlu1 %6797 }
0x1032   : >> { %11675 = vmatmul.mubr.msk.f32.vlgmr.msra.gmra.mxu0 %vm870_vm1, %v15764_v58 }
0x1033   : >> { %11677 = vmatprep.mubr.msk.f32.mxu0 %vm870_vm1, %v15771_v6  ;;  %11768 = vmatpush3.xpose.msk.msra.mxu0 %vm870_vm1, %v6804_v9  ;;  %v5963_v8 = vpop.permute.xlu0 %5962 }
0x1035   : >> { %v6794_v28 = vpop.permute.xlu1 %6793 }
0x1036   : >> { %11678 = vmatmul.mubr.msk.f32.gmra.mxu0 %vm870_vm1, %v15773_v53 }
0x1037   : >> { %11680 = vmatprep.mubr.msk.f32.mxu0 %vm870_vm1, %v15779_v44  ;;  %v5547_v62 = vpop.permute.xlu0 %5546  ;;  %v15948_v44 = vld [vmem:[%s17867_s2 + $0x8] sm:$0xff] }
0x1038   : >> { %11576 = vmatprep.subr.mxu1 %v5547_v62 }
0x1039   : >> { %v6790_v63 = vpop.permute.xlu1 %6789  ;;  %11577 = vmatpush3.msra.mxu1 %v5547_v62 }
0x103a   : >> { %11578 = vmatprep.subr.mxu1 %v5545_v24  ;;  %11681 = vmatmul.mubr.msk.f32.gmra.mxu0 %vm870_vm1, %v15781_v42 }
0x103b   : >> { %11579 = vmatpush3.msra.mxu1 %v5545_v24  ;;  %11683 = vmatprep.mubr.msk.f32.mxu0 %vm870_vm1, %v15787_v47 }
0x103c   : >> { %11580 = vmatprep.subr.mxu1 %v15815_v51 }
0x103d   : >> { %v6786_v58 = vpop.permute.xlu1 %6785  ;;  %11581 = vmatpush3.msra.mxu1 %v15815_v51  ;;  %v15966_v51 = vld [vmem:[%s17867_s2 + $0x18] sm:$0xff] }
0x103e   : >> { %11582 = vmatprep.subr.mxu1 %v5541_v36  ;;  %11684 = vmatmul.mubr.msk.f32.gmra.mxu0 %vm870_vm1, %v15798_v18 }
0x103f   : >> { %11583 = vmatpush3.msra.mxu1 %v5541_v36  ;;  %11686 = vmatprep.mubr.msk.f32.mxu0 %vm870_vm1, %v15795_v56  ;;  %v15956_v56 = vld [vmem:[%s17867_s2] sm:$0xff] }
0x1040   : >> { %11584 = vmatprep.subr.mxu1 %v15824_v34  ;;  %v15986_v36 = vld [vmem:[%s17867_s2 + $0x20] sm:$0xff] }
0x1041   : >> { %v6802_v6 = vpop.permute.xlu1 %6801  ;;  %11585 = vmatpush3.msra.mxu1 %v15824_v34 }
0x1042   : >> { %11586 = vmatprep.subr.mxu1 %v5537_v50  ;;  %11687 = vmatmul.mubr.msk.f32.gmra.mxu0 %vm870_vm1, %v15808_v25 }
0x1043   : >> { %11769 = vmatprep.subr.msk.mxu0 %vm870_vm1, %v6802_v6  ;;  %11587 = vmatpush3.msra.mxu1 %v5537_v50 }
0x1044   : >> { %11689 = vmatprep.mubr.msk.f32.mxu0 %vm870_vm1, %v15805_v3  ;;  %11770 = vmatpush3.xpose.msk.msra.mxu0 %vm870_vm1, %v6802_v6 }
0x1045   : >> { %11588 = vmatprep.subr.mxu1 %v15830_v30  ;;  %11771 = vmatprep.subr.msk.mxu0 %vm870_vm1, %v6800_v21 }
0x1046   : >> { %11589 = vmatpush3.msra.mxu1 %v15830_v30  ;;  %11690 = vmatmul.mubr.msk.f32.gmra.mxu0 %vm870_vm1, %v15818_v31 }
0x1047   : >> { %11590 = vmatprep.subr.mxu1 %v5533_v14  ;;  %11692 = vmatprep.mubr.msk.f32.mxu0 %vm870_vm1, %v5963_v8 }
0x1048   : >> { %11591 = vmatpush3.msra.mxu1 %v5533_v14  ;;  %11772 = vmatpush3.xpose.msk.msra.mxu0 %vm870_vm1, %v6800_v21  ;;  %v15994_v21 = vld [vmem:[%s17867_s2 + $0x28] sm:$0xff] }
0x1049   : >> { %11592 = vmatprep.subr.mxu1 %v15836_v41  ;;  %11773 = vmatprep.subr.msk.mxu0 %vm870_vm1, %v6798_v60 }
0x104a   : >> { %11593 = vmatpush3.msra.mxu1 %v15836_v41  ;;  %11693 = vmatmul.mubr.msk.f32.gmra.mxu0 %vm870_vm1, %v15827_v22 }
0x104b   : >> { %11594 = vmatprep.subr.mxu1 %v5529_v4 }
0x104c   : >> { %11595 = vmatpush3.msra.mxu1 %v5529_v4  ;;  %11774 = vmatpush3.xpose.msk.msra.mxu0 %vm870_vm1, %v6798_v60 }
0x104d   : >> { %11596 = vmatprep.subr.mxu1 %v15842_v12  ;;  %11775 = vmatprep.subr.msk.mxu0 %vm870_vm1, %v15858_v40 }
0x104e   : >> { %11597 = vmatpush3.msra.mxu1 %v15842_v12 }
0x104f   : >> { %11598 = vmatprep.subr.mxu1 %v5525_v57 }
0x1050   : >> { %11599 = vmatpush3.msra.mxu1 %v5525_v57  ;;  %11776 = vmatpush3.xpose.msk.msra.mxu0 %vm870_vm1, %v15858_v40  ;;  %v16006_v57 = vld [vmem:[%s17867_s2 + $0x30] sm:$0xff] }
0x1051   : >> { %11600 = vmatprep.subr.mxu1 %v15848_v19  ;;  %11777 = vmatprep.subr.msk.mxu0 %vm870_vm1, %v6794_v28 }
0x1052   : >> { %11601 = vmatpush3.msra.mxu1 %v15848_v19 }
0x1054   : >> { %11778 = vmatpush3.xpose.msk.msra.mxu0 %vm870_vm1, %v6794_v28 }
0x1055   : >> { %11779 = vmatprep.subr.msk.mxu0 %vm870_vm1, %v15864_v26 }
0x1058   : >> { %11780 = vmatpush3.xpose.msk.msra.mxu0 %vm870_vm1, %v15864_v26 }
0x1059   : >> { %11781 = vmatprep.subr.msk.mxu0 %vm870_vm1, %v6790_v63 }
0x105c   : >> { %11782 = vmatpush3.xpose.msk.msra.mxu0 %vm870_vm1, %v6790_v63  ;;  %v16026_v63 = vld [vmem:[%s17867_s2 + $0x40] sm:$0xff] }
0x105d   : >> { %11783 = vmatprep.subr.msk.mxu0 %vm870_vm1, %v15870_v35 }
0x1060   : >> { %11784 = vmatpush3.xpose.msk.msra.mxu0 %vm870_vm1, %v15870_v35 }
0x1061   : >> { %11785 = vmatprep.subr.msk.mxu0 %vm870_vm1, %v6786_v58 }
0x1064   : >> { %11786 = vmatpush3.xpose.msk.msra.mxu0 %vm870_vm1, %v6786_v58 }
0x1065   : >> { %11787 = vmatprep.subr.msk.mxu0 %vm870_vm1, %v15876_v45 }
0x1068   : >> { %11788 = vmatpush3.xpose.msk.msra.mxu0 %vm870_vm1, %v15876_v45  ;;  %v16014_v45 = vld [vmem:[%s17867_s2 + $0x38] sm:$0xff] }
0x10b2   : >> { %v11555_v53 = vpop.f32.mrf.mxu0 }
0x10b3   : >> { %v15951_v42 = vadd.f32 %v15948_v44, %v11555_v53  ;;  %v16034_v53 = vld [vmem:[%s17867_s2 + $0x48] sm:$0xff] }
0x10b4   : >> { %v5299_v47 = vpop.f32.mrf.mxu0 }
0x10b5   : >> { %v15959_v18 = vadd.f32 %v15956_v56, %v5299_v47  ;;  %v5371_v3 = vsel %vm1062_vm2, %v15951_v42, -inf }
0x10b6   : >> { %5372 = vmax.xlane.f32.xlu1 %v5371_v3  ;;  %v11558_v25 = vpop.f32.mrf.mxu0 }
0x10b7   : >> { %v15969_v31 = vadd.f32 %v15966_v51, %v11558_v25  ;;  %v5368_v34 = vsel %vm1062_vm2, %v15959_v18, -inf }
0x10b8   : >> { %v5309_v22 = vpop.f32.mrf.mxu0  ;;  %5369 = vmax.xlane.f32.xlu0 %v5368_v34 }
0x10b9   : >> { %v15979_v41 = vadd.f32 %v15976_v15, %v5309_v22  ;;  %v5377_v24 = vsel %vm1062_vm2, %v15969_v31, -inf  ;;  %v16046_v22 = vld [vmem:[%s17867_s2 + $0x50] sm:$0xff] }
0x10ba   : >> { %v11561_v30 = vpop.f32.mrf.mxu0 }
0x10bb   : >> { %v15997_v14 = vadd.f32 %v15994_v21, %v11561_v30  ;;  %v5374_v4 = vsel %vm1062_vm2, %v15979_v41, -inf }
0x10bc   : >> { %v5319_v12 = vpop.f32.mrf.mxu0  ;;  %5378 = vmax.xlane.f32.xlu0 %v5377_v24 }
0x10bd   : >> { %v15989_v19 = vadd.f32 %v15986_v36, %v5319_v12  ;;  %v5383_v28 = vsel %vm1062_vm2, %v15997_v14, -inf  ;;  %v16054_v12 = vld [vmem:[%s17867_s2 + $0x58] sm:$0xff] }
0x10be   : >> { %v11564_v50 = vpop.f32.mrf.mxu0 }
0x10bf   : >> { %v5380_v40 = vsel %vm1062_vm2, %v15989_v19, -inf  ;;  %v16017_v60 = vadd.f32 %v16014_v45, %v11564_v50 }
0x10c0   : >> { %v5329_v26 = vpop.f32.mrf.mxu0  ;;  %5381 = vmax.xlane.f32.xlu1 %v5380_v40  ;;  %5375 = vmax.xlane.f32.xlu0 %v5374_v4 }
0x10c1   : >> { %v16009_v35 = vadd.f32 %v16006_v57, %v5329_v26  ;;  %v5389_v25 = vsel %vm1062_vm2, %v16017_v60, -inf }
0x10c2   : >> { %v11567_v9 = vpop.f32.mrf.mxu0 }
0x10c3   : >> { %v5386_v8 = vsel %vm1062_vm2, %v16009_v35, -inf  ;;  %v16037_v47 = vadd.f32 %v16034_v53, %v11567_v9  ;;  %v16066_v9 = vld [vmem:[%s17867_s2 + $0x60] sm:$0xff] }
0x10c4   : >> { %v5339_v62 = vpop.f32.mrf.mxu0  ;;  %5387 = vmax.xlane.f32.xlu1 %v5386_v8  ;;  %5384 = vmax.xlane.f32.xlu0 %v5383_v28  ;;  %v16074_v28 = vld [vmem:[%s17867_s2 + $0x68] sm:$0xff] }
0x10c5   : >> { %v16029_v58 = vadd.f32 %v16026_v63, %v5339_v62  ;;  %v5395_v4 = vsel %vm1062_vm2, %v16037_v47, -inf }
0x10c6   : >> { %v11570_v6 = vpop.f32.mrf.mxu0 }
0x10c7   : >> { %v5392_v3 = vsel %vm1062_vm2, %v16029_v58, -inf  ;;  %v16057_v50 = vadd.f32 %v16054_v12, %v11570_v6 }
0x10c8   : >> { %v5349_v34 = vpop.f32.mrf.mxu0  ;;  %5393 = vmax.xlane.f32.xlu1 %v5392_v3  ;;  %5390 = vmax.xlane.f32.xlu0 %v5389_v25 }
0x10c9   : >> { %v16049_v30 = vadd.f32 %v16046_v22, %v5349_v34  ;;  %v5401_v3 = vsel %vm1062_vm2, %v16057_v50, -inf }
0x10ca   : >> { %v11573_v24 = vpop.f32.mrf.mxu0 }
0x10cb   : >> { %v5398_v40 = vsel %vm1062_vm2, %v16049_v30, -inf  ;;  %v16077_v62 = vadd.f32 %v16074_v28, %v11573_v24 }
0x10cc   : >> { %v5359_v26 = vpop.f32.mrf.mxu0  ;;  %5399 = vmax.xlane.f32.xlu1 %v5398_v40  ;;  %5396 = vmax.xlane.f32.xlu0 %v5395_v4 }
0x10cd   : >> { %v16069_v8 = vadd.f32 %v16066_v9, %v5359_v26  ;;  %v5407_v25 = vsel %vm1062_vm2, %v16077_v62, -inf }
0x10cf   : >> { %v5404_v6 = vsel %vm1062_vm2, %v16069_v8, -inf }
0x10d0   : >> { %5405 = vmax.xlane.f32.xlu1 %v5404_v6  ;;  %5402 = vmax.xlane.f32.xlu0 %v5401_v3 }
0x10d4   : >> { %5408 = vmax.xlane.f32.xlu0 %v5407_v25 }
0x10e1   : >> { %6781 = vrot.lane.b32.xlu1 %v15605_v43, %s18107_s20 }
0x10e5   : >> { %6777 = vrot.lane.b32.xlu1 %v15555_v38, %s18107_s20 }
0x10e9   : >> { %6751 = vrot.lane.b32.xlu1 %v15601_v54, %s18108_s0 }
0x10ea   : >> { %6779 = vrot.lane.b32.xlu0 %v15601_v54, %s18107_s20  ;;  %s18120_s20 = smov 40  }
0x10ed   : >> { %6755 = vrot.lane.b32.xlu1 %v15593_v27, %s18108_s0 }
0x10ee   : >> { %6749 = vrot.lane.b32.xlu0 %v15555_v38, %s18108_s0 }
0x10f2   : >> { %6753 = vrot.lane.b32.xlu0 %v15605_v43, %s18108_s0 }
0x10f6   : >> { %6757 = vrot.lane.b32.xlu0 %v15597_v20, %s18108_s0 }
0x113f   : >> { %v5373_v34 = vpop.xlane.xlu1 %5372 }
0x1140   : >> { %v5411_v24 = vsub.f32 %v15951_v42, %v5373_v34 }
0x1141   : >> { %v5370_v40 = vpop.xlane.xlu0 %5369 }
0x1142   : >> { %v5426_v4 = vmul.f32 1.442695, %v5411_v24  ;;  %v5410_v26 = vsub.f32 %v15959_v18, %v5370_v40 }
0x1144   : >> { %12420 = vpow2.f32 %v5426_v4  ;;  %v5424_v6 = vmul.f32 1.442695, %v5410_v26 }
0x1145   : >> { %v5379_v3 = vpop.xlane.xlu0 %5378 }
0x1146   : >> { %12422 = vpow2.f32 %v5424_v6  ;;  %v5413_v25 = vsub.f32 %v15969_v31, %v5379_v3 }
0x1148   : >> { %v5430_v7 = vmul.f32 1.442695, %v5413_v25 }
0x1149   : >> { %v5382_v32 = vpop.xlane.xlu1 %5381  ;;  %v5376_v2 = vpop.xlane.xlu0 %5375 }
0x114a   : >> { %12424 = vpow2.f32 %v5430_v7  ;;  %v5414_v48 = vsub.f32 %v15989_v19, %v5382_v32  ;;  %v5412_v29 = vsub.f32 %v15979_v41, %v5376_v2 }
0x114c   : >> { %v5428_v52 = vmul.f32 1.442695, %v5412_v29  ;;  %v5432_v42 = vmul.f32 1.442695, %v5414_v48 }
0x114d   : >> { %v5388_v34 = vpop.xlane.xlu1 %5387  ;;  %v5385_v24 = vpop.xlane.xlu0 %5384 }
0x114e   : >> { %v5416_v18 = vsub.f32 %v16009_v35, %v5388_v34  ;;  %v5415_v40 = vsub.f32 %v15997_v14, %v5385_v24  ;;  %12426 = vpow2.f32 %v5428_v52 }
0x114f   : >> { %12428 = vpow2.f32 %v5432_v42 }
0x1150   : >> { %v5434_v4 = vmul.f32 1.442695, %v5415_v40  ;;  %v5436_v31 = vmul.f32 1.442695, %v5416_v18 }
0x1151   : >> { %v16108_v26 = vpop.eup %12420  ;;  %v5394_v6 = vpop.xlane.xlu1 %5393 }
0x1152   : >> { %v5391_v7 = vpop.xlane.xlu0 %5390  ;;  %v5418_v32 = vsub.f32 %v16029_v58, %v5394_v6  ;;  %v5455_v29 = vsel %vm1062_vm2, %v16108_v26, 0.0  ;;  %12430 = vpow2.f32 %v5434_v4 }
0x1153   : >> { %v5417_v2 = vsub.f32 %v16017_v60, %v5391_v7  ;;  %v16114_v48 = vpop.eup %12422  ;;  %5456 = vadd.xlane.f32.xlu0 %v5455_v29  ;;  %12432 = vpow2.f32 %v5436_v31 }
0x1154   : >> { %v5452_v52 = vsel %vm1062_vm2, %v16114_v48, 0.0  ;;  %v5440_v19 = vmul.f32 1.442695, %v5418_v32 }
0x1155   : >> { %v5438_v41 = vmul.f32 1.442695, %v5417_v2  ;;  %v5400_v14 = vpop.xlane.xlu1 %5399  ;;  %5453 = vadd.xlane.f32.xlu1 %v5452_v52 }
0x1156   : >> { %v5397_v35 = vpop.xlane.xlu0 %5396  ;;  %v5420_v58 = vsub.f32 %v16049_v30, %v5400_v14 }
0x1157   : >> { %v5419_v60 = vsub.f32 %v16037_v47, %v5397_v35  ;;  %v16120_v3 = vpop.eup %12424  ;;  %12434 = vpow2.f32 %v5438_v41 }
0x1158   : >> { %v5461_v42 = vsel %vm1062_vm2, %v16120_v3, 0.0  ;;  %12436 = vpow2.f32 %v5440_v19  ;;  %v5444_v34 = vmul.f32 1.442695, %v5420_v58 }
0x1159   : >> { %v5442_v25 = vmul.f32 1.442695, %v5419_v60  ;;  %v5406_v24 = vpop.xlane.xlu1 %5405  ;;  %5462 = vadd.xlane.f32.xlu0 %v5461_v42 }
0x115a   : >> { %v5403_v18 = vpop.xlane.xlu0 %5402  ;;  %v5422_v40 = vsub.f32 %v16069_v8, %v5406_v24 }
0x115b   : >> { %v5421_v4 = vsub.f32 %v16057_v50, %v5403_v18  ;;  %12438 = vpow2.f32 %v5442_v25  ;;  %v16126_v30 = vpop.eup %12426 }
0x115c   : >> { %12440 = vpow2.f32 %v5444_v34  ;;  %v5448_v31 = vmul.f32 1.442695, %v5422_v40  ;;  %v5458_v7 = vsel %vm1062_vm2, %v16126_v30, 0.0  ;;  %v16130_v2 = vpop.eup %12428 }
0x115d   : >> { %v5446_v47 = vmul.f32 1.442695, %v5421_v4  ;;  %v6782_v6 = vpop.permute.xlu1 %6781  ;;  %5459 = vadd.xlane.f32.xlu1 %v5458_v7  ;;  %v5464_v41 = vsel %vm1062_vm2, %v16130_v2, 0.0 }
0x115e   : >> { %v5409_v32 = vpop.xlane.xlu0 %5408  ;;  %11789 = vmatprep.subr.msk.mxu0 %vm870_vm1, %v6782_v6 }
0x115f   : >> { %v5423_v29 = vsub.f32 %v16077_v62, %v5409_v32  ;;  %12442 = vpow2.f32 %v5446_v47  ;;  %11790 = vmatpush3.xpose.msk.msra.mxu0 %vm870_vm1, %v6782_v6  ;;  %v16135_v50 = vpop.eup %12430 }
0x1160   : >> { %12444 = vpow2.f32 %v5448_v31  ;;  %v5467_v52 = vsel %vm1062_vm2, %v16135_v50, 0.0  ;;  %v16141_v14 = vpop.eup %12432 }
0x1161   : >> { %v5450_v8 = vmul.f32 1.442695, %v5423_v29  ;;  %v6778_v62 = vpop.permute.xlu1 %6777  ;;  %5465 = vadd.xlane.f32.xlu1 %v5464_v41  ;;  %5468 = vadd.xlane.f32.xlu0 %v5467_v52  ;;  %v5470_v58 = vsel %vm1062_vm2, %v16141_v14, 0.0 }
0x1162   : >> { %v6780_v19 = vpop.permute.xlu0 %6779 }
0x1163   : >> { %12446 = vpow2.f32 %v5450_v8  ;;  %11791 = vmatprep.subr.msk.mxu0 %vm870_vm1, %v6780_v19 }
0x1164   : >> { %v16144_v35 = vpop.eup %12434  ;;  %11792 = vmatpush3.xpose.msk.msra.mxu0 %vm870_vm1, %v6780_v19 }
0x1165   : >> { %11793 = vmatprep.subr.msk.mxu0 %vm870_vm1, %v6778_v62  ;;  %v5473_v60 = vsel %vm1062_vm2, %v16144_v35, 0.0  ;;  %v16152_v42 = vpop.eup %12436  ;;  %5471 = vadd.xlane.f32.xlu1 %v5470_v58  ;;  %v6752_v24 = vpop.permute.xlu1 %6751 }
0x1166   : >> { %v6750_v25 = vpop.permute.xlu0 %6749  ;;  %5474 = vadd.xlane.f32.xlu0 %v5473_v60  ;;  %v5476_v18 = vsel %vm1062_vm2, %v16152_v42, 0.0 }
0x1167   : >> { %11795 = vmatprep.mubr.msk.f32.mxu0 %vm870_vm1, %v6750_v25 }
0x1168   : >> { %v16155_v34 = vpop.eup %12438  ;;  %11794 = vmatpush3.xpose.msk.msra.mxu0 %vm870_vm1, %v6778_v62  ;;  %v11676_v62 = vpop.f32.mrf.mxu0 }
0x1169   : >> { %v5479_v40 = vsel %vm1062_vm2, %v16155_v34, 0.0  ;;  %v16162_v47 = vpop.eup %12440  ;;  %5477 = vadd.xlane.f32.xlu1 %v5476_v18  ;;  %v6756_v8 = vpop.permute.xlu1 %6755 }
0x116a   : >> { %v6754_v4 = vpop.permute.xlu0 %6753  ;;  %5480 = vadd.xlane.f32.xlu0 %v5479_v40  ;;  %v5482_v6 = vsel %vm1062_vm2, %v16162_v47, 0.0  ;;  %v6116_v58 = vpop.f32.mrf.mxu0 }
0x116b   : >> { %11796 = vmatmul.mubr.msk.f32.vlgmr.msra.gmra.mxu0 %vm870_vm1, %v6752_v24 }
0x116c   : >> { %v16165_v31 = vpop.eup %12442  ;;  %11798 = vmatprep.mubr.msk.f32.mxu0 %vm870_vm1, %v6754_v4  ;;  %v11679_v60 = vpop.f32.mrf.mxu0 }
0x116d   : >> { %v5485_v7 = vsel %vm1062_vm2, %v16165_v31, 0.0  ;;  %v16172_v29 = vpop.eup %12444  ;;  %5483 = vadd.xlane.f32.xlu1 %v5482_v6  ;;  %v16201_v6 = vadd.f32 %v15956_v56, %v6116_v58  ;;  %v16212_v37 = vadd.f32 %v15966_v51, %v11679_v60 }
0x116e   : >> { %v6758_v32 = vpop.permute.xlu0 %6757  ;;  %5486 = vadd.xlane.f32.xlu0 %v5485_v7  ;;  %v5488_v19 = vsel %vm1062_vm2, %v16172_v29, 0.0  ;;  %v6126_v25 = vpop.f32.mrf.mxu0 }
0x116f   : >> { %11799 = vmatmul.mubr.msk.f32.gmra.mxu0 %vm870_vm1, %v6756_v8  ;;  %v16207_v8 = vadd.f32 %v15976_v15, %v6126_v25 }
0x1170   : >> { %v16174_v41 = vpop.eup %12446  ;;  %11801 = vmatprep.mubr.msk.f32.mxu0 %vm870_vm1, %v6758_v32  ;;  %v11682_v24 = vpop.f32.mrf.mxu0  ;;  %v16204_v32 = vadd.f32 %v15948_v44, %v11676_v62 }
0x1171   : >> { %v5491_v52 = vsel %vm1062_vm2, %v16174_v41, 0.0  ;;  %5489 = vadd.xlane.f32.xlu1 %v5488_v19  ;;  %v6191_v44 = vsel %vm1062_vm2, %v16207_v8, -inf  ;;  %v16222_v15 = vadd.f32 %v15994_v21, %v11682_v24 }
0x1172   : >> { %5492 = vadd.xlane.f32.xlu0 %v5491_v52  ;;  %v6136_v18 = vpop.f32.mrf.mxu0  ;;  %v6185_v52 = vsel %vm1062_vm2, %v16201_v6, -inf  ;;  %v6188_v56 = vsel %vm1062_vm2, %v16204_v32, -inf }
0x1173   : >> { %v16215_v33 = vadd.f32 %v15986_v36, %v6136_v18  ;;  %v6194_v36 = vsel %vm1062_vm2, %v16212_v37, -inf }
0x1174   : >> { %v11685_v40 = vpop.f32.mrf.mxu0 }
0x1175   : >> { %v6197_v51 = vsel %vm1062_vm2, %v16215_v33, -inf  ;;  %v16232_v25 = vadd.f32 %v16014_v45, %v11685_v40 }
0x1176   : >> { %v6146_v4 = vpop.f32.mrf.mxu0 }
0x1177   : >> { %v16225_v58 = vadd.f32 %v16006_v57, %v6146_v4  ;;  %v6200_v57 = vsel %vm1062_vm2, %v16222_v15, -inf }
0x1178   : >> { %v11688_v7 = vpop.f32.mrf.mxu0 }
0x1179   : >> { %v6203_v21 = vsel %vm1062_vm2, %v16225_v58, -inf  ;;  %v16242_v4 = vadd.f32 %v16034_v53, %v11688_v7 }
0x117a   : >> { %v6156_v19 = vpop.f32.mrf.mxu0 }
0x117b   : >> { %v16235_v18 = vadd.f32 %v16026_v63, %v6156_v19  ;;  %v6206_v63 = vsel %vm1062_vm2, %v16232_v25, -inf }
0x117c   : >> { %v11691_v62 = vpop.f32.mrf.mxu0 }
0x117d   : >> { %v6209_v45 = vsel %vm1062_vm2, %v16235_v18, -inf  ;;  %v16252_v19 = vadd.f32 %v16054_v12, %v11691_v62  ;;  %v9916_v62 = vld [vmem:[%s17870_s5 + $0x20] sm:$0xff] }
0x117e   : >> { %v6166_v60 = vpop.f32.mrf.mxu0  ;;  %11623 = vmatprep.subr.mxu1 %v9916_v62 }
0x117f   : >> { %v6218_v12 = vsel %vm1062_vm2, %v16252_v19, -inf }
0x1180   : >> { %v11694_v24 = vpop.f32.mrf.mxu0 }
0x1181   : >> { %v16262_v7 = vadd.f32 %v16074_v28, %v11694_v24 }
0x1182   : >> { %6759 = vrot.lane.b32.xlu1 %v15585_v5, %s18108_s0  ;;  %v6176_v40 = vpop.f32.mrf.mxu0 }
0x1186   : >> { %6763 = vrot.lane.b32.xlu1 %v15577_v10, %s18108_s0 }
0x1188   : >> { %6761 = vrot.lane.b32.xlu0 %v15589_v1, %s18108_s0 }
0x118a   : >> { %6767 = vrot.lane.b32.xlu1 %v15569_v11, %s18108_s0 }
0x118c   : >> { %6765 = vrot.lane.b32.xlu0 %v15581_v61, %s18108_s0 }
0x118e   : >> { %6771 = vrot.lane.b32.xlu1 %v15565_v0, %s18108_s0 }
0x1190   : >> { %6769 = vrot.lane.b32.xlu0 %v15573_v46, %s18108_s0 }
0x1192   : >> { %6775 = vrot.lane.b32.xlu1 %v15559_v13, %s18108_s0 }
0x1194   : >> { %6773 = vrot.lane.b32.xlu0 %v15561_v39, %s18108_s0  ;;  %s18114_s0 = smov 48  }
0x11b3   : >> { %6186 = vmax.xlane.f32.xlu0 %v6185_v52  ;;  %v16245_v52 = vadd.f32 %v16046_v22, %v6166_v60  ;;  %v6212_v22 = vsel %vm1062_vm2, %v16242_v4, -inf }
0x11b5   : >> { %v6215_v53 = vsel %vm1062_vm2, %v16245_v52, -inf }
0x11b6   : >> { %6189 = vmax.xlane.f32.xlu1 %v6188_v56  ;;  %v16255_v56 = vadd.f32 %v16066_v9, %v6176_v40  ;;  %v6224_v9 = vsel %vm1062_vm2, %v16262_v7, -inf }
0x11b7   : >> { %6192 = vmax.xlane.f32.xlu0 %v6191_v44 }
0x11b8   : >> { %v6221_v44 = vsel %vm1062_vm2, %v16255_v56, -inf }
0x11ba   : >> { %6198 = vmax.xlane.f32.xlu1 %v6197_v51 }
0x11bb   : >> { %6195 = vmax.xlane.f32.xlu0 %v6194_v36 }
0x11be   : >> { %6204 = vmax.xlane.f32.xlu1 %v6203_v21 }
0x11bf   : >> { %6201 = vmax.xlane.f32.xlu0 %v6200_v57 }
0x11c2   : >> { %6210 = vmax.xlane.f32.xlu1 %v6209_v45 }
0x11c3   : >> { %6207 = vmax.xlane.f32.xlu0 %v6206_v63 }
0x11c6   : >> { %6216 = vmax.xlane.f32.xlu1 %v6215_v53 }
0x11c7   : >> { %6213 = vmax.xlane.f32.xlu0 %v6212_v22 }
0x11ca   : >> { %6222 = vmax.xlane.f32.xlu1 %v6221_v44 }
0x11cb   : >> { %6219 = vmax.xlane.f32.xlu0 %v6218_v12 }
0x11cf   : >> { %6225 = vmax.xlane.f32.xlu0 %v6224_v9 }
0x11db   : >> { %6365 = vrot.lane.b32.xlu1 %v15559_v13, %s18109_s1 }
0x11dc   : >> { %v5457_v28 = vpop.xlane.xlu0 %5456 }
0x11dd   : >> { %12448 = vrcp.f32 %v5457_v28 }
0x11de   : >> { %v5454_v51 = vpop.xlane.xlu1 %5453 }
0x11df   : >> { %12450 = vrcp.f32 %v5454_v51  ;;  %6361 = vrot.lane.b32.xlu1 %v15565_v0, %s18109_s1 }
0x11e2   : >> { %v5463_v36 = vpop.xlane.xlu0 %5462 }
0x11e3   : >> { %6357 = vrot.lane.b32.xlu1 %v15569_v11, %s18109_s1  ;;  %12452 = vrcp.f32 %v5463_v36 }
0x11e5   : >> { %6363 = vrot.lane.b32.xlu0 %v15561_v39, %s18109_s1 }
0x11e6   : >> { %v5460_v60 = vpop.xlane.xlu1 %5459 }
0x11e7   : >> { %12454 = vrcp.f32 %v5460_v60  ;;  %6353 = vrot.lane.b32.xlu1 %v15577_v10, %s18109_s1 }
0x11e9   : >> { %6359 = vrot.lane.b32.xlu0 %v15573_v46, %s18109_s1 }
0x11ea   : >> { %v12449_v21 = vpop.eup %12448  ;;  %v5466_v57 = vpop.xlane.xlu1 %5465 }
0x11eb   : >> { %v5469_v24 = vpop.xlane.xlu0 %5468  ;;  %12456 = vrcp.f32 %v5466_v57  ;;  %6349 = vrot.lane.b32.xlu1 %v15585_v5, %s18109_s1  ;;  %v5509_v40 = vmul.f32 %v12449_v21, %v16108_v26 }
0x11ec   : >> { %v12451_v45 = vpop.eup %12450  ;;  %12458 = vrcp.f32 %v5469_v24 }
0x11ed   : >> { %6355 = vrot.lane.b32.xlu0 %v15581_v61, %s18109_s1  ;;  %v5508_v63 = vmul.f32 %v12451_v45, %v16114_v48 }
0x11ee   : >> { %v5472_v53 = vpop.xlane.xlu1 %5471 }
0x11ef   : >> { %v5475_v22 = vpop.xlane.xlu0 %5474  ;;  %11602 = vmatprep.mubr.msk.f32.mxu1 %vm1062_vm2, %v5508_v63  ;;  %12460 = vrcp.f32 %v5472_v53  ;;  %6345 = vrot.lane.b32.xlu1 %v15593_v27, %s18109_s1 }
0x11f0   : >> { %11603 = vmatmul.mubr.msk.f32.vlgmr.msra.gmra.mxu1 %vm1062_vm2, %v5509_v40  ;;  %12462 = vrcp.f32 %v5475_v22  ;;  %v12453_v48 = vpop.eup %12452 }
0x11f1   : >> { %6351 = vrot.lane.b32.xlu0 %v15589_v1, %s18109_s1  ;;  %11624 = vmatpush3.msra.mxu1 %v9916_v62  ;;  %v5511_v36 = vmul.f32 %v12453_v48, %v16120_v3 }
0x11f2   : >> { %v5478_v44 = vpop.xlane.xlu1 %5477 }
0x11f3   : >> { %v5481_v12 = vpop.xlane.xlu0 %5480  ;;  %12464 = vrcp.f32 %v5478_v44  ;;  %6341 = vrot.lane.b32.xlu1 %v15601_v54, %s18109_s1 }
0x11f4   : >> { %v12455_v26 = vpop.eup %12454  ;;  %12466 = vrcp.f32 %v5481_v12 }
0x11f5   : >> { %6347 = vrot.lane.b32.xlu0 %v15597_v20, %s18109_s1  ;;  %v5510_v9 = vmul.f32 %v12455_v26, %v16126_v30 }
0x11f6   : >> { %v5484_v28 = vpop.xlane.xlu1 %5483 }
0x11f7   : >> { %v5487_v51 = vpop.xlane.xlu0 %5486  ;;  %12468 = vrcp.f32 %v5484_v28  ;;  %7614 = vrot.lane.b32.xlu1 %v15559_v13, %s18110_s22  ;;  %11605 = vmatprep.mubr.msk.f32.mxu1 %vm1062_vm2, %v5510_v9 }
0x11f8   : >> { %v12457_v62 = vpop.eup %12456  ;;  %12470 = vrcp.f32 %v5487_v51  ;;  %11606 = vmatmul.mubr.msk.f32.gmra.mxu1 %vm1062_vm2, %v5511_v36 }
0x11f9   : >> { %6343 = vrot.lane.b32.xlu0 %v15605_v43, %s18109_s1  ;;  %v12459_v60 = vpop.eup %12458  ;;  %v5512_v30 = vmul.f32 %v12457_v62, %v16130_v2 }
0x11fa   : >> { %v5490_v21 = vpop.xlane.xlu1 %5489  ;;  %v5513_v3 = vmul.f32 %v12459_v60, %v16135_v50 }
0x11fb   : >> { %v5493_v57 = vpop.xlane.xlu0 %5492  ;;  %12472 = vrcp.f32 %v5490_v21  ;;  %7612 = vrot.lane.b32.xlu1 %v15561_v39, %s18110_s22  ;;  %11608 = vmatprep.mubr.msk.f32.mxu1 %vm1062_vm2, %v5512_v30 }
0x11fc   : >> { %v12461_v24 = vpop.eup %12460  ;;  %12474 = vrcp.f32 %v5493_v57  ;;  %11609 = vmatmul.mubr.msk.f32.gmra.mxu1 %vm1062_vm2, %v5513_v3 }
0x11fd   : >> { %6339 = vrot.lane.b32.xlu0 %v15555_v38, %s18109_s1  ;;  %v12463_v45 = vpop.eup %12462  ;;  %v5514_v2 = vmul.f32 %v12461_v24, %v16141_v14 }
0x11fe   : >> { %v6760_v63 = vpop.permute.xlu1 %6759  ;;  %v5515_v50 = vmul.f32 %v12463_v45, %v16144_v35 }
0x11ff   : >> { %v6762_v40 = vpop.permute.xlu0 %6761  ;;  %7608 = vrot.lane.b32.xlu1 %v15573_v46, %s18110_s22  ;;  %11611 = vmatprep.mubr.msk.f32.mxu1 %vm1062_vm2, %v5514_v2 }
0x1200   : >> { %v12465_v53 = vpop.eup %12464  ;;  %11802 = vmatmul.mubr.msk.f32.gmra.mxu0 %vm870_vm1, %v6760_v63  ;;  %11612 = vmatmul.mubr.msk.f32.gmra.mxu1 %vm1062_vm2, %v5515_v50 }
0x1201   : >> { %7610 = vrot.lane.b32.xlu0 %v15565_v0, %s18110_s22  ;;  %v12467_v22 = vpop.eup %12466  ;;  %11804 = vmatprep.mubr.msk.f32.mxu0 %vm870_vm1, %v6762_v40  ;;  %v5516_v14 = vmul.f32 %v12465_v53, %v16152_v42 }
0x1202   : >> { %v6764_v44 = vpop.permute.xlu1 %6763  ;;  %v5517_v12 = vmul.f32 %v12467_v22, %v16155_v34 }
0x1203   : >> { %v6766_v35 = vpop.permute.xlu0 %6765  ;;  %7604 = vrot.lane.b32.xlu1 %v15581_v61, %s18110_s22  ;;  %11614 = vmatprep.mubr.msk.f32.mxu1 %vm1062_vm2, %v5516_v14 }
0x1204   : >> { %v12469_v48 = vpop.eup %12468  ;;  %11805 = vmatmul.mubr.msk.f32.gmra.mxu0 %vm870_vm1, %v6764_v44  ;;  %11615 = vmatmul.mubr.msk.f32.gmra.mxu1 %vm1062_vm2, %v5517_v12 }
0x1205   : >> { %7606 = vrot.lane.b32.xlu0 %v15569_v11, %s18110_s22  ;;  %v12471_v26 = vpop.eup %12470  ;;  %11807 = vmatprep.mubr.msk.f32.mxu0 %vm870_vm1, %v6766_v35  ;;  %v5518_v42 = vmul.f32 %v12469_v48, %v16162_v47 }
0x1206   : >> { %v6768_v9 = vpop.permute.xlu1 %6767  ;;  %v5519_v28 = vmul.f32 %v12471_v26, %v16165_v31 }
0x1207   : >> { %v6770_v34 = vpop.permute.xlu0 %6769  ;;  %7600 = vrot.lane.b32.xlu1 %v15589_v1, %s18110_s22  ;;  %11617 = vmatprep.mubr.msk.f32.mxu1 %vm1062_vm2, %v5518_v42 }
0x1208   : >> { %v12473_v51 = vpop.eup %12472  ;;  %11808 = vmatmul.mubr.msk.f32.gmra.mxu0 %vm870_vm1, %v6768_v9  ;;  %11618 = vmatmul.mubr.msk.f32.gmra.mxu1 %vm1062_vm2, %v5519_v28 }
0x1209   : >> { %7602 = vrot.lane.b32.xlu0 %v15577_v10, %s18110_s22  ;;  %v12475_v36 = vpop.eup %12474  ;;  %11810 = vmatprep.mubr.msk.f32.mxu0 %vm870_vm1, %v6770_v34  ;;  %v5520_v47 = vmul.f32 %v12473_v51, %v16172_v29 }
0x120a   : >> { %v6772_v62 = vpop.permute.xlu1 %6771  ;;  %v5521_v60 = vmul.f32 %v12475_v36, %v16174_v41 }
0x120b   : >> { %v6774_v31 = vpop.permute.xlu0 %6773  ;;  %7596 = vrot.lane.b32.xlu1 %v15597_v20, %s18110_s22  ;;  %11620 = vmatprep.mubr.msk.f32.mxu1 %vm1062_vm2, %v5520_v47 }
0x120c   : >> { %11811 = vmatmul.mubr.msk.f32.gmra.mxu0 %vm870_vm1, %v6772_v62  ;;  %11621 = vmatmul.mubr.msk.f32.gmra.mxu1 %vm1062_vm2, %v5521_v60 }
0x120d   : >> { %7598 = vrot.lane.b32.xlu0 %v15585_v5, %s18110_s22  ;;  %11813 = vmatprep.mubr.msk.f32.mxu0 %vm870_vm1, %v6774_v31 }
0x120e   : >> { %v6776_v30 = vpop.permute.xlu1 %6775 }
0x120f   : >> { %7592 = vrot.lane.b32.xlu1 %v15605_v43, %s18110_s22 }
0x1210   : >> { %11814 = vmatmul.mubr.msk.f32.gmra.mxu0 %vm870_vm1, %v6776_v30 }
0x1211   : >> { %7594 = vrot.lane.b32.xlu0 %v15593_v27, %s18110_s22 }
0x1213   : >> { %7588 = vrot.lane.b32.xlu1 %v15555_v38, %s18110_s22 }
0x1215   : >> { %7590 = vrot.lane.b32.xlu0 %v15601_v54, %s18110_s22 }
0x1217   : >> { %7562 = vrot.lane.b32.xlu1 %v15601_v54, %s18111_s29 }
0x1219   : >> { %7560 = vrot.lane.b32.xlu0 %v15555_v38, %s18111_s29 }
0x123c   : >> { %v6187_v29 = vpop.xlane.xlu0 %6186 }
0x123d   : >> { %v6227_v41 = vsub.f32 %v16201_v6, %v6187_v29 }
0x123f   : >> { %v6241_v21 = vmul.f32 1.442695, %v6227_v41  ;;  %v6190_v57 = vpop.xlane.xlu1 %6189 }
0x1240   : >> { %v6193_v3 = vpop.xlane.xlu0 %6192  ;;  %v6228_v24 = vsub.f32 %v16204_v32, %v6190_v57 }
0x1241   : >> { %12476 = vpow2.f32 %v6241_v21  ;;  %v6229_v45 = vsub.f32 %v16207_v8, %v6193_v3 }
0x1242   : >> { %v6243_v2 = vmul.f32 1.442695, %v6228_v24 }
0x1243   : >> { %v6245_v63 = vmul.f32 1.442695, %v6229_v45  ;;  %v6199_v40 = vpop.xlane.xlu1 %6198 }
0x1244   : >> { %v6196_v50 = vpop.xlane.xlu0 %6195  ;;  %12478 = vpow2.f32 %v6243_v2  ;;  %v6231_v53 = vsub.f32 %v16215_v33, %v6199_v40 }
0x1245   : >> { %v6230_v22 = vsub.f32 %v16212_v37, %v6196_v50  ;;  %12480 = vpow2.f32 %v6245_v63 }
0x1246   : >> { %v6249_v14 = vmul.f32 1.442695, %v6231_v53 }
0x1247   : >> { %v6247_v6 = vmul.f32 1.442695, %v6230_v22  ;;  %v6205_v44 = vpop.xlane.xlu1 %6204 }
0x1248   : >> { %v6202_v35 = vpop.xlane.xlu0 %6201  ;;  %12482 = vpow2.f32 %v6249_v14  ;;  %v6233_v12 = vsub.f32 %v16225_v58, %v6205_v44 }
0x1249   : >> { %v6232_v32 = vsub.f32 %v16222_v15, %v6202_v35  ;;  %12484 = vpow2.f32 %v6247_v6 }
0x124a   : >> { %v6253_v8 = vmul.f32 1.442695, %v6233_v12 }
0x124b   : >> { %v6251_v48 = vmul.f32 1.442695, %v6232_v32  ;;  %v6211_v26 = vpop.xlane.xlu1 %6210 }
0x124c   : >> { %v6208_v42 = vpop.xlane.xlu0 %6207  ;;  %12486 = vpow2.f32 %v6253_v8  ;;  %v6235_v33 = vsub.f32 %v16235_v18, %v6211_v26 }
0x124d   : >> { %v6234_v37 = vsub.f32 %v16232_v25, %v6208_v42  ;;  %12488 = vpow2.f32 %v6251_v48 }
0x124e   : >> { %v16379_v9 = vpop.eup %12476  ;;  %v6257_v34 = vmul.f32 1.442695, %v6235_v33 }
0x124f   : >> { %v6255_v28 = vmul.f32 1.442695, %v6234_v37  ;;  %v6269_v58 = vsel %vm1062_vm2, %v16379_v9, 0.0  ;;  %v6217_v51 = vpop.xlane.xlu1 %6216 }
0x1250   : >> { %6270 = vadd.xlane.f32.xlu1 %v6269_v58  ;;  %v6214_v15 = vpop.xlane.xlu0 %6213  ;;  %12490 = vpow2.f32 %v6257_v34  ;;  %v6237_v36 = vsub.f32 %v16245_v52, %v6217_v51 }
0x1251   : >> { %v6236_v47 = vsub.f32 %v16242_v4, %v6214_v15  ;;  %v16385_v62 = vpop.eup %12478  ;;  %12492 = vpow2.f32 %v6255_v28 }
0x1252   : >> { %v16387_v25 = vpop.eup %12480  ;;  %v6261_v18 = vmul.f32 1.442695, %v6237_v36  ;;  %v6272_v60 = vsel %vm1062_vm2, %v16385_v62, 0.0 }
0x1253   : >> { %v6259_v31 = vmul.f32 1.442695, %v6236_v47  ;;  %v6223_v30 = vpop.xlane.xlu1 %6222  ;;  %6273 = vadd.xlane.f32.xlu0 %v6272_v60  ;;  %v6275_v29 = vsel %vm1062_vm2, %v16387_v25, 0.0 }
0x1254   : >> { %v6220_v41 = vpop.xlane.xlu0 %6219  ;;  %12494 = vpow2.f32 %v6261_v18  ;;  %v6239_v52 = vsub.f32 %v16255_v56, %v6223_v30  ;;  %6276 = vadd.xlane.f32.xlu1 %v6275_v29 }
0x1255   : >> { %v6238_v4 = vsub.f32 %v16252_v19, %v6220_v41  ;;  %v16395_v21 = vpop.eup %12482  ;;  %12496 = vpow2.f32 %v6259_v31 }
0x1256   : >> { %v16397_v57 = vpop.eup %12484  ;;  %v6265_v3 = vmul.f32 1.442695, %v6239_v52  ;;  %v6281_v45 = vsel %vm1062_vm2, %v16395_v21, 0.0 }
0x1257   : >> { %v6263_v24 = vmul.f32 1.442695, %v6238_v4  ;;  %v16401_v2 = vpop.permute.xlu1 %6365  ;;  %v6278_v63 = vsel %vm1062_vm2, %v16397_v57, 0.0 }
0x1258   : >> { %v6226_v40 = vpop.xlane.xlu0 %6225  ;;  %12498 = vpow2.f32 %v6265_v3  ;;  %6282 = vadd.xlane.f32.xlu1 %v6281_v45  ;;  %6279 = vadd.xlane.f32.xlu0 %v6278_v63 }
0x1259   : >> { %v6240_v19 = vsub.f32 %v16262_v7, %v6226_v40  ;;  %v16406_v56 = vpop.eup %12486  ;;  %12500 = vpow2.f32 %v6263_v24  ;;  %11695 = vmatprep.subr.mxu1 %v16401_v2 }
0x125a   : >> { %v16409_v50 = vpop.eup %12488  ;;  %v6287_v22 = vsel %vm1062_vm2, %v16406_v56, 0.0 }
0x125b   : >> { %v6267_v53 = vmul.f32 1.442695, %v6240_v19  ;;  %v16413_v14 = vpop.permute.xlu1 %6361  ;;  %v6284_v6 = vsel %vm1062_vm2, %v16409_v50, 0.0 }
0x125c   : >> { %v16417_v44 = vpop.permute.xlu0 %6363  ;;  %6288 = vadd.xlane.f32.xlu1 %v6287_v22  ;;  %6285 = vadd.xlane.f32.xlu0 %v6284_v6 }
0x125d   : >> { %12502 = vpow2.f32 %v6267_v53  ;;  %v16419_v7 = vpop.eup %12490 }
0x125e   : >> { %v16421_v35 = vpop.eup %12492  ;;  %v6293_v12 = vsel %vm1062_vm2, %v16419_v7, 0.0 }
0x125f   : >> { %v16425_v32 = vpop.permute.xlu1 %6357  ;;  %v6290_v8 = vsel %vm1062_vm2, %v16421_v35, 0.0 }
0x1260   : >> { %v16429_v48 = vpop.permute.xlu0 %6359  ;;  %6294 = vadd.xlane.f32.xlu1 %v6293_v12  ;;  %6291 = vadd.xlane.f32.xlu0 %v6290_v8 }
0x1261   : >> { %v16431_v26 = vpop.eup %12494 }
0x1262   : >> { %v16433_v42 = vpop.eup %12496  ;;  %v6299_v33 = vsel %vm1062_vm2, %v16431_v26, 0.0 }
0x1263   : >> { %v16437_v37 = vpop.permute.xlu1 %6353  ;;  %v6296_v34 = vsel %vm1062_vm2, %v16433_v42, 0.0 }
0x1264   : >> { %v16441_v28 = vpop.permute.xlu0 %6355  ;;  %6300 = vadd.xlane.f32.xlu1 %v6299_v33  ;;  %6297 = vadd.xlane.f32.xlu0 %v6296_v34 }
0x1265   : >> { %v16443_v58 = vpop.eup %12498 }
0x1266   : >> { %v16445_v51 = vpop.eup %12500  ;;  %v6305_v15 = vsel %vm1062_vm2, %v16443_v58, 0.0 }
0x1267   : >> { %v16449_v36 = vpop.permute.xlu1 %6349  ;;  %v6302_v47 = vsel %vm1062_vm2, %v16445_v51, 0.0 }
0x1268   : >> { %v16453_v18 = vpop.permute.xlu0 %6351  ;;  %6306 = vadd.xlane.f32.xlu1 %v6305_v15  ;;  %6303 = vadd.xlane.f32.xlu0 %v6302_v47  ;;  %v11797_v47 = vpop.f32.mrf.mxu0 }
0x126a   : >> { %v16455_v31 = vpop.eup %12502 }
0x126b   : >> { %v6308_v60 = vsel %vm1062_vm2, %v16455_v31, 0.0  ;;  %v16459_v30 = vpop.permute.xlu1 %6345 }
0x126c   : >> { %v16461_v29 = vpop.permute.xlu0 %6347  ;;  %6309 = vadd.xlane.f32.xlu0 %v6308_v60 }
0x126f   : >> { %v16463_v41 = vpop.permute.xlu1 %6341 }
0x1270   : >> { %v16465_v52 = vpop.permute.xlu0 %6343 }
0x1273   : >> { %v7615_v4 = vpop.permute.xlu1 %7614 }
0x1274   : >> { %v16467_v3 = vpop.permute.xlu0 %6339  ;;  %11888 = vmatprep.subr.msk.mxu0 %vm870_vm1, %v7615_v4 }
0x1275   : >> { %11889 = vmatpush3.xpose.msk.msra.mxu0 %vm870_vm1, %v7615_v4  ;;  %v6927_v4 = vpop.f32.mrf.mxu0 }
0x1277   : >> { %v7613_v24 = vpop.permute.xlu1 %7612 }
0x1278   : >> { %v7611_v45 = vpop.permute.xlu0 %7610  ;;  %11890 = vmatprep.subr.msk.mxu0 %vm870_vm1, %v7613_v24 }
0x1279   : >> { %7566 = vrot.lane.b32.xlu1 %v15593_v27, %s18111_s29  ;;  %11891 = vmatpush3.xpose.msk.msra.mxu0 %vm870_vm1, %v7613_v24 }
0x127a   : >> { %11892 = vmatprep.subr.msk.mxu0 %vm870_vm1, %v7611_v45 }
0x127b   : >> { %v7609_v40 = vpop.permute.xlu1 %7608 }
0x127c   : >> { %v7607_v63 = vpop.permute.xlu0 %7606 }
0x127d   : >> { %7570 = vrot.lane.b32.xlu1 %v15585_v5, %s18111_s29  ;;  %11893 = vmatpush3.xpose.msk.msra.mxu0 %vm870_vm1, %v7611_v45  ;;  %v16525_v45 = vld [vmem:[%s17867_s2 + $0x8] sm:$0xff] }
0x127e   : >> { %11894 = vmatprep.subr.msk.mxu0 %vm870_vm1, %v7609_v40 }
0x127f   : >> { %v7605_v22 = vpop.permute.xlu1 %7604 }
0x1280   : >> { %v7603_v19 = vpop.permute.xlu0 %7602 }
0x1281   : >> { %7574 = vrot.lane.b32.xlu1 %v15577_v10, %s18111_s29  ;;  %11895 = vmatpush3.xpose.msk.msra.mxu0 %vm870_vm1, %v7609_v40  ;;  %v11800_v40 = vpop.f32.mrf.mxu0 }
0x1282   : >> { %7564 = vrot.lane.b32.xlu0 %v15605_v43, %s18111_s29  ;;  %11896 = vmatprep.subr.msk.mxu0 %vm870_vm1, %v7607_v63 }
0x1283   : >> { %v7601_v8 = vpop.permute.xlu1 %7600 }
0x1284   : >> { %v7599_v53 = vpop.permute.xlu0 %7598 }
0x1285   : >> { %7578 = vrot.lane.b32.xlu1 %v15569_v11, %s18111_s29  ;;  %11897 = vmatpush3.xpose.msk.msra.mxu0 %vm870_vm1, %v7607_v63  ;;  %v16528_v63 = vadd.f32 %v16525_v45, %v11797_v47  ;;  %v16560_v47 = vld [vmem:[%s17867_s2 + $0x18] sm:$0xff] }
0x1286   : >> { %7568 = vrot.lane.b32.xlu0 %v15597_v20, %s18111_s29  ;;  %11898 = vmatprep.subr.msk.mxu0 %vm870_vm1, %v7605_v22 }
0x1287   : >> { %v7597_v34 = vpop.permute.xlu1 %7596 }
0x1288   : >> { %v7595_v6 = vpop.permute.xlu0 %7594 }
0x1289   : >> { %7582 = vrot.lane.b32.xlu1 %v15565_v0, %s18111_s29  ;;  %11899 = vmatpush3.xpose.msk.msra.mxu0 %vm870_vm1, %v7605_v22 }
0x128a   : >> { %7572 = vrot.lane.b32.xlu0 %v15589_v1, %s18111_s29  ;;  %11900 = vmatprep.subr.msk.mxu0 %vm870_vm1, %v7603_v19 }
0x128b   : >> { %v7593_v15 = vpop.permute.xlu1 %7592 }
0x128c   : >> { %v7591_v12 = vpop.permute.xlu0 %7590 }
0x128d   : >> { %7586 = vrot.lane.b32.xlu1 %v15559_v13, %s18111_s29  ;;  %11901 = vmatpush3.xpose.msk.msra.mxu0 %vm870_vm1, %v7603_v19 }
0x128e   : >> { %7576 = vrot.lane.b32.xlu0 %v15581_v61, %s18111_s29  ;;  %11902 = vmatprep.subr.msk.mxu0 %vm870_vm1, %v7601_v8 }
0x128f   : >> { %v7589_v60 = vpop.permute.xlu1 %7588 }
0x1290   : >> { %v7561_v33 = vpop.permute.xlu0 %7560 }
0x1291   : >> { %11916 = vmatprep.mubr.msk.f32.mxu0 %vm870_vm1, %v7561_v33  ;;  %11903 = vmatpush3.xpose.msk.msra.mxu0 %vm870_vm1, %v7601_v8  ;;  %v16546_v33 = vld [vmem:[%s17867_s2 + $0x10] sm:$0xff] }
0x1292   : >> { %7580 = vrot.lane.b32.xlu0 %v15573_v46, %s18111_s29  ;;  %11904 = vmatprep.subr.msk.mxu0 %vm870_vm1, %v7599_v53 }
0x1293   : >> { %v7563_v24 = vpop.permute.xlu1 %7562 }
0x1295   : >> { %11905 = vmatpush3.xpose.msk.msra.mxu0 %vm870_vm1, %v7599_v53  ;;  %v16534_v53 = vld [vmem:[%s17867_s2] sm:$0xff] }
0x1296   : >> { %7584 = vrot.lane.b32.xlu0 %v15561_v39, %s18111_s29  ;;  %11906 = vmatprep.subr.msk.mxu0 %vm870_vm1, %v7597_v34  ;;  %v16537_v22 = vadd.f32 %v16534_v53, %v6927_v4 }
0x1299   : >> { %11907 = vmatpush3.xpose.msk.msra.mxu0 %vm870_vm1, %v7597_v34 }
0x129a   : >> { %11908 = vmatprep.subr.msk.mxu0 %vm870_vm1, %v7595_v6 }
0x129d   : >> { %11909 = vmatpush3.xpose.msk.msra.mxu0 %vm870_vm1, %v7595_v6  ;;  %v6999_v6 = vsel %vm1062_vm2, %v16528_v63, -inf }
0x129e   : >> { %11910 = vmatprep.subr.msk.mxu0 %vm870_vm1, %v7593_v15 }
0x12a1   : >> { %11911 = vmatpush3.xpose.msk.msra.mxu0 %vm870_vm1, %v7593_v15  ;;  %v6996_v15 = vsel %vm1062_vm2, %v16537_v22, -inf }
0x12a2   : >> { %11912 = vmatprep.subr.msk.mxu0 %vm870_vm1, %v7591_v12 }
0x12a5   : >> { %11913 = vmatpush3.xpose.msk.msra.mxu0 %vm870_vm1, %v7591_v12  ;;  %v6937_v12 = vpop.f32.mrf.mxu0 }
0x12a6   : >> { %11914 = vmatprep.subr.msk.mxu0 %vm870_vm1, %v7589_v60  ;;  %v16549_v34 = vadd.f32 %v16546_v33, %v6937_v12  ;;  %v16594_v12 = vld [vmem:[%s17867_s2 + $0x20] sm:$0xff] }
0x12a9   : >> { %11915 = vmatpush3.xpose.msk.msra.mxu0 %vm870_vm1, %v7589_v60  ;;  %v16563_v60 = vadd.f32 %v16560_v47, %v11800_v40 }
0x12ab   : >> { %v7005_v40 = vsel %vm1062_vm2, %v16563_v60, -inf }
0x12ac   : >> { %11917 = vmatmul.mubr.msk.f32.vlgmr.msra.gmra.mxu0 %vm870_vm1, %v7563_v24 }
0x12b0   : >> { %v11604_v19 = vpop.f32.mrf.mxu1 }
0x12b1   : >> { %7000 = vmax.xlane.f32.xlu1 %v6999_v6 }
0x12b2   : >> { %v5672_v8 = vpop.f32.mrf.mxu1 }
0x12b3   : >> { %11625 = vmatprep.mubr.msk.f32.mxu1 %vm870_vm1, %v5672_v8 }
0x12b4   : >> { %11626 = vmatmul.mubr.msk.f32.vlgmr.msra.gmra.mxu1 %vm870_vm1, %v11604_v19  ;;  %v16584_v19 = vld [vmem:[%s17867_s2 + $0x28] sm:$0xff] }
0x12b5   : >> { %11696 = vmatpush3.msra.mxu1 %v16401_v2  ;;  %6997 = vmax.xlane.f32.xlu0 %v6996_v15  ;;  %v7002_v2 = vsel %vm1062_vm2, %v16549_v34, -inf }
0x12b6   : >> { %11697 = vmatprep.subr.mxu1 %v16417_v44 }
0x12b7   : >> { %11698 = vmatpush3.msra.mxu1 %v16417_v44 }
0x12b8   : >> { %11699 = vmatprep.subr.mxu1 %v16413_v14  ;;  %v11607_v4 = vpop.f32.mrf.mxu1 }
0x12b9   : >> { %11700 = vmatpush3.msra.mxu1 %v16413_v14  ;;  %7003 = vmax.xlane.f32.xlu0 %v7002_v2  ;;  %v16606_v2 = vld [vmem:[%s17867_s2 + $0x38] sm:$0xff] }
0x12ba   : >> { %11701 = vmatprep.subr.mxu1 %v16429_v48  ;;  %v5682_v44 = vpop.f32.mrf.mxu1 }
0x12bb   : >> { %11702 = vmatpush3.msra.mxu1 %v16429_v48  ;;  %11628 = vmatprep.mubr.msk.f32.mxu1 %vm870_vm1, %v5682_v44 }
0x12bc   : >> { %11703 = vmatprep.subr.mxu1 %v16425_v32  ;;  %v11610_v24 = vpop.f32.mrf.mxu1  ;;  %11629 = vmatmul.mubr.msk.f32.gmra.mxu1 %vm870_vm1, %v11607_v4 }
0x12bd   : >> { %7006 = vmax.xlane.f32.xlu0 %v7005_v40  ;;  %11704 = vmatpush3.msra.mxu1 %v16425_v32 }
0x12be   : >> { %11705 = vmatprep.subr.mxu1 %v16441_v28  ;;  %v5692_v14 = vpop.f32.mrf.mxu1 }
0x12bf   : >> { %11706 = vmatpush3.msra.mxu1 %v16441_v28  ;;  %11631 = vmatprep.mubr.msk.f32.mxu1 %vm870_vm1, %v5692_v14  ;;  %v16619_v14 = vld [vmem:[%s17867_s2 + $0x30] sm:$0xff] }
0x12c0   : >> { %11707 = vmatprep.subr.mxu1 %v16437_v37  ;;  %v11803_v48 = vpop.f32.mrf.mxu0  ;;  %11632 = vmatmul.mubr.msk.f32.gmra.mxu1 %vm870_vm1, %v11610_v24  ;;  %v11613_v32 = vpop.f32.mrf.mxu1 }
0x12c1   : >> { %v16587_v6 = vadd.f32 %v16584_v19, %v11803_v48  ;;  %11708 = vmatpush3.msra.mxu1 %v16437_v37 }
0x12c2   : >> { %11709 = vmatprep.subr.mxu1 %v16453_v18  ;;  %v6947_v28 = vpop.f32.mrf.mxu0  ;;  %v5702_v15 = vpop.f32.mrf.mxu1 }
0x12c3   : >> { %v16597_v8 = vadd.f32 %v16594_v12, %v6947_v28  ;;  %11710 = vmatpush3.msra.mxu1 %v16453_v18  ;;  %v7011_v4 = vsel %vm1062_vm2, %v16587_v6, -inf  ;;  %11634 = vmatprep.mubr.msk.f32.mxu1 %vm870_vm1, %v5702_v15  ;;  %v16632_v15 = vld [vmem:[%s17867_s2 + $0x48] sm:$0xff] }
0x12c4   : >> { %v11806_v37 = vpop.f32.mrf.mxu0  ;;  %7012 = vmax.xlane.f32.xlu0 %v7011_v4  ;;  %11711 = vmatprep.subr.mxu1 %v16449_v36  ;;  %v11616_v24 = vpop.f32.mrf.mxu1 }
0x12c5   : >> { %v16609_v44 = vadd.f32 %v16606_v2, %v11806_v37  ;;  %11635 = vmatmul.mubr.msk.f32.gmra.mxu1 %vm870_vm1, %v11613_v32  ;;  %v7008_v18 = vsel %vm1062_vm2, %v16597_v8, -inf }
0x12c6   : >> { %11712 = vmatpush3.msra.mxu1 %v16449_v36  ;;  %v6957_v40 = vpop.f32.mrf.mxu0  ;;  %7009 = vmax.xlane.f32.xlu1 %v7008_v18  ;;  %v5712_v28 = vpop.f32.mrf.mxu1 }
0x12c7   : >> { %v16622_v48 = vadd.f32 %v16619_v14, %v6957_v40  ;;  %11713 = vmatprep.subr.mxu1 %v16461_v29  ;;  %v7017_v32 = vsel %vm1062_vm2, %v16609_v44, -inf  ;;  %11637 = vmatprep.mubr.msk.f32.mxu1 %vm870_vm1, %v5712_v28  ;;  %v16645_v40 = vld [vmem:[%s17867_s2 + $0x40] sm:$0xff] }
0x12c8   : >> { %11714 = vmatpush3.msra.mxu1 %v16461_v29  ;;  %v11809_v36 = vpop.f32.mrf.mxu0  ;;  %7018 = vmax.xlane.f32.xlu0 %v7017_v32  ;;  %v11619_v37 = vpop.f32.mrf.mxu1 }
0x12c9   : >> { %v16635_v4 = vadd.f32 %v16632_v15, %v11809_v36  ;;  %11715 = vmatprep.subr.mxu1 %v16459_v30  ;;  %v7014_v18 = vsel %vm1062_vm2, %v16622_v48, -inf  ;;  %11638 = vmatmul.mubr.msk.f32.gmra.mxu1 %vm870_vm1, %v11616_v24 }
0x12ca   : >> { %v6967_v29 = vpop.f32.mrf.mxu0  ;;  %7015 = vmax.xlane.f32.xlu1 %v7014_v18  ;;  %11716 = vmatpush3.msra.mxu1 %v16459_v30  ;;  %v5722_v32 = vpop.f32.mrf.mxu1  ;;  %v16658_v30 = vld [vmem:[%s17867_s2 + $0x58] sm:$0xff] }
0x12cb   : >> { %v16648_v28 = vadd.f32 %v16645_v40, %v6967_v29  ;;  %v7023_v36 = vsel %vm1062_vm2, %v16635_v4, -inf  ;;  %11717 = vmatprep.subr.mxu1 %v16465_v52  ;;  %11640 = vmatprep.mubr.msk.f32.mxu1 %vm870_vm1, %v5722_v32 }
0x12cc   : >> { %v11812_v24 = vpop.f32.mrf.mxu0  ;;  %11718 = vmatpush3.msra.mxu1 %v16465_v52  ;;  %7024 = vmax.xlane.f32.xlu0 %v7023_v36  ;;  %v11622_v29 = vpop.f32.mrf.mxu1  ;;  %v16671_v52 = vld [vmem:[%s17867_s2 + $0x50] sm:$0xff] }
0x12cd   : >> { %v16661_v18 = vadd.f32 %v16658_v30, %v11812_v24  ;;  %v7020_v23 = vsel %vm1062_vm2, %v16648_v28, -inf  ;;  %11719 = vmatprep.subr.mxu1 %v16463_v41  ;;  %11641 = vmatmul.mubr.msk.f32.gmra.mxu1 %vm870_vm1, %v11619_v37 }
0x12ce   : >> { %v6977_v32 = vpop.f32.mrf.mxu0  ;;  %11720 = vmatpush3.msra.mxu1 %v16463_v41  ;;  %7021 = vmax.xlane.f32.xlu1 %v7020_v23  ;;  %v5732_v36 = vpop.f32.mrf.mxu1  ;;  %v16684_v41 = vld [vmem:[%s17867_s2 + $0x68] sm:$0xff] }
0x12cf   : >> { %v16674_v24 = vadd.f32 %v16671_v52, %v6977_v32  ;;  %v7029_v16 = vsel %vm1062_vm2, %v16661_v18, -inf  ;;  %11721 = vmatprep.subr.mxu1 %v16467_v3  ;;  %11643 = vmatprep.mubr.msk.f32.mxu1 %vm870_vm1, %v5732_v36  ;;  %18112 = vst [vmem:[#allocation28_spill] sm:$0xff] %v16684_v41  ;;  %v16695_v36 = vld [vmem:[%s17867_s2 + $0x60] sm:$0xff] }
0x12d0   : >> { %v11815_v37 = vpop.f32.mrf.mxu0  ;;  %11722 = vmatpush3.msra.mxu1 %v16467_v3  ;;  %7030 = vmax.xlane.f32.xlu0 %v7029_v16  ;;  %18113 = vst [vmem:[#allocation36_spill] sm:$0xff] %v16695_v36 }
0x12d1   : >> { %v16687_v32 = vadd.f32 %v16684_v41, %v11815_v37  ;;  %v7026_v23 = vsel %vm1062_vm2, %v16674_v24, -inf  ;;  %11644 = vmatmul.mubr.msk.f32.gmra.mxu1 %vm870_vm1, %v11622_v29 }
0x12d2   : >> { %v6987_v59 = vpop.f32.mrf.mxu0  ;;  %7027 = vmax.xlane.f32.xlu1 %v7026_v23 }
0x12d3   : >> { %v16698_v3 = vadd.f32 %v16695_v36, %v6987_v59  ;;  %v7035_v37 = vsel %vm1062_vm2, %v16687_v32, -inf  ;;  %v9917_v59 = vld [vmem:[%s17870_s5 + $0x28] sm:$0xff] }
0x12d4   : >> { %7036 = vmax.xlane.f32.xlu0 %v7035_v37  ;;  %11744 = vmatprep.subr.mxu1 %v9917_v59 }
0x12d5   : >> { %v7032_v16 = vsel %vm1062_vm2, %v16698_v3, -inf }
0x12d6   : >> { %7033 = vmax.xlane.f32.xlu1 %v7032_v16 }
0x12d9   : >> { %v6271_v49 = vpop.xlane.xlu1 %6270 }
0x12da   : >> { %12504 = vrcp.f32 %v6271_v49 }
0x12dc   : >> { %v6274_v29 = vpop.xlane.xlu0 %6273 }
0x12dd   : >> { %v6277_v55 = vpop.xlane.xlu1 %6276  ;;  %12506 = vrcp.f32 %v6274_v29 }
0x12de   : >> { %12508 = vrcp.f32 %v6277_v55 }
0x12e1   : >> { %v6283_v17 = vpop.xlane.xlu1 %6282  ;;  %v6280_v41 = vpop.xlane.xlu0 %6279 }
0x12e2   : >> { %12510 = vrcp.f32 %v6283_v17 }
0x12e3   : >> { %12512 = vrcp.f32 %v6280_v41 }
0x12e5   : >> { %v6289_v23 = vpop.xlane.xlu1 %6288  ;;  %v6286_v37 = vpop.xlane.xlu0 %6285 }
0x12e6   : >> { %12514 = vrcp.f32 %v6289_v23 }
0x12e7   : >> { %v12505_v36 = vpop.eup %12504  ;;  %12516 = vrcp.f32 %v6286_v37  ;;  %7176 = vrot.lane.b32.xlu1 %v15559_v13, %s18114_s0 }
0x12e8   : >> { %v6325_v49 = vmul.f32 %v12505_v36, %v16379_v9 }
0x12e9   : >> { %v6295_v55 = vpop.xlane.xlu1 %6294  ;;  %v6292_v16 = vpop.xlane.xlu0 %6291 }
0x12ea   : >> { %11723 = vmatprep.mubr.msk.f32.mxu1 %vm1062_vm2, %v6325_v49  ;;  %v12507_v17 = vpop.eup %12506  ;;  %12518 = vrcp.f32 %v6295_v55  ;;  %7174 = vrot.lane.b32.xlu0 %v15561_v39, %s18114_s0 }
0x12eb   : >> { %v12509_v41 = vpop.eup %12508  ;;  %v6326_v29 = vmul.f32 %v12507_v17, %v16385_v62  ;;  %12520 = vrcp.f32 %v6292_v16  ;;  %7172 = vrot.lane.b32.xlu1 %v15565_v0, %s18114_s0 }
0x12ec   : >> { %v6327_v9 = vmul.f32 %v12509_v41, %v16387_v25 }
0x12ed   : >> { %v6301_v36 = vpop.xlane.xlu1 %6300  ;;  %v6298_v23 = vpop.xlane.xlu0 %6297  ;;  %11724 = vmatmul.mubr.msk.f32.vlgmr.msra.gmra.mxu1 %vm1062_vm2, %v6326_v29 }
0x12ee   : >> { %12522 = vrcp.f32 %v6301_v36  ;;  %11726 = vmatprep.mubr.msk.f32.mxu1 %vm1062_vm2, %v6327_v9  ;;  %11745 = vmatpush3.msra.mxu1 %v9917_v59 }
0x12ef   : >> { %v12511_v37 = vpop.eup %12510  ;;  %12524 = vrcp.f32 %v6298_v23  ;;  %7170 = vrot.lane.b32.xlu0 %v15573_v46, %s18114_s0  ;;  %7168 = vrot.lane.b32.xlu1 %v15569_v11, %s18114_s0 }
0x12f0   : >> { %v12513_v62 = vpop.eup %12512  ;;  %v6329_v49 = vmul.f32 %v12511_v37, %v16395_v21 }
0x12f1   : >> { %v6307_v25 = vpop.xlane.xlu1 %6306  ;;  %v6304_v55 = vpop.xlane.xlu0 %6303  ;;  %v6328_v16 = vmul.f32 %v12513_v62, %v16397_v57 }
0x12f2   : >> { %12526 = vrcp.f32 %v6307_v25 }
0x12f3   : >> { %v12515_v17 = vpop.eup %12514  ;;  %12528 = vrcp.f32 %v6304_v55  ;;  %7166 = vrot.lane.b32.xlu0 %v15581_v61, %s18114_s0  ;;  %11727 = vmatmul.mubr.msk.f32.gmra.mxu1 %vm1062_vm2, %v6328_v16 }
0x12f4   : >> { %v12517_v59 = vpop.eup %12516  ;;  %7164 = vrot.lane.b32.xlu1 %v15577_v10, %s18114_s0  ;;  %11729 = vmatprep.mubr.msk.f32.mxu1 %vm1062_vm2, %v6329_v49  ;;  %v6331_v21 = vmul.f32 %v12515_v17, %v16406_v56 }
0x12f5   : >> { %v7567_v41 = vpop.permute.xlu1 %7566  ;;  %v6310_v29 = vpop.xlane.xlu0 %6309  ;;  %v6330_v57 = vmul.f32 %v12517_v59, %v16409_v50 }
0x12f6   : >> { %12530 = vrcp.f32 %v6310_v29 }
0x12f7   : >> { %v12519_v9 = vpop.eup %12518  ;;  %7162 = vrot.lane.b32.xlu0 %v15589_v1, %s18114_s0  ;;  %11730 = vmatmul.mubr.msk.f32.gmra.mxu1 %vm1062_vm2, %v6330_v57 }
0x12f8   : >> { %v12521_v36 = vpop.eup %12520  ;;  %7160 = vrot.lane.b32.xlu1 %v15585_v5, %s18114_s0  ;;  %11732 = vmatprep.mubr.msk.f32.mxu1 %vm1062_vm2, %v6331_v21  ;;  %v6333_v23 = vmul.f32 %v12519_v9, %v16419_v7 }
0x12f9   : >> { %v7571_v56 = vpop.permute.xlu1 %7570  ;;  %v7565_v37 = vpop.permute.xlu0 %7564  ;;  %v6332_v62 = vmul.f32 %v12521_v36, %v16421_v35 }
0x12fa   : >> { %11919 = vmatprep.mubr.msk.f32.mxu0 %vm870_vm1, %v7565_v37 }
0x12fb   : >> { %v12523_v50 = vpop.eup %12522  ;;  %7158 = vrot.lane.b32.xlu0 %v15597_v20, %s18114_s0  ;;  %11733 = vmatmul.mubr.msk.f32.gmra.mxu1 %vm1062_vm2, %v6332_v62 }
0x12fc   : >> { %v12525_v49 = vpop.eup %12524  ;;  %7156 = vrot.lane.b32.xlu1 %v15593_v27, %s18114_s0  ;;  %11735 = vmatprep.mubr.msk.f32.mxu1 %vm1062_vm2, %v6333_v23  ;;  %v6335_v7 = vmul.f32 %v12523_v50, %v16431_v26 }
0x12fd   : >> { %11920 = vmatmul.mubr.msk.f32.gmra.mxu0 %vm870_vm1, %v7567_v41  ;;  %v7569_v25 = vpop.permute.xlu0 %7568  ;;  %v6334_v35 = vmul.f32 %v12525_v49, %v16433_v42  ;;  %v7575_v55 = vpop.permute.xlu1 %7574 }
0x12fe   : >> { %11922 = vmatprep.mubr.msk.f32.mxu0 %vm870_vm1, %v7569_v25 }
0x12ff   : >> { %v12527_v16 = vpop.eup %12526  ;;  %7154 = vrot.lane.b32.xlu0 %v15605_v43, %s18114_s0  ;;  %11736 = vmatmul.mubr.msk.f32.gmra.mxu1 %vm1062_vm2, %v6334_v35 }
0x1300   : >> { %v12529_v17 = vpop.eup %12528  ;;  %11738 = vmatprep.mubr.msk.f32.mxu1 %vm1062_vm2, %v6335_v7  ;;  %v6337_v59 = vmul.f32 %v12527_v16, %v16443_v58 }
0x1301   : >> { %11923 = vmatmul.mubr.msk.f32.gmra.mxu0 %vm870_vm1, %v7571_v56  ;;  %v7573_v26 = vpop.permute.xlu0 %7572  ;;  %v6336_v21 = vmul.f32 %v12529_v17, %v16445_v51  ;;  %v7579_v41 = vpop.permute.xlu1 %7578 }
0x1302   : >> { %11925 = vmatprep.mubr.msk.f32.mxu0 %vm870_vm1, %v7573_v26 }
0x1303   : >> { %v12531_v42 = vpop.eup %12530  ;;  %11739 = vmatmul.mubr.msk.f32.gmra.mxu1 %vm1062_vm2, %v6336_v21 }
0x1304   : >> { %11741 = vmatprep.mubr.msk.f32.mxu1 %vm1062_vm2, %v6337_v59  ;;  %v6338_v29 = vmul.f32 %v12531_v42, %v16455_v31 }
0x1305   : >> { %11926 = vmatmul.mubr.msk.f32.gmra.mxu0 %vm870_vm1, %v7575_v55  ;;  %v7577_v57 = vpop.permute.xlu0 %7576  ;;  %v7583_v51 = vpop.permute.xlu1 %7582 }
0x1306   : >> { %11928 = vmatprep.mubr.msk.f32.mxu0 %vm870_vm1, %v7577_v57 }
0x1307   : >> { %11742 = vmatmul.mubr.msk.f32.gmra.mxu1 %vm1062_vm2, %v6338_v29 }
0x1309   : >> { %11929 = vmatmul.mubr.msk.f32.gmra.mxu0 %vm870_vm1, %v7579_v41  ;;  %v7581_v58 = vpop.permute.xlu0 %7580  ;;  %v7587_v36 = vpop.permute.xlu1 %7586 }
0x130a   : >> { %11931 = vmatprep.mubr.msk.f32.mxu0 %vm870_vm1, %v7581_v58 }
0x130d   : >> { %11932 = vmatmul.mubr.msk.f32.gmra.mxu0 %vm870_vm1, %v7583_v51  ;;  %v7585_v9 = vpop.permute.xlu0 %7584 }
0x130e   : >> { %11934 = vmatprep.mubr.msk.f32.mxu0 %vm870_vm1, %v7585_v9 }
0x1311   : >> { %11935 = vmatmul.mubr.msk.f32.gmra.mxu0 %vm870_vm1, %v7587_v36 }
0x133a   : >> { %v7001_v31 = vpop.xlane.xlu1 %7000 }
0x133b   : >> { %v7039_v23 = vsub.f32 %v16528_v63, %v7001_v31 }
0x133d   : >> { %v7054_v56 = vmul.f32 1.442695, %v7039_v23 }
0x133e   : >> { %v6998_v37 = vpop.xlane.xlu0 %6997 }
0x133f   : >> { %12532 = vpow2.f32 %v7054_v56  ;;  %v7038_v62 = vsub.f32 %v16537_v22, %v6998_v37 }
0x1341   : >> { %v7052_v50 = vmul.f32 1.442695, %v7038_v62 }
0x1342   : >> { %v7004_v49 = vpop.xlane.xlu0 %7003 }
0x1343   : >> { %12534 = vpow2.f32 %v7052_v50  ;;  %v7040_v7 = vsub.f32 %v16549_v34, %v7004_v49 }
0x1345   : >> { %v7056_v25 = vmul.f32 1.442695, %v7040_v7 }
0x1346   : >> { %v7007_v35 = vpop.xlane.xlu0 %7006 }
0x1347   : >> { %12536 = vpow2.f32 %v7056_v25  ;;  %v7041_v55 = vsub.f32 %v16563_v60, %v7007_v35 }
0x1349   : >> { %v7058_v16 = vmul.f32 1.442695, %v7041_v55 }
0x134b   : >> { %12538 = vpow2.f32 %v7058_v16 }
0x134c   : >> { %v16775_v17 = vpop.eup %12532 }
0x134d   : >> { %v7013_v63 = vpop.xlane.xlu0 %7012  ;;  %v7083_v59 = vsel %vm1062_vm2, %v16775_v17, 0.0 }
0x134e   : >> { %v7043_v22 = vsub.f32 %v16587_v6, %v7013_v63  ;;  %7084 = vadd.xlane.f32.xlu0 %v7083_v59 }
0x134f   : >> { %v7010_v26 = vpop.xlane.xlu1 %7009 }
0x1350   : >> { %v16780_v21 = vpop.eup %12534  ;;  %v7062_v34 = vmul.f32 1.442695, %v7043_v22  ;;  %v7042_v42 = vsub.f32 %v16597_v8, %v7010_v26 }
0x1351   : >> { %v7080_v60 = vsel %vm1062_vm2, %v16780_v21, 0.0  ;;  %v7019_v29 = vpop.xlane.xlu0 %7018 }
0x1352   : >> { %12540 = vpow2.f32 %v7062_v34  ;;  %v7060_v41 = vmul.f32 1.442695, %v7042_v42  ;;  %7081 = vadd.xlane.f32.xlu1 %v7080_v60  ;;  %v7045_v57 = vsub.f32 %v16609_v44, %v7019_v29 }
0x1353   : >> { %v7016_v58 = vpop.xlane.xlu1 %7015 }
0x1354   : >> { %v16786_v51 = vpop.eup %12536  ;;  %12542 = vpow2.f32 %v7060_v41  ;;  %v7044_v6 = vsub.f32 %v16622_v48, %v7016_v58  ;;  %v7066_v9 = vmul.f32 1.442695, %v7045_v57 }
0x1355   : >> { %v7086_v36 = vsel %vm1062_vm2, %v16786_v51, 0.0  ;;  %v7025_v31 = vpop.xlane.xlu0 %7024 }
0x1356   : >> { %v7064_v8 = vmul.f32 1.442695, %v7044_v6  ;;  %7087 = vadd.xlane.f32.xlu1 %v7086_v36  ;;  %12544 = vpow2.f32 %v7066_v9  ;;  %v7047_v23 = vsub.f32 %v16635_v4, %v7025_v31 }
0x1357   : >> { %v7022_v44 = vpop.xlane.xlu1 %7021 }
0x1358   : >> { %v16792_v56 = vpop.eup %12538  ;;  %12546 = vpow2.f32 %v7064_v8  ;;  %v7070_v37 = vmul.f32 1.442695, %v7047_v23  ;;  %v7046_v62 = vsub.f32 %v16648_v28, %v7022_v44 }
0x1359   : >> { %v7089_v48 = vsel %vm1062_vm2, %v16792_v56, 0.0  ;;  %v7031_v50 = vpop.xlane.xlu0 %7030 }
0x135a   : >> { %7090 = vadd.xlane.f32.xlu0 %v7089_v48  ;;  %12548 = vpow2.f32 %v7070_v37  ;;  %v7068_v49 = vmul.f32 1.442695, %v7046_v62  ;;  %v7049_v7 = vsub.f32 %v16661_v18, %v7031_v50 }
0x135b   : >> { %v7028_v25 = vpop.xlane.xlu1 %7027 }
0x135c   : >> { %12550 = vpow2.f32 %v7068_v49  ;;  %v7074_v35 = vmul.f32 1.442695, %v7049_v7  ;;  %v7048_v4 = vsub.f32 %v16674_v24, %v7028_v25 }
0x135d   : >> { %v7037_v55 = vpop.xlane.xlu0 %7036 }
0x135e   : >> { %12552 = vpow2.f32 %v7074_v35  ;;  %v7072_v63 = vmul.f32 1.442695, %v7048_v4  ;;  %v7051_v28 = vsub.f32 %v16687_v32, %v7037_v55 }
0x135f   : >> { %v16799_v16 = vpop.eup %12540  ;;  %v7034_v59 = vpop.xlane.xlu1 %7033 }
0x1360   : >> { %v7095_v22 = vsel %vm1062_vm2, %v16799_v16, 0.0  ;;  %12554 = vpow2.f32 %v7072_v63  ;;  %v7078_v18 = vmul.f32 1.442695, %v7051_v28  ;;  %v7050_v34 = vsub.f32 %v16698_v3, %v7034_v59 }
0x1361   : >> { %v16804_v26 = vpop.eup %12542  ;;  %7096 = vadd.xlane.f32.xlu0 %v7095_v22 }
0x1362   : >> { %v7092_v24 = vsel %vm1062_vm2, %v16804_v26, 0.0  ;;  %12556 = vpow2.f32 %v7078_v18  ;;  %v7076_v42 = vmul.f32 1.442695, %v7050_v34 }
0x1363   : >> { %7093 = vadd.xlane.f32.xlu1 %v7092_v24  ;;  %v16809_v60 = vpop.eup %12544  ;;  %v7177_v32 = vpop.permute.xlu1 %7176 }
0x1364   : >> { %12558 = vpow2.f32 %v7076_v42  ;;  %11816 = vmatprep.subr.mxu1 %v7177_v32  ;;  %v7101_v29 = vsel %vm1062_vm2, %v16809_v60, 0.0 }
0x1365   : >> { %v16811_v41 = vpop.eup %12546  ;;  %7102 = vadd.xlane.f32.xlu0 %v7101_v29 }
0x1366   : >> { %v7098_v3 = vsel %vm1062_vm2, %v16811_v41, 0.0 }
0x1367   : >> { %7099 = vadd.xlane.f32.xlu1 %v7098_v3  ;;  %v16817_v57 = vpop.eup %12548 }
0x1368   : >> { %v7107_v58 = vsel %vm1062_vm2, %v16817_v57, 0.0 }
0x1369   : >> { %v16821_v6 = vpop.eup %12550  ;;  %7108 = vadd.xlane.f32.xlu0 %v7107_v58 }
0x136a   : >> { %v7104_v9 = vsel %vm1062_vm2, %v16821_v6, 0.0 }
0x136b   : >> { %v16825_v36 = vpop.eup %12552  ;;  %7105 = vadd.xlane.f32.xlu1 %v7104_v9 }
0x136c   : >> { %v7113_v8 = vsel %vm1062_vm2, %v16825_v36, 0.0  ;;  %v11918_v22 = vpop.f32.mrf.mxu0 }
0x136d   : >> { %v16829_v31 = vpop.eup %12554  ;;  %7114 = vadd.xlane.f32.xlu0 %v7113_v8  ;;  %v16868_v24 = vadd.f32 %v16525_v45, %v11918_v22  ;;  %v7175_v8 = vpop.permute.xlu0 %7174 }
0x136e   : >> { %v7110_v23 = vsel %vm1062_vm2, %v16829_v31, 0.0  ;;  %v7738_v34 = vpop.f32.mrf.mxu0  ;;  %v7173_v45 = vpop.permute.xlu1 %7172 }
0x136f   : >> { %v16833_v44 = vpop.eup %12556  ;;  %7111 = vadd.xlane.f32.xlu1 %v7110_v23  ;;  %v16873_v29 = vadd.f32 %v16534_v53, %v7738_v34  ;;  %v7810_v3 = vsel %vm1062_vm2, %v16868_v24, -inf }
0x1370   : >> { %v7119_v37 = vsel %vm1062_vm2, %v16833_v44, 0.0 }
0x1371   : >> { %v16837_v62 = vpop.eup %12558  ;;  %7120 = vadd.xlane.f32.xlu0 %v7119_v37  ;;  %v7807_v9 = vsel %vm1062_vm2, %v16873_v29, -inf  ;;  %v7171_v22 = vpop.permute.xlu0 %7170 }
0x1372   : >> { %v7116_v48 = vsel %vm1062_vm2, %v16837_v62, 0.0  ;;  %v7169_v53 = vpop.permute.xlu1 %7168 }
0x1373   : >> { %7117 = vadd.xlane.f32.xlu1 %v7116_v48 }
0x1374   : >> { %v16841_v50 = vpop.f32.mrf.mxu1 }
0x1376   : >> { %v16843_v49 = vpop.f32.mrf.mxu1 }
0x1377   : >> { %18115 = vst [vmem:[#allocation4_spill] sm:$0xff] %v16843_v49  ;;  %v7167_v49 = vpop.permute.xlu0 %7166 }
0x137c   : >> { %v16845_v7 = vpop.f32.mrf.mxu1 }
0x137e   : >> { %v16847_v25 = vpop.f32.mrf.mxu1 }
0x1380   : >> { %v16851_v35 = vpop.f32.mrf.mxu1 }
0x1382   : >> { %v16855_v4 = vpop.f32.mrf.mxu1 }
0x1384   : >> { %7152 = vrot.lane.b32.xlu1 %v15601_v54, %s18114_s0 }
0x1385   : >> { %v16857_v55 = vpop.f32.mrf.mxu1 }
0x1387   : >> { %7150 = vrot.lane.b32.xlu0 %v15555_v38, %s18114_s0  ;;  %v16859_v63 = vpop.f32.mrf.mxu1 }
0x1389   : >> { %v16861_v28 = vpop.f32.mrf.mxu1 }
0x138b   : >> { %v16863_v59 = vpop.f32.mrf.mxu1 }
0x138d   : >> { %v16865_v18 = vpop.f32.mrf.mxu1 }
0x138f   : >> { %v16870_v42 = vpop.f32.mrf.mxu1 }
0x1391   : >> { %v16877_v58 = vpop.f32.mrf.mxu1 }
0x1392   : >> { %18116 = vst [vmem:[#allocation29_spill] sm:$0xff] %v16877_v58 }
0x1393   : >> { %v16881_v23 = vpop.f32.mrf.mxu1 }
0x1394   : >> { %18117 = vst [vmem:[#allocation3_spill] sm:$0xff] %v16881_v23  ;;  %v7165_v23 = vpop.permute.xlu1 %7164 }
0x13a6   : >> { %7811 = vmax.xlane.f32.xlu0 %v7810_v3 }
0x13a8   : >> { %7808 = vmax.xlane.f32.xlu1 %v7807_v9 }
0x13ad   : >> { %v11725_v37 = vpop.f32.mrf.mxu1 }
0x13af   : >> { %v6489_v48 = vpop.f32.mrf.mxu1 }
0x13b0   : >> { %11746 = vmatprep.mubr.msk.f32.mxu1 %vm870_vm1, %v6489_v48 }
0x13b1   : >> { %11747 = vmatmul.mubr.msk.f32.vlgmr.msra.gmra.mxu1 %vm870_vm1, %v11725_v37 }
0x13b2   : >> { %11817 = vmatpush3.msra.mxu1 %v7177_v32 }
0x13b3   : >> { %v11728_v34 = vpop.f32.mrf.mxu1  ;;  %11818 = vmatprep.subr.mxu1 %v7175_v8 }
0x13b4   : >> { %11819 = vmatpush3.msra.mxu1 %v7175_v8  ;;  %v7163_v8 = vpop.permute.xlu0 %7162 }
0x13b5   : >> { %v6499_v3 = vpop.f32.mrf.mxu1  ;;  %11820 = vmatprep.subr.mxu1 %v7173_v45 }
0x13b6   : >> { %11749 = vmatprep.mubr.msk.f32.mxu1 %vm870_vm1, %v6499_v3  ;;  %11821 = vmatpush3.msra.mxu1 %v7173_v45  ;;  %v7161_v45 = vpop.permute.xlu1 %7160 }
0x13b7   : >> { %v11731_v9 = vpop.f32.mrf.mxu1  ;;  %11750 = vmatmul.mubr.msk.f32.gmra.mxu1 %vm870_vm1, %v11728_v34  ;;  %11822 = vmatprep.subr.mxu1 %v7171_v22 }
0x13b8   : >> { %11823 = vmatpush3.msra.mxu1 %v7171_v22 }
0x13b9   : >> { %v6509_v48 = vpop.f32.mrf.mxu1  ;;  %11824 = vmatprep.subr.mxu1 %v7169_v53 }
0x13ba   : >> { %11752 = vmatprep.mubr.msk.f32.mxu1 %vm870_vm1, %v6509_v48  ;;  %11825 = vmatpush3.msra.mxu1 %v7169_v53 }
0x13bb   : >> { %v11734_v32 = vpop.f32.mrf.mxu1  ;;  %11753 = vmatmul.mubr.msk.f32.gmra.mxu1 %vm870_vm1, %v11731_v9  ;;  %11826 = vmatprep.subr.mxu1 %v7167_v49 }
0x13bc   : >> { %11827 = vmatpush3.msra.mxu1 %v7167_v49 }
0x13bd   : >> { %v11921_v37 = vpop.f32.mrf.mxu0  ;;  %v6519_v3 = vpop.f32.mrf.mxu1  ;;  %11828 = vmatprep.subr.mxu1 %v7165_v23 }
0x13be   : >> { %v16890_v34 = vadd.f32 %v16560_v47, %v11921_v37  ;;  %11755 = vmatprep.mubr.msk.f32.mxu1 %vm870_vm1, %v6519_v3  ;;  %11829 = vmatpush3.msra.mxu1 %v7165_v23  ;;  %v7159_v47 = vpop.permute.xlu0 %7158 }
0x13bf   : >> { %v7748_v22 = vpop.f32.mrf.mxu0  ;;  %v11737_v58 = vpop.f32.mrf.mxu1  ;;  %11756 = vmatmul.mubr.msk.f32.gmra.mxu1 %vm870_vm1, %v11734_v32  ;;  %11830 = vmatprep.subr.mxu1 %v7163_v8 }
0x13c0   : >> { %v16895_v53 = vadd.f32 %v16546_v33, %v7748_v22  ;;  %v7816_v49 = vsel %vm1062_vm2, %v16890_v34, -inf  ;;  %11831 = vmatpush3.msra.mxu1 %v7163_v8  ;;  %v7157_v8 = vpop.permute.xlu1 %7156 }
0x13c1   : >> { %v11924_v9 = vpop.f32.mrf.mxu0  ;;  %7817 = vmax.xlane.f32.xlu0 %v7816_v49  ;;  %v6529_v48 = vpop.f32.mrf.mxu1  ;;  %11832 = vmatprep.subr.mxu1 %v7161_v45 }
0x13c2   : >> { %v16900_v37 = vadd.f32 %v16584_v19, %v11924_v9  ;;  %11758 = vmatprep.mubr.msk.f32.mxu1 %vm870_vm1, %v6529_v48  ;;  %v7813_v23 = vsel %vm1062_vm2, %v16895_v53, -inf  ;;  %11833 = vmatpush3.msra.mxu1 %v7161_v45  ;;  %v7155_v48 = vpop.permute.xlu0 %7154 }
0x13c3   : >> { %v7758_v33 = vpop.f32.mrf.mxu0  ;;  %7814 = vmax.xlane.f32.xlu1 %v7813_v23  ;;  %v11740_v32 = vpop.f32.mrf.mxu1  ;;  %11759 = vmatmul.mubr.msk.f32.gmra.mxu1 %vm870_vm1, %v11737_v58 }
0x13c4   : >> { %v16907_v3 = vadd.f32 %v16594_v12, %v7758_v33  ;;  %v7822_v22 = vsel %vm1062_vm2, %v16900_v37, -inf  ;;  %11834 = vmatprep.subr.mxu1 %v7159_v47 }
0x13c5   : >> { %v11927_v19 = vpop.f32.mrf.mxu0  ;;  %7823 = vmax.xlane.f32.xlu0 %v7822_v22  ;;  %v6539_v49 = vpop.f32.mrf.mxu1  ;;  %11835 = vmatpush3.msra.mxu1 %v7159_v47 }
0x13c6   : >> { %v16912_v9 = vadd.f32 %v16606_v2, %v11927_v19  ;;  %11761 = vmatprep.mubr.msk.f32.mxu1 %vm870_vm1, %v6539_v49  ;;  %v7819_v58 = vsel %vm1062_vm2, %v16907_v3, -inf  ;;  %11836 = vmatprep.subr.mxu1 %v7157_v8 }
0x13c7   : >> { %v7768_v45 = vpop.f32.mrf.mxu0  ;;  %7820 = vmax.xlane.f32.xlu1 %v7819_v58  ;;  %v11743_v12 = vpop.f32.mrf.mxu1  ;;  %11762 = vmatmul.mubr.msk.f32.gmra.mxu1 %vm870_vm1, %v11740_v32 }
0x13c8   : >> { %v16919_v23 = vadd.f32 %v16619_v14, %v7768_v45  ;;  %11837 = vmatpush3.msra.mxu1 %v7157_v8  ;;  %v7828_v2 = vsel %vm1062_vm2, %v16912_v9, -inf }
0x13c9   : >> { %v11930_v47 = vpop.f32.mrf.mxu0  ;;  %7829 = vmax.xlane.f32.xlu0 %v7828_v2  ;;  %11838 = vmatprep.subr.mxu1 %v7155_v48  ;;  %v6549_v33 = vpop.f32.mrf.mxu1  ;;  %v18118_v2 = vld [vmem:[#allocation28_spill] sm:$0xff] }
0x13ca   : >> { %v16924_v22 = vadd.f32 %v16632_v15, %v11930_v47  ;;  %11839 = vmatpush3.msra.mxu1 %v7155_v48  ;;  %11764 = vmatprep.mubr.msk.f32.mxu1 %vm870_vm1, %v6549_v33  ;;  %v7825_v32 = vsel %vm1062_vm2, %v16919_v23, -inf }
0x13cb   : >> { %v7778_v19 = vpop.f32.mrf.mxu0  ;;  %7826 = vmax.xlane.f32.xlu1 %v7825_v32  ;;  %11765 = vmatmul.mubr.msk.f32.gmra.mxu1 %vm870_vm1, %v11743_v12  ;;  %v18119_v32 = vld [vmem:[#allocation36_spill] sm:$0xff] }
0x13cc   : >> { %v16931_v14 = vadd.f32 %v16645_v40, %v7778_v19  ;;  %v7834_v8 = vsel %vm1062_vm2, %v16924_v22, -inf }
0x13cd   : >> { %v11933_v49 = vpop.f32.mrf.mxu0  ;;  %7835 = vmax.xlane.f32.xlu0 %v7834_v8 }
0x13ce   : >> { %v16936_v15 = vadd.f32 %v16658_v30, %v11933_v49  ;;  %v7831_v58 = vsel %vm1062_vm2, %v16931_v14, -inf }
0x13cf   : >> { %v7788_v45 = vpop.f32.mrf.mxu0  ;;  %7832 = vmax.xlane.f32.xlu1 %v7831_v58 }
0x13d0   : >> { %v16941_v48 = vadd.f32 %v16671_v52, %v7788_v45  ;;  %v7840_v40 = vsel %vm1062_vm2, %v16936_v15, -inf }
0x13d1   : >> { %v11936_v12 = vpop.f32.mrf.mxu0  ;;  %7841 = vmax.xlane.f32.xlu0 %v7840_v40 }
0x13d2   : >> { %v16946_v47 = vadd.f32 %v18118_v2, %v11936_v12  ;;  %v7837_v30 = vsel %vm1062_vm2, %v16941_v48, -inf }
0x13d3   : >> { %v7798_v33 = vpop.f32.mrf.mxu0  ;;  %7838 = vmax.xlane.f32.xlu1 %v7837_v30 }
0x13d4   : >> { %v16951_v19 = vadd.f32 %v18119_v32, %v7798_v33  ;;  %v7846_v52 = vsel %vm1062_vm2, %v16946_v47, -inf }
0x13d5   : >> { %7847 = vmax.xlane.f32.xlu0 %v7846_v52 }
0x13d6   : >> { %v7843_v8 = vsel %vm1062_vm2, %v16951_v19, -inf }
0x13d7   : >> { %7844 = vmax.xlane.f32.xlu1 %v7843_v8  ;;  %v7085_v58 = vpop.xlane.xlu0 %7084 }
0x13db   : >> { %v7082_v49 = vpop.xlane.xlu1 %7081 }
0x13dc   : >> { %12560 = vrcp.f32 %v7082_v49 }
0x13dd   : >> { %12562 = vrcp.f32 %v7085_v58 }
0x13df   : >> { %v7088_v40 = vpop.xlane.xlu1 %7087 }
0x13e0   : >> { %12564 = vrcp.f32 %v7088_v40 }
0x13e3   : >> { %v7091_v45 = vpop.xlane.xlu0 %7090 }
0x13e4   : >> { %12566 = vrcp.f32 %v7091_v45 }
0x13e8   : >> { %7987 = vrot.lane.b32.xlu1 %v15559_v13, %s18120_s20 }
0x13e9   : >> { %v12561_v12 = vpop.eup %12560 }
0x13ea   : >> { %v7097_v2 = vpop.xlane.xlu0 %7096  ;;  %v7136_v30 = vmul.f32 %v12561_v12, %v16780_v21 }
0x13eb   : >> { %7985 = vrot.lane.b32.xlu0 %v15561_v39, %s18120_s20 }
0x13ec   : >> { %7983 = vrot.lane.b32.xlu1 %v15565_v0, %s18120_s20  ;;  %11844 = vmatprep.mubr.msk.f32.mxu1 %vm1062_vm2, %v7136_v30  ;;  %v7094_v33 = vpop.xlane.xlu1 %7093 }
0x13ed   : >> { %12568 = vrcp.f32 %v7094_v33 }
0x13ee   : >> { %v7103_v32 = vpop.xlane.xlu0 %7102  ;;  %12570 = vrcp.f32 %v7097_v2 }
0x13ef   : >> { %7981 = vrot.lane.b32.xlu0 %v15573_v46, %s18120_s20 }
0x13f0   : >> { %7979 = vrot.lane.b32.xlu1 %v15569_v11, %s18120_s20  ;;  %v7100_v13 = vpop.xlane.xlu1 %7099 }
0x13f1   : >> { %12572 = vrcp.f32 %v7100_v13 }
0x13f2   : >> { %v7109_v21 = vpop.xlane.xlu0 %7108  ;;  %12574 = vrcp.f32 %v7103_v32 }
0x13f3   : >> { %7977 = vrot.lane.b32.xlu0 %v15581_v61, %s18120_s20  ;;  %v12563_v61 = vpop.eup %12562 }
0x13f4   : >> { %7975 = vrot.lane.b32.xlu1 %v15577_v10, %s18120_s20  ;;  %v7106_v39 = vpop.xlane.xlu1 %7105 }
0x13f5   : >> { %12576 = vrcp.f32 %v7106_v39 }
0x13f6   : >> { %v7115_v0 = vpop.xlane.xlu0 %7114  ;;  %12578 = vrcp.f32 %v7109_v21 }
0x13f7   : >> { %7973 = vrot.lane.b32.xlu0 %v15589_v1, %s18120_s20 }
0x13f8   : >> { %7971 = vrot.lane.b32.xlu1 %v15585_v5, %s18120_s20  ;;  %v7112_v11 = vpop.xlane.xlu1 %7111  ;;  %v12565_v5 = vpop.eup %12564 }
0x13f9   : >> { %v12567_v8 = vpop.eup %12566  ;;  %12580 = vrcp.f32 %v7112_v11 }
0x13fa   : >> { %v7121_v46 = vpop.xlane.xlu0 %7120  ;;  %v12569_v49 = vpop.eup %12568  ;;  %12582 = vrcp.f32 %v7115_v0  ;;  %v7139_v58 = vmul.f32 %v12567_v8, %v16792_v56 }
0x13fb   : >> { %7969 = vrot.lane.b32.xlu0 %v15597_v20, %s18120_s20  ;;  %v9918_v20 = vld [vmem:[%s17870_s5 + $0x30] sm:$0xff]  ;;  %v12571_v45 = vpop.eup %12570 }
0x13fc   : >> { %7967 = vrot.lane.b32.xlu1 %v15593_v27, %s18120_s20  ;;  %v7118_v10 = vpop.xlane.xlu1 %7117  ;;  %v7137_v27 = vmul.f32 %v12563_v61, %v16775_v17  ;;  %v7140_v17 = vmul.f32 %v12569_v49, %v16804_v26 }
0x13fd   : >> { %12584 = vrcp.f32 %v7118_v10 }
0x13fe   : >> { %v7151_v52 = vpop.permute.xlu0 %7150  ;;  %v12573_v40 = vpop.eup %12572  ;;  %12586 = vrcp.f32 %v7121_v46 }
0x13ff   : >> { %7965 = vrot.lane.b32.xlu0 %v15605_v43, %s18120_s20  ;;  %v7138_v43 = vmul.f32 %v12565_v5, %v16786_v51  ;;  %v7141_v51 = vmul.f32 %v12571_v45, %v16799_v16  ;;  %v12575_v12 = vpop.eup %12574  ;;  %v7142_v2 = vmul.f32 %v12573_v40, %v16811_v41 }
0x1400   : >> { %v7153_v1 = vpop.permute.xlu1 %7152  ;;  %v7143_v56 = vmul.f32 %v12575_v12, %v16809_v60 }
0x1401   : >> { %11840 = vmatprep.subr.mxu1 %v7153_v1 }
0x1402   : >> { %11841 = vmatpush3.msra.mxu1 %v7153_v1  ;;  %v12577_v30 = vpop.eup %12576 }
0x1403   : >> { %11842 = vmatprep.subr.mxu1 %v7151_v52  ;;  %v12579_v33 = vpop.eup %12578  ;;  %v7144_v26 = vmul.f32 %v12577_v30, %v16821_v6 }
0x1404   : >> { %11843 = vmatpush3.msra.mxu1 %v7151_v52  ;;  %v7145_v16 = vmul.f32 %v12579_v33, %v16817_v57 }
0x1405   : >> { %11845 = vmatmul.mubr.msk.f32.vlgmr.msra.gmra.mxu1 %vm1062_vm2, %v7137_v27  ;;  %11865 = vmatprep.subr.mxu1 %v9918_v20 }
0x1406   : >> { %11847 = vmatprep.mubr.msk.f32.mxu1 %vm1062_vm2, %v7138_v43  ;;  %11866 = vmatpush3.msra.mxu1 %v9918_v20  ;;  %v12581_v32 = vpop.eup %12580 }
0x1407   : >> { %v12583_v13 = vpop.eup %12582  ;;  %v7146_v41 = vmul.f32 %v12581_v32, %v16829_v31 }
0x1408   : >> { %v7147_v60 = vmul.f32 %v12583_v13, %v16825_v36 }
0x1409   : >> { %11848 = vmatmul.mubr.msk.f32.gmra.mxu1 %vm1062_vm2, %v7139_v58 }
0x140a   : >> { %11850 = vmatprep.mubr.msk.f32.mxu1 %vm1062_vm2, %v7140_v17  ;;  %v12585_v21 = vpop.eup %12584 }
0x140b   : >> { %v12587_v39 = vpop.eup %12586  ;;  %v7148_v6 = vmul.f32 %v12585_v21, %v16837_v62 }
0x140c   : >> { %v7149_v0 = vmul.f32 %v12587_v39, %v16833_v44 }
0x140d   : >> { %11851 = vmatmul.mubr.msk.f32.gmra.mxu1 %vm1062_vm2, %v7141_v51 }
0x140e   : >> { %11853 = vmatprep.mubr.msk.f32.mxu1 %vm1062_vm2, %v7142_v2 }
0x1411   : >> { %11854 = vmatmul.mubr.msk.f32.gmra.mxu1 %vm1062_vm2, %v7143_v56 }
0x1412   : >> { %11856 = vmatprep.mubr.msk.f32.mxu1 %vm1062_vm2, %v7144_v26 }
0x1415   : >> { %11857 = vmatmul.mubr.msk.f32.gmra.mxu1 %vm1062_vm2, %v7145_v16 }
0x1416   : >> { %11859 = vmatprep.mubr.msk.f32.mxu1 %vm1062_vm2, %v7146_v41 }
0x1419   : >> { %11860 = vmatmul.mubr.msk.f32.gmra.mxu1 %vm1062_vm2, %v7147_v60 }
0x141a   : >> { %11862 = vmatprep.mubr.msk.f32.mxu1 %vm1062_vm2, %v7148_v6 }
0x141d   : >> { %11863 = vmatmul.mubr.msk.f32.gmra.mxu1 %vm1062_vm2, %v7149_v0 }
0x142f   : >> { %v7812_v57 = vpop.xlane.xlu0 %7811 }
0x1430   : >> { %v7850_v31 = vsub.f32 %v16868_v24, %v7812_v57 }
0x1431   : >> { %v7809_v11 = vpop.xlane.xlu1 %7808 }
0x1432   : >> { %v7865_v46 = vmul.f32 1.442695, %v7850_v31  ;;  %v7849_v10 = vsub.f32 %v16873_v29, %v7809_v11 }
0x1434   : >> { %12588 = vpow2.f32 %v7865_v46  ;;  %v7863_v36 = vmul.f32 1.442695, %v7849_v10 }
0x1436   : >> { %12590 = vpow2.f32 %v7863_v36 }
0x1441   : >> { %v17014_v61 = vpop.eup %12588 }
0x1442   : >> { %v7894_v62 = vsel %vm1062_vm2, %v17014_v61, 0.0 }
0x1443   : >> { %v17018_v1 = vpop.eup %12590  ;;  %7895 = vadd.xlane.f32.xlu0 %v7894_v62 }
0x1444   : >> { %v7891_v44 = vsel %vm1062_vm2, %v17018_v1, 0.0 }
0x1445   : >> { %7892 = vadd.xlane.f32.xlu1 %v7891_v44 }
0x144a   : >> { %v7818_v24 = vpop.xlane.xlu0 %7817 }
0x144b   : >> { %v7852_v5 = vsub.f32 %v16890_v34, %v7818_v24 }
0x144c   : >> { %v7815_v52 = vpop.xlane.xlu1 %7814 }
0x144d   : >> { %v7869_v29 = vmul.f32 1.442695, %v7852_v5  ;;  %v7851_v20 = vsub.f32 %v16895_v53, %v7815_v52 }
0x144e   : >> { %v7824_v27 = vpop.xlane.xlu0 %7823 }
0x144f   : >> { %12592 = vpow2.f32 %v7869_v29  ;;  %v7867_v8 = vmul.f32 1.442695, %v7851_v20  ;;  %v7854_v43 = vsub.f32 %v16900_v37, %v7824_v27  ;;  %v17074_v27 = vld [vmem:[%s17871_s6 + $0x1] ss:$0 sm:$0xff] }
0x1450   : >> { %v7821_v49 = vpop.xlane.xlu1 %7820 }
0x1451   : >> { %12594 = vpow2.f32 %v7867_v8  ;;  %v7873_v58 = vmul.f32 1.442695, %v7854_v43  ;;  %v7853_v45 = vsub.f32 %v16907_v3, %v7821_v49 }
0x1452   : >> { %v7830_v17 = vpop.xlane.xlu0 %7829 }
0x1453   : >> { %12596 = vpow2.f32 %v7873_v58  ;;  %v7871_v40 = vmul.f32 1.442695, %v7853_v45  ;;  %v7856_v51 = vsub.f32 %v16912_v9, %v7830_v17  ;;  %v5925_v45 = vadd.f32 %v16841_v50, %v17074_v27 }
0x1454   : >> { %v7827_v34 = vpop.xlane.xlu1 %7826 }
0x1455   : >> { %12598 = vpow2.f32 %v7871_v40  ;;  %v7877_v12 = vmul.f32 1.442695, %v7856_v51  ;;  %v7855_v53 = vsub.f32 %v16919_v23, %v7827_v34 }
0x1456   : >> { %v7836_v2 = vpop.xlane.xlu0 %7835 }
0x1457   : >> { %12600 = vpow2.f32 %v7877_v12  ;;  %v7875_v30 = vmul.f32 1.442695, %v7855_v53  ;;  %v7858_v37 = vsub.f32 %v16924_v22, %v7836_v2  ;;  %v5927_v2 = vadd.f32 %v16845_v7, %v17074_v27 }
0x1458   : >> { %v7833_v56 = vpop.xlane.xlu1 %7832  ;;  %v5931_v7 = vadd.f32 %v16857_v55, %v17074_v27 }
0x1459   : >> { %12602 = vpow2.f32 %v7875_v30  ;;  %v7881_v33 = vmul.f32 1.442695, %v7858_v37  ;;  %v7857_v3 = vsub.f32 %v16931_v14, %v7833_v56  ;;  %v5926_v30 = vadd.f32 %v17074_v27, %v16847_v25 }
0x145a   : >> { %v7842_v26 = vpop.xlane.xlu0 %7841 }
0x145b   : >> { %12604 = vpow2.f32 %v7881_v33  ;;  %v7879_v32 = vmul.f32 1.442695, %v7857_v3  ;;  %v7860_v9 = vsub.f32 %v16936_v15, %v7842_v26  ;;  %v5929_v33 = vadd.f32 %v16851_v35, %v17074_v27 }
0x145c   : >> { %v17031_v16 = vpop.eup %12592  ;;  %v7839_v13 = vpop.xlane.xlu1 %7838 }
0x145d   : >> { %12606 = vpow2.f32 %v7879_v32  ;;  %v7885_v23 = vmul.f32 1.442695, %v7860_v9  ;;  %v7859_v41 = vsub.f32 %v16941_v48, %v7839_v13  ;;  %v7900_v22 = vsel %vm1062_vm2, %v17031_v16, 0.0 }
0x145e   : >> { %v17036_v21 = vpop.eup %12594  ;;  %7901 = vadd.xlane.f32.xlu0 %v7900_v22  ;;  %v7848_v60 = vpop.xlane.xlu0 %7847  ;;  %v5928_v32 = vadd.f32 %v17074_v27, %v16855_v4 }
0x145f   : >> { %12608 = vpow2.f32 %v7885_v23  ;;  %v7883_v14 = vmul.f32 1.442695, %v7859_v41  ;;  %v7862_v39 = vsub.f32 %v16946_v47, %v7848_v60  ;;  %v7897_v15 = vsel %vm1062_vm2, %v17036_v21, 0.0 }
0x1460   : >> { %v17041_v6 = vpop.eup %12596  ;;  %7898 = vadd.xlane.f32.xlu1 %v7897_v15  ;;  %v7845_v0 = vpop.xlane.xlu1 %7844  ;;  %v5930_v41 = vadd.f32 %v17074_v27, %v16859_v63  ;;  %v5933_v60 = vadd.f32 %v16861_v28, %v17074_v27  ;;  %v5935_v63 = vadd.f32 %v16865_v18, %v17074_v27  ;;  %v5934_v28 = vadd.f32 %v17074_v27, %v16870_v42 }
0x1461   : >> { %12610 = vpow2.f32 %v7883_v14  ;;  %v7889_v48 = vmul.f32 1.442695, %v7862_v39  ;;  %v7861_v57 = vsub.f32 %v16951_v19, %v7845_v0  ;;  %v7906_v31 = vsel %vm1062_vm2, %v17041_v6, 0.0 }
0x1462   : >> { %v17046_v11 = vpop.eup %12598  ;;  %7907 = vadd.xlane.f32.xlu0 %v7906_v31  ;;  %v5932_v39 = vadd.f32 %v17074_v27, %v16863_v59  ;;  %v18121_v31 = vld [vmem:[#allocation29_spill] sm:$0xff] }
0x1463   : >> { %12612 = vpow2.f32 %v7889_v48  ;;  %v7887_v46 = vmul.f32 1.442695, %v7861_v57  ;;  %v7903_v47 = vsel %vm1062_vm2, %v17046_v11, 0.0 }
0x1464   : >> { %v17050_v10 = vpop.eup %12600  ;;  %7904 = vadd.xlane.f32.xlu1 %v7903_v47  ;;  %v17052_v36 = vpop.permute.xlu1 %7987 }
0x1465   : >> { %12614 = vpow2.f32 %v7887_v46  ;;  %11937 = vmatprep.subr.mxu1 %v17052_v36  ;;  %v7912_v19 = vsel %vm1062_vm2, %v17050_v10, 0.0  ;;  %v5937_v46 = vadd.f32 %v18121_v31, %v17074_v27 }
0x1466   : >> { %v17057_v62 = vpop.eup %12602  ;;  %7913 = vadd.xlane.f32.xlu0 %v7912_v19  ;;  %v18122_v19 = vld [vmem:[#allocation3_spill] sm:$0xff] }
0x1467   : >> { %v7909_v44 = vsel %vm1062_vm2, %v17057_v62, 0.0  ;;  %v5936_v18 = vadd.f32 %v17074_v27, %v18122_v19 }
0x1468   : >> { %v17061_v24 = vpop.eup %12604  ;;  %7910 = vadd.xlane.f32.xlu1 %v7909_v44  ;;  %v7984_v42 = vpop.permute.xlu1 %7983 }
0x1469   : >> { %v7918_v5 = vsel %vm1062_vm2, %v17061_v24, 0.0 }
0x146a   : >> { %v17065_v52 = vpop.eup %12606  ;;  %7919 = vadd.xlane.f32.xlu0 %v7918_v5 }
0x146b   : >> { %v7915_v29 = vsel %vm1062_vm2, %v17065_v52, 0.0 }
0x146c   : >> { %v17069_v20 = vpop.eup %12608  ;;  %7916 = vadd.xlane.f32.xlu1 %v7915_v29 }
0x146d   : >> { %v7924_v8 = vsel %vm1062_vm2, %v17069_v20, 0.0 }
0x146e   : >> { %v17078_v43 = vpop.eup %12610  ;;  %7925 = vadd.xlane.f32.xlu0 %v7924_v8  ;;  %v7980_v8 = vpop.permute.xlu1 %7979 }
0x146f   : >> { %v7921_v49 = vsel %vm1062_vm2, %v17078_v43, 0.0 }
0x1470   : >> { %v17082_v58 = vpop.eup %12612  ;;  %7922 = vadd.xlane.f32.xlu1 %v7921_v49 }
0x1471   : >> { %v7930_v17 = vsel %vm1062_vm2, %v17082_v58, 0.0  ;;  %v11748_v40 = vpop.f32.mrf.mxu1 }
0x1472   : >> { %v17088_v51 = vpop.eup %12614  ;;  %7931 = vadd.xlane.f32.xlu0 %v7930_v17  ;;  %v17090_v34 = vadd.f32 %v11748_v40, %v5925_v45  ;;  %v7976_v49 = vpop.permute.xlu1 %7975 }
0x1473   : >> { %v7927_v12 = vsel %vm1062_vm2, %v17088_v51, 0.0  ;;  %v17094_v53 = vpop.f32.mrf.mxu1  ;;  %v7986_v45 = vpop.permute.xlu0 %7985 }
0x1474   : >> { %7928 = vadd.xlane.f32.xlu1 %v7927_v12 }
0x1477   : >> { %v11751_v50 = vpop.f32.mrf.mxu1  ;;  %v7982_v40 = vpop.permute.xlu0 %7981 }
0x1478   : >> { %v17100_v37 = vadd.f32 %v11751_v50, %v5927_v2 }
0x1479   : >> { %v6676_v56 = vpop.f32.mrf.mxu1 }
0x147a   : >> { %v17104_v3 = vadd.f32 %v6676_v56, %v5926_v30 }
0x147b   : >> { %v11754_v26 = vpop.f32.mrf.mxu1  ;;  %v7978_v56 = vpop.permute.xlu0 %7977 }
0x147c   : >> { %v17108_v9 = vadd.f32 %v11754_v26, %v5929_v33 }
0x147d   : >> { %v6686_v13 = vpop.f32.mrf.mxu1 }
0x147e   : >> { %v17112_v23 = vadd.f32 %v6686_v13, %v5928_v32 }
0x147f   : >> { %v11757_v25 = vpop.f32.mrf.mxu1  ;;  %v7974_v13 = vpop.permute.xlu0 %7973 }
0x1480   : >> { %v17116_v22 = vadd.f32 %v11757_v25, %v5931_v7 }
0x1481   : >> { %v6696_v35 = vpop.f32.mrf.mxu1 }
0x1482   : >> { %v17120_v14 = vadd.f32 %v6696_v35, %v5930_v41 }
0x1483   : >> { %v11760_v4 = vpop.f32.mrf.mxu1  ;;  %v7970_v35 = vpop.permute.xlu0 %7969 }
0x1484   : >> { %v17124_v15 = vadd.f32 %v11760_v4, %v5933_v60 }
0x1485   : >> { %7963 = vrot.lane.b32.xlu1 %v15601_v54, %s18120_s20  ;;  %v6706_v55 = vpop.f32.mrf.mxu1 }
0x1486   : >> { %v17130_v0 = vadd.f32 %v6706_v55, %v5932_v39 }
0x1487   : >> { %v11763_v48 = vpop.f32.mrf.mxu1 }
0x1488   : >> { %v17134_v57 = vadd.f32 %v11763_v48, %v5935_v63  ;;  %7961 = vrot.lane.b32.xlu0 %v15555_v38, %s18120_s20  ;;  %v7972_v38 = vpop.permute.xlu1 %7971  ;;  %v7966_v63 = vpop.permute.xlu0 %7965 }
0x1489   : >> { %v6716_v59 = vpop.f32.mrf.mxu1 }
0x148a   : >> { %v17140_v54 = vadd.f32 %v6716_v59, %v5934_v28 }
0x148b   : >> { %v11766_v47 = vpop.f32.mrf.mxu1 }
0x148c   : >> { %v17144_v44 = vadd.f32 %v11766_v47, %v5937_v46  ;;  %v7968_v50 = vpop.permute.xlu1 %7967 }
0x148d   : >> { %v6726_v5 = vpop.f32.mrf.mxu1 }
0x148e   : >> { %v17146_v29 = vadd.f32 %v6726_v5, %v5936_v18 }
0x14c5   : >> { %v11846_v17 = vpop.f32.mrf.mxu1 }
0x14c7   : >> { %v7300_v12 = vpop.f32.mrf.mxu1 }
0x14c8   : >> { %11867 = vmatprep.mubr.msk.f32.mxu1 %vm870_vm1, %v7300_v12 }
0x14c9   : >> { %v11849_v2 = vpop.f32.mrf.mxu1  ;;  %11868 = vmatmul.mubr.msk.f32.vlgmr.msra.gmra.mxu1 %vm870_vm1, %v11846_v17 }
0x14ca   : >> { %11938 = vmatpush3.msra.mxu1 %v17052_v36 }
0x14cb   : >> { %11939 = vmatprep.subr.mxu1 %v7986_v45  ;;  %v7310_v30 = vpop.f32.mrf.mxu1 }
0x14cc   : >> { %11940 = vmatpush3.msra.mxu1 %v7986_v45  ;;  %11870 = vmatprep.mubr.msk.f32.mxu1 %vm870_vm1, %v7310_v30  ;;  %v7896_v59 = vpop.xlane.xlu0 %7895 }
0x14cd   : >> { %11941 = vmatprep.subr.mxu1 %v7984_v42  ;;  %v11852_v33 = vpop.f32.mrf.mxu1  ;;  %11871 = vmatmul.mubr.msk.f32.gmra.mxu1 %vm870_vm1, %v11849_v2 }
0x14ce   : >> { %11942 = vmatpush3.msra.mxu1 %v7984_v42  ;;  %v7893_v26 = vpop.xlane.xlu1 %7892 }
0x14cf   : >> { %11943 = vmatprep.subr.mxu1 %v7982_v40  ;;  %v7320_v32 = vpop.f32.mrf.mxu1  ;;  %12616 = vrcp.f32 %v7893_v26 }
0x14d0   : >> { %11944 = vmatpush3.msra.mxu1 %v7982_v40  ;;  %11873 = vmatprep.mubr.msk.f32.mxu1 %vm870_vm1, %v7320_v32  ;;  %12618 = vrcp.f32 %v7896_v59 }
0x14d1   : >> { %11945 = vmatprep.subr.mxu1 %v7980_v8  ;;  %v11855_v36 = vpop.f32.mrf.mxu1  ;;  %11874 = vmatmul.mubr.msk.f32.gmra.mxu1 %vm870_vm1, %v11852_v33 }
0x14d2   : >> { %11946 = vmatpush3.msra.mxu1 %v7980_v8 }
0x14d3   : >> { %11947 = vmatprep.subr.mxu1 %v7978_v56  ;;  %v7330_v7 = vpop.f32.mrf.mxu1 }
0x14d4   : >> { %11948 = vmatpush3.msra.mxu1 %v7978_v56  ;;  %11876 = vmatprep.mubr.msk.f32.mxu1 %vm870_vm1, %v7330_v7 }
0x14d5   : >> { %11949 = vmatprep.subr.mxu1 %v7976_v49  ;;  %v11858_v25 = vpop.f32.mrf.mxu1  ;;  %11877 = vmatmul.mubr.msk.f32.gmra.mxu1 %vm870_vm1, %v11855_v36 }
0x14d6   : >> { %11950 = vmatpush3.msra.mxu1 %v7976_v49 }
0x14d7   : >> { %11951 = vmatprep.subr.mxu1 %v7974_v13  ;;  %v7340_v41 = vpop.f32.mrf.mxu1 }
0x14d8   : >> { %11952 = vmatpush3.msra.mxu1 %v7974_v13  ;;  %11879 = vmatprep.mubr.msk.f32.mxu1 %vm870_vm1, %v7340_v41 }
0x14d9   : >> { %11953 = vmatprep.subr.mxu1 %v7972_v38  ;;  %v11861_v60 = vpop.f32.mrf.mxu1  ;;  %11880 = vmatmul.mubr.msk.f32.gmra.mxu1 %vm870_vm1, %v11858_v25 }
0x14da   : >> { %11954 = vmatpush3.msra.mxu1 %v7972_v38 }
0x14db   : >> { %11955 = vmatprep.subr.mxu1 %v7970_v35  ;;  %v7350_v4 = vpop.f32.mrf.mxu1 }
0x14dc   : >> { %11956 = vmatpush3.msra.mxu1 %v7970_v35  ;;  %11882 = vmatprep.mubr.msk.f32.mxu1 %vm870_vm1, %v7350_v4  ;;  %v12617_v39 = vpop.eup %12616 }
0x14dd   : >> { %11957 = vmatprep.subr.mxu1 %v7968_v50  ;;  %v11864_v55 = vpop.f32.mrf.mxu1  ;;  %11883 = vmatmul.mubr.msk.f32.gmra.mxu1 %vm870_vm1, %v11861_v60  ;;  %v7947_v28 = vmul.f32 %v12617_v39, %v17018_v1  ;;  %v12619_v17 = vpop.eup %12618 }
0x14de   : >> { %11958 = vmatpush3.msra.mxu1 %v7968_v50  ;;  %v7948_v50 = vmul.f32 %v12619_v17, %v17014_v61 }
0x14df   : >> { %11959 = vmatprep.subr.mxu1 %v7966_v63  ;;  %v7360_v48 = vpop.f32.mrf.mxu1 }
0x14e0   : >> { %11960 = vmatpush3.msra.mxu1 %v7966_v63  ;;  %11885 = vmatprep.mubr.msk.f32.mxu1 %vm870_vm1, %v7360_v48 }
0x14e1   : >> { %11886 = vmatmul.mubr.msk.f32.gmra.mxu1 %vm870_vm1, %v11864_v55 }
0x14e2   : >> { %11965 = vmatprep.mubr.msk.f32.mxu1 %vm1062_vm2, %v7947_v28 }
0x14e7   : >> { %v7902_v31 = vpop.xlane.xlu0 %7901 }
0x14e9   : >> { %v7899_v46 = vpop.xlane.xlu1 %7898 }
0x14ea   : >> { %12620 = vrcp.f32 %v7899_v46 }
0x14eb   : >> { %v7908_v47 = vpop.xlane.xlu0 %7907  ;;  %12622 = vrcp.f32 %v7902_v31 }
0x14ed   : >> { %v7905_v19 = vpop.xlane.xlu1 %7904 }
0x14ee   : >> { %12624 = vrcp.f32 %v7905_v19 }
0x14ef   : >> { %v7914_v18 = vpop.xlane.xlu0 %7913  ;;  %12626 = vrcp.f32 %v7908_v47 }
0x14f1   : >> { %v7911_v5 = vpop.xlane.xlu1 %7910 }
0x14f2   : >> { %12628 = vrcp.f32 %v7911_v5 }
0x14f3   : >> { %v7920_v42 = vpop.xlane.xlu0 %7919  ;;  %12630 = vrcp.f32 %v7914_v18 }
0x14f5   : >> { %v7917_v8 = vpop.xlane.xlu1 %7916 }
0x14f6   : >> { %12632 = vrcp.f32 %v7917_v8 }
0x14f7   : >> { %v7926_v49 = vpop.xlane.xlu0 %7925  ;;  %v12621_v12 = vpop.eup %12620  ;;  %12634 = vrcp.f32 %v7920_v42 }
0x14f8   : >> { %v12623_v30 = vpop.eup %12622  ;;  %v7949_v56 = vmul.f32 %v12621_v12, %v17036_v21 }
0x14f9   : >> { %v7923_v45 = vpop.xlane.xlu1 %7922  ;;  %v7950_v26 = vmul.f32 %v12623_v30, %v17031_v16 }
0x14fa   : >> { %12636 = vrcp.f32 %v7923_v45 }
0x14fb   : >> { %v7932_v1 = vpop.xlane.xlu0 %7931  ;;  %v12625_v33 = vpop.eup %12624  ;;  %12638 = vrcp.f32 %v7926_v49 }
0x14fc   : >> { %v12627_v32 = vpop.eup %12626  ;;  %v7951_v36 = vmul.f32 %v12625_v33, %v17046_v11 }
0x14fd   : >> { %v7929_v38 = vpop.xlane.xlu1 %7928  ;;  %v7952_v21 = vmul.f32 %v12627_v32, %v17041_v6 }
0x14fe   : >> { %12640 = vrcp.f32 %v7929_v38 }
0x14ff   : >> { %v7962_v2 = vpop.permute.xlu0 %7961  ;;  %v12629_v61 = vpop.eup %12628  ;;  %12642 = vrcp.f32 %v7932_v1 }
0x1500   : >> { %v12631_v13 = vpop.eup %12630  ;;  %v7953_v7 = vmul.f32 %v12629_v61, %v17057_v62 }
0x1501   : >> { %v7964_v40 = vpop.permute.xlu1 %7963  ;;  %v7954_v16 = vmul.f32 %v12631_v13, %v17050_v10  ;;  %v18124_v13 = vld [vmem:[#allocation24_spill] sm:$0xff] }
0x1502   : >> { %11961 = vmatprep.subr.mxu1 %v7964_v40 }
0x1503   : >> { %11962 = vmatpush3.msra.mxu1 %v7964_v40  ;;  %v12633_v25 = vpop.eup %12632 }
0x1504   : >> { %11963 = vmatprep.subr.mxu1 %v7962_v2  ;;  %v12635_v41 = vpop.eup %12634  ;;  %v7955_v11 = vmul.f32 %v12633_v25, %v17065_v52 }
0x1505   : >> { %11964 = vmatpush3.msra.mxu1 %v7962_v2  ;;  %v7956_v6 = vmul.f32 %v12635_v41, %v17061_v24  ;;  %v9919_v24 = vld [vmem:[%s17870_s5 + $0x38] sm:$0xff] }
0x1506   : >> { %11966 = vmatmul.mubr.msk.f32.vlgmr.msra.gmra.mxu1 %vm1062_vm2, %v7948_v50  ;;  %11986 = vmatprep.subr.mxu1 %v9919_v24  ;;  %v18125_v41 = vld [vmem:[#allocation22_spill] sm:$0xff] }
0x1507   : >> { %11968 = vmatprep.mubr.msk.f32.mxu1 %vm1062_vm2, %v7949_v56  ;;  %v12637_v35 = vpop.eup %12636  ;;  %11987 = vmatpush3.msra.mxu1 %v9919_v24 }
0x1508   : >> { %v12639_v60 = vpop.eup %12638  ;;  %v7957_v62 = vmul.f32 %v12637_v35, %v17078_v43  ;;  %v18123_v43 = vld [vmem:[#allocation4_spill] sm:$0xff] }
0x1509   : >> { %v7958_v10 = vmul.f32 %v12639_v60, %v17069_v20  ;;  %v5924_v20 = vadd.f32 %v17074_v27, %v18123_v43 }
0x150a   : >> { %11969 = vmatmul.mubr.msk.f32.gmra.mxu1 %vm1062_vm2, %v7950_v26 }
0x150b   : >> { %11971 = vmatprep.mubr.msk.f32.mxu1 %vm1062_vm2, %v7951_v36  ;;  %v12641_v4 = vpop.eup %12640 }
0x150c   : >> { %v12643_v39 = vpop.eup %12642  ;;  %v7959_v52 = vmul.f32 %v12641_v4, %v17088_v51  ;;  %v6735_v51 = vadd.f32 %v17094_v53, %v5924_v20 }
0x150d   : >> { %v7960_v55 = vmul.f32 %v12643_v39, %v17082_v58 }
0x150e   : >> { %11972 = vmatmul.mubr.msk.f32.gmra.mxu1 %vm1062_vm2, %v7952_v21 }
0x150f   : >> { %11974 = vmatprep.mubr.msk.f32.mxu1 %vm1062_vm2, %v7953_v7 }
0x1512   : >> { %11975 = vmatmul.mubr.msk.f32.gmra.mxu1 %vm1062_vm2, %v7954_v16 }
0x1513   : >> { %11977 = vmatprep.mubr.msk.f32.mxu1 %vm1062_vm2, %v7955_v11 }
0x1516   : >> { %11978 = vmatmul.mubr.msk.f32.gmra.mxu1 %vm1062_vm2, %v7956_v6 }
0x1517   : >> { %11980 = vmatprep.mubr.msk.f32.mxu1 %vm1062_vm2, %v7957_v62  ;;  %v18126_v62 = vld [vmem:[#allocation40_spill] sm:$0xff] }
0x151a   : >> { %11981 = vmatmul.mubr.msk.f32.gmra.mxu1 %vm1062_vm2, %v7958_v10 }
0x151b   : >> { %11983 = vmatprep.mubr.msk.f32.mxu1 %vm1062_vm2, %v7959_v52 }
0x151e   : >> { %11984 = vmatmul.mubr.msk.f32.gmra.mxu1 %vm1062_vm2, %v7960_v55  ;;  %v18127_v55 = vld [vmem:[#allocation21_spill] sm:$0xff] }
0x1589   : >> { %v11869_v63 = vpop.f32.mrf.mxu1 }
0x158a   : >> { %v7547_v48 = vadd.f32 %v11869_v63, %v17090_v34 }
0x158b   : >> { %v7477_v28 = vpop.f32.mrf.mxu1 }
0x158c   : >> { %v7546_v59 = vadd.f32 %v7477_v28, %v6735_v51  ;;  %v18128_v51 = vld [vmem:[#allocation26_spill] sm:$0xff] }
0x158d   : >> { %v11872_v31 = vpop.f32.mrf.mxu1 }
0x158e   : >> { %v7549_v58 = vadd.f32 %v11872_v31, %v17100_v37 }
0x158f   : >> { %v7487_v46 = vpop.f32.mrf.mxu1 }
0x1590   : >> { %v7548_v47 = vadd.f32 %v7487_v46, %v17104_v3 }
0x1591   : >> { %v11875_v19 = vpop.f32.mrf.mxu1 }
0x1592   : >> { %v17201_v18 = vadd.f32 %v11875_v19, %v17108_v9 }
0x1593   : >> { %v7497_v5 = vpop.f32.mrf.mxu1 }
0x1594   : >> { %v17204_v27 = vadd.f32 %v7497_v5, %v17112_v23  ;;  %v18130_v5 = vld [vmem:[#allocation41_spill] sm:$0xff] }
0x1595   : >> { %v11878_v42 = vpop.f32.mrf.mxu1 }
0x1596   : >> { %v17207_v53 = vadd.f32 %v11878_v42, %v17116_v22 }
0x1597   : >> { %v7507_v34 = vpop.f32.mrf.mxu1 }
0x1598   : >> { %v17210_v8 = vadd.f32 %v7507_v34, %v17120_v14 }
0x1599   : >> { %v11881_v37 = vpop.f32.mrf.mxu1 }
0x159a   : >> { %v17213_v49 = vadd.f32 %v11881_v37, %v17124_v15 }
0x159b   : >> { %v7517_v3 = vpop.f32.mrf.mxu1 }
0x159c   : >> { %v17216_v9 = vadd.f32 %v7517_v3, %v17130_v0  ;;  %v18131_v3 = vld [vmem:[#allocation19_spill] sm:$0xff] }
0x159d   : >> { %v11884_v45 = vpop.f32.mrf.mxu1 }
0x159e   : >> { %v17219_v23 = vadd.f32 %v11884_v45, %v17134_v57 }
0x159f   : >> { %v7527_v1 = vpop.f32.mrf.mxu1 }
0x15a0   : >> { %v17222_v22 = vadd.f32 %v7527_v1, %v17140_v54 }
0x15a1   : >> { %v11887_v38 = vpop.f32.mrf.mxu1 }
0x15a2   : >> { %v17225_v14 = vadd.f32 %v11887_v38, %v17144_v44 }
0x15a3   : >> { %v7537_v17 = vpop.f32.mrf.mxu1 }
0x15a4   : >> { %v17228_v15 = vadd.f32 %v7537_v17, %v17146_v29  ;;  %v18132_v17 = vld [vmem:[#allocation17_spill] sm:$0xff] }
0x15c6   : >> { %v11967_v40 = vpop.f32.mrf.mxu1 }
0x15c8   : >> { %v8111_v12 = vpop.f32.mrf.mxu1 }
0x15c9   : >> { %11988 = vmatprep.mubr.msk.f32.mxu1 %vm870_vm1, %v8111_v12 }
0x15ca   : >> { %v11970_v0 = vpop.f32.mrf.mxu1  ;;  %11989 = vmatmul.mubr.msk.f32.vlgmr.msra.gmra.mxu1 %vm870_vm1, %v11967_v40 }
0x15cc   : >> { %v8121_v57 = vpop.f32.mrf.mxu1 }
0x15cd   : >> { %11991 = vmatprep.mubr.msk.f32.mxu1 %vm870_vm1, %v8121_v57  ;;  %v18133_v57 = vld [vmem:[#allocation18_spill] sm:$0xff] }
0x15ce   : >> { %v11973_v54 = vpop.f32.mrf.mxu1  ;;  %11992 = vmatmul.mubr.msk.f32.gmra.mxu1 %vm870_vm1, %v11970_v0 }
0x15d0   : >> { %v8131_v2 = vpop.f32.mrf.mxu1 }
0x15d1   : >> { %11994 = vmatprep.mubr.msk.f32.mxu1 %vm870_vm1, %v8131_v2 }
0x15d2   : >> { %v11976_v44 = vpop.f32.mrf.mxu1  ;;  %11995 = vmatmul.mubr.msk.f32.gmra.mxu1 %vm870_vm1, %v11973_v54 }
0x15d4   : >> { %v8141_v29 = vpop.f32.mrf.mxu1 }
0x15d5   : >> { %11997 = vmatprep.mubr.msk.f32.mxu1 %vm870_vm1, %v8141_v29  ;;  %v18134_v29 = vld [vmem:[#allocation25_spill] sm:$0xff] }
0x15d6   : >> { %v11979_v50 = vpop.f32.mrf.mxu1  ;;  %11998 = vmatmul.mubr.msk.f32.gmra.mxu1 %vm870_vm1, %v11976_v44 }
0x15d8   : >> { %v8151_v30 = vpop.f32.mrf.mxu1 }
0x15d9   : >> { %12000 = vmatprep.mubr.msk.f32.mxu1 %vm870_vm1, %v8151_v30 }
0x15da   : >> { %v11982_v56 = vpop.f32.mrf.mxu1  ;;  %12001 = vmatmul.mubr.msk.f32.gmra.mxu1 %vm870_vm1, %v11979_v50 }
0x15dc   : >> { %v8161_v33 = vpop.f32.mrf.mxu1 }
0x15dd   : >> { %12003 = vmatprep.mubr.msk.f32.mxu1 %vm870_vm1, %v8161_v33  ;;  %v18135_v33 = vld [vmem:[#allocation38_spill] sm:$0xff] }
0x15de   : >> { %v11985_v26 = vpop.f32.mrf.mxu1  ;;  %12004 = vmatmul.mubr.msk.f32.gmra.mxu1 %vm870_vm1, %v11982_v56 }
0x15e0   : >> { %v8171_v32 = vpop.f32.mrf.mxu1 }
0x15e1   : >> { %12006 = vmatprep.mubr.msk.f32.mxu1 %vm870_vm1, %v8171_v32 }
0x15e2   : >> { %12007 = vmatmul.mubr.msk.f32.gmra.mxu1 %vm870_vm1, %v11985_v26 }
0x168a   : >> { %v11990_v36 = vpop.f32.mrf.mxu1 }
0x168b   : >> { %v8358_v61 = vadd.f32 %v11990_v36, %v7547_v48 }
0x168c   : >> { %v8288_v21 = vpop.f32.mrf.mxu1 }
0x168d   : >> { %v17245_v7 = vadd.f32 %v8358_v61, %v18124_v13  ;;  %v8357_v25 = vadd.f32 %v8288_v21, %v7546_v59  ;;  %v18136_v61 = vld [vmem:[#allocation33_spill] sm:$0xff] }
0x168e   : >> { %v11993_v16 = vpop.f32.mrf.mxu1 }
0x168f   : >> { %v17248_v11 = vadd.f32 %v8357_v25, %v18125_v41  ;;  %v8360_v35 = vadd.f32 %v11993_v16, %v7549_v58  ;;  %v8392_v6 = vsel %vm631_vm0, %v17245_v7, 0.0  ;;  %v18129_v58 = vld [vmem:[#allocation20_spill] sm:$0xff]  ;;  %v18137_v25 = vld [vmem:[#allocation27_spill] sm:$0xff] }
0x1690   : >> { %8393 = vadd.xlane.f32.xlu0 %v8392_v6  ;;  %v8298_v60 = vpop.f32.mrf.mxu1 }
0x1691   : >> { %v17253_v4 = vadd.f32 %v8360_v35, %v18126_v62  ;;  %v8359_v10 = vadd.f32 %v8298_v60, %v7548_v47  ;;  %v8389_v39 = vsel %vm631_vm0, %v17248_v11, 0.0  ;;  %v10153_v35 = vld [vmem:[%s17872_s7 + $0x38] sm:$0xff] }
0x1692   : >> { %8390 = vadd.xlane.f32.xlu1 %v8389_v39  ;;  %v11996_v52 = vpop.f32.mrf.mxu1  ;;  %12009 = vmatprep.subr.mxu0 %v10153_v35 }
0x1693   : >> { %v17258_v24 = vadd.f32 %v8359_v10, %v18127_v55  ;;  %v8362_v43 = vadd.f32 %v11996_v52, %v17201_v18  ;;  %v8398_v20 = vsel %vm631_vm0, %v17253_v4, 0.0  ;;  %12010 = vmatpush3.msra.mxu0 %v10153_v35 }
0x1694   : >> { %8399 = vadd.xlane.f32.xlu0 %v8398_v20  ;;  %v8308_v63 = vpop.f32.mrf.mxu1 }
0x1695   : >> { %v17264_v48 = vadd.f32 %v8362_v43, %v18128_v51  ;;  %v8361_v28 = vadd.f32 %v8308_v63, %v17204_v27  ;;  %v8395_v59 = vsel %vm631_vm0, %v17258_v24, 0.0 }
0x1696   : >> { %8396 = vadd.xlane.f32.xlu1 %v8395_v59  ;;  %v11999_v31 = vpop.f32.mrf.mxu1 }
0x1697   : >> { %v17270_v46 = vadd.f32 %v8361_v28, %v18129_v58  ;;  %v8364_v47 = vadd.f32 %v11999_v31, %v17207_v53  ;;  %v8404_v19 = vsel %vm631_vm0, %v17264_v48, 0.0 }
0x1698   : >> { %8405 = vadd.xlane.f32.xlu0 %v8404_v19  ;;  %v8318_v18 = vpop.f32.mrf.mxu1 }
0x1699   : >> { %v17276_v42 = vadd.f32 %v8364_v47, %v18130_v5  ;;  %v8363_v27 = vadd.f32 %v8318_v18, %v17210_v8  ;;  %v8401_v34 = vsel %vm631_vm0, %v17270_v46, 0.0 }
0x169a   : >> { %8402 = vadd.xlane.f32.xlu1 %v8401_v34  ;;  %v12002_v37 = vpop.f32.mrf.mxu1 }
0x169b   : >> { %v17282_v45 = vadd.f32 %v8363_v27, %v18131_v3  ;;  %v8366_v53 = vadd.f32 %v12002_v37, %v17213_v49  ;;  %v8410_v1 = vsel %vm631_vm0, %v17276_v42, 0.0 }
0x169c   : >> { %8411 = vadd.xlane.f32.xlu0 %v8410_v1  ;;  %v8328_v38 = vpop.f32.mrf.mxu1 }
0x169d   : >> { %v17288_v40 = vadd.f32 %v8366_v53, %v18132_v17  ;;  %v8365_v8 = vadd.f32 %v8328_v38, %v17216_v9  ;;  %v8407_v12 = vsel %vm631_vm0, %v17282_v45, 0.0 }
0x169e   : >> { %8408 = vadd.xlane.f32.xlu1 %v8407_v12  ;;  %v12005_v0 = vpop.f32.mrf.mxu1 }
0x169f   : >> { %v17294_v54 = vadd.f32 %v8365_v8, %v18133_v57  ;;  %v8368_v49 = vadd.f32 %v12005_v0, %v17219_v23  ;;  %v8416_v2 = vsel %vm631_vm0, %v17288_v40, 0.0 }
0x16a0   : >> { %8417 = vadd.xlane.f32.xlu0 %v8416_v2  ;;  %v8338_v44 = vpop.f32.mrf.mxu1 }
0x16a1   : >> { %v17300_v50 = vadd.f32 %v8368_v49, %v18134_v29  ;;  %v8367_v9 = vadd.f32 %v8338_v44, %v17222_v22  ;;  %v8413_v30 = vsel %vm631_vm0, %v17294_v54, 0.0 }
0x16a2   : >> { %8414 = vadd.xlane.f32.xlu1 %v8413_v30  ;;  %v12008_v56 = vpop.f32.mrf.mxu1 }
0x16a3   : >> { %v17306_v26 = vadd.f32 %v8367_v9, %v18135_v33  ;;  %v8370_v23 = vadd.f32 %v12008_v56, %v17225_v14  ;;  %v8422_v32 = vsel %vm631_vm0, %v17300_v50, 0.0 }
0x16a4   : >> { %8423 = vadd.xlane.f32.xlu0 %v8422_v32  ;;  %v8348_v36 = vpop.f32.mrf.mxu1 }
0x16a5   : >> { %v17312_v21 = vadd.f32 %v8370_v23, %v18136_v61  ;;  %v8369_v22 = vadd.f32 %v8348_v36, %v17228_v15  ;;  %v8419_v13 = vsel %vm631_vm0, %v17306_v26, 0.0 }
0x16a6   : >> { %8420 = vadd.xlane.f32.xlu1 %v8419_v13 }
0x16a7   : >> { %v17318_v16 = vadd.f32 %v8369_v22, %v18137_v25  ;;  %v8428_v14 = vsel %vm631_vm0, %v17312_v21, 0.0 }
0x16a8   : >> { %8429 = vadd.xlane.f32.xlu0 %v8428_v14 }
0x16a9   : >> { %v8425_v41 = vsel %vm631_vm0, %v17318_v16, 0.0 }
0x16aa   : >> { %8426 = vadd.xlane.f32.xlu1 %v8425_v41 }
0x1719   : >> { %v8394_v15 = vpop.xlane.xlu0 %8393 }
0x171a   : >> { %v8432_v6 = vmul.f32 0.03125, %v8394_v15 }
0x171b   : >> { %v8391_v60 = vpop.xlane.xlu1 %8390 }
0x171c   : >> { %v17328_v62 = vsub.f32 %v17245_v7, %v8432_v6  ;;  %v8431_v10 = vmul.f32 0.03125, %v8391_v60 }
0x171d   : >> { %v8400_v39 = vpop.xlane.xlu0 %8399 }
0x171e   : >> { %v17331_v52 = vsub.f32 %v17248_v11, %v8431_v10  ;;  %v8434_v55 = vmul.f32 0.03125, %v8400_v39  ;;  %v8460_v43 = vmul.f32 %v17328_v62, %v17328_v62 }
0x171f   : >> { %v8397_v20 = vpop.xlane.xlu1 %8396 }
0x1720   : >> { %v17336_v63 = vsub.f32 %v17253_v4, %v8434_v55  ;;  %v8433_v51 = vmul.f32 0.03125, %v8397_v20  ;;  %v8476_v28 = vsel %vm631_vm0, %v8460_v43, 0.0  ;;  %v8459_v7 = vmul.f32 %v17331_v52, %v17331_v52  ;;  %v10151_v20 = vld [vmem:[%s17872_s7 + $0x28] sm:$0xff] }
0x1721   : >> { %v8406_v59 = vpop.xlane.xlu0 %8405  ;;  %8477 = vadd.xlane.f32.xlu0 %v8476_v28  ;;  %v10177_v28 = vld [vmem:[%s17874_s9 + $0x78] sm:$0xff] }
0x1722   : >> { %v17342_v31 = vsub.f32 %v17258_v24, %v8433_v51  ;;  %v8436_v11 = vmul.f32 0.03125, %v8406_v59  ;;  %v8473_v58 = vsel %vm631_vm0, %v8459_v7, 0.0  ;;  %v8462_v47 = vmul.f32 %v17336_v63, %v17336_v63  ;;  %v10150_v51 = vld [vmem:[%s17872_s7 + $0x20] sm:$0xff]  ;;  %v10176_v7 = vld [vmem:[%s17874_s9 + $0x70] sm:$0xff]  ;;  %12038 = vmatprep.subr.mxu1 %v10177_v28  ;;  %v10175_v59 = vld [vmem:[%s17874_s9 + $0x68] sm:$0xff] }
0x1723   : >> { %v8403_v19 = vpop.xlane.xlu1 %8402  ;;  %8474 = vadd.xlane.f32.xlu1 %v8473_v58  ;;  %12039 = vmatpush3.msra.mxu1 %v10177_v28  ;;  %v10173_v58 = vld [vmem:[%s17874_s9 + $0x58] sm:$0xff] }
0x1724   : >> { %v17348_v4 = vsub.f32 %v17264_v48, %v8436_v11  ;;  %v8435_v18 = vmul.f32 0.03125, %v8403_v19  ;;  %v8482_v5 = vsel %vm631_vm0, %v8462_v47, 0.0  ;;  %v8461_v27 = vmul.f32 %v17342_v31, %v17342_v31  ;;  %12040 = vmatprep.subr.mxu1 %v10176_v7  ;;  %v10174_v11 = vld [vmem:[%s17874_s9 + $0x60] sm:$0xff]  ;;  %v10172_v47 = vld [vmem:[%s17874_s9 + $0x50] sm:$0xff] }
0x1725   : >> { %v8412_v34 = vpop.xlane.xlu0 %8411  ;;  %8483 = vadd.xlane.f32.xlu0 %v8482_v5  ;;  %12041 = vmatpush3.msra.mxu1 %v10176_v7 }
0x1726   : >> { %v17354_v24 = vsub.f32 %v17270_v46, %v8435_v18  ;;  %v8438_v37 = vmul.f32 0.03125, %v8412_v34  ;;  %v8479_v3 = vsel %vm631_vm0, %v8461_v27, 0.0  ;;  %v8464_v53 = vmul.f32 %v17348_v4, %v17348_v4  ;;  %12042 = vmatprep.subr.mxu1 %v10175_v59 }
0x1727   : >> { %v8409_v1 = vpop.xlane.xlu1 %8408  ;;  %8480 = vadd.xlane.f32.xlu1 %v8479_v3  ;;  %12043 = vmatpush3.msra.mxu1 %v10175_v59 }
0x1728   : >> { %v17360_v48 = vsub.f32 %v17276_v42, %v8438_v37  ;;  %v8437_v38 = vmul.f32 0.03125, %v8409_v1  ;;  %v8488_v17 = vsel %vm631_vm0, %v8464_v53, 0.0  ;;  %v8463_v8 = vmul.f32 %v17354_v24, %v17354_v24  ;;  %12044 = vmatprep.subr.mxu1 %v10174_v11 }
0x1729   : >> { %v8418_v12 = vpop.xlane.xlu0 %8417  ;;  %8489 = vadd.xlane.f32.xlu0 %v8488_v17  ;;  %12045 = vmatpush3.msra.mxu1 %v10174_v11 }
0x172a   : >> { %v17366_v46 = vsub.f32 %v17282_v45, %v8437_v38  ;;  %v8440_v0 = vmul.f32 0.03125, %v8418_v12  ;;  %v8485_v57 = vsel %vm631_vm0, %v8463_v8, 0.0  ;;  %v8466_v49 = vmul.f32 %v17360_v48, %v17360_v48  ;;  %12046 = vmatprep.subr.mxu1 %v10173_v58 }
0x172b   : >> { %v8415_v2 = vpop.xlane.xlu1 %8414  ;;  %8486 = vadd.xlane.f32.xlu1 %v8485_v57  ;;  %12047 = vmatpush3.msra.mxu1 %v10173_v58 }
0x172c   : >> { %v17372_v42 = vsub.f32 %v17288_v40, %v8440_v0  ;;  %v8439_v44 = vmul.f32 0.03125, %v8415_v2  ;;  %v8494_v29 = vsel %vm631_vm0, %v8466_v49, 0.0  ;;  %v8465_v9 = vmul.f32 %v17366_v46, %v17366_v46  ;;  %12048 = vmatprep.subr.mxu1 %v10172_v47 }
0x172d   : >> { %v8424_v30 = vpop.xlane.xlu0 %8423  ;;  %8495 = vadd.xlane.f32.xlu0 %v8494_v29  ;;  %12049 = vmatpush3.msra.mxu1 %v10172_v47 }
0x172e   : >> { %v17378_v45 = vsub.f32 %v17294_v54, %v8439_v44  ;;  %v8442_v56 = vmul.f32 0.03125, %v8424_v30  ;;  %v8491_v33 = vsel %vm631_vm0, %v8465_v9, 0.0  ;;  %v8468_v23 = vmul.f32 %v17372_v42, %v17372_v42 }
0x172f   : >> { %v8421_v32 = vpop.xlane.xlu1 %8420  ;;  %8492 = vadd.xlane.f32.xlu1 %v8491_v33 }
0x1730   : >> { %v17384_v40 = vsub.f32 %v17300_v50, %v8442_v56  ;;  %v8441_v36 = vmul.f32 0.03125, %v8421_v32  ;;  %v8500_v61 = vsel %vm631_vm0, %v8468_v23, 0.0  ;;  %v8467_v22 = vmul.f32 %v17378_v45, %v17378_v45 }
0x1731   : >> { %8501 = vadd.xlane.f32.xlu0 %v8500_v61  ;;  %v8430_v54 = vpop.xlane.xlu0 %8429 }
0x1732   : >> { %v17390_v13 = vsub.f32 %v17306_v26, %v8441_v36  ;;  %v8444_v25 = vmul.f32 0.03125, %v8430_v54  ;;  %v8497_v14 = vsel %vm631_vm0, %v8467_v22, 0.0  ;;  %v8470_v41 = vmul.f32 %v17384_v40, %v17384_v40  ;;  %v17441_v54 = vld [vmem:[%s17876_s11 + $0x1] ss:$0 sm:$0xff] }
0x1733   : >> { %8498 = vadd.xlane.f32.xlu1 %v8497_v14  ;;  %v8427_v50 = vpop.xlane.xlu1 %8426 }
0x1734   : >> { %v17396_v35 = vsub.f32 %v17312_v21, %v8444_v25  ;;  %v8443_v15 = vmul.f32 0.03125, %v8427_v50  ;;  %v8506_v6 = vsel %vm631_vm0, %v8470_v41, 0.0  ;;  %v8469_v60 = vmul.f32 %v17390_v13, %v17390_v13 }
0x1735   : >> { %8507 = vadd.xlane.f32.xlu0 %v8506_v6 }
0x1736   : >> { %v17402_v26 = vsub.f32 %v17318_v16, %v8443_v15  ;;  %v8503_v10 = vsel %vm631_vm0, %v8469_v60, 0.0  ;;  %v8472_v39 = vmul.f32 %v17396_v35, %v17396_v35  ;;  %v10152_v16 = vld [vmem:[%s17872_s7 + $0x30] sm:$0xff] }
0x1737   : >> { %8504 = vadd.xlane.f32.xlu1 %v8503_v10  ;;  %12011 = vmatprep.subr.mxu0 %v10152_v16 }
0x1738   : >> { %v8512_v55 = vsel %vm631_vm0, %v8472_v39, 0.0  ;;  %v8471_v21 = vmul.f32 %v17402_v26, %v17402_v26  ;;  %12012 = vmatpush3.msra.mxu0 %v10152_v16 }
0x1739   : >> { %8513 = vadd.xlane.f32.xlu0 %v8512_v55  ;;  %12013 = vmatprep.subr.mxu0 %v10151_v20 }
0x173a   : >> { %v8509_v43 = vsel %vm631_vm0, %v8471_v21, 0.0  ;;  %12014 = vmatpush3.msra.mxu0 %v10151_v20 }
0x173b   : >> { %8510 = vadd.xlane.f32.xlu1 %v8509_v43  ;;  %12015 = vmatprep.subr.mxu0 %v10150_v51  ;;  %v17449_v43 = vld [vmem:[%s17877_s12 + $0x1] ss:$0 sm:$0xff] }
0x173c   : >> { %12016 = vmatpush3.msra.mxu0 %v10150_v51 }
0x17aa   : >> { %v8478_v19 = vpop.xlane.xlu0 %8477 }
0x17ab   : >> { %v8516_v18 = vmul.f32 0.03125, %v8478_v19 }
0x17ac   : >> { %v8475_v5 = vpop.xlane.xlu1 %8474 }
0x17ad   : >> { %v8530_v27 = vadd.f32 1e-05, %v8516_v18  ;;  %v8515_v34 = vmul.f32 0.03125, %v8475_v5 }
0x17ae   : >> { %v8484_v37 = vpop.xlane.xlu0 %8483 }
0x17af   : >> { %12644 = vrsqrt.f32 %v8530_v27  ;;  %v8529_v3 = vadd.f32 1e-05, %v8515_v34  ;;  %v8518_v53 = vmul.f32 0.03125, %v8484_v37 }
0x17b0   : >> { %v8481_v1 = vpop.xlane.xlu1 %8480 }
0x17b1   : >> { %12646 = vrsqrt.f32 %v8529_v3  ;;  %v8532_v38 = vadd.f32 1e-05, %v8518_v53  ;;  %v8517_v17 = vmul.f32 0.03125, %v8481_v1 }
0x17b2   : >> { %v8490_v8 = vpop.xlane.xlu0 %8489 }
0x17b3   : >> { %12648 = vrsqrt.f32 %v8532_v38  ;;  %v8531_v12 = vadd.f32 1e-05, %v8517_v17  ;;  %v8520_v0 = vmul.f32 0.03125, %v8490_v8 }
0x17b4   : >> { %v8487_v57 = vpop.xlane.xlu1 %8486 }
0x17b5   : >> { %12650 = vrsqrt.f32 %v8531_v12  ;;  %v8534_v49 = vadd.f32 1e-05, %v8520_v0  ;;  %v8519_v2 = vmul.f32 0.03125, %v8487_v57 }
0x17b6   : >> { %v8496_v44 = vpop.xlane.xlu0 %8495 }
0x17b7   : >> { %12652 = vrsqrt.f32 %v8534_v49  ;;  %v8533_v29 = vadd.f32 1e-05, %v8519_v2  ;;  %v8522_v9 = vmul.f32 0.03125, %v8496_v44 }
0x17b8   : >> { %v8493_v30 = vpop.xlane.xlu1 %8492 }
0x17b9   : >> { %12654 = vrsqrt.f32 %v8533_v29  ;;  %v8536_v56 = vadd.f32 1e-05, %v8522_v9  ;;  %v8521_v33 = vmul.f32 0.03125, %v8493_v30 }
0x17ba   : >> { %v8502_v23 = vpop.xlane.xlu0 %8501 }
0x17bb   : >> { %12656 = vrsqrt.f32 %v8536_v56  ;;  %v8535_v32 = vadd.f32 1e-05, %v8521_v33  ;;  %v8524_v36 = vmul.f32 0.03125, %v8502_v23 }
0x17bc   : >> { %v12645_v61 = vpop.eup %12644  ;;  %v8499_v22 = vpop.xlane.xlu1 %8498 }
0x17bd   : >> { %v8558_v25 = vmul.f32 %v12645_v61, %v17328_v62  ;;  %12658 = vrsqrt.f32 %v8535_v32  ;;  %v8538_v14 = vadd.f32 1e-05, %v8524_v36  ;;  %v8523_v41 = vmul.f32 0.03125, %v8499_v22 }
0x17be   : >> { %v12647_v50 = vpop.eup %12646  ;;  %v8508_v15 = vpop.xlane.xlu0 %8507 }
0x17bf   : >> { %12660 = vrsqrt.f32 %v8538_v14  ;;  %v8537_v6 = vadd.f32 1e-05, %v8523_v41  ;;  %v8526_v60 = vmul.f32 0.03125, %v8508_v15  ;;  %v8578_v39 = vmul.f32 %v17441_v54, %v8558_v25 }
0x17c0   : >> { %v12649_v10 = vpop.eup %12648  ;;  %v8505_v55 = vpop.xlane.xlu1 %8504  ;;  %v8557_v21 = vmul.f32 %v12647_v50, %v17331_v52 }
0x17c1   : >> { %v8560_v62 = vmul.f32 %v12649_v10, %v17336_v63  ;;  %12662 = vrsqrt.f32 %v8537_v6  ;;  %v8540_v16 = vadd.f32 1e-05, %v8526_v60  ;;  %v8525_v51 = vmul.f32 0.03125, %v8505_v55  ;;  %v10155_v55 = vld [vmem:[%s17873_s8 + $0x1] ss:$0 sm:$0xff] }
0x17c2   : >> { %v12651_v20 = vpop.eup %12650  ;;  %v8514_v28 = vpop.xlane.xlu0 %8513  ;;  %v8577_v7 = vmul.f32 %v17441_v54, %v8557_v21  ;;  %v17455_v52 = vadd.f32 %v17449_v43, %v8578_v39  ;;  %v10170_v39 = vld [vmem:[%s17874_s9 + $0x40] sm:$0xff] }
0x17c3   : >> { %12664 = vrsqrt.f32 %v8540_v16  ;;  %v8528_v59 = vmul.f32 0.03125, %v8514_v28  ;;  %v8559_v11 = vmul.f32 %v12651_v20, %v17342_v31  ;;  %v8539_v47 = vadd.f32 1e-05, %v8525_v51 }
0x17c4   : >> { %v12653_v58 = vpop.eup %12652  ;;  %v8511_v19 = vpop.xlane.xlu1 %8510  ;;  %v17458_v18 = vadd.f32 %v17449_v43, %v8577_v7  ;;  %v8580_v63 = vmul.f32 %v17441_v54, %v8560_v62 }
0x17c5   : >> { %v8562_v5 = vmul.f32 %v12653_v58, %v17348_v4  ;;  %v8542_v27 = vadd.f32 1e-05, %v8528_v59  ;;  %v8527_v34 = vmul.f32 0.03125, %v8511_v19  ;;  %v8579_v37 = vmul.f32 %v17441_v54, %v8559_v11 }
0x17c6   : >> { %v12655_v3 = vpop.eup %12654  ;;  %12666 = vrsqrt.f32 %v8539_v47  ;;  %12017 = vmatprep.mubr.msk.f32.mxu0 %vm631_vm0, %v17458_v18  ;;  %v17472_v38 = vadd.f32 %v17449_v43, %v8580_v63 }
0x17c7   : >> { %12668 = vrsqrt.f32 %v8542_v27  ;;  %v8541_v31 = vadd.f32 1e-05, %v8527_v34  ;;  %12018 = vmatmul.mubr.msk.f32.vlgmr.msra.gmra.mxu0 %vm631_vm0, %v17455_v52  ;;  %v17468_v53 = vadd.f32 %v17449_v43, %v8579_v37  ;;  %v8561_v1 = vmul.f32 %v12655_v3, %v17354_v24 }
0x17c8   : >> { %v12657_v4 = vpop.eup %12656  ;;  %v8582_v12 = vmul.f32 %v17441_v54, %v8562_v5 }
0x17c9   : >> { %v8564_v17 = vmul.f32 %v12657_v4, %v17360_v48  ;;  %12670 = vrsqrt.f32 %v8541_v31  ;;  %12020 = vmatprep.mubr.msk.f32.mxu0 %vm631_vm0, %v17468_v53  ;;  %v8581_v8 = vmul.f32 %v17441_v54, %v8561_v1 }
0x17ca   : >> { %v12659_v0 = vpop.eup %12658  ;;  %v17489_v2 = vadd.f32 %v17449_v43, %v8582_v12 }
0x17cb   : >> { %12021 = vmatmul.mubr.msk.f32.gmra.mxu0 %vm631_vm0, %v17472_v38  ;;  %v17482_v24 = vadd.f32 %v17449_v43, %v8581_v8  ;;  %v8563_v57 = vmul.f32 %v12659_v0, %v17366_v46  ;;  %v8584_v29 = vmul.f32 %v17441_v54, %v8564_v17 }
0x17cc   : >> { %v12661_v49 = vpop.eup %12660 }
0x17cd   : >> { %v8566_v48 = vmul.f32 %v12661_v49, %v17372_v42  ;;  %12023 = vmatprep.mubr.msk.f32.mxu0 %vm631_vm0, %v17482_v24  ;;  %v8583_v44 = vmul.f32 %v17441_v54, %v8563_v57  ;;  %v17503_v33 = vadd.f32 %v17449_v43, %v8584_v29 }
0x17ce   : >> { %v12663_v9 = vpop.eup %12662 }
0x17cf   : >> { %12024 = vmatmul.mubr.msk.f32.gmra.mxu0 %vm631_vm0, %v17489_v2  ;;  %v17496_v30 = vadd.f32 %v17449_v43, %v8583_v44  ;;  %v8565_v46 = vmul.f32 %v12663_v9, %v17378_v45  ;;  %v8586_v32 = vmul.f32 %v17441_v54, %v8566_v48 }
0x17d0   : >> { %v12665_v42 = vpop.eup %12664 }
0x17d1   : >> { %v8568_v56 = vmul.f32 %v12665_v42, %v17384_v40  ;;  %12026 = vmatprep.mubr.msk.f32.mxu0 %vm631_vm0, %v17496_v30  ;;  %v8585_v23 = vmul.f32 %v17441_v54, %v8565_v46  ;;  %v17517_v25 = vadd.f32 %v17449_v43, %v8586_v32 }
0x17d3   : >> { %v12667_v36 = vpop.eup %12666  ;;  %12027 = vmatmul.mubr.msk.f32.gmra.mxu0 %vm631_vm0, %v17503_v33  ;;  %v17510_v61 = vadd.f32 %v17449_v43, %v8585_v23  ;;  %v8588_v14 = vmul.f32 %v17441_v54, %v8568_v56 }
0x17d4   : >> { %v12669_v45 = vpop.eup %12668  ;;  %v8567_v40 = vmul.f32 %v12667_v36, %v17390_v13 }
0x17d5   : >> { %v8570_v22 = vmul.f32 %v12669_v45, %v17396_v35  ;;  %12029 = vmatprep.mubr.msk.f32.mxu0 %vm631_vm0, %v17510_v61  ;;  %v17528_v35 = vadd.f32 %v17449_v43, %v8588_v14 }
0x17d6   : >> { %v12671_v41 = vpop.eup %12670  ;;  %v8587_v50 = vmul.f32 %v17441_v54, %v8567_v40 }
0x17d7   : >> { %12030 = vmatmul.mubr.msk.f32.gmra.mxu0 %vm631_vm0, %v17517_v25  ;;  %v8569_v15 = vmul.f32 %v12671_v41, %v17402_v26  ;;  %v8590_v60 = vmul.f32 %v17441_v54, %v8570_v22  ;;  %v10179_v41 = vld [vmem:[%s17875_s10 + $0x1] ss:$0 sm:$0xff] }
0x17d8   : >> { %v17525_v13 = vadd.f32 %v17449_v43, %v8587_v50 }
0x17d9   : >> { %v8589_v6 = vmul.f32 %v17441_v54, %v8569_v15  ;;  %v17542_v26 = vadd.f32 %v17449_v43, %v8590_v60  ;;  %v10171_v54 = vld [vmem:[%s17874_s9 + $0x48] sm:$0xff] }
0x17da   : >> { %12032 = vmatprep.mubr.msk.f32.mxu0 %vm631_vm0, %v17525_v13  ;;  %12050 = vmatprep.subr.mxu1 %v10171_v54 }
0x17db   : >> { %12033 = vmatmul.mubr.msk.f32.gmra.mxu0 %vm631_vm0, %v17528_v35  ;;  %v17537_v10 = vadd.f32 %v17449_v43, %v8589_v6  ;;  %12051 = vmatpush3.msra.mxu1 %v10171_v54 }
0x17dc   : >> { %12052 = vmatprep.subr.mxu1 %v10170_v39 }
0x17dd   : >> { %12035 = vmatprep.mubr.msk.f32.mxu0 %vm631_vm0, %v17537_v10  ;;  %12053 = vmatpush3.msra.mxu1 %v10170_v39 }
0x17df   : >> { %12036 = vmatmul.mubr.msk.f32.gmra.mxu0 %vm631_vm0, %v17542_v26 }
0x1887   : >> { %v12019_v21 = vpop.f32.mrf.mxu0 }
0x1888   : >> { %v8738_v43 = vadd.f32 %v12019_v21, %v10155_v55 }
0x1889   : >> { %v8732_v62 = vpop.f32.mrf.mxu0 }
0x188a   : >> { %v8733_v16 = vadd.f32 %v10155_v55, %v8732_v62  ;;  %v8802_v28 = vmax.f32 %v8738_v43, 0.0 }
0x188b   : >> { %v12022_v20 = vpop.f32.mrf.mxu0 }
0x188c   : >> { %v8801_v51 = vmax.f32 %v8733_v16, 0.0  ;;  %v8748_v7 = vadd.f32 %v12022_v20, %v10155_v55 }
0x188d   : >> { %v8742_v59 = vpop.f32.mrf.mxu0 }
0x188e   : >> { %v8743_v11 = vadd.f32 %v10155_v55, %v8742_v59  ;;  %12054 = vmatprep.mubr.msk.f32.mxu1 %vm4522_vm3, %v8801_v51  ;;  %v8804_v19 = vmax.f32 %v8748_v7, 0.0 }
0x188f   : >> { %v12025_v58 = vpop.f32.mrf.mxu0  ;;  %12055 = vmatmul.mubr.msk.f32.vlgmr.msra.gmra.mxu1 %vm4522_vm3, %v8802_v28 }
0x1890   : >> { %v8803_v47 = vmax.f32 %v8743_v11, 0.0  ;;  %v8758_v63 = vadd.f32 %v12025_v58, %v10155_v55 }
0x1891   : >> { %v8752_v5 = vpop.f32.mrf.mxu0 }
0x1892   : >> { %v8753_v27 = vadd.f32 %v10155_v55, %v8752_v5  ;;  %12057 = vmatprep.mubr.msk.f32.mxu1 %vm4522_vm3, %v8803_v47  ;;  %v8806_v3 = vmax.f32 %v8758_v63, 0.0 }
0x1893   : >> { %v12028_v34 = vpop.f32.mrf.mxu0  ;;  %12058 = vmatmul.mubr.msk.f32.gmra.mxu1 %vm4522_vm3, %v8804_v19 }
0x1894   : >> { %v8805_v37 = vmax.f32 %v8753_v27, 0.0  ;;  %v8768_v31 = vadd.f32 %v12028_v34, %v10155_v55 }
0x1895   : >> { %v8762_v1 = vpop.f32.mrf.mxu0 }
0x1896   : >> { %v8763_v4 = vadd.f32 %v10155_v55, %v8762_v1  ;;  %12060 = vmatprep.mubr.msk.f32.mxu1 %vm4522_vm3, %v8805_v37  ;;  %v8808_v12 = vmax.f32 %v8768_v31, 0.0 }
0x1897   : >> { %v12031_v17 = vpop.f32.mrf.mxu0  ;;  %12061 = vmatmul.mubr.msk.f32.gmra.mxu1 %vm4522_vm3, %v8806_v3 }
0x1898   : >> { %v8807_v8 = vmax.f32 %v8763_v4, 0.0  ;;  %v8778_v0 = vadd.f32 %v12031_v17, %v10155_v55 }
0x1899   : >> { %v8772_v57 = vpop.f32.mrf.mxu0 }
0x189a   : >> { %v8773_v49 = vadd.f32 %v10155_v55, %v8772_v57  ;;  %12063 = vmatprep.mubr.msk.f32.mxu1 %vm4522_vm3, %v8807_v8  ;;  %v8810_v29 = vmax.f32 %v8778_v0, 0.0 }
0x189b   : >> { %v12034_v48 = vpop.f32.mrf.mxu0  ;;  %12064 = vmatmul.mubr.msk.f32.gmra.mxu1 %vm4522_vm3, %v8808_v12 }
0x189c   : >> { %v8809_v44 = vmax.f32 %v8773_v49, 0.0  ;;  %v8788_v9 = vadd.f32 %v12034_v48, %v10155_v55 }
0x189d   : >> { %v8782_v46 = vpop.f32.mrf.mxu0 }
0x189e   : >> { %v8783_v42 = vadd.f32 %v10155_v55, %v8782_v46  ;;  %12066 = vmatprep.mubr.msk.f32.mxu1 %vm4522_vm3, %v8809_v44  ;;  %v8812_v32 = vmax.f32 %v8788_v9, 0.0 }
0x189f   : >> { %v12037_v56 = vpop.f32.mrf.mxu0  ;;  %12067 = vmatmul.mubr.msk.f32.gmra.mxu1 %vm4522_vm3, %v8810_v29 }
0x18a0   : >> { %v8811_v23 = vmax.f32 %v8783_v42, 0.0  ;;  %v8798_v36 = vadd.f32 %v12037_v56, %v10155_v55 }
0x18a1   : >> { %v8792_v45 = vpop.f32.mrf.mxu0 }
0x18a2   : >> { %v8793_v40 = vadd.f32 %v10155_v55, %v8792_v45  ;;  %12069 = vmatprep.mubr.msk.f32.mxu1 %vm4522_vm3, %v8811_v23  ;;  %v8814_v14 = vmax.f32 %v8798_v36, 0.0 }
0x18a3   : >> { %12070 = vmatmul.mubr.msk.f32.gmra.mxu1 %vm4522_vm3, %v8812_v32 }
0x18a4   : >> { %v8813_v22 = vmax.f32 %v8793_v40, 0.0 }
0x18a6   : >> { %12072 = vmatprep.mubr.msk.f32.mxu1 %vm4522_vm3, %v8813_v22 }
0x18a7   : >> { %12073 = vmatmul.mubr.msk.f32.gmra.mxu1 %vm4522_vm3, %v8814_v14 }
0x194f   : >> { %v12056_v50 = vpop.f32.mrf.mxu1 }
0x1950   : >> { %v8946_v15 = vadd.f32 %v12056_v50, %v10179_v41 }
0x1951   : >> { %v8940_v6 = vpop.f32.mrf.mxu1 }
0x1952   : >> { %v17573_v60 = vadd.f32 %v8946_v15, %v17455_v52  ;;  %v8941_v54 = vadd.f32 %v10179_v41, %v8940_v6 }
0x1953   : >> { %v12059_v39 = vpop.f32.mrf.mxu1 }
0x1954   : >> { %v17576_v55 = vadd.f32 %v8941_v54, %v17458_v18  ;;  %v8956_v21 = vadd.f32 %v12059_v39, %v10179_v41  ;;  %v9030_v43 = vsel %vm631_vm0, %v17573_v60, 0.0 }
0x1955   : >> { %9031 = vadd.xlane.f32.xlu0 %v9030_v43  ;;  %v8950_v62 = vpop.f32.mrf.mxu1 }
0x1956   : >> { %v17581_v16 = vadd.f32 %v8956_v21, %v17472_v38  ;;  %v8951_v20 = vadd.f32 %v10179_v41, %v8950_v62  ;;  %v9027_v51 = vsel %vm631_vm0, %v17576_v55, 0.0 }
0x1957   : >> { %9028 = vadd.xlane.f32.xlu1 %v9027_v51  ;;  %v12062_v52 = vpop.f32.mrf.mxu1 }
0x1958   : >> { %v17586_v28 = vadd.f32 %v8951_v20, %v17468_v53  ;;  %v8966_v18 = vadd.f32 %v12062_v52, %v10179_v41  ;;  %v9036_v7 = vsel %vm631_vm0, %v17581_v16, 0.0 }
0x1959   : >> { %9037 = vadd.xlane.f32.xlu0 %v9036_v7  ;;  %v8960_v59 = vpop.f32.mrf.mxu1 }
0x195a   : >> { %v17591_v11 = vadd.f32 %v8966_v18, %v17489_v2  ;;  %v8961_v38 = vadd.f32 %v10179_v41, %v8960_v59  ;;  %v9033_v58 = vsel %vm631_vm0, %v17586_v28, 0.0 }
0x195b   : >> { %9034 = vadd.xlane.f32.xlu1 %v9033_v58  ;;  %v12065_v47 = vpop.f32.mrf.mxu1 }
0x195c   : >> { %v17596_v19 = vadd.f32 %v8961_v38, %v17482_v24  ;;  %v8976_v53 = vadd.f32 %v12065_v47, %v10179_v41  ;;  %v9042_v63 = vsel %vm631_vm0, %v17591_v11, 0.0 }
0x195d   : >> { %9043 = vadd.xlane.f32.xlu0 %v9042_v63  ;;  %v8970_v5 = vpop.f32.mrf.mxu1 }
0x195e   : >> { %v17601_v27 = vadd.f32 %v8976_v53, %v17503_v33  ;;  %v8971_v2 = vadd.f32 %v10179_v41, %v8970_v5  ;;  %v9039_v34 = vsel %vm631_vm0, %v17596_v19, 0.0 }
0x195f   : >> { %9040 = vadd.xlane.f32.xlu1 %v9039_v34  ;;  %v12068_v37 = vpop.f32.mrf.mxu1 }
0x1960   : >> { %v17606_v3 = vadd.f32 %v8971_v2, %v17496_v30  ;;  %v8986_v24 = vadd.f32 %v12068_v37, %v10179_v41  ;;  %v9048_v31 = vsel %vm631_vm0, %v17601_v27, 0.0 }
0x1961   : >> { %9049 = vadd.xlane.f32.xlu0 %v9048_v31  ;;  %v8980_v1 = vpop.f32.mrf.mxu1 }
0x1962   : >> { %v17611_v4 = vadd.f32 %v8986_v24, %v17517_v25  ;;  %v8981_v33 = vadd.f32 %v10179_v41, %v8980_v1  ;;  %v9045_v17 = vsel %vm631_vm0, %v17606_v3, 0.0 }
0x1963   : >> { %9046 = vadd.xlane.f32.xlu1 %v9045_v17  ;;  %v12071_v8 = vpop.f32.mrf.mxu1 }
0x1964   : >> { %v17616_v12 = vadd.f32 %v8981_v33, %v17510_v61  ;;  %v9054_v30 = vsel %vm631_vm0, %v17611_v4, 0.0  ;;  %v8996_v57 = vadd.f32 %v12071_v8, %v10179_v41 }
0x1965   : >> { %9055 = vadd.xlane.f32.xlu0 %v9054_v30  ;;  %v8990_v0 = vpop.f32.mrf.mxu1 }
0x1966   : >> { %v8991_v49 = vadd.f32 %v10179_v41, %v8990_v0  ;;  %v9051_v25 = vsel %vm631_vm0, %v17616_v12, 0.0  ;;  %v17626_v9 = vadd.f32 %v8996_v57, %v17528_v35 }
0x1967   : >> { %9052 = vadd.xlane.f32.xlu1 %v9051_v25  ;;  %v12074_v48 = vpop.f32.mrf.mxu1 }
0x1968   : >> { %v17623_v44 = vadd.f32 %v8991_v49, %v17525_v13  ;;  %v9006_v61 = vadd.f32 %v12074_v48, %v10179_v41  ;;  %v9060_v13 = vsel %vm631_vm0, %v17626_v9, 0.0 }
0x1969   : >> { %v9000_v29 = vpop.f32.mrf.mxu1 }
0x196a   : >> { %v9001_v46 = vadd.f32 %v10179_v41, %v9000_v29  ;;  %v9057_v42 = vsel %vm631_vm0, %v17623_v44, 0.0  ;;  %v17634_v23 = vadd.f32 %v9006_v61, %v17542_v26 }
0x196b   : >> { %9058 = vadd.xlane.f32.xlu1 %v9057_v42 }
0x196c   : >> { %v17631_v56 = vadd.f32 %v9001_v46, %v17537_v10  ;;  %v9066_v35 = vsel %vm631_vm0, %v17634_v23, 0.0 }
0x196e   : >> { %v9063_v32 = vsel %vm631_vm0, %v17631_v56, 0.0 }
0x196f   : >> { %9061 = vadd.xlane.f32.xlu1 %v9060_v13  ;;  %9064 = vadd.xlane.f32.xlu0 %v9063_v32 }
0x1973   : >> { %9067 = vadd.xlane.f32.xlu0 %v9066_v35 }
0x19de   : >> { %v9032_v36 = vpop.xlane.xlu0 %9031 }
0x19df   : >> { %v9070_v45 = vmul.f32 0.03125, %v9032_v36 }
0x19e0   : >> { %v9029_v40 = vpop.xlane.xlu1 %9028 }
0x19e1   : >> { %v17643_v10 = vsub.f32 %v17573_v60, %v9070_v45  ;;  %v9069_v26 = vmul.f32 0.03125, %v9029_v40 }
0x19e2   : >> { %v9038_v22 = vpop.xlane.xlu0 %9037 }
0x19e3   : >> { %v17646_v14 = vsub.f32 %v17576_v55, %v9069_v26  ;;  %v9072_v41 = vmul.f32 0.03125, %v9038_v22  ;;  %v9098_v50 = vmul.f32 %v17643_v10, %v17643_v10 }
0x19e4   : >> { %v9035_v15 = vpop.xlane.xlu1 %9034 }
0x19e5   : >> { %v17651_v6 = vsub.f32 %v17581_v16, %v9072_v41  ;;  %v9071_v54 = vmul.f32 0.03125, %v9035_v15  ;;  %v9114_v39 = vsel %vm631_vm0, %v9098_v50, 0.0  ;;  %v9097_v60 = vmul.f32 %v17646_v14, %v17646_v14  ;;  %v9252_v50 = vld [vmem:[%s17880_s15 + $0x18] sm:$0xff] }
0x19e6   : >> { %v9044_v21 = vpop.xlane.xlu0 %9043  ;;  %9115 = vadd.xlane.f32.xlu0 %v9114_v39  ;;  %12075 = vmatprep.subr.mxu0 %v9252_v50  ;;  %v9249_v39 = vld [vmem:[%s17880_s15] sm:$0xff] }
0x19e7   : >> { %v17657_v43 = vsub.f32 %v17586_v28, %v9071_v54  ;;  %v9074_v55 = vmul.f32 0.03125, %v9044_v21  ;;  %v9111_v62 = vsel %vm631_vm0, %v9097_v60, 0.0  ;;  %v9100_v20 = vmul.f32 %v17651_v6, %v17651_v6  ;;  %12104 = vmatprep.subr.mxu1 %v9252_v50  ;;  %12076 = vmatpush3.msra.mxu0 %v9252_v50  ;;  %v9250_v54 = vld [vmem:[%s17880_s15 + $0x8] sm:$0xff] }
0x19e8   : >> { %9112 = vadd.xlane.f32.xlu1 %v9111_v62  ;;  %v9041_v16 = vpop.xlane.xlu1 %9040  ;;  %12108 = vmatpush3.msra.mxu1 %v9252_v50 }
0x19e9   : >> { %v17663_v51 = vsub.f32 %v17591_v11, %v9074_v55  ;;  %v9073_v52 = vmul.f32 0.03125, %v9041_v16  ;;  %v9120_v18 = vsel %vm631_vm0, %v9100_v20, 0.0  ;;  %v9099_v7 = vmul.f32 %v17657_v43, %v17657_v43 }
0x19ea   : >> { %v9050_v59 = vpop.xlane.xlu0 %9049  ;;  %9121 = vadd.xlane.f32.xlu0 %v9120_v18 }
0x19eb   : >> { %v17669_v28 = vsub.f32 %v17596_v19, %v9073_v52  ;;  %v9076_v38 = vmul.f32 0.03125, %v9050_v59  ;;  %v9117_v58 = vsel %vm631_vm0, %v9099_v7, 0.0  ;;  %v9102_v47 = vmul.f32 %v17663_v51, %v17663_v51 }
0x19ec   : >> { %9118 = vadd.xlane.f32.xlu1 %v9117_v58  ;;  %v9047_v11 = vpop.xlane.xlu1 %9046 }
0x19ed   : >> { %v17675_v53 = vsub.f32 %v17601_v27, %v9076_v38  ;;  %v9075_v63 = vmul.f32 0.03125, %v9047_v11  ;;  %v9126_v5 = vsel %vm631_vm0, %v9102_v47, 0.0  ;;  %v9101_v2 = vmul.f32 %v17669_v28, %v17669_v28 }
0x19ee   : >> { %v9056_v34 = vpop.xlane.xlu0 %9055  ;;  %9127 = vadd.xlane.f32.xlu0 %v9126_v5 }
0x19ef   : >> { %v17681_v19 = vsub.f32 %v17606_v3, %v9075_v63  ;;  %v9078_v37 = vmul.f32 0.03125, %v9056_v34  ;;  %v9123_v24 = vsel %vm631_vm0, %v9101_v2, 0.0  ;;  %v9104_v31 = vmul.f32 %v17675_v53, %v17675_v53 }
0x19f0   : >> { %9124 = vadd.xlane.f32.xlu1 %v9123_v24  ;;  %v9053_v27 = vpop.xlane.xlu1 %9052 }
0x19f1   : >> { %v17687_v1 = vsub.f32 %v17611_v4, %v9078_v37  ;;  %v9077_v33 = vmul.f32 0.03125, %v9053_v27  ;;  %v9132_v17 = vsel %vm631_vm0, %v9104_v31, 0.0  ;;  %v9103_v8 = vmul.f32 %v17681_v19, %v17681_v19 }
0x19f2   : >> { %9133 = vadd.xlane.f32.xlu0 %v9132_v17 }
0x19f3   : >> { %v17693_v3 = vsub.f32 %v17616_v12, %v9077_v33  ;;  %v9129_v30 = vsel %vm631_vm0, %v9103_v8, 0.0  ;;  %v9106_v0 = vmul.f32 %v17687_v1, %v17687_v1 }
0x19f4   : >> { %9130 = vadd.xlane.f32.xlu1 %v9129_v30  ;;  %v9059_v57 = vpop.xlane.xlu1 %9058 }
0x19f5   : >> { %v9079_v49 = vmul.f32 0.03125, %v9059_v57  ;;  %v9138_v4 = vsel %vm631_vm0, %v9106_v0, 0.0  ;;  %v9105_v25 = vmul.f32 %v17693_v3, %v17693_v3 }
0x19f6   : >> { %9139 = vadd.xlane.f32.xlu0 %v9138_v4 }
0x19f7   : >> { %v17702_v48 = vsub.f32 %v17623_v44, %v9079_v49  ;;  %v9135_v12 = vsel %vm631_vm0, %v9105_v25, 0.0  ;;  %v17741_v49 = vld [vmem:[%s17878_s13 + $0x1] ss:$0 sm:$0xff] }
0x19f8   : >> { %v9065_v29 = vpop.xlane.xlu0 %9064  ;;  %9136 = vadd.xlane.f32.xlu1 %v9135_v12  ;;  %v9062_v61 = vpop.xlane.xlu1 %9061 }
0x19f9   : >> { %v9081_v46 = vmul.f32 0.03125, %v9065_v29  ;;  %v9080_v42 = vmul.f32 0.03125, %v9062_v61  ;;  %v9107_v13 = vmul.f32 %v17702_v48, %v17702_v48 }
0x19fb   : >> { %v17708_v32 = vsub.f32 %v17631_v56, %v9081_v46  ;;  %v17711_v35 = vsub.f32 %v17626_v9, %v9080_v42  ;;  %v9141_v36 = vsel %vm631_vm0, %v9107_v13, 0.0 }
0x19fc   : >> { %v9068_v44 = vpop.xlane.xlu0 %9067  ;;  %9142 = vadd.xlane.f32.xlu1 %v9141_v36 }
0x19fd   : >> { %v9082_v45 = vmul.f32 0.03125, %v9068_v44  ;;  %v9109_v40 = vmul.f32 %v17708_v32, %v17708_v32  ;;  %v9108_v26 = vmul.f32 %v17711_v35, %v17711_v35  ;;  %v17749_v44 = vld [vmem:[%s17879_s14 + $0x1] ss:$0 sm:$0xff] }
0x19ff   : >> { %v17719_v22 = vsub.f32 %v17634_v23, %v9082_v45  ;;  %v9147_v56 = vsel %vm631_vm0, %v9109_v40, 0.0  ;;  %v9144_v41 = vsel %vm631_vm0, %v9108_v26, 0.0  ;;  %v9251_v23 = vld [vmem:[%s17880_s15 + $0x10] sm:$0xff] }
0x1a00   : >> { %9148 = vadd.xlane.f32.xlu0 %v9147_v56  ;;  %9145 = vadd.xlane.f32.xlu1 %v9144_v41 }
0x1a01   : >> { %v9110_v9 = vmul.f32 %v17719_v22, %v17719_v22  ;;  %12077 = vmatprep.subr.mxu0 %v9251_v23  ;;  %12105 = vmatprep.subr.mxu1 %v9251_v23 }
0x1a02   : >> { %12078 = vmatpush3.msra.mxu0 %v9251_v23  ;;  %12109 = vmatpush3.msra.mxu1 %v9251_v23 }
0x1a03   : >> { %v9150_v15 = vsel %vm631_vm0, %v9110_v9, 0.0  ;;  %12079 = vmatprep.subr.mxu0 %v9250_v54  ;;  %12106 = vmatprep.subr.mxu1 %v9250_v54 }
0x1a04   : >> { %9151 = vadd.xlane.f32.xlu0 %v9150_v15  ;;  %12080 = vmatpush3.msra.mxu0 %v9250_v54 }
0x1a05   : >> { %12081 = vmatprep.subr.mxu0 %v9249_v39  ;;  %12110 = vmatpush3.msra.mxu1 %v9250_v54 }
0x1a06   : >> { %12082 = vmatpush3.msra.mxu0 %v9249_v39  ;;  %12107 = vmatprep.subr.mxu1 %v9249_v39 }
0x1a07   : >> { %12111 = vmatpush3.msra.mxu1 %v9249_v39 }
0x1a6f   : >> { %v9116_v60 = vpop.xlane.xlu0 %9115 }
0x1a70   : >> { %v9154_v21 = vmul.f32 0.03125, %v9116_v60 }
0x1a71   : >> { %v9113_v55 = vpop.xlane.xlu1 %9112 }
0x1a72   : >> { %v9168_v62 = vadd.f32 1e-05, %v9154_v21  ;;  %v9153_v20 = vmul.f32 0.03125, %v9113_v55 }
0x1a73   : >> { %v9122_v16 = vpop.xlane.xlu0 %9121 }
0x1a74   : >> { %12672 = vrsqrt.f32 %v9168_v62  ;;  %v9167_v52 = vadd.f32 1e-05, %v9153_v20  ;;  %v9156_v18 = vmul.f32 0.03125, %v9122_v16 }
0x1a75   : >> { %v9119_v7 = vpop.xlane.xlu1 %9118 }
0x1a76   : >> { %12674 = vrsqrt.f32 %v9167_v52  ;;  %v9170_v59 = vadd.f32 1e-05, %v9156_v18  ;;  %v9155_v38 = vmul.f32 0.03125, %v9119_v7 }
0x1a77   : >> { %v9128_v58 = vpop.xlane.xlu0 %9127 }
0x1a78   : >> { %12676 = vrsqrt.f32 %v9170_v59  ;;  %v9169_v47 = vadd.f32 1e-05, %v9155_v38  ;;  %v9158_v11 = vmul.f32 0.03125, %v9128_v58 }
0x1a79   : >> { %v9125_v63 = vpop.xlane.xlu1 %9124 }
0x1a7a   : >> { %12678 = vrsqrt.f32 %v9169_v47  ;;  %v9172_v5 = vadd.f32 1e-05, %v9158_v11  ;;  %v9157_v2 = vmul.f32 0.03125, %v9125_v63 }
0x1a7b   : >> { %v9134_v34 = vpop.xlane.xlu0 %9133 }
0x1a7c   : >> { %12680 = vrsqrt.f32 %v9172_v5  ;;  %v9171_v37 = vadd.f32 1e-05, %v9157_v2  ;;  %v9160_v24 = vmul.f32 0.03125, %v9134_v34 }
0x1a7d   : >> { %v9131_v31 = vpop.xlane.xlu1 %9130 }
0x1a7e   : >> { %12682 = vrsqrt.f32 %v9171_v37  ;;  %v9174_v27 = vadd.f32 1e-05, %v9160_v24  ;;  %v9159_v33 = vmul.f32 0.03125, %v9131_v31 }
0x1a7f   : >> { %v9140_v17 = vpop.xlane.xlu0 %9139 }
0x1a80   : >> { %12684 = vrsqrt.f32 %v9174_v27  ;;  %v9173_v8 = vadd.f32 1e-05, %v9159_v33  ;;  %v9162_v30 = vmul.f32 0.03125, %v9140_v17 }
0x1a81   : >> { %v12673_v0 = vpop.eup %12672  ;;  %v9137_v57 = vpop.xlane.xlu1 %9136 }
0x1a82   : >> { %v9196_v4 = vmul.f32 %v12673_v0, %v17643_v10  ;;  %12686 = vrsqrt.f32 %v9173_v8  ;;  %v9176_v25 = vadd.f32 1e-05, %v9162_v30  ;;  %v9161_v12 = vmul.f32 0.03125, %v9137_v57 }
0x1a83   : >> { %v12675_v29 = vpop.eup %12674 }
0x1a84   : >> { %12688 = vrsqrt.f32 %v9176_v25  ;;  %v9175_v61 = vadd.f32 1e-05, %v9161_v12  ;;  %v9195_v46 = vmul.f32 %v12675_v29, %v17646_v14  ;;  %v9216_v13 = vmul.f32 %v17741_v49, %v9196_v4 }
0x1a85   : >> { %v12677_v42 = vpop.eup %12676  ;;  %v9143_v36 = vpop.xlane.xlu1 %9142 }
0x1a86   : >> { %v9198_v45 = vmul.f32 %v12677_v42, %v17651_v6  ;;  %12690 = vrsqrt.f32 %v9175_v61  ;;  %v9163_v10 = vmul.f32 0.03125, %v9143_v36  ;;  %v9215_v26 = vmul.f32 %v17741_v49, %v9195_v46 }
0x1a87   : >> { %v12679_v40 = vpop.eup %12678  ;;  %v9236_v9 = vadd.f32 %v17749_v44, %v9216_v13 }
0x1a88   : >> { %v9177_v56 = vadd.f32 1e-05, %v9163_v10  ;;  %v9197_v41 = vmul.f32 %v12679_v40, %v17657_v43  ;;  %v9235_v23 = vadd.f32 %v17749_v44, %v9215_v26  ;;  %v9218_v54 = vmul.f32 %v17741_v49, %v9198_v45 }
0x1a89   : >> { %v12681_v14 = vpop.eup %12680  ;;  %v9149_v50 = vpop.xlane.xlu0 %9148 }
0x1a8a   : >> { %v9146_v15 = vpop.xlane.xlu1 %9145  ;;  %v9200_v39 = vmul.f32 %v12681_v14, %v17663_v51  ;;  %12692 = vrsqrt.f32 %v9177_v56  ;;  %v9165_v6 = vmul.f32 0.03125, %v9149_v50  ;;  %12083 = vmatprep.mubr.msk.f32.mxu0 %vm631_vm0, %v9235_v23  ;;  %v9217_v55 = vmul.f32 %v17741_v49, %v9197_v41 }
0x1a8b   : >> { %v9164_v60 = vmul.f32 0.03125, %v9146_v15  ;;  %v12683_v21 = vpop.eup %12682  ;;  %12084 = vmatmul.mubr.msk.f32.vlgmr.msra.gmra.mxu0 %vm631_vm0, %v9236_v9  ;;  %v9238_v51 = vadd.f32 %v17749_v44, %v9218_v54 }
0x1a8c   : >> { %v9179_v43 = vadd.f32 1e-05, %v9165_v6  ;;  %v9199_v20 = vmul.f32 %v12683_v21, %v17669_v28  ;;  %v9237_v18 = vadd.f32 %v17749_v44, %v9217_v55  ;;  %v9220_v7 = vmul.f32 %v17741_v49, %v9200_v39 }
0x1a8d   : >> { %v9178_v62 = vadd.f32 1e-05, %v9164_v60  ;;  %v12685_v16 = vpop.eup %12684  ;;  %v9152_v52 = vpop.xlane.xlu0 %9151 }
0x1a8e   : >> { %v9202_v59 = vmul.f32 %v12685_v16, %v17675_v53  ;;  %12694 = vrsqrt.f32 %v9179_v43  ;;  %v9166_v38 = vmul.f32 0.03125, %v9152_v52  ;;  %v9219_v58 = vmul.f32 %v17741_v49, %v9199_v20  ;;  %12086 = vmatprep.mubr.msk.f32.mxu0 %vm631_vm0, %v9237_v18 }
0x1a8f   : >> { %v12687_v47 = vpop.eup %12686  ;;  %12696 = vrsqrt.f32 %v9178_v62  ;;  %12087 = vmatmul.mubr.msk.f32.gmra.mxu0 %vm631_vm0, %v9238_v51  ;;  %v9240_v2 = vadd.f32 %v17749_v44, %v9220_v7 }
0x1a90   : >> { %v9180_v11 = vadd.f32 1e-05, %v9166_v38  ;;  %v9239_v28 = vadd.f32 %v17749_v44, %v9219_v58  ;;  %v9201_v63 = vmul.f32 %v12687_v47, %v17681_v19  ;;  %v9222_v37 = vmul.f32 %v17741_v49, %v9202_v59 }
0x1a91   : >> { %v12689_v5 = vpop.eup %12688 }
0x1a92   : >> { %v9204_v53 = vmul.f32 %v12689_v5, %v17687_v1  ;;  %12698 = vrsqrt.f32 %v9180_v11  ;;  %12089 = vmatprep.mubr.msk.f32.mxu0 %vm631_vm0, %v9239_v28  ;;  %v9221_v34 = vmul.f32 %v17741_v49, %v9201_v63  ;;  %v9242_v19 = vadd.f32 %v17749_v44, %v9222_v37 }
0x1a93   : >> { %v12691_v24 = vpop.eup %12690  ;;  %12090 = vmatmul.mubr.msk.f32.gmra.mxu0 %vm631_vm0, %v9240_v2 }
0x1a94   : >> { %v9241_v31 = vadd.f32 %v17749_v44, %v9221_v34  ;;  %v9203_v27 = vmul.f32 %v12691_v24, %v17693_v3  ;;  %v9224_v33 = vmul.f32 %v17741_v49, %v9204_v53 }
0x1a96   : >> { %12092 = vmatprep.mubr.msk.f32.mxu0 %vm631_vm0, %v9241_v31  ;;  %v9223_v1 = vmul.f32 %v17741_v49, %v9203_v27  ;;  %v9244_v0 = vadd.f32 %v17749_v44, %v9224_v33 }
0x1a97   : >> { %v12693_v17 = vpop.eup %12692  ;;  %12093 = vmatmul.mubr.msk.f32.gmra.mxu0 %vm631_vm0, %v9242_v19 }
0x1a98   : >> { %v9243_v8 = vadd.f32 %v17749_v44, %v9223_v1  ;;  %v9205_v30 = vmul.f32 %v12693_v17, %v17702_v48 }
0x1a9a   : >> { %12095 = vmatprep.mubr.msk.f32.mxu0 %vm631_vm0, %v9243_v8  ;;  %v9225_v3 = vmul.f32 %v17741_v49, %v9205_v30 }
0x1a9b   : >> { %v12695_v57 = vpop.eup %12694  ;;  %12096 = vmatmul.mubr.msk.f32.gmra.mxu0 %vm631_vm0, %v9244_v0 }
0x1a9c   : >> { %v12697_v4 = vpop.eup %12696  ;;  %v9245_v25 = vadd.f32 %v17749_v44, %v9225_v3  ;;  %v9207_v12 = vmul.f32 %v12695_v57, %v17708_v32 }
0x1a9d   : >> { %v9206_v29 = vmul.f32 %v12697_v4, %v17711_v35  ;;  %v17807_v35 = vld [vmem:[%s17881_s16] ss:$0 sm:$0xff] }
0x1a9e   : >> { %12098 = vmatprep.mubr.msk.f32.mxu0 %vm631_vm0, %v9245_v25  ;;  %v9227_v48 = vmul.f32 %v17741_v49, %v9207_v12 }
0x1a9f   : >> { %v12699_v61 = vpop.eup %12698  ;;  %v9226_v46 = vmul.f32 %v17741_v49, %v9206_v29 }
0x1aa0   : >> { %v9208_v42 = vmul.f32 %v12699_v61, %v17719_v22  ;;  %v9247_v13 = vadd.f32 %v17749_v44, %v9227_v48 }
0x1aa1   : >> { %v9246_v36 = vadd.f32 %v17749_v44, %v9226_v46 }
0x1aa2   : >> { %v9228_v45 = vmul.f32 %v17741_v49, %v9208_v42  ;;  %12101 = vmatprep.mubr.msk.f32.mxu1 %vm631_vm0, %v9247_v13 }
0x1aa3   : >> { %12099 = vmatmul.mubr.msk.f32.gmra.mxu0 %vm631_vm0, %v9246_v36 }
0x1aa4   : >> { %v9248_v32 = vadd.f32 %v17749_v44, %v9228_v45 }
0x1aa6   : >> { %12102 = vmatmul.mubr.msk.f32.vlgmr.msra.gmra.mxu1 %vm631_vm0, %v9248_v32 }
0x1b4b   : >> { %v12085_v22 = vpop.f32.mrf.mxu0 }
0x1b4c   : >> { %v9374_v10 = vadd.f32 %v12085_v22, %v17807_v35 }
0x1b4d   : >> { %v9368_v40 = vpop.f32.mrf.mxu0 }
0x1b4e   : >> { %v9438_v26 = vsub.f32 0.0, %v9374_v10  ;;  %v9369_v49 = vadd.f32 %v17807_v35, %v9368_v40 }
0x1b4f   : >> { %v12088_v56 = vpop.f32.mrf.mxu0 }
0x1b50   : >> { %v9453_v41 = vmul.f32 1.442695, %v9438_v26  ;;  %v9437_v14 = vsub.f32 0.0, %v9369_v49  ;;  %v9384_v9 = vadd.f32 %v12088_v56, %v17807_v35 }
0x1b51   : >> { %v9378_v44 = vpop.f32.mrf.mxu0 }
0x1b52   : >> { %12700 = vpow2.f32 %v9453_v41  ;;  %v9451_v50 = vmul.f32 1.442695, %v9437_v14  ;;  %v9440_v15 = vsub.f32 0.0, %v9384_v9  ;;  %v9379_v23 = vadd.f32 %v17807_v35, %v9378_v44 }
0x1b53   : >> { %v12091_v54 = vpop.f32.mrf.mxu0 }
0x1b54   : >> { %12702 = vpow2.f32 %v9451_v50  ;;  %v9457_v39 = vmul.f32 1.442695, %v9440_v15  ;;  %v9439_v6 = vsub.f32 0.0, %v9379_v23  ;;  %v9394_v60 = vadd.f32 %v12091_v54, %v17807_v35 }
0x1b55   : >> { %v9388_v21 = vpop.f32.mrf.mxu0 }
0x1b56   : >> { %12704 = vpow2.f32 %v9457_v39  ;;  %v9455_v55 = vmul.f32 1.442695, %v9439_v6  ;;  %v9442_v43 = vsub.f32 0.0, %v9394_v60  ;;  %v9389_v62 = vadd.f32 %v17807_v35, %v9388_v21 }
0x1b57   : >> { %v12094_v20 = vpop.f32.mrf.mxu0 }
0x1b58   : >> { %12706 = vpow2.f32 %v9455_v55  ;;  %v9461_v16 = vmul.f32 1.442695, %v9442_v43  ;;  %v9441_v52 = vsub.f32 0.0, %v9389_v62  ;;  %v9404_v18 = vadd.f32 %v12094_v20, %v17807_v35 }
0x1b59   : >> { %v9398_v51 = vpop.f32.mrf.mxu0 }
0x1b5a   : >> { %12708 = vpow2.f32 %v9461_v16  ;;  %v9459_v7 = vmul.f32 1.442695, %v9441_v52  ;;  %v9444_v59 = vsub.f32 0.0, %v9404_v18  ;;  %v9399_v38 = vadd.f32 %v17807_v35, %v9398_v51 }
0x1b5b   : >> { %v12097_v58 = vpop.f32.mrf.mxu0 }
0x1b5c   : >> { %12710 = vpow2.f32 %v9459_v7  ;;  %v9465_v47 = vmul.f32 1.442695, %v9444_v59  ;;  %v9443_v11 = vsub.f32 0.0, %v9399_v38  ;;  %v9414_v28 = vadd.f32 %v12097_v58, %v17807_v35 }
0x1b5d   : >> { %v9408_v63 = vpop.f32.mrf.mxu0 }
0x1b5e   : >> { %12712 = vpow2.f32 %v9465_v47  ;;  %v9463_v5 = vmul.f32 1.442695, %v9443_v11  ;;  %v9446_v2 = vsub.f32 0.0, %v9414_v28  ;;  %v9409_v53 = vadd.f32 %v17807_v35, %v9408_v63 }
0x1b5f   : >> { %v12701_v34 = vpop.eup %12700 }
0x1b60   : >> { %v9480_v37 = vadd.f32 1.0, %v12701_v34  ;;  %12714 = vpow2.f32 %v9463_v5  ;;  %v9469_v24 = vmul.f32 1.442695, %v9446_v2  ;;  %v9445_v31 = vsub.f32 0.0, %v9409_v53 }
0x1b61   : >> { %v12703_v27 = vpop.eup %12702 }
0x1b62   : >> { %12716 = vrcp.f32 %v9480_v37  ;;  %v9479_v19 = vadd.f32 1.0, %v12703_v27  ;;  %v9467_v1 = vmul.f32 1.442695, %v9445_v31 }
0x1b63   : >> { %v12100_v33 = vpop.f32.mrf.mxu0  ;;  %v12705_v17 = vpop.eup %12704  ;;  %12718 = vpow2.f32 %v9469_v24 }
0x1b64   : >> { %v9424_v8 = vadd.f32 %v12100_v33, %v17807_v35  ;;  %12720 = vrcp.f32 %v9479_v19  ;;  %v9482_v30 = vadd.f32 1.0, %v12705_v17 }
0x1b65   : >> { %v9418_v0 = vpop.f32.mrf.mxu0  ;;  %v12707_v3 = vpop.eup %12706  ;;  %12722 = vpow2.f32 %v9467_v1 }
0x1b66   : >> { %v9448_v57 = vsub.f32 0.0, %v9424_v8  ;;  %v9419_v4 = vadd.f32 %v17807_v35, %v9418_v0  ;;  %v12103_v25 = vpop.f32.mrf.mxu1  ;;  %12724 = vrcp.f32 %v9482_v30  ;;  %v9481_v12 = vadd.f32 1.0, %v12707_v3 }
0x1b67   : >> { %v9434_v29 = vadd.f32 %v12103_v25, %v17807_v35  ;;  %v12709_v48 = vpop.eup %12708 }
0x1b68   : >> { %v9473_v61 = vmul.f32 1.442695, %v9448_v57  ;;  %v9447_v46 = vsub.f32 0.0, %v9419_v4  ;;  %v9428_v42 = vpop.f32.mrf.mxu1  ;;  %12726 = vrcp.f32 %v9481_v12  ;;  %v9484_v13 = vadd.f32 1.0, %v12709_v48 }
0x1b69   : >> { %v9450_v36 = vsub.f32 0.0, %v9434_v29  ;;  %v9429_v45 = vadd.f32 %v17807_v35, %v9428_v42  ;;  %v12711_v32 = vpop.eup %12710 }
0x1b6a   : >> { %12728 = vpow2.f32 %v9473_v61  ;;  %v9471_v22 = vmul.f32 1.442695, %v9447_v46  ;;  %v9483_v10 = vadd.f32 1.0, %v12711_v32 }
0x1b6b   : >> { %12730 = vrcp.f32 %v9484_v13  ;;  %v9477_v40 = vmul.f32 1.442695, %v9450_v36  ;;  %v9449_v26 = vsub.f32 0.0, %v9429_v45  ;;  %v12713_v49 = vpop.eup %12712 }
0x1b6c   : >> { %12732 = vpow2.f32 %v9471_v22  ;;  %v9486_v56 = vadd.f32 1.0, %v12713_v49 }
0x1b6d   : >> { %12734 = vrcp.f32 %v9483_v10  ;;  %v9475_v41 = vmul.f32 1.442695, %v9449_v26  ;;  %v12715_v14 = vpop.eup %12714 }
0x1b6e   : >> { %12736 = vpow2.f32 %v9477_v40  ;;  %v9485_v35 = vadd.f32 1.0, %v12715_v14 }
0x1b6f   : >> { %12738 = vrcp.f32 %v9486_v56  ;;  %v12717_v9 = vpop.eup %12716 }
0x1b70   : >> { %12740 = vpow2.f32 %v9475_v41  ;;  %v12719_v44 = vpop.eup %12718  ;;  %9523 = vst.msk [vmem:[%s17829_s18 + $0x8] sm:$0xff] %vm870_vm1, %v12717_v9 }
0x1b71   : >> { %12742 = vrcp.f32 %v9485_v35  ;;  %v12721_v50 = vpop.eup %12720  ;;  %v9488_v15 = vadd.f32 1.0, %v12719_v44 }
0x1b72   : >> { %v12723_v23 = vpop.eup %12722  ;;  %9522 = vst.msk [vmem:[%s17829_s18] sm:$0xff] %vm870_vm1, %v12721_v50 }
0x1b73   : >> { %v12725_v54 = vpop.eup %12724  ;;  %12744 = vrcp.f32 %v9488_v15  ;;  %v9487_v39 = vadd.f32 1.0, %v12723_v23 }
0x1b74   : >> { %9525 = vst.msk [vmem:[%s17829_s18 + $0x18] sm:$0xff] %vm870_vm1, %v12725_v54 }
0x1b75   : >> { %v12727_v6 = vpop.eup %12726  ;;  %12746 = vrcp.f32 %v9487_v39 }
0x1b76   : >> { %9524 = vst.msk [vmem:[%s17829_s18 + $0x10] sm:$0xff] %vm870_vm1, %v12727_v6 }
0x1b77   : >> { %v12729_v60 = vpop.eup %12728 }
0x1b78   : >> { %v12731_v21 = vpop.eup %12730  ;;  %v9490_v55 = vadd.f32 1.0, %v12729_v60 }
0x1b79   : >> { %v12733_v43 = vpop.eup %12732  ;;  %9527 = vst.msk [vmem:[%s17829_s18 + $0x28] sm:$0xff] %vm870_vm1, %v12731_v21 }
0x1b7a   : >> { %v12735_v62 = vpop.eup %12734  ;;  %12748 = vrcp.f32 %v9490_v55  ;;  %v9489_v20 = vadd.f32 1.0, %v12733_v43 }
0x1b7b   : >> { %v12737_v16 = vpop.eup %12736  ;;  %9526 = vst.msk [vmem:[%s17829_s18 + $0x20] sm:$0xff] %vm870_vm1, %v12735_v62 }
0x1b7c   : >> { %v12739_v52 = vpop.eup %12738  ;;  %12750 = vrcp.f32 %v9489_v20  ;;  %v9492_v18 = vadd.f32 1.0, %v12737_v16 }
0x1b7d   : >> { %v12741_v51 = vpop.eup %12740  ;;  %9529 = vst.msk [vmem:[%s17829_s18 + $0x38] sm:$0xff] %vm870_vm1, %v12739_v52 }
0x1b7e   : >> { %v12743_v7 = vpop.eup %12742  ;;  %12752 = vrcp.f32 %v9492_v18  ;;  %v9491_v59 = vadd.f32 1.0, %v12741_v51 }
0x1b7f   : >> { %9528 = vst.msk [vmem:[%s17829_s18 + $0x30] sm:$0xff] %vm870_vm1, %v12743_v7 }
0x1b80   : >> { %12754 = vrcp.f32 %v9491_v59  ;;  %v12745_v38 = vpop.eup %12744 }
0x1b81   : >> { %9531 = vst.msk [vmem:[%s17829_s18 + $0x48] sm:$0xff] %vm870_vm1, %v12745_v38 }
0x1b82   : >> { %v12747_v58 = vpop.eup %12746 }
0x1b83   : >> { %9530 = vst.msk [vmem:[%s17829_s18 + $0x40] sm:$0xff] %vm870_vm1, %v12747_v58 }
0x1b87   : >> { %v12749_v47 = vpop.eup %12748 }
0x1b88   : >> { %9533 = vst.msk [vmem:[%s17829_s18 + $0x58] sm:$0xff] %vm870_vm1, %v12749_v47 }
0x1b89   : >> { %v12751_v11 = vpop.eup %12750 }
0x1b8a   : >> { %9532 = vst.msk [vmem:[%s17829_s18 + $0x50] sm:$0xff] %vm870_vm1, %v12751_v11  ;;  %573 = sbr.rel (!%p571_p4) target bundleno = 15 (0xf), region = 143 }
0x1b8b   : >> { %v12753_v28 = vpop.eup %12752 }
0x1b8c   : >> { %9535 = vst.msk [vmem:[%s17829_s18 + $0x68] sm:$0xff] %vm870_vm1, %v12753_v28 }
0x1b8d   : >> { %v12755_v63 = vpop.eup %12754 }
0x1b8e   : >> { %9534 = vst.msk [vmem:[%s17829_s18 + $0x60] sm:$0xff] %vm870_vm1, %v12755_v63 }
0x1b8f PF: > { %s18139_s19 = sld [smem:[#allocation2_spill]] }
0x1b95   : > { %s27_s24 = sadd.s32 1, %s18139_s19  }
0x1b96   : > { %p24_p5 = scmp.ge.s32.totalorder %s27_s24, 4  }
0x1b98   :  { %26 = sbr.rel (!%p24_p5) target bundleno = 3 (0x3), region = 154 }

</bundles_post_ra>
